<compile_context>
chip_gen: v7x
topology: tpu7x:2x2x1
jax: 0.10.0
libtpu: 0.0.40
codegen_flags: <defaults>
</compile_context>

<pallas_src>
import functools

import jax
import jax.numpy as jnp
from jax.experimental import pallas as pl
from jax.experimental.pallas import tpu as pltpu

SEQ = 64              # chess board squares (fixed by the module)
TOKEN_COMPRESS = 32   # smolgen token_compress output size (fixed by the module)
COMPRESS = 256        # smolgen compress_size (module default)

_VMEM_LIMIT = 48 * 1024 * 1024   # <= 64 MiB physical VMEM on v7x


def _round_up(x, m):
    return ((x + m - 1) // m) * m


def _cparams():
    return pltpu.CompilerParams(
        dimension_semantics=("parallel",),       # batch-block axis -> megacore shardable (v7x)
        vmem_limit_bytes=_VMEM_LIMIT)


def _layernorm(x, w, b, eps):
    mean = jnp.mean(x, axis=-1, keepdims=True)
    var = jnp.mean((x - mean) ** 2, axis=-1, keepdims=True)   # biased variance (unbiased=False)
    return (x - mean) / jnp.sqrt(var + eps) * w + b


# --------------------------------------------------------------------------
# Kernel 1: smolgen (folded token_compress + compress -> ReLU -> LayerNorm
#           -> batched per-head proj -> 64x64 logits, lane-dense 4096-wide store)
#   Output rows are head-major within the block: row = h * nb + b_local, lane = q*64 + k.
# --------------------------------------------------------------------------
def _smolgen_kernel(num_heads, nb, x_ref, wcomb_ref, bpc_ref, lnw_ref, lnb_ref,
                    whp_ref, bhp_ref, wlg_ref, blg_ref, out_ref):
    cdt = wcomb_ref.dtype                                    # compute dtype (f32 or bf16)
    xflat = x_ref[...]                                       # (nb, 64*H) f32

    # token_compress folded into the compress matmul host-side (exact)
    pv = jnp.dot(xflat.astype(cdt), wcomb_ref[...],
                 preferred_element_type=jnp.float32) + bpc_ref[...]
    pv = jnp.maximum(pv, 0.0)                                # ReLU
    pv = _layernorm(pv, lnw_ref[...], lnb_ref[...], 1e-5)    # torch nn.LayerNorm eps

    # all head projections in one batched matmul: (nh, nb, 256) = (nh, nb, 256) x (nh, 256, 256)
    pv_b = jnp.broadcast_to(pv.astype(cdt)[None], (num_heads, nb, COMPRESS))
    hv = jnp.einsum("hbc,hcj->hbj", pv_b, whp_ref[...],
                    preferred_element_type=jnp.float32) + bhp_ref[...]
    hv = hv.reshape(num_heads * nb, COMPRESS)                # head-major rows (nb % 8 == 0 -> free)

    # single big logits matmul: M = nh*nb, K = 256, N = 4096 (lane-dense output)
    lg = jnp.dot(hv.astype(cdt), wlg_ref[...],
                 preferred_element_type=jnp.float32) + blg_ref[...]
    out_ref[0] = lg.astype(out_ref.dtype)                    # (nh*nb, 4096), bf16 by default


# --------------------------------------------------------------------------
# Kernel 2: attention (+pos bias +smolgen) -> post-LN residual -> Mish FFN -> post-LN residual
#   One grid step handles nb boards; per head the boards run through batched 3-D einsums,
#   head outputs are accumulated directly through wo[h] (no concat).
# --------------------------------------------------------------------------
def _layer_kernel(num_heads, head_dim, nb,
                  x_ref, smol_ref, wq_ref, wk_ref, wv_ref, wo_ref, bo_ref, pb_ref,
                  ln1w_ref, ln1b_ref, w1_ref, b1_ref, w2_ref, b2_ref,
                  ln2w_ref, ln2b_ref, out_ref):
    cdt = wq_ref.dtype
    x = x_ref[...]                                           # (nb*64, H) f32
    xc = x.astype(cdt)
    rows = nb * SEQ
    hidden = x_ref.shape[1]

    attn = jnp.zeros((rows, hidden), jnp.float32)
    for h in range(num_heads):
        # per-head weight slices are static -> no 32-lane activation slicing (feedback #8)
        # 1/sqrt(head_dim) is folded into wq host-side
        qh = jnp.dot(xc, wq_ref[h], preferred_element_type=jnp.float32)
        kh = jnp.dot(xc, wk_ref[h], preferred_element_type=jnp.float32)
        vh = jnp.dot(xc, wv_ref[h], preferred_element_type=jnp.float32)
        qh = qh.reshape(nb, SEQ, head_dim).astype(cdt)
        kh = kh.reshape(nb, SEQ, head_dim).astype(cdt)
        vh = vh.reshape(nb, SEQ, head_dim).astype(cdt)

        s = jnp.einsum("bqd,bkd->bqk", qh, kh,
                       preferred_element_type=jnp.float32)   # (nb, 64, 64)
        # slice the smol ref per head (keeps the live block nh-fold smaller, feedback #6)
        s = s + pb_ref[h] + smol_ref[0, h * nb:(h + 1) * nb].astype(jnp.float32)
        s = s - jnp.max(s, axis=-1, keepdims=True)
        e = jnp.exp(s)
        # approx reciprocal runs on the otherwise-idle EUP slot
        p = e * pl.reciprocal(jnp.sum(e, axis=-1, keepdims=True), approx=True)

        oh = jnp.einsum("bqk,bkd->bqd", p.astype(cdt), vh,
                        preferred_element_type=jnp.float32)  # (nb, 64, hd)
        attn = attn + jnp.dot(oh.reshape(rows, head_dim).astype(cdt), wo_ref[h],
                              preferred_element_type=jnp.float32)

    attn = attn + bo_ref[...]

    # x = x + norm1(attention(x))
    x1 = x + _layernorm(attn, ln1w_ref[...], ln1b_ref[...], 1e-6)

    # FFN with Mish: mish(h) = h * tanh(softplus(h)).
    # tanh(ln u) = (u^2 - 1) / (u^2 + 1) with u = 1 + e^h, evaluated via t = exp(-|h|):
    # one exp + one approx reciprocal instead of exp + log + tanh (feedback #10).
    h1 = jnp.dot(x1.astype(cdt), w1_ref[...], preferred_element_type=jnp.float32) + b1_ref[...]
    t = jnp.exp(-jnp.abs(h1))
    pos = h1 >= 0.0
    num = jnp.where(pos, 1.0 + 2.0 * t, t * (2.0 + t))
    den = jnp.where(pos, 1.0 + 2.0 * t + 2.0 * t * t, 2.0 + t * (2.0 + t))
    mish = h1 * num * pl.reciprocal(den, approx=True)

    ffn = jnp.dot(mish.astype(cdt), w2_ref[...], preferred_element_type=jnp.float32) + b2_ref[...]

    # x = x + norm2(ffn(x))
    out_ref[...] = (x1 + _layernorm(ffn, ln2w_ref[...], ln2b_ref[...], 1e-6)).astype(out_ref.dtype)


# --------------------------------------------------------------------------
# Wrapper
# --------------------------------------------------------------------------
def chess_transformer_layer(x, params, num_heads, head_dim, *,
                            block_boards=32,
                            compute_dtype=jnp.bfloat16,     # bf16 MXU operands by default
                            smol_dtype=jnp.bfloat16):       # bf16 smol storage by default
    B, S, H = x.shape
    assert S == SEQ
    nh, hd = num_heads, head_dim
    cdt = compute_dtype

    # board-block size: multiple of 8; clamp so nblk >= 2 whenever B allows it (two v7x TCs).
    target = max(8, (block_boards // 8) * 8)
    nb = min(target, max(8, _round_up((B + 1) // 2, 8)))
    b_pad = _round_up(B, nb)
    nblk = b_pad // nb

    xp = x if b_pad == B else jnp.pad(x, ((0, b_pad - B), (0, 0), (0, 0)))
    x_rows = xp.reshape(b_pad * SEQ, H)          # lane-dense rows for attention/FFN kernel
    x_flat = xp.reshape(b_pad, SEQ * H)          # per-board flattened rows for smolgen kernel

    # --- host-side weight prep ---------------------------------------------------------------
    # token_compress folded into position_compress:
    #   Wcomb[s*H + h, j] = sum_c wtc[h, c] * wpc[s*32 + c, j]            (exact, feedback #1)
    wpc3 = params["wpc"].reshape(SEQ, TOKEN_COMPRESS, COMPRESS)
    wcomb = jnp.einsum("hc,scj->shj", params["wtc"], wpc3,
                       precision=jax.lax.Precision.HIGHEST).reshape(SEQ * H, COMPRESS)
    wcomb = wcomb.astype(cdt)

    # per-head q/k/v weights (nh, H, hd); softmax scale folded into wq
    wq3 = (params["wq"] * (float(hd) ** -0.5)).reshape(H, nh, hd).transpose(1, 0, 2).astype(cdt)
    wk3 = params["wk"].reshape(H, nh, hd).transpose(1, 0, 2).astype(cdt)
    wv3 = params["wv"].reshape(H, nh, hd).transpose(1, 0, 2).astype(cdt)
    wo3 = params["wo"].reshape(nh, hd, H).astype(cdt)        # per-head output accumulation

    whp = params["whp"].astype(cdt)                          # (nh, 256, 256)
    wlg = params["wlg"].astype(cdt)
    bhp3 = params["bhp"].reshape(nh, 1, COMPRESS)

    # zero-pad ffn_size to a full 128-lane granule (numerically exact: mish(0)=0, zero w2 rows)
    F = params["w1"].shape[1]
    Fp = _round_up(F, 128)
    w1p = jnp.pad(params["w1"], ((0, 0), (0, Fp - F))).astype(cdt)
    b1p = jnp.pad(params["b1"], ((0, 0), (0, Fp - F)))
    w2p = jnp.pad(params["w2"], ((0, Fp - F), (0, 0))).astype(cdt)

    # ---- kernel 1: smolgen (folded token_compress, all heads batched, lane-dense output) ----
    smol = pl.pallas_call(
        functools.partial(_smolgen_kernel, nh, nb),
        out_shape=jax.ShapeDtypeStruct((nblk, nh * nb, SEQ * SEQ), smol_dtype),
        grid=(nblk,),
        in_specs=[
            pl.BlockSpec((nb, SEQ * H), lambda i: (i, 0)),
            pl.BlockSpec((SEQ * H, COMPRESS), lambda i: (0, 0)),
            pl.BlockSpec((1, COMPRESS), lambda i: (0, 0)),
            pl.BlockSpec((1, COMPRESS), lambda i: (0, 0)),
            pl.BlockSpec((1, COMPRESS), lambda i: (0, 0)),
            pl.BlockSpec((nh, COMPRESS, COMPRESS), lambda i: (0, 0, 0)),
            pl.BlockSpec((nh, 1, COMPRESS), lambda i: (0, 0, 0)),
            pl.BlockSpec((COMPRESS, SEQ * SEQ), lambda i: (0, 0)),
            pl.BlockSpec((1, SEQ * SEQ), lambda i: (0, 0)),
        ],
        out_specs=pl.BlockSpec((1, nh * nb, SEQ * SEQ), lambda i: (i, 0, 0)),
        compiler_params=_cparams(),
    )(x_flat, wcomb, params["bpc"], params["sm_lnw"], params["sm_lnb"],
      whp, bhp3, wlg, params["blg"])
    # free row-major reshape: (nblk, nh*nb, 4096) -> (nblk, nh*nb, 64, 64)
    smol4 = smol.reshape(nblk, nh * nb, SEQ, SEQ)

    # ---- kernel 2: attention + post-LN + Mish FFN + post-LN ----
    def const(shape):
        n = len(shape)
        return pl.BlockSpec(shape, lambda i, _n=n: (0,) * _n)

    out2 = pl.pallas_call(
        functools.partial(_layer_kernel, nh, hd, nb),
        out_shape=jax.ShapeDtypeStruct((b_pad * SEQ, H), jnp.float32),
        grid=(nblk,),
        in_specs=[
            pl.BlockSpec((nb * SEQ, H), lambda i: (i, 0)),
            pl.BlockSpec((1, nh * nb, SEQ, SEQ), lambda i: (i, 0, 0, 0)),
            const(wq3.shape), const(wk3.shape), const(wv3.shape),
            const(wo3.shape), const(params["bo"].shape), const(params["pos_bias"].shape),
            const(params["ln1w"].shape), const(params["ln1b"].shape),
            const(w1p.shape), const(b1p.shape), const(w2p.shape), const(params["b2"].shape),
            const(params["ln2w"].shape), const(params["ln2b"].shape),
        ],
        out_specs=pl.BlockSpec((nb * SEQ, H), lambda i: (i, 0)),
        compiler_params=_cparams(),
    )(x_rows, smol4, wq3, wk3, wv3, wo3, params["bo"], params["pos_bias"],
      params["ln1w"], params["ln1b"], w1p, b1p, w2p, params["b2"],
      params["ln2w"], params["ln2b"])

    return out2.reshape(b_pad, SEQ, H)[:B]


# --------------------------------------------------------------------------
# Pure-JAX reference (mirrors the PyTorch forward exactly)
# --------------------------------------------------------------------------
def reference_forward(x, params, num_heads, head_dim):
    B, S, H = x.shape
    with jax.default_matmul_precision("float32"):
        ct = x @ params["wtc"]                                               # [B,64,32]
        flat = ct.reshape(B, -1)
        pv = jnp.maximum(flat @ params["wpc"] + params["bpc"], 0.0)
        pv = _layernorm(pv, params["sm_lnw"], params["sm_lnb"], 1e-5)
        smol = []
        for h in range(num_heads):
            hv = pv @ params["whp"][h] + params["bhp"][h]
            smol.append((hv @ params["wlg"] + params["blg"]).reshape(B, S, S))
        smol = jnp.stack(smol, axis=1)                                       # [B,nh,64,64]

        def proj(w):
            return (x @ w).reshape(B, S, num_heads, head_dim).transpose(0, 2, 1, 3)

        q, k, v = proj(params["wq"]), proj(params["wk"]), proj(params["wv"])
        scores = jnp.einsum("bhqd,bhkd->bhqk", q, k) * (head_dim ** -0.5)
        scores = scores + params["pos_bias"][None] + smol
        attn = jax.nn.softmax(scores, axis=-1)
        o = jnp.einsum("bhqk,bhkd->bhqd", attn, v)
        o = o.transpose(0, 2, 1, 3).reshape(B, S, num_heads * head_dim)
        o = o @ params["wo"] + params["bo"]
        x1 = x + _layernorm(o, params["ln1w"], params["ln1b"], 1e-6)
        h1 = x1 @ params["w1"] + params["b1"]
        sp = jnp.maximum(h1, 0.0) + jnp.log(1.0 + jnp.exp(-jnp.abs(h1)))
        f = (h1 * jnp.tanh(sp)) @ params["w2"] + params["b2"]
        return x1 + _layernorm(f, params["ln2w"], params["ln2b"], 1e-6)


# --------------------------------------------------------------------------
# Deterministic parameter construction (shapes from the module's __init__)
# --------------------------------------------------------------------------
def make_params(key, hidden, num_heads, head_dim, ffn_size):
    def xavier(k, fan_in, fan_out, shape=None):
        std = (2.0 / (fan_in + fan_out)) ** 0.5
        return (std * jax.random.normal(k, shape or (fan_in, fan_out))).astype(jnp.float32)

    ks = list(jax.random.split(key, 24))
    qkv = num_heads * head_dim
    p = {}
    # attention
    p["wq"] = xavier(ks[0], hidden, qkv)
    p["wk"] = xavier(ks[1], hidden, qkv)
    p["wv"] = xavier(ks[2], hidden, qkv)
    p["wo"] = xavier(ks[3], qkv, hidden)
    p["bo"] = 0.01 * jax.random.normal(ks[4], (1, hidden), jnp.float32)
    p["pos_bias"] = 0.02 * jax.random.normal(ks[5], (num_heads, SEQ, SEQ), jnp.float32)
    # smolgen
    p["wtc"] = xavier(ks[6], hidden, TOKEN_COMPRESS)                               # token_compress (no bias)
    p["wpc"] = xavier(ks[7], SEQ * TOKEN_COMPRESS, COMPRESS)                       # position_compress linear
    p["bpc"] = 0.01 * jax.random.normal(ks[8], (1, COMPRESS), jnp.float32)
    p["sm_lnw"] = 1.0 + 0.05 * jax.random.normal(ks[9], (1, COMPRESS), jnp.float32)
    p["sm_lnb"] = 0.01 * jax.random.normal(ks[10], (1, COMPRESS), jnp.float32)
    p["whp"] = xavier(ks[11], COMPRESS, COMPRESS, (num_heads, COMPRESS, COMPRESS))  # per-head projections
    p["bhp"] = 0.01 * jax.random.normal(ks[12], (num_heads, COMPRESS), jnp.float32)
    p["wlg"] = xavier(ks[13], COMPRESS, SEQ * SEQ)                                 # attention_logits_proj
    p["blg"] = 0.01 * jax.random.normal(ks[14], (1, SEQ * SEQ), jnp.float32)
    # FFN
    p["w1"] = xavier(ks[15], hidden, ffn_size)
    p["b1"] = 0.01 * jax.random.normal(ks[16], (1, ffn_size), jnp.float32)
    p["w2"] = xavier(ks[17], ffn_size, hidden)
    p["b2"] = 0.01 * jax.random.normal(ks[18], (1, hidden), jnp.float32)
    # post-LN norms (custom LayerNorm, eps=1e-6)
    p["ln1w"] = 1.0 + 0.05 * jax.random.normal(ks[19], (1, hidden), jnp.float32)
    p["ln1b"] = 0.01 * jax.random.normal(ks[20], (1, hidden), jnp.float32)
    p["ln2w"] = 1.0 + 0.05 * jax.random.normal(ks[21], (1, hidden), jnp.float32)
    p["ln2b"] = 0.01 * jax.random.normal(ks[22], (1, hidden), jnp.float32)
    return p


if __name__ == "__main__":
    HIDDEN, NUM_HEADS, HEAD_DIM, FFN = 32, 2, 32, 48

    key = jax.random.PRNGKey(0)
    pkey, xkey = jax.random.split(key)
    params = make_params(pkey, HIDDEN, NUM_HEADS, HEAD_DIM, FFN)

    x = jax.random.normal(xkey, (16, SEQ, HIDDEN), jnp.float32)
    ref = reference_forward(x, params, NUM_HEADS, HEAD_DIM)

    # f32 MXU / f32 smol path: B=16 -> two grid steps of 8 boards each (exercises the grid).
    # Deviations vs. the exact reference: folded Wcomb, folded 1/sqrt(hd), approx reciprocals.
    out = jax.block_until_ready(chess_transformer_layer(
        x, params, NUM_HEADS, HEAD_DIM,
        compute_dtype=jnp.float32, smol_dtype=jnp.float32))
    assert out.shape == (16, SEQ, HIDDEN) and out.dtype == jnp.float32
    max_err = float(jnp.max(jnp.abs(out - ref)))
    if max_err > 1e-2:
        raise AssertionError(f"Pallas f32 output mismatch vs reference, max abs err = {max_err}")

    # default path: bf16 MXU operands + bf16 smol storage; B=5 exercises batch padding (-> 8).
    xb = x[:5]
    out_bf16 = jax.block_until_ready(
        chess_transformer_layer(xb, params, NUM_HEADS, HEAD_DIM))
    assert out_bf16.shape == (5, SEQ, HIDDEN) and out_bf16.dtype == jnp.float32
    max_err_bf16 = float(jnp.max(jnp.abs(out_bf16 - ref[:5])))
    if max_err_bf16 > 3e-1:   # bf16 operands / f32 accumulation -> looser tolerance
        raise AssertionError(f"Pallas bf16 output mismatch vs reference, max abs err = {max_err_bf16}")

    print("KERNEL_OK")
</pallas_src>

<mosaic_0001>
module attributes {stable_mosaic.version = 11 : i64} {
  func.func @_smolgen_kernel(%arg0: i32, %arg1: memref<8x2048xf32, #tpu.memory_space<vmem>>, %arg2: memref<2048x256xf32, #tpu.memory_space<vmem>>, %arg3: memref<1x256xf32, #tpu.memory_space<vmem>>, %arg4: memref<1x256xf32, #tpu.memory_space<vmem>>, %arg5: memref<1x256xf32, #tpu.memory_space<vmem>>, %arg6: memref<2x256x256xf32, #tpu.memory_space<vmem>>, %arg7: memref<2x1x256xf32, #tpu.memory_space<vmem>>, %arg8: memref<256x4096xf32, #tpu.memory_space<vmem>>, %arg9: memref<1x4096xf32, #tpu.memory_space<vmem>>, %arg10: memref<1x16x4096xf32, #tpu.memory_space<vmem>>) attributes {dimension_semantics = [#tpu.dimension_semantics<parallel>], iteration_bounds = array<i64: 2>, scalar_prefetch = 0 : i64, scratch_operands = 0 : i64, tpu.core_type = #tpu.core_type<tc>, window_params = [{transform_indices = @transform_0, window_bounds = array<i64: 8, 2048>}, {pipeline_mode = #tpu.pipeline_mode<synchronous>, transform_indices = @transform_1, window_bounds = array<i64: 2048, 256>}, {pipeline_mode = #tpu.pipeline_mode<synchronous>, transform_indices = @transform_2, window_bounds = array<i64: 1, 256>}, {pipeline_mode = #tpu.pipeline_mode<synchronous>, transform_indices = @transform_3, window_bounds = array<i64: 1, 256>}, {pipeline_mode = #tpu.pipeline_mode<synchronous>, transform_indices = @transform_4, window_bounds = array<i64: 1, 256>}, {pipeline_mode = #tpu.pipeline_mode<synchronous>, transform_indices = @transform_5, window_bounds = array<i64: 2, 256, 256>}, {pipeline_mode = #tpu.pipeline_mode<synchronous>, transform_indices = @transform_6, window_bounds = array<i64: 2, 1, 256>}, {pipeline_mode = #tpu.pipeline_mode<synchronous>, transform_indices = @transform_7, window_bounds = array<i64: 256, 4096>}, {pipeline_mode = #tpu.pipeline_mode<synchronous>, transform_indices = @transform_8, window_bounds = array<i64: 1, 4096>}, {transform_indices = @transform_9, window_bounds = array<i64: 1, 16, 4096>}]} {
    %c0 = arith.constant 0 : index
    %c0_0 = arith.constant 0 : index
    %0 = vector.load %arg1[%c0, %c0_0] : memref<8x2048xf32, #tpu.memory_space<vmem>>, vector<8x2048xf32>
    %c0_1 = arith.constant 0 : index
    %c0_2 = arith.constant 0 : index
    %1 = vector.load %arg2[%c0_1, %c0_2] : memref<2048x256xf32, #tpu.memory_space<vmem>>, vector<2048x256xf32>
    %cst = arith.constant dense<0.000000e+00> : vector<8x256xf32>
    %2 = tpu.matmul %0, %1, %cst {dimension_numbers = #tpu.dot_dimension_numbers<[1], [0], [0], [1], [0, 0, 1, 1], [], []>} : vector<8x2048xf32>, vector<2048x256xf32>, vector<8x256xf32> -> vector<8x256xf32>
    %c0_3 = arith.constant 0 : index
    %c0_4 = arith.constant 0 : index
    %3 = vector.load %arg3[%c0_3, %c0_4] : memref<1x256xf32, #tpu.memory_space<vmem>>, vector<1x256xf32>
    %4 = vector.broadcast %3 : vector<1x256xf32> to vector<8x256xf32>
    %5 = arith.addf %2, %4 : vector<8x256xf32>
    %cst_5 = arith.constant 0.000000e+00 : f32
    %6 = vector.broadcast %cst_5 : f32 to vector<8x256xf32>
    %7 = arith.maximumf %5, %6 : vector<8x256xf32>
    %c0_6 = arith.constant 0 : index
    %c0_7 = arith.constant 0 : index
    %8 = vector.load %arg4[%c0_6, %c0_7] : memref<1x256xf32, #tpu.memory_space<vmem>>, vector<1x256xf32>
    %c0_8 = arith.constant 0 : index
    %c0_9 = arith.constant 0 : index
    %9 = vector.load %arg5[%c0_8, %c0_9] : memref<1x256xf32, #tpu.memory_space<vmem>>, vector<1x256xf32>
    %cst_10 = arith.constant dense<0.000000e+00> : vector<8xf32>
    %10 = vector.multi_reduction <add>, %7, %cst_10 [1] : vector<8x256xf32> to vector<8xf32>
    %11 = vector.shape_cast %10 : vector<8xf32> to vector<8x1xf32>
    %cst_11 = arith.constant 2.560000e+02 : f32
    %12 = vector.broadcast %cst_11 : f32 to vector<8x1xf32>
    %13 = arith.divf %11, %12 : vector<8x1xf32>
    %14 = vector.broadcast %13 : vector<8x1xf32> to vector<8x256xf32>
    %15 = arith.subf %7, %14 : vector<8x256xf32>
    %16 = arith.mulf %15, %15 : vector<8x256xf32>
    %cst_12 = arith.constant dense<0.000000e+00> : vector<8xf32>
    %17 = vector.multi_reduction <add>, %16, %cst_12 [1] : vector<8x256xf32> to vector<8xf32>
    %18 = vector.shape_cast %17 : vector<8xf32> to vector<8x1xf32>
    %cst_13 = arith.constant 2.560000e+02 : f32
    %19 = vector.broadcast %cst_13 : f32 to vector<8x1xf32>
    %20 = arith.divf %18, %19 : vector<8x1xf32>
    %21 = vector.broadcast %13 : vector<8x1xf32> to vector<8x256xf32>
    %22 = arith.subf %7, %21 : vector<8x256xf32>
    %cst_14 = arith.constant 9.99999974E-6 : f32
    %23 = vector.broadcast %cst_14 : f32 to vector<8x1xf32>
    %24 = arith.addf %20, %23 : vector<8x1xf32>
    %25 = math.sqrt %24 : vector<8x1xf32>
    %26 = vector.broadcast %25 : vector<8x1xf32> to vector<8x256xf32>
    %27 = arith.divf %22, %26 : vector<8x256xf32>
    %28 = vector.broadcast %8 : vector<1x256xf32> to vector<8x256xf32>
    %29 = arith.mulf %27, %28 : vector<8x256xf32>
    %30 = vector.broadcast %9 : vector<1x256xf32> to vector<8x256xf32>
    %31 = arith.addf %29, %30 : vector<8x256xf32>
    %32 = vector.shape_cast %31 : vector<8x256xf32> to vector<1x8x256xf32>
    %33 = vector.shape_cast %32 : vector<1x8x256xf32> to vector<1x8x256xf32>
    %34 = vector.broadcast %33 : vector<1x8x256xf32> to vector<2x8x256xf32>
    %c0_15 = arith.constant 0 : index
    %c0_16 = arith.constant 0 : index
    %c0_17 = arith.constant 0 : index
    %35 = vector.load %arg6[%c0_15, %c0_16, %c0_17] : memref<2x256x256xf32, #tpu.memory_space<vmem>>, vector<2x256x256xf32>
    "tpu.trace_start"() <{level = 10 : i32, message = "hbc,hcj->hbj"}> : () -> ()
    %cst_18 = arith.constant dense<0.000000e+00> : vector<2x8x256xf32>
    %36 = tpu.matmul %34, %35, %cst_18 {dimension_numbers = #tpu.dot_dimension_numbers<[2], [1], [1], [2], [0, 0, 0, 1, 1, 2], [0], [0]>} : vector<2x8x256xf32>, vector<2x256x256xf32>, vector<2x8x256xf32> -> vector<2x8x256xf32>
    "tpu.trace_stop"() : () -> ()
    %c0_19 = arith.constant 0 : index
    %c0_20 = arith.constant 0 : index
    %c0_21 = arith.constant 0 : index
    %37 = vector.load %arg7[%c0_19, %c0_20, %c0_21] : memref<2x1x256xf32, #tpu.memory_space<vmem>>, vector<2x1x256xf32>
    %38 = vector.broadcast %37 : vector<2x1x256xf32> to vector<2x8x256xf32>
    %39 = arith.addf %36, %38 : vector<2x8x256xf32>
    %40 = vector.shape_cast %39 : vector<2x8x256xf32> to vector<16x256xf32>
    %c0_22 = arith.constant 0 : index
    %c0_23 = arith.constant 0 : index
    %41 = vector.load %arg8[%c0_22, %c0_23] : memref<256x4096xf32, #tpu.memory_space<vmem>>, vector<256x4096xf32>
    %cst_24 = arith.constant dense<0.000000e+00> : vector<16x4096xf32>
    %42 = tpu.matmul %40, %41, %cst_24 {dimension_numbers = #tpu.dot_dimension_numbers<[1], [0], [0], [1], [0, 0, 1, 1], [], []>} : vector<16x256xf32>, vector<256x4096xf32>, vector<16x4096xf32> -> vector<16x4096xf32>
    %c0_25 = arith.constant 0 : index
    %c0_26 = arith.constant 0 : index
    %43 = vector.load %arg9[%c0_25, %c0_26] : memref<1x4096xf32, #tpu.memory_space<vmem>>, vector<1x4096xf32>
    %44 = vector.broadcast %43 : vector<1x4096xf32> to vector<16x4096xf32>
    %45 = arith.addf %42, %44 : vector<16x4096xf32>
    %c0_27 = arith.constant 0 : index
    %c0_28 = arith.constant 0 : index
    %c0_29 = arith.constant 0 : index
    %46 = vector.load %arg10[%c0_27, %c0_28, %c0_29] : memref<1x16x4096xf32, #tpu.memory_space<vmem>>, vector<1x16x4096xf32>
    %47 = vector.shape_cast %46 : vector<1x16x4096xf32> to vector<16x4096xf32>
    %48 = vector.shape_cast %45 : vector<16x4096xf32> to vector<1x16x4096xf32>
    tpu.vector_store %arg10[%c0_27, %c0_28, %c0_29], %48 {strides = array<i32>} : memref<1x16x4096xf32, #tpu.memory_space<vmem>>, vector<1x16x4096xf32>,
    return
  }
  func.func @transform_0(%arg0: i32) -> (i32, i32) {
    %c0_i32 = arith.constant 0 : i32
    %c0_i32_0 = arith.constant 0 : i32
    return %arg0, %c0_i32 : i32, i32
  }
  func.func @transform_1(%arg0: i32) -> (i32, i32) {
    %c0_i32 = arith.constant 0 : i32
    %c0_i32_0 = arith.constant 0 : i32
    %c0_i32_1 = arith.constant 0 : i32
    return %c0_i32, %c0_i32_0 : i32, i32
  }
  func.func @transform_2(%arg0: i32) -> (i32, i32) {
    %c0_i32 = arith.constant 0 : i32
    %c0_i32_0 = arith.constant 0 : i32
    %c0_i32_1 = arith.constant 0 : i32
    return %c0_i32, %c0_i32_0 : i32, i32
  }
  func.func @transform_3(%arg0: i32) -> (i32, i32) {
    %c0_i32 = arith.constant 0 : i32
    %c0_i32_0 = arith.constant 0 : i32
    %c0_i32_1 = arith.constant 0 : i32
    return %c0_i32, %c0_i32_0 : i32, i32
  }
  func.func @transform_4(%arg0: i32) -> (i32, i32) {
    %c0_i32 = arith.constant 0 : i32
    %c0_i32_0 = arith.constant 0 : i32
    %c0_i32_1 = arith.constant 0 : i32
    return %c0_i32, %c0_i32_0 : i32, i32
  }
  func.func @transform_5(%arg0: i32) -> (i32, i32, i32) {
    %c0_i32 = arith.constant 0 : i32
    %c0_i32_0 = arith.constant 0 : i32
    %c0_i32_1 = arith.constant 0 : i32
    %c0_i32_2 = arith.constant 0 : i32
    return %c0_i32, %c0_i32_0, %c0_i32_1 : i32, i32, i32
  }
  func.func @transform_6(%arg0: i32) -> (i32, i32, i32) {
    %c0_i32 = arith.constant 0 : i32
    %c0_i32_0 = arith.constant 0 : i32
    %c0_i32_1 = arith.constant 0 : i32
    %c0_i32_2 = arith.constant 0 : i32
    return %c0_i32, %c0_i32_0, %c0_i32_1 : i32, i32, i32
  }
  func.func @transform_7(%arg0: i32) -> (i32, i32) {
    %c0_i32 = arith.constant 0 : i32
    %c0_i32_0 = arith.constant 0 : i32
    %c0_i32_1 = arith.constant 0 : i32
    return %c0_i32, %c0_i32_0 : i32, i32
  }
  func.func @transform_8(%arg0: i32) -> (i32, i32) {
    %c0_i32 = arith.constant 0 : i32
    %c0_i32_0 = arith.constant 0 : i32
    %c0_i32_1 = arith.constant 0 : i32
    return %c0_i32, %c0_i32_0 : i32, i32
  }
  func.func @transform_9(%arg0: i32) -> (i32, i32, i32) {
    %c0_i32 = arith.constant 0 : i32
    %c0_i32_0 = arith.constant 0 : i32
    %c0_i32_1 = arith.constant 0 : i32
    return %arg0, %c0_i32, %c0_i32_0 : i32, i32, i32
  }
}

</mosaic_0001>

<bundles_post_ra>
// kernel: tpu_custom_call.1
= control target key start
LH: loop header
LB: loop body
LE: loop exit
PB: predicated region body
PF: predicated region fallthrough
CT: control target
= control target key end

     0   :  { %s7478_s0 = inlined_call_operand.hbm [shape: f32[16,2048], index: 0, kind: input, shape index: {}]   ;;  %s7479_s1 = inlined_call_operand.hbm [shape: f32[2048,256], index: 1, kind: input, shape index: {}]   ;;  %s7480_s2 = inlined_call_operand.hbm [shape: f32[1,256], index: 2, kind: input, shape index: {}]   ;;  %s7481_s3 = inlined_call_operand.hbm [shape: f32[1,256], index: 3, kind: input, shape index: {}]   ;;  %s7482_s4 = inlined_call_operand.hbm [shape: f32[1,256], index: 4, kind: input, shape index: {}]   ;;  %s7483_s5 = inlined_call_operand.hbm [shape: f32[2,256,256], index: 5, kind: input, shape index: {}]   ;;  %s7484_s6 = inlined_call_operand.hbm [shape: f32[2,1,256], index: 6, kind: input, shape index: {}]   ;;  %s7485_s7 = inlined_call_operand.hbm [shape: f32[256,4096], index: 7, kind: input, shape index: {}]   ;;  %s7486_s8 = inlined_call_operand.hbm [shape: f32[1,4096], index: 8, kind: input, shape index: {}]   ;;  %s7487_s9 = inlined_call_operand.hbm [shape: f32[2,16,4096], index: 9, kind: output, shape index: {}]  }
   0x1   :  { %7492 = sst [smem:[#allocation24_spill]] %s7479_s1 }
   0x2   :  { %7493 = sst [smem:[#allocation25_spill]] %s7487_s9 }
   0x3   :  { %14 = vsyncpa [#allocation3], 0 }
   0x4   :  { %16 = vsyncpa [#allocation3 + $0x1], 0 }
   0x5   :  { %17 = vsyncpa [#allocation6], 0 }
   0x6   :  { %18 = vsyncpa [#allocation9], 0 }
   0x7   :  { %19 = vsyncpa [#allocation12], 0 }
   0x8   :  { %20 = vsyncpa [#allocation15], 0 }
   0x9   :  { %21 = vsyncpa [#allocation4], 0 }
   0xa   :  { %23 = vsyncpa [#allocation4 + $0x1], 0  ;;  %s6823_s30 = smov 0   ;;  %s6825_s10 = smov 0  }
   0xb   :  { %s6827_s11 = smov 0   ;;  %s6829_s12 = smov 0  }
   0xc LB: > { %s6756_s13 = smov [#allocation5]   ;;  %s6844_s15 = sadd.s32 4294967295, %s6754_s12   ;;  %s6754_s12 = sphi %s6829_s12, %s7519_s12   ;;  %s6750_s11 = sphi %s6827_s11, %s7518_s11   ;;  %s6746_s10 = sphi %s6825_s10, %s7517_s10   ;;  %s6742_s30 = sphi %s6823_s30, %s7516_s30  }
   0xd   : > { %s266_s14 = sshll.u32 %s6756_s13, 4  ;;  %p4565_p0 = scmp.ge.s32.totalorder %s6754_s12, 1  ;;  %s6849_s14 = int_to_ptr.vmem [resolvable:$true] %s266_s14 }
   0xe   : > { %p7489_p1 = scmp.eq.s32.totalorder %s6844_s15, 0  ;;  %p254_p2 = scmp.lt.s32.totalorder %s6754_s12, 3 }
   0xf   : > { %s6757_s17 = smov [#allocation8]   ;;  %s6758_s20 = smov [#allocation11]  }
  0x10   : > { %p6851_p3 = pnand %p4565_p0, %p254_p2  ;;  %s291_s18 = sshll.u32 %s6757_s17, 4  ;;  %s6864_s18 = int_to_ptr.vmem [resolvable:$true] %s291_s18 }
  0x11   : > { %s312_s21 = sshll.u32 %s6758_s20, 4  ;;  %s7496_s1 = sld [smem:[#allocation24_spill]]  ;;  %s6866_s21 = int_to_ptr.vmem [resolvable:$true] %s312_s21 }
  0x12   : > { %s7494_s16 = scalar_select %p6851_p3, 1, 0 }
  0x13   : > { %p6312_p5 = pneg %p6851_p3 }
  0x15   : > { %p6860_p6 = pnand %p6312_p5, %p7489_p1 }
  0x17   : > { %s6418_s24 = scalar_lea.hbm %s7496_s1, 65536  ;;  %p6876_p8 = pneg %p6860_p6 }
  0x18   : > { %p6419_p7 = scmp.ne.s32.totalorder %s7496_s1, %s6418_s24  ;;  %p6425_p11 = scmp.lt.u32.totalorder %s6418_s24, %s7496_s1 }
  0x1a   : > { %p6421_p9 = pnand %p6876_p8, %p6419_p7 }
  0x1c   : > { %p6422_p10 = pneg %p6421_p9 }
  0x1e   : > { %p6427_p12 = pnand %p6425_p11, %p6422_p10 }
  0x20   : > { %6430 = shalt.err (!%p6427_p12)
}
  0x21   : > { %s6431_s13 = scalar_lea.vmem %s6849_s14, 65536  ;;  %p6439_p5 = scmp.lt.s32.totalorder %s6849_s14, %s6849_s14 }
  0x22   : > { %p6432_p13 = scmp.ne.s32.totalorder %s6849_s14, %s6431_s13  ;;  %p6440_p4 = scmp.lt.s32.totalorder %s6431_s13, %s6431_s13 }
  0x24   : > { %p6434_p0 = pnand %p6432_p13, %p6876_p8  ;;  %p6441_p7 = por %p6440_p4, %p6439_p5 }
  0x26   : > { %p6435_p2 = pneg %p6434_p0 }
  0x28   : > { %p6442_p9 = pnand %p6441_p7, %p6435_p2 }
  0x2a   : > { %6445 = shalt.err (!%p6442_p9)
}
  0x2b   : > { %s6759_s17 = smov 256   ;;  %s6760_s20 = smov 16  }
  0x2c   : > { %6315 = dma.hbm_to_vmem [thread:$0]  (!%p6860_p6), %s7496_s1, 65536, %s6849_s14, [#allocation6], %s6759_s17, %s6759_s17, %s6760_s20  }
  0x2d   : > { %s6446_s26 = scalar_lea.hbm %s7481_s3, 32 }
  0x2e   : > { %p6447_p4 = scmp.ne.s32.totalorder %s7481_s3, %s6446_s26  ;;  %p6453_p12 = scmp.lt.u32.totalorder %s6446_s26, %s7481_s3 }
  0x30   : > { %p6449_p10 = pnand %p6447_p4, %p6876_p8 }
  0x32   : > { %p6450_p11 = pneg %p6449_p10 }
  0x34   : > { %p6455_p13 = pnand %p6453_p12, %p6450_p11 }
  0x36   : > { %6458 = shalt.err (!%p6455_p13)
}
  0x37   : > { %s6459_s14 = scalar_lea.vmem %s6864_s18, 32  ;;  %p6467_p7 = scmp.lt.s32.totalorder %s6864_s18, %s6864_s18 }
  0x38   : > { %p6460_p0 = scmp.ne.s32.totalorder %s6864_s18, %s6459_s14  ;;  %p6468_p9 = scmp.lt.s32.totalorder %s6459_s14, %s6459_s14 }
  0x3a   : > { %p6462_p2 = pnand %p6460_p0, %p6876_p8  ;;  %p6469_p4 = por %p6468_p9, %p6467_p7 }
  0x3c   : > { %p6463_p5 = pneg %p6462_p2 }
  0x3e   : > { %p6470_p10 = pnand %p6469_p4, %p6463_p5 }
  0x40   : > { %6473 = shalt.err (!%p6470_p10)
}
  0x41   : > { %6321 = dma.hbm_to_vmem [thread:$0]  (!%p6860_p6), %s7481_s3, 32, %s6864_s18, [#allocation9]  }
  0x42   : > { %s6474_s25 = scalar_lea.hbm %s7483_s5, 16384 }
  0x43   : > { %p6475_p11 = scmp.ne.s32.totalorder %s7483_s5, %s6474_s25  ;;  %p6481_p0 = scmp.lt.u32.totalorder %s6474_s25, %s7483_s5 }
  0x45   : > { %p6477_p12 = pnand %p6475_p11, %p6876_p8 }
  0x47   : > { %p6478_p13 = pneg %p6477_p12 }
  0x49   : > { %p6483_p2 = pnand %p6481_p0, %p6478_p13 }
  0x4b   : > { %6486 = shalt.err (!%p6483_p2)
}
  0x4c   : > { %s6487_s18 = scalar_lea.vmem %s6866_s21, 16384  ;;  %p6495_p4 = scmp.lt.s32.totalorder %s6866_s21, %s6866_s21 }
  0x4d   : > { %p6488_p5 = scmp.ne.s32.totalorder %s6866_s21, %s6487_s18  ;;  %p6496_p10 = scmp.lt.s32.totalorder %s6487_s18, %s6487_s18 }
  0x4f   : > { %p6490_p7 = pnand %p6488_p5, %p6876_p8  ;;  %p6497_p11 = por %p6496_p10, %p6495_p4 }
  0x51   : > { %p6491_p9 = pneg %p6490_p7 }
  0x53   : > { %p6498_p12 = pnand %p6497_p11, %p6491_p9 }
  0x55   : > { %6501 = shalt.err (!%p6498_p12)
}
  0x56   : > { %6327 = dma.hbm_to_vmem [thread:$0]  (!%p6860_p6), %s7483_s5, 16384, %s6866_s21, [#allocation12], %s6759_s17, %s6759_s17, %s6760_s20  }
  0x57   : > { %s6761_s22 = smov [#allocation14]   ;;  %s6502_s26 = scalar_lea.hbm %s7485_s7, 131072 }
  0x58   : > { %s338_s23 = sshll.u32 %s6761_s22, 4  ;;  %p6503_p13 = scmp.ne.s32.totalorder %s7485_s7, %s6502_s26  ;;  %s339_s23 = int_to_ptr.vmem [resolvable:$true] %s338_s23 }
  0x59   : > { %p6509_p5 = scmp.lt.u32.totalorder %s6502_s26, %s7485_s7 }
  0x5a   : > { %p6505_p0 = pnand %p6503_p13, %p6876_p8 }
  0x5c   : > { %p6506_p2 = pneg %p6505_p0 }
  0x5e   : > { %p6511_p7 = pnand %p6509_p5, %p6506_p2 }
  0x60   : > { %6514 = shalt.err (!%p6511_p7)
}
  0x61   : > { %s6515_s21 = scalar_lea.vmem %s339_s23, 131072  ;;  %p6523_p11 = scmp.lt.s32.totalorder %s339_s23, %s339_s23 }
  0x62   : > { %p6516_p9 = scmp.ne.s32.totalorder %s339_s23, %s6515_s21  ;;  %p6524_p12 = scmp.lt.s32.totalorder %s6515_s21, %s6515_s21 }
  0x64   : > { %p6518_p4 = pnand %p6516_p9, %p6876_p8  ;;  %p6525_p1 = por %p6524_p12, %p6523_p11 }
  0x66   : > { %p6519_p10 = pneg %p6518_p4 }
  0x68   : > { %p6526_p3 = pnand %p6525_p1, %p6519_p10 }
  0x6a   : > { %6529 = shalt.err (!%p6526_p3)
}
  0x6b   : > { %s6762_s20 = smov 4096   ;;  %s6763_s22 = smov [#allocation7]  }
  0x6c   : > { %6333 = dma.hbm_to_vmem [thread:$0]  (!%p6860_p6), %s7485_s7, 131072, %s339_s23, [#allocation15], %s6762_s20, %s6762_s20, %s6759_s17  }
  0x6d   : > { %s280_s24 = sshll.u32 %s6763_s22, 4  ;;  %s6764_s25 = smov [#allocation10]   ;;  %s281_s24 = int_to_ptr.vmem [resolvable:$true] %s280_s24 }
  0x6e   : > { %s302_s26 = sshll.u32 %s6764_s25, 4  ;;  %s6530_s13 = scalar_lea.hbm %s7480_s2, 32  ;;  %s303_s26 = int_to_ptr.vmem [resolvable:$true] %s302_s26 }
  0x6f   : > { %p6531_p1 = scmp.ne.s32.totalorder %s7480_s2, %s6530_s13  ;;  %p6537_p0 = scmp.lt.u32.totalorder %s6530_s13, %s7480_s2 }
  0x71   : > { %p6533_p3 = pnand %p6531_p1, %p6876_p8 }
  0x73   : > { %p6534_p13 = pneg %p6533_p3 }
  0x75   : > { %p6539_p2 = pnand %p6537_p0, %p6534_p13 }
  0x77   : > { %6542 = shalt.err (!%p6539_p2)
}
  0x78   : > { %s6543_s17 = scalar_lea.vmem %s281_s24, 32  ;;  %p6551_p4 = scmp.lt.s32.totalorder %s281_s24, %s281_s24 }
  0x79   : > { %p6544_p5 = scmp.ne.s32.totalorder %s281_s24, %s6543_s17  ;;  %p6552_p10 = scmp.lt.s32.totalorder %s6543_s17, %s6543_s17 }
  0x7b   : > { %p6546_p7 = pnand %p6544_p5, %p6876_p8  ;;  %p6553_p11 = por %p6552_p10, %p6551_p4 }
  0x7d   : > { %p6547_p9 = pneg %p6546_p7 }
  0x7f   : > { %p6554_p12 = pnand %p6553_p11, %p6547_p9 }
  0x81   : > { %6557 = shalt.err (!%p6554_p12)
}
  0x82   : > { %6318 = dma.hbm_to_vmem [thread:$0]  (!%p6860_p6), %s7480_s2, 32, %s281_s24, [#allocation6]  }
  0x83   : > { %s6558_s22 = scalar_lea.hbm %s7482_s4, 32 }
  0x84   : > { %p6559_p1 = scmp.ne.s32.totalorder %s7482_s4, %s6558_s22  ;;  %p6565_p0 = scmp.lt.u32.totalorder %s6558_s22, %s7482_s4 }
  0x86   : > { %p6561_p3 = pnand %p6559_p1, %p6876_p8 }
  0x88   : > { %p6562_p13 = pneg %p6561_p3 }
  0x8a   : > { %p6567_p2 = pnand %p6565_p0, %p6562_p13 }
  0x8c   : > { %6570 = shalt.err (!%p6567_p2)
}
  0x8d   : > { %s6571_s18 = scalar_lea.vmem %s303_s26, 32  ;;  %p6579_p4 = scmp.lt.s32.totalorder %s303_s26, %s303_s26 }
  0x8e   : > { %p6572_p5 = scmp.ne.s32.totalorder %s303_s26, %s6571_s18  ;;  %p6580_p10 = scmp.lt.s32.totalorder %s6571_s18, %s6571_s18 }
  0x90   : > { %p6574_p7 = pnand %p6572_p5, %p6876_p8  ;;  %p6581_p11 = por %p6580_p10, %p6579_p4 }
  0x92   : > { %p6575_p9 = pneg %p6574_p7 }
  0x94   : > { %p6582_p12 = pnand %p6581_p11, %p6575_p9 }
  0x96   : > { %6585 = shalt.err (!%p6582_p12)
}
  0x97   : > { %6324 = dma.hbm_to_vmem [thread:$0]  (!%p6860_p6), %s7482_s4, 32, %s303_s26, [#allocation9]  }
  0x98   : > { %s6765_s14 = smov [#allocation13]   ;;  %s6586_s1 = scalar_lea.hbm %s7484_s6, 64 }
  0x99   : > { %s325_s17 = sshll.u32 %s6765_s14, 4  ;;  %p6587_p1 = scmp.ne.s32.totalorder %s7484_s6, %s6586_s1  ;;  %s326_s17 = int_to_ptr.vmem [resolvable:$true] %s325_s17 }
  0x9a   : > { %p6593_p0 = scmp.lt.u32.totalorder %s6586_s1, %s7484_s6 }
  0x9b   : > { %p6589_p3 = pnand %p6587_p1, %p6876_p8 }
  0x9d   : > { %p6590_p13 = pneg %p6589_p3 }
  0x9f   : > { %p6595_p2 = pnand %p6593_p0, %p6590_p13 }
  0xa1   : > { %6598 = shalt.err (!%p6595_p2)
}
  0xa2   : > { %s6599_s26 = scalar_lea.vmem %s326_s17, 64  ;;  %p6607_p4 = scmp.lt.s32.totalorder %s326_s17, %s326_s17 }
  0xa3   : > { %p6600_p5 = scmp.ne.s32.totalorder %s326_s17, %s6599_s26  ;;  %p6608_p10 = scmp.lt.s32.totalorder %s6599_s26, %s6599_s26 }
  0xa5   : > { %p6602_p7 = pnand %p6600_p5, %p6876_p8  ;;  %p6609_p11 = por %p6608_p10, %p6607_p4 }
  0xa7   : > { %p6603_p9 = pneg %p6602_p7 }
  0xa9   : > { %p6610_p12 = pnand %p6609_p11, %p6603_p9 }
  0xab   : > { %6613 = shalt.err (!%p6610_p12)
}
  0xac   : > { %s6766_s29 = smov 32   ;;  %s6767_s13 = smov 2  }
  0xad   : > { %6330 = dma.hbm_to_vmem [thread:$0]  (!%p6860_p6), %s7484_s6, 64, %s326_s17, [#allocation12], %s6766_s29, %s6766_s29, %s6767_s13  }
  0xae   : > { %s6768_s21 = smov [#allocation16]   ;;  %s6614_s1 = scalar_lea.hbm %s7486_s8, 512 }
  0xaf   : > { %s352_s14 = sshll.u32 %s6768_s21, 4  ;;  %p6615_p1 = scmp.ne.s32.totalorder %s7486_s8, %s6614_s1  ;;  %s353_s14 = int_to_ptr.vmem [resolvable:$true] %s352_s14 }
  0xb0   : > { %p6621_p0 = scmp.lt.u32.totalorder %s6614_s1, %s7486_s8 }
  0xb1   : > { %p6617_p3 = pnand %p6615_p1, %p6876_p8 }
  0xb3   : > { %p6618_p13 = pneg %p6617_p3 }
  0xb5   : > { %p6623_p2 = pnand %p6621_p0, %p6618_p13 }
  0xb7   : > { %6626 = shalt.err (!%p6623_p2)
}
  0xb8   : > { %s6627_s17 = scalar_lea.vmem %s353_s14, 512  ;;  %p6635_p4 = scmp.lt.s32.totalorder %s353_s14, %s353_s14 }
  0xb9   : > { %p6628_p5 = scmp.ne.s32.totalorder %s353_s14, %s6627_s17  ;;  %p6636_p10 = scmp.lt.s32.totalorder %s6627_s17, %s6627_s17 }
  0xbb   : > { %p6630_p7 = pnand %p6628_p5, %p6876_p8  ;;  %p6637_p11 = por %p6636_p10, %p6635_p4 }
  0xbd   : > { %p6631_p9 = pneg %p6630_p7 }
  0xbf   : > { %p6638_p12 = pnand %p6637_p11, %p6631_p9 }
  0xc1   : > { %6641 = shalt.err (!%p6638_p12)
}
  0xc2   : > { %6336 = dma.hbm_to_vmem [thread:$0]  (!%p6860_p6), %s7486_s8, 512, %s353_s14, [#allocation15]  }
  0xc3   : > { %s4564_s27 = sadd.s32 4294967294, %s6754_s12   ;;  %s7042_s19 = sadd.s32 1, %s6754_s12  }
  0xc4   : > { %s36_s13 = sadd.s32 1, %s6750_s11  ;;  %s33_s18 = ssub.s32 %s6754_s12, %s7042_s19 }
  0xc5   : > { %p43_p8 = scmp.ne.s32.totalorder %s6750_s11, %s6746_s10  ;;  %p34_p1 = scmp.eq.s32.totalorder %s33_s18, 0 }
  0xc6   : > { %p44_p3 = scmp.eq.s32.totalorder %s6754_s12, 0  ;;  %p49_p13 = scmp.ne.s32.totalorder %s6746_s10, %s6742_s30 }
  0xc7   : > { %p241_p0 = scmp.eq.s32.totalorder %s6844_s15, 1  ;;  %p7498_p5 = scmp.eq.s32.totalorder %s6844_s15, 0 }
  0xc8   : > { %s7054_s24 = scalar_select %p34_p1, %s6750_s11, %s36_s13  }
  0xc9   : > { %p45_p2 = por %p44_p3, %p43_p8  ;;  %p7058_p7 = por %p7498_p5, %p49_p13 }
  0xca   : > { %p7062_p6 = por %p241_p0, %p43_p8  ;;  %p247_p9 = scmp.eq.s32.totalorder %s4564_s27, 1 }
  0xcb   : > { %p6353_p4 = scmp.lt.s32.totalorder %s6754_s12, 2  ;;  %s363_s23 = sand.u32 1, %s6750_s11  }
  0xcc   : > { %s7500_s14 = scalar_select %p7062_p6, 1, 0 }
  0xcd   : > { %p7068_p10 = por %p247_p9, %p49_p13  ;;  %s4575_s1 = sshll.u32 %s363_s23, 7 }
  0xce   : > { %s4594_s9 = sshll.u32 %s6754_s12, 11  ;;  %s367_s17 = scalar_lea.vmem [#allocation2], %s4575_s1 }
  0xcf   : > { %s7501_s20 = scalar_select %p7068_p10, 1, 0 }
  0xd0   : > { %s7076_s28 = scalar_lea.hbm %s7478_s0, %s4594_s9  ;;  %s375_s26 = sshll.u32 %s367_s17, 4  ;;  %s7082_s26 = int_to_ptr.vmem [resolvable:$true] %s375_s26 }
  0xd1   : > { %p7078_p11 = pnand %p6353_p4, %p45_p2  ;;  %s364_s27 = scalar_lea.sflag [#allocation3], %s363_s23 }
  0xd2   : > { %s6642_s13 = scalar_lea.hbm %s7076_s28, 2048  ;;  %s6647_s9 = scalar_lea.hbm %s7478_s0, 4096 }
  0xd3   : > { %p6643_p12 = scmp.ne.s32.totalorder %s7076_s28, %s6642_s13  ;;  %p6644_p8 = pneg %p7078_p11 }
  0xd4   : > { %p6648_p13 = scmp.lt.u32.totalorder %s7076_s28, %s7478_s0  ;;  %p6649_p0 = scmp.lt.u32.totalorder %s6647_s9, %s6642_s13 }
  0xd5   : > { %p6645_p1 = pnand %p6644_p8, %p6643_p12  ;;  %p6651_p5 = scmp.lt.u32.totalorder %s6642_s13, %s7076_s28 }
  0xd6   : > { %p6650_p2 = por %p6649_p0, %p6648_p13 }
  0xd7   : > { %p6646_p3 = pneg %p6645_p1 }
  0xd8   : > { %p6652_p9 = por %p6651_p5, %p6650_p2 }
  0xda   : > { %p6653_p4 = pnand %p6652_p9, %p6646_p3 }
  0xdc   : > { %6656 = shalt.err (!%p6653_p4)
}
  0xdd   : > { %s6657_s23 = scalar_lea.vmem %s7082_s26, 2048  ;;  %s6769_s17 = smov [#allocation2]  }
  0xde   : > { %p6658_p12 = scmp.ne.s32.totalorder %s7082_s26, %s6657_s23  ;;  %s6662_s18 = sshll.u32 %s6769_s17, 4  ;;  %s6663_s18 = int_to_ptr.vmem [resolvable:$false] %s6662_s18 }
  0xdf   : > { %s6664_s1 = scalar_lea.vmem %s6663_s18, 4096  ;;  %p6665_p6 = scmp.lt.s32.totalorder %s7082_s26, %s6663_s18 }
  0xe0   : > { %p6660_p1 = pnand %p6658_p12, %p6644_p8  ;;  %p6666_p13 = scmp.lt.s32.totalorder %s6664_s1, %s6657_s23 }
  0xe2   : > { %p6661_p10 = pneg %p6660_p1  ;;  %p6667_p0 = por %p6666_p13, %p6665_p6 }
  0xe4   : > { %p6668_p2 = pnand %p6667_p0, %p6661_p10 }
  0xe6   : > { %6671 = shalt.err (!%p6668_p2)
}
  0xe7   : > { %6340 = dma.hbm_to_vmem [thread:$0]  (!%p7078_p11), %s7076_s28, 2048, %s7082_s26, %s364_s27  }
  0xe8   : > { %p7503_p3 = scmp.ne.s32.totalorder %s7494_s16, 0 }
  0xe9   : > { %s7112_s13 = sand.u32 (!%p7503_p3), 1, %s6746_s10  }
  0xea   : > { %384 = sbr.rel (%p7503_p3) target bundleno = 2413 (0x96d), region = 56  ;;  %s4579_s9 = sshll.u32 (!%p7503_p3), %s7112_s13, 7 }
  0xeb   : > { %s387_s22 = scalar_lea.sflag (!%p7503_p3), [#allocation3], %s7112_s13  ;;  %s7116_s25 = scalar_lea.vmem (!%p7503_p3), [#allocation2], %s4579_s9 }
  0xf1   : > { %6717 = dma.done.wait (%p7058_p7), %s387_s22, 2048  }
  0xf2   : > { %6719 = vsyncadd (%p7058_p7), %s387_s22, 4294965248  ;;  %p7504_p6 = scmp.eq.s32.totalorder %s6844_s15, 0 }
  0xf4   : > { %6721 = dma.done.wait (%p7504_p6), [#allocation6], 65568   ;;  %p7505_p10 = pmov %p7504_p6 }
  0xf5   : > { %p7506_p11 = pmov %p7504_p6 }
  0xf6   : > { %6723 = vsyncadd (%p7505_p10), [#allocation6], 4294901728 }
  0xf7   : > { %6725 = dma.done.wait (%p7506_p11), [#allocation9], 64   ;;  %p7507_p8 = pmov %p7504_p6 }
  0xf8   : > { %p7508_p5 = pmov %p7504_p6 }
  0xf9   : > { %6727 = vsyncadd (%p7507_p8), [#allocation9], 4294967232 }
  0xfa   : > { %6729 = dma.done.wait (%p7508_p5), [#allocation12], 16448   ;;  %p7509_p9 = pmov %p7508_p5 }
  0xfb   : > { %p7510_p7 = pmov %p7508_p5 }
  0xfc   : > { %6731 = vsyncadd (%p7509_p9), [#allocation12], 4294950848 }
  0xfd   : > { %6733 = dma.done.wait (%p7510_p7), [#allocation15], 131584   ;;  %p7511_p4 = pmov %p7508_p5 }
  0xfe   : > { %v474_v0 = vld [vmem:[#allocation5 + $0x8] sm:$0xff]  ;;  %v476_v1 = vld [vmem:[#allocation5 + $0x18] sm:$0xff]  ;;  %v473_v2 = vld [vmem:[#allocation5] sm:$0xff]  ;;  %s4588_s16 = sshll.u32 %s7112_s13, 9  ;;  %s4595_s28 = sshll.u32 %s6844_s15, 13 }
  0xff   : > { %6735 = vsyncadd (%p7511_p4), [#allocation15], 4294835712  ;;  %v4596_v3 = vpack.c.bf16 %v476_v1, %v474_v0  ;;  %v475_v4 = vld [vmem:[#allocation5 + $0x10] sm:$0xff]  ;;  %v478_v5 = vld [vmem:[#allocation5 + $0x28] sm:$0xff]  ;;  %s7263_s21 = scalar_lea.vmem [#allocation17], %s4588_s16  ;;  %s7512_s23 = sld [smem:[#allocation25_spill]] }
 0x100   : > { %v480_v6 = vld [vmem:[#allocation5 + $0x38] sm:$0xff]  ;;  %v4598_v7 = vpack.c.bf16 %v475_v4, %v473_v2  ;;  %v477_v9 = vld [vmem:[#allocation5 + $0x20] sm:$0xff]  ;;  %v479_v10 = vld [vmem:[#allocation5 + $0x30] sm:$0xff]  ;;  %s4415_s26 = sshll.u32 %s7263_s21, 4  ;;  %s4402_s15 = scalar_lea.sflag [#allocation4], %s7112_s13  ;;  %s7432_s26 = int_to_ptr.vmem [resolvable:$true] %s4415_s26 }
 0x101   : > { %v4600_v8 = vpack.c.bf16 %v480_v6, %v478_v5  ;;  %v482_v11 = vld [vmem:[#allocation5 + $0x48] sm:$0xff]  ;;  %4597 = vmatprep.subr.bf16.mxu0 %v4596_v3  ;;  %v484_v12 = vld [vmem:[#allocation5 + $0x58] sm:$0xff]  ;;  %v4602_v13 = vpack.c.bf16 %v479_v10, %v477_v9  ;;  %v481_v15 = vld [vmem:[#allocation5 + $0x40] sm:$0xff]  ;;  %s6672_s18 = scalar_lea.vmem %s7432_s26, 8192  ;;  %p7513_p1 = scmp.ne.s32.totalorder %s7500_s14, 0 }
 0x102   : > { %4599 = vmatpush1.bf16.msra.mxu0 %v4598_v7  ;;  %v4604_v14 = vpack.c.bf16 %v484_v12, %v482_v11  ;;  %v483_v16 = vld [vmem:[#allocation5 + $0x50] sm:$0xff]  ;;  %v486_v17 = vld [vmem:[#allocation5 + $0x68] sm:$0xff]  ;;  %v488_v18 = vld [vmem:[#allocation5 + $0x78] sm:$0xff]  ;;  %p6673_p12 = scmp.ne.s32.totalorder %s7432_s26, %s6672_s18  ;;  %s6770_s1 = smov [#allocation17]  }
 0x103   : > { %4601 = vmatprep.subr.bf16.mxu0 %v4600_v8  ;;  %v4606_v19 = vpack.c.bf16 %v483_v16, %v481_v15  ;;  %v4608_v20 = vpack.c.bf16 %v488_v18, %v486_v17  ;;  %v485_v21 = vld [vmem:[#allocation5 + $0x60] sm:$0xff]  ;;  %v487_v22 = vld [vmem:[#allocation5 + $0x70] sm:$0xff]  ;;  %v490_v23 = vld [vmem:[#allocation5 + $0x88] sm:$0xff]  ;;  %s6676_s9 = sshll.u32 %s6770_s1, 4  ;;  %s6677_s9 = int_to_ptr.vmem [resolvable:$false] %s6676_s9 }
 0x104   : > { %v492_v24 = vld [vmem:[#allocation5 + $0x98] sm:$0xff]  ;;  %v4610_v25 = vpack.c.bf16 %v487_v22, %v485_v21  ;;  %v489_v27 = vld [vmem:[#allocation5 + $0x80] sm:$0xff]  ;;  %v491_v28 = vld [vmem:[#allocation5 + $0x90] sm:$0xff]  ;;  %p6674_p13 = pnand %p6673_p12, %p7513_p1  ;;  %s6678_s22 = scalar_lea.vmem %s6677_s9, 16384 }
 0x105   : > { %v4612_v26 = vpack.c.bf16 %v492_v24, %v490_v23  ;;  %v494_v29 = vld [vmem:[#allocation5 + $0xa8] sm:$0xff]  ;;  %v496_v30 = vld [vmem:[#allocation5 + $0xb8] sm:$0xff]  ;;  %v4614_v31 = vpack.c.bf16 %v491_v28, %v489_v27  ;;  %v493_v33 = vld [vmem:[#allocation5 + $0xa0] sm:$0xff]  ;;  %s7430_s17 = scalar_lea.hbm %s7512_s23, %s4595_s28  ;;  %p6679_p2 = scmp.lt.s32.totalorder %s7432_s26, %s6677_s9 }
 0x106   : > { %4603 = vmatpush1.bf16.msra.mxu0 %v4602_v13  ;;  %v4616_v32 = vpack.c.bf16 %v496_v30, %v494_v29  ;;  %v495_v34 = vld [vmem:[#allocation5 + $0xb0] sm:$0xff]  ;;  %v498_v35 = vld [vmem:[#allocation5 + $0xc8] sm:$0xff]  ;;  %v500_v36 = vld [vmem:[#allocation5 + $0xd8] sm:$0xff]  ;;  %p6675_p0 = pneg %p6674_p13  ;;  %p6680_p3 = scmp.lt.s32.totalorder %s6678_s22, %s6672_s18 }
 0x107   : > { %4605 = vmatprep.subr.bf16.mxu0 %v4604_v14  ;;  %v4618_v37 = vpack.c.bf16 %v495_v34, %v493_v33  ;;  %v4620_v38 = vpack.c.bf16 %v500_v36, %v498_v35  ;;  %v497_v39 = vld [vmem:[#allocation5 + $0xc0] sm:$0xff]  ;;  %v499_v40 = vld [vmem:[#allocation5 + $0xd0] sm:$0xff]  ;;  %v458_v41 = vld [vmem:[%s7116_s25 + $0x8] sm:$0xff] }
 0x108   : > { %v502_v42 = vld [vmem:[#allocation5 + $0xe8] sm:$0xff]  ;;  %v504_v43 = vld [vmem:[#allocation5 + $0xf8] sm:$0xff]  ;;  %1061 = vmatprep.mubr.f32.mxu0 %v458_v41  ;;  %v4622_v44 = vpack.c.bf16 %v499_v40, %v497_v39  ;;  %v501_v46 = vld [vmem:[#allocation5 + $0xe0] sm:$0xff]  ;;  %p6681_p6 = por %p6680_p3, %p6679_p2 }
 0x109   : > { %v4624_v45 = vpack.c.bf16 %v504_v43, %v502_v42  ;;  %v503_v47 = vld [vmem:[#allocation5 + $0xf0] sm:$0xff]  ;;  %v506_v48 = vld [vmem:[#allocation5 + $0x108] sm:$0xff]  ;;  %v508_v49 = vld [vmem:[#allocation5 + $0x118] sm:$0xff] }
 0x10a   : > { %4607 = vmatpush1.bf16.msra.mxu0 %v4606_v19  ;;  %v4626_v50 = vpack.c.bf16 %v503_v47, %v501_v46  ;;  %v4628_v51 = vpack.c.bf16 %v508_v49, %v506_v48  ;;  %v505_v52 = vld [vmem:[#allocation5 + $0x100] sm:$0xff]  ;;  %v507_v53 = vld [vmem:[#allocation5 + $0x110] sm:$0xff]  ;;  %v510_v54 = vld [vmem:[#allocation5 + $0x128] sm:$0xff]  ;;  %p6682_p10 = pnand %p6681_p6, %p6675_p0 }
 0x10b   : > { %4609 = vmatprep.subr.bf16.mxu0 %v4608_v20  ;;  %v512_v55 = vld [vmem:[#allocation5 + $0x138] sm:$0xff]  ;;  %v4630_v56 = vpack.c.bf16 %v507_v53, %v505_v52  ;;  %v509_v58 = vld [vmem:[#allocation5 + $0x120] sm:$0xff]  ;;  %v511_v59 = vld [vmem:[#allocation5 + $0x130] sm:$0xff] }
 0x10c   : > { %v4632_v57 = vpack.c.bf16 %v512_v55, %v510_v54  ;;  %v514_v60 = vld [vmem:[#allocation5 + $0x148] sm:$0xff]  ;;  %v516_v61 = vld [vmem:[#allocation5 + $0x158] sm:$0xff]  ;;  %v4634_v62 = vpack.c.bf16 %v511_v59, %v509_v58  ;;  %v513_v0 = vld [vmem:[#allocation5 + $0x140] sm:$0xff] }
 0x10d   : > { %v4636_v63 = vpack.c.bf16 %v516_v61, %v514_v60  ;;  %v515_v1 = vld [vmem:[#allocation5 + $0x150] sm:$0xff]  ;;  %v518_v2 = vld [vmem:[#allocation5 + $0x168] sm:$0xff]  ;;  %v520_v3 = vld [vmem:[#allocation5 + $0x178] sm:$0xff] }
 0x10e   : > { %4611 = vmatpush1.bf16.msra.mxu0 %v4610_v25  ;;  %v4638_v4 = vpack.c.bf16 %v515_v1, %v513_v0  ;;  %v4640_v5 = vpack.c.bf16 %v520_v3, %v518_v2  ;;  %v517_v6 = vld [vmem:[#allocation5 + $0x160] sm:$0xff]  ;;  %v519_v7 = vld [vmem:[#allocation5 + $0x170] sm:$0xff]  ;;  %v522_v8 = vld [vmem:[#allocation5 + $0x188] sm:$0xff] }
 0x10f   : > { %4613 = vmatprep.subr.bf16.mxu0 %v4612_v26  ;;  %v524_v9 = vld [vmem:[#allocation5 + $0x198] sm:$0xff]  ;;  %v4642_v10 = vpack.c.bf16 %v519_v7, %v517_v6  ;;  %v521_v12 = vld [vmem:[#allocation5 + $0x180] sm:$0xff]  ;;  %v523_v13 = vld [vmem:[#allocation5 + $0x190] sm:$0xff] }
 0x110   : > { %v4644_v11 = vpack.c.bf16 %v524_v9, %v522_v8  ;;  %v526_v14 = vld [vmem:[#allocation5 + $0x1a8] sm:$0xff]  ;;  %v528_v15 = vld [vmem:[#allocation5 + $0x1b8] sm:$0xff]  ;;  %v4646_v16 = vpack.c.bf16 %v523_v13, %v521_v12  ;;  %v525_v18 = vld [vmem:[#allocation5 + $0x1a0] sm:$0xff] }
 0x111   : > { %v4648_v17 = vpack.c.bf16 %v528_v15, %v526_v14  ;;  %v527_v19 = vld [vmem:[#allocation5 + $0x1b0] sm:$0xff]  ;;  %v530_v20 = vld [vmem:[#allocation5 + $0x1c8] sm:$0xff]  ;;  %v532_v21 = vld [vmem:[#allocation5 + $0x1d8] sm:$0xff] }
 0x112   : > { %4615 = vmatpush1.bf16.msra.mxu0 %v4614_v31  ;;  %v4650_v22 = vpack.c.bf16 %v527_v19, %v525_v18  ;;  %v4652_v23 = vpack.c.bf16 %v532_v21, %v530_v20  ;;  %v529_v24 = vld [vmem:[#allocation5 + $0x1c0] sm:$0xff]  ;;  %v531_v25 = vld [vmem:[#allocation5 + $0x1d0] sm:$0xff]  ;;  %v534_v26 = vld [vmem:[#allocation5 + $0x1e8] sm:$0xff] }
 0x113   : > { %4617 = vmatprep.subr.bf16.mxu0 %v4616_v32  ;;  %v536_v27 = vld [vmem:[#allocation5 + $0x1f8] sm:$0xff]  ;;  %v4654_v28 = vpack.c.bf16 %v531_v25, %v529_v24  ;;  %v533_v30 = vld [vmem:[#allocation5 + $0x1e0] sm:$0xff]  ;;  %v535_v31 = vld [vmem:[#allocation5 + $0x1f0] sm:$0xff] }
 0x114   : > { %v4656_v29 = vpack.c.bf16 %v536_v27, %v534_v26  ;;  %v538_v32 = vld [vmem:[#allocation5 + $0x208] sm:$0xff]  ;;  %v540_v33 = vld [vmem:[#allocation5 + $0x218] sm:$0xff]  ;;  %v4658_v34 = vpack.c.bf16 %v535_v31, %v533_v30  ;;  %v537_v36 = vld [vmem:[#allocation5 + $0x200] sm:$0xff] }
 0x115   : > { %v4660_v35 = vpack.c.bf16 %v540_v33, %v538_v32  ;;  %v544_v39 = vld [vmem:[#allocation5 + $0x238] sm:$0xff]  ;;  %v457_v40 = vld [vmem:[%s7116_s25] sm:$0xff]  ;;  %v546_v46 = vld [vmem:[#allocation5 + $0x248] sm:$0xff] }
 0x116   : > { %4619 = vmatpush1.bf16.msra.mxu0 %v4618_v37  ;;  %v539_v37 = vld [vmem:[#allocation5 + $0x210] sm:$0xff]  ;;  %v541_v43 = vld [vmem:[#allocation5 + $0x220] sm:$0xff]  ;;  %v548_v47 = vld [vmem:[#allocation5 + $0x258] sm:$0xff] }
 0x117   : > { %4621 = vmatprep.subr.bf16.mxu0 %v4620_v38  ;;  %v542_v38 = vld [vmem:[#allocation5 + $0x228] sm:$0xff]  ;;  %v4662_v41 = vpack.c.bf16 %v539_v37, %v537_v36  ;;  %v4668_v49 = vpack.c.bf16 %v548_v47, %v546_v46  ;;  %v552_v53 = vld [vmem:[#allocation5 + $0x278] sm:$0xff]  ;;  %v585_v46 = vld [vmem:[#allocation5 + $0x380] sm:$0xff] }
 0x118   : > { %v4664_v42 = vpack.c.bf16 %v544_v39, %v542_v38  ;;  %v550_v52 = vld [vmem:[#allocation5 + $0x268] sm:$0xff]  ;;  %v556_v59 = vld [vmem:[#allocation5 + $0x298] sm:$0xff]  ;;  %v587_v47 = vld [vmem:[#allocation5 + $0x390] sm:$0xff] }
 0x119   : > { %v4672_v55 = vpack.c.bf16 %v552_v53, %v550_v52  ;;  %v554_v58 = vld [vmem:[#allocation5 + $0x288] sm:$0xff]  ;;  %v560_v1 = vld [vmem:[#allocation5 + $0x2b8] sm:$0xff]  ;;  %v589_v52 = vld [vmem:[#allocation5 + $0x3a0] sm:$0xff] }
 0x11a   : > { %4623 = vmatpush1.bf16.msra.mxu0 %v4622_v44  ;;  %v543_v44 = vld [vmem:[#allocation5 + $0x230] sm:$0xff]  ;;  %v4676_v61 = vpack.c.bf16 %v556_v59, %v554_v58  ;;  %v558_v0 = vld [vmem:[#allocation5 + $0x2a8] sm:$0xff]  ;;  %v564_v7 = vld [vmem:[#allocation5 + $0x2d8] sm:$0xff] }
 0x11b   : > { %4625 = vmatprep.subr.bf16.mxu0 %v4624_v45  ;;  %v460_v45 = vld [vmem:[%s7116_s25 + $0x18] sm:$0xff]  ;;  %v4666_v48 = vpack.c.bf16 %v543_v44, %v541_v43  ;;  %v4680_v3 = vpack.c.bf16 %v560_v1, %v558_v0  ;;  %v562_v6 = vld [vmem:[#allocation5 + $0x2c8] sm:$0xff]  ;;  %v591_v53 = vld [vmem:[#allocation5 + $0x3b0] sm:$0xff] }
 0x11c   : > { %v4684_v9 = vpack.c.bf16 %v564_v7, %v562_v6  ;;  %v566_v12 = vld [vmem:[#allocation5 + $0x2e8] sm:$0xff]  ;;  %v568_v13 = vld [vmem:[#allocation5 + $0x2f8] sm:$0xff]  ;;  %v593_v58 = vld [vmem:[#allocation5 + $0x3c0] sm:$0xff] }
 0x11d   : > { %v4688_v15 = vpack.c.bf16 %v568_v13, %v566_v12  ;;  %v570_v18 = vld [vmem:[#allocation5 + $0x308] sm:$0xff]  ;;  %v572_v19 = vld [vmem:[#allocation5 + $0x318] sm:$0xff]  ;;  %v595_v59 = vld [vmem:[#allocation5 + $0x3d0] sm:$0xff] }
 0x11e   : > { %4627 = vmatpush1.bf16.msra.mxu0 %v4626_v50  ;;  %v545_v50 = vld [vmem:[#allocation5 + $0x240] sm:$0xff]  ;;  %v4692_v21 = vpack.c.bf16 %v572_v19, %v570_v18  ;;  %v574_v24 = vld [vmem:[#allocation5 + $0x328] sm:$0xff]  ;;  %v576_v25 = vld [vmem:[#allocation5 + $0x338] sm:$0xff] }
 0x11f   : > { %4629 = vmatprep.subr.bf16.mxu0 %v4628_v51  ;;  %v547_v51 = vld [vmem:[#allocation5 + $0x250] sm:$0xff]  ;;  %v4696_v27 = vpack.c.bf16 %v576_v25, %v574_v24  ;;  %v578_v30 = vld [vmem:[#allocation5 + $0x348] sm:$0xff]  ;;  %v580_v31 = vld [vmem:[#allocation5 + $0x358] sm:$0xff] }
 0x120   : > { %v4670_v54 = vpack.c.bf16 %v547_v51, %v545_v50  ;;  %v4700_v33 = vpack.c.bf16 %v580_v31, %v578_v30  ;;  %v582_v36 = vld [vmem:[#allocation5 + $0x368] sm:$0xff]  ;;  %v584_v37 = vld [vmem:[#allocation5 + $0x378] sm:$0xff]  ;;  %v4710_v50 = vpack.c.bf16 %v587_v47, %v585_v46  ;;  %v597_v0 = vld [vmem:[#allocation5 + $0x3e0] sm:$0xff] }
 0x121   : > { %v4704_v39 = vpack.c.bf16 %v584_v37, %v582_v36  ;;  %v588_v43 = vld [vmem:[#allocation5 + $0x398] sm:$0xff]  ;;  %v599_v1 = vld [vmem:[#allocation5 + $0x3f0] sm:$0xff]  ;;  %v601_v6 = vld [vmem:[#allocation5 + $0x400] sm:$0xff] }
 0x122   : > { %4631 = vmatpush1.bf16.msra.mxu0 %v4630_v56  ;;  %v549_v56 = vld [vmem:[#allocation5 + $0x260] sm:$0xff]  ;;  %v603_v7 = vld [vmem:[#allocation5 + $0x410] sm:$0xff]  ;;  %v630_v46 = vld [vmem:[#allocation5 + $0x4e8] sm:$0xff] }
 0x123   : > { %4633 = vmatprep.subr.bf16.mxu0 %v4632_v57  ;;  %v551_v57 = vld [vmem:[#allocation5 + $0x270] sm:$0xff]  ;;  %v605_v13 = vld [vmem:[#allocation5 + $0x420] sm:$0xff]  ;;  %v632_v47 = vld [vmem:[#allocation5 + $0x4f8] sm:$0xff] }
 0x124   : > { %v4674_v60 = vpack.c.bf16 %v551_v57, %v549_v56  ;;  %v4714_v56 = vpack.c.bf16 %v591_v53, %v589_v52  ;;  %v634_v52 = vld [vmem:[#allocation5 + $0x508] sm:$0xff]  ;;  %v636_v53 = vld [vmem:[#allocation5 + $0x518] sm:$0xff] }
 0x126   : > { %4635 = vmatpush1.bf16.msra.mxu0 %v4634_v62  ;;  %v553_v62 = vld [vmem:[#allocation5 + $0x280] sm:$0xff] }
 0x127   : > { %4637 = vmatprep.subr.bf16.mxu0 %v4636_v63  ;;  %v555_v63 = vld [vmem:[#allocation5 + $0x290] sm:$0xff] }
 0x128   : > { %v4678_v2 = vpack.c.bf16 %v555_v63, %v553_v62  ;;  %v4718_v62 = vpack.c.bf16 %v595_v59, %v593_v58  ;;  %v638_v58 = vld [vmem:[#allocation5 + $0x528] sm:$0xff]  ;;  %v640_v59 = vld [vmem:[#allocation5 + $0x538] sm:$0xff] }
 0x12a   : > { %4639 = vmatpush1.bf16.msra.mxu0 %v4638_v4  ;;  %v557_v4 = vld [vmem:[#allocation5 + $0x2a0] sm:$0xff] }
 0x12b   : > { %4641 = vmatprep.subr.bf16.mxu0 %v4640_v5  ;;  %v559_v5 = vld [vmem:[#allocation5 + $0x2b0] sm:$0xff] }
 0x12c   : > { %v4682_v8 = vpack.c.bf16 %v559_v5, %v557_v4  ;;  %v4722_v4 = vpack.c.bf16 %v599_v1, %v597_v0  ;;  %v642_v0 = vld [vmem:[#allocation5 + $0x548] sm:$0xff]  ;;  %v644_v1 = vld [vmem:[#allocation5 + $0x558] sm:$0xff] }
 0x12e   : > { %4643 = vmatpush1.bf16.msra.mxu0 %v4642_v10  ;;  %v561_v10 = vld [vmem:[#allocation5 + $0x2c0] sm:$0xff] }
 0x12f   : > { %4645 = vmatprep.subr.bf16.mxu0 %v4644_v11  ;;  %v563_v11 = vld [vmem:[#allocation5 + $0x2d0] sm:$0xff] }
 0x130   : > { %v4686_v14 = vpack.c.bf16 %v563_v11, %v561_v10  ;;  %v459_v10 = vld [vmem:[%s7116_s25 + $0x10] sm:$0xff]  ;;  %v4726_v11 = vpack.c.bf16 %v603_v7, %v601_v6  ;;  %v646_v6 = vld [vmem:[#allocation5 + $0x568] sm:$0xff]  ;;  %v648_v7 = vld [vmem:[#allocation5 + $0x578] sm:$0xff] }
 0x132   : > { %4647 = vmatpush1.bf16.msra.mxu0 %v4646_v16  ;;  %v565_v16 = vld [vmem:[#allocation5 + $0x2e0] sm:$0xff] }
 0x133   : > { %4649 = vmatprep.subr.bf16.mxu0 %v4648_v17  ;;  %v567_v17 = vld [vmem:[#allocation5 + $0x2f0] sm:$0xff] }
 0x134   : > { %v4690_v20 = vpack.c.bf16 %v567_v17, %v565_v16  ;;  %v610_v16 = vld [vmem:[#allocation5 + $0x448] sm:$0xff]  ;;  %v612_v17 = vld [vmem:[#allocation5 + $0x458] sm:$0xff] }
 0x135   : > { %v4732_v19 = vpack.c.bf16 %v612_v17, %v610_v16  ;;  %v649_v16 = vld [vmem:[#allocation5 + $0x580] sm:$0xff]  ;;  %v651_v17 = vld [vmem:[#allocation5 + $0x590] sm:$0xff] }
 0x136   : > { %4651 = vmatpush1.bf16.msra.mxu0 %v4650_v22  ;;  %v569_v22 = vld [vmem:[#allocation5 + $0x300] sm:$0xff] }
 0x137   : > { %4653 = vmatprep.subr.bf16.mxu0 %v4652_v23  ;;  %v571_v23 = vld [vmem:[#allocation5 + $0x310] sm:$0xff] }
 0x138   : > { %v4694_v26 = vpack.c.bf16 %v571_v23, %v569_v22  ;;  %v614_v22 = vld [vmem:[#allocation5 + $0x468] sm:$0xff]  ;;  %v616_v23 = vld [vmem:[#allocation5 + $0x478] sm:$0xff] }
 0x139   : > { %v4736_v25 = vpack.c.bf16 %v616_v23, %v614_v22  ;;  %v653_v22 = vld [vmem:[#allocation5 + $0x5a0] sm:$0xff]  ;;  %v655_v23 = vld [vmem:[#allocation5 + $0x5b0] sm:$0xff] }
 0x13a   : > { %4655 = vmatpush1.bf16.msra.mxu0 %v4654_v28  ;;  %v573_v28 = vld [vmem:[#allocation5 + $0x320] sm:$0xff] }
 0x13b   : > { %4657 = vmatprep.subr.bf16.mxu0 %v4656_v29  ;;  %v575_v29 = vld [vmem:[#allocation5 + $0x330] sm:$0xff] }
 0x13c   : > { %v4698_v32 = vpack.c.bf16 %v575_v29, %v573_v28  ;;  %v618_v28 = vld [vmem:[#allocation5 + $0x488] sm:$0xff]  ;;  %v620_v29 = vld [vmem:[#allocation5 + $0x498] sm:$0xff] }
 0x13d   : > { %v4740_v31 = vpack.c.bf16 %v620_v29, %v618_v28  ;;  %v657_v28 = vld [vmem:[#allocation5 + $0x5c0] sm:$0xff]  ;;  %v659_v29 = vld [vmem:[#allocation5 + $0x5d0] sm:$0xff] }
 0x13e   : > { %4659 = vmatpush1.bf16.msra.mxu0 %v4658_v34  ;;  %v577_v34 = vld [vmem:[#allocation5 + $0x340] sm:$0xff] }
 0x13f   : > { %4661 = vmatprep.subr.bf16.mxu0 %v4660_v35  ;;  %v579_v35 = vld [vmem:[#allocation5 + $0x350] sm:$0xff] }
 0x140   : > { %v4702_v38 = vpack.c.bf16 %v579_v35, %v577_v34  ;;  %v622_v34 = vld [vmem:[#allocation5 + $0x4a8] sm:$0xff]  ;;  %v624_v35 = vld [vmem:[#allocation5 + $0x4b8] sm:$0xff] }
 0x141   : > { %1062 = vmatmul.mubr.f32.vlgmr.msra.gmra.mrb[0].mxu0 %v457_v40  ;;  %v581_v40 = vld [vmem:[#allocation5 + $0x360] sm:$0xff]  ;;  %v4744_v37 = vpack.c.bf16 %v624_v35, %v622_v34  ;;  %v663_v35 = vld [vmem:[#allocation5 + $0x5f0] sm:$0xff] }
 0x142   : > { %4663 = vmatpush1.bf16.msra.mxu0 %v4662_v41  ;;  %1132 = vmatprep.mubr.f32.mxu0 %v460_v45  ;;  %v583_v41 = vld [vmem:[#allocation5 + $0x370] sm:$0xff]  ;;  %v661_v34 = vld [vmem:[#allocation5 + $0x5e0] sm:$0xff] }
 0x143   : > { %4665 = vmatprep.subr.bf16.mxu0 %v4664_v42  ;;  %v586_v42 = vld [vmem:[#allocation5 + $0x388] sm:$0xff]  ;;  %v4706_v44 = vpack.c.bf16 %v583_v41, %v581_v40  ;;  %v628_v41 = vld [vmem:[#allocation5 + $0x4d8] sm:$0xff] }
 0x144   : > { %v4708_v45 = vpack.c.bf16 %v588_v43, %v586_v42  ;;  %v626_v40 = vld [vmem:[#allocation5 + $0x4c8] sm:$0xff] }
 0x145   : > { %v4748_v43 = vpack.c.bf16 %v628_v41, %v626_v40  ;;  %v665_v40 = vld [vmem:[#allocation5 + $0x600] sm:$0xff]  ;;  %v667_v41 = vld [vmem:[#allocation5 + $0x610] sm:$0xff] }
 0x146   : > { %4667 = vmatpush1.bf16.msra.mxu0 %v4666_v48  ;;  %v590_v48 = vld [vmem:[#allocation5 + $0x3a8] sm:$0xff] }
 0x147   : > { %4669 = vmatprep.subr.bf16.mxu0 %v4668_v49  ;;  %v592_v49 = vld [vmem:[#allocation5 + $0x3b8] sm:$0xff] }
 0x148   : > { %v4712_v51 = vpack.c.bf16 %v592_v49, %v590_v48  ;;  %v4752_v49 = vpack.c.bf16 %v632_v47, %v630_v46  ;;  %v669_v47 = vld [vmem:[#allocation5 + $0x620] sm:$0xff] }
 0x14a   : > { %4671 = vmatpush1.bf16.msra.mxu0 %v4670_v54  ;;  %v594_v54 = vld [vmem:[#allocation5 + $0x3c8] sm:$0xff] }
 0x14b   : > { %4673 = vmatprep.subr.bf16.mxu0 %v4672_v55  ;;  %v596_v55 = vld [vmem:[#allocation5 + $0x3d8] sm:$0xff] }
 0x14c   : > { %v4716_v57 = vpack.c.bf16 %v596_v55, %v594_v54  ;;  %v4756_v55 = vpack.c.bf16 %v636_v53, %v634_v52 }
 0x14e   : > { %4675 = vmatpush1.bf16.msra.mxu0 %v4674_v60  ;;  %v598_v60 = vld [vmem:[#allocation5 + $0x3e8] sm:$0xff] }
 0x14f   : > { %4677 = vmatprep.subr.bf16.mxu0 %v4676_v61  ;;  %v600_v61 = vld [vmem:[#allocation5 + $0x3f8] sm:$0xff] }
 0x150   : > { %v4720_v63 = vpack.c.bf16 %v600_v61, %v598_v60  ;;  %v4760_v61 = vpack.c.bf16 %v640_v59, %v638_v58 }
 0x152   : > { %4679 = vmatpush1.bf16.msra.mxu0 %v4678_v2  ;;  %v602_v2 = vld [vmem:[#allocation5 + $0x408] sm:$0xff] }
 0x153   : > { %4681 = vmatprep.subr.bf16.mxu0 %v4680_v3  ;;  %v604_v3 = vld [vmem:[#allocation5 + $0x418] sm:$0xff] }
 0x154   : > { %v4724_v5 = vpack.c.bf16 %v604_v3, %v602_v2  ;;  %v4764_v3 = vpack.c.bf16 %v644_v1, %v642_v0 }
 0x156   : > { %4683 = vmatpush1.bf16.msra.mxu0 %v4682_v8  ;;  %v606_v8 = vld [vmem:[#allocation5 + $0x428] sm:$0xff] }
 0x157   : > { %4685 = vmatprep.subr.bf16.mxu0 %v4684_v9  ;;  %v608_v9 = vld [vmem:[#allocation5 + $0x438] sm:$0xff] }
 0x158   : > { %v4728_v12 = vpack.c.bf16 %v608_v9, %v606_v8  ;;  %v4768_v9 = vpack.c.bf16 %v648_v7, %v646_v6 }
 0x15a   : > { %4687 = vmatpush1.bf16.msra.mxu0 %v4686_v14  ;;  %v607_v14 = vld [vmem:[#allocation5 + $0x430] sm:$0xff] }
 0x15b   : > { %4689 = vmatprep.subr.bf16.mxu0 %v4688_v15  ;;  %v462_v15 = vld [vmem:[%s7116_s25 + $0x28] sm:$0xff]  ;;  %v4730_v18 = vpack.c.bf16 %v607_v14, %v605_v13  ;;  %v652_v13 = vld [vmem:[#allocation5 + $0x598] sm:$0xff] }
 0x15e   : > { %4691 = vmatpush1.bf16.msra.mxu0 %v4690_v20  ;;  %v609_v20 = vld [vmem:[#allocation5 + $0x440] sm:$0xff] }
 0x15f   : > { %4693 = vmatprep.subr.bf16.mxu0 %v4692_v21  ;;  %v611_v21 = vld [vmem:[#allocation5 + $0x450] sm:$0xff] }
 0x160   : > { %v4734_v24 = vpack.c.bf16 %v611_v21, %v609_v20  ;;  %v4774_v20 = vpack.c.bf16 %v651_v17, %v649_v16  ;;  %v694_v16 = vld [vmem:[#allocation5 + $0x6e8] sm:$0xff]  ;;  %v696_v17 = vld [vmem:[#allocation5 + $0x6f8] sm:$0xff] }
 0x162   : > { %4695 = vmatpush1.bf16.msra.mxu0 %v4694_v26  ;;  %v613_v26 = vld [vmem:[#allocation5 + $0x460] sm:$0xff] }
 0x163   : > { %4697 = vmatprep.subr.bf16.mxu0 %v4696_v27  ;;  %v615_v27 = vld [vmem:[#allocation5 + $0x470] sm:$0xff] }
 0x164   : > { %v4738_v30 = vpack.c.bf16 %v615_v27, %v613_v26  ;;  %v4778_v26 = vpack.c.bf16 %v655_v23, %v653_v22  ;;  %v698_v22 = vld [vmem:[#allocation5 + $0x708] sm:$0xff]  ;;  %v700_v23 = vld [vmem:[#allocation5 + $0x718] sm:$0xff] }
 0x166   : > { %4699 = vmatpush1.bf16.msra.mxu0 %v4698_v32  ;;  %v617_v32 = vld [vmem:[#allocation5 + $0x480] sm:$0xff] }
 0x167   : > { %4701 = vmatprep.subr.bf16.mxu0 %v4700_v33  ;;  %v619_v33 = vld [vmem:[#allocation5 + $0x490] sm:$0xff] }
 0x168   : > { %v4742_v36 = vpack.c.bf16 %v619_v33, %v617_v32  ;;  %v4782_v32 = vpack.c.bf16 %v659_v29, %v657_v28  ;;  %v702_v28 = vld [vmem:[#allocation5 + $0x728] sm:$0xff]  ;;  %v704_v29 = vld [vmem:[#allocation5 + $0x738] sm:$0xff] }
 0x16a   : > { %4703 = vmatpush1.bf16.msra.mxu0 %v4702_v38  ;;  %v621_v38 = vld [vmem:[#allocation5 + $0x4a0] sm:$0xff] }
 0x16b   : > { %4705 = vmatprep.subr.bf16.mxu0 %v4704_v39  ;;  %v623_v39 = vld [vmem:[#allocation5 + $0x4b0] sm:$0xff] }
 0x16c   : > { %v4746_v42 = vpack.c.bf16 %v623_v39, %v621_v38  ;;  %v4786_v38 = vpack.c.bf16 %v663_v35, %v661_v34  ;;  %v706_v34 = vld [vmem:[#allocation5 + $0x748] sm:$0xff]  ;;  %v708_v35 = vld [vmem:[#allocation5 + $0x758] sm:$0xff] }
 0x16e   : > { %4707 = vmatpush1.bf16.msra.mxu0 %v4706_v44  ;;  %v625_v44 = vld [vmem:[#allocation5 + $0x4c0] sm:$0xff] }
 0x16f   : > { %4709 = vmatprep.subr.bf16.mxu0 %v4708_v45  ;;  %v627_v45 = vld [vmem:[#allocation5 + $0x4d0] sm:$0xff] }
 0x170   : > { %v4750_v48 = vpack.c.bf16 %v627_v45, %v625_v44  ;;  %v461_v44 = vld [vmem:[%s7116_s25 + $0x20] sm:$0xff]  ;;  %v4790_v45 = vpack.c.bf16 %v667_v41, %v665_v40  ;;  %v710_v40 = vld [vmem:[#allocation5 + $0x768] sm:$0xff]  ;;  %v712_v41 = vld [vmem:[#allocation5 + $0x778] sm:$0xff] }
 0x172   : > { %4711 = vmatpush1.bf16.msra.mxu0 %v4710_v50  ;;  %v629_v50 = vld [vmem:[#allocation5 + $0x4e0] sm:$0xff] }
 0x173   : > { %4713 = vmatprep.subr.bf16.mxu0 %v4712_v51  ;;  %v631_v51 = vld [vmem:[#allocation5 + $0x4f0] sm:$0xff] }
 0x174   : > { %v4754_v54 = vpack.c.bf16 %v631_v51, %v629_v50  ;;  %v674_v50 = vld [vmem:[#allocation5 + $0x648] sm:$0xff]  ;;  %v676_v51 = vld [vmem:[#allocation5 + $0x658] sm:$0xff] }
 0x175   : > { %v4796_v53 = vpack.c.bf16 %v676_v51, %v674_v50  ;;  %v713_v50 = vld [vmem:[#allocation5 + $0x780] sm:$0xff]  ;;  %v715_v51 = vld [vmem:[#allocation5 + $0x790] sm:$0xff] }
 0x176   : > { %4715 = vmatpush1.bf16.msra.mxu0 %v4714_v56  ;;  %v633_v56 = vld [vmem:[#allocation5 + $0x500] sm:$0xff] }
 0x177   : > { %4717 = vmatprep.subr.bf16.mxu0 %v4716_v57  ;;  %v635_v57 = vld [vmem:[#allocation5 + $0x510] sm:$0xff] }
 0x178   : > { %v4758_v60 = vpack.c.bf16 %v635_v57, %v633_v56  ;;  %v678_v56 = vld [vmem:[#allocation5 + $0x668] sm:$0xff]  ;;  %v680_v57 = vld [vmem:[#allocation5 + $0x678] sm:$0xff] }
 0x179   : > { %v4800_v59 = vpack.c.bf16 %v680_v57, %v678_v56  ;;  %v717_v56 = vld [vmem:[#allocation5 + $0x7a0] sm:$0xff]  ;;  %v719_v57 = vld [vmem:[#allocation5 + $0x7b0] sm:$0xff] }
 0x17a   : > { %4719 = vmatpush1.bf16.msra.mxu0 %v4718_v62  ;;  %v637_v62 = vld [vmem:[#allocation5 + $0x520] sm:$0xff] }
 0x17b   : > { %4721 = vmatprep.subr.bf16.mxu0 %v4720_v63  ;;  %v639_v63 = vld [vmem:[#allocation5 + $0x530] sm:$0xff] }
 0x17c   : > { %v4762_v2 = vpack.c.bf16 %v639_v63, %v637_v62  ;;  %v682_v62 = vld [vmem:[#allocation5 + $0x688] sm:$0xff]  ;;  %v684_v63 = vld [vmem:[#allocation5 + $0x698] sm:$0xff] }
 0x17d   : > { %v4804_v1 = vpack.c.bf16 %v684_v63, %v682_v62  ;;  %v721_v62 = vld [vmem:[#allocation5 + $0x7c0] sm:$0xff]  ;;  %v723_v63 = vld [vmem:[#allocation5 + $0x7d0] sm:$0xff] }
 0x17e   : > { %4723 = vmatpush1.bf16.msra.mxu0 %v4722_v4  ;;  %v641_v4 = vld [vmem:[#allocation5 + $0x540] sm:$0xff] }
 0x17f   : > { %4725 = vmatprep.subr.bf16.mxu0 %v4724_v5  ;;  %v643_v5 = vld [vmem:[#allocation5 + $0x550] sm:$0xff] }
 0x180   : > { %v4766_v8 = vpack.c.bf16 %v643_v5, %v641_v4  ;;  %v686_v4 = vld [vmem:[#allocation5 + $0x6a8] sm:$0xff]  ;;  %v688_v5 = vld [vmem:[#allocation5 + $0x6b8] sm:$0xff] }
 0x181   : > { %1133 = vmatmul.mubr.f32.vlgmr.msra.gmra.mrb[0].mxu0 %v459_v10  ;;  %v645_v10 = vld [vmem:[#allocation5 + $0x560] sm:$0xff]  ;;  %v4808_v7 = vpack.c.bf16 %v688_v5, %v686_v4  ;;  %v727_v5 = vld [vmem:[#allocation5 + $0x7f0] sm:$0xff] }
 0x182   : > { %4727 = vmatpush1.bf16.msra.mxu0 %v4726_v11  ;;  %1203 = vmatprep.mubr.f32.mxu0 %v462_v15  ;;  %v647_v11 = vld [vmem:[#allocation5 + $0x570] sm:$0xff]  ;;  %v725_v4 = vld [vmem:[#allocation5 + $0x7e0] sm:$0xff] }
 0x183   : > { %4729 = vmatprep.subr.bf16.mxu0 %v4728_v12  ;;  %v650_v12 = vld [vmem:[#allocation5 + $0x588] sm:$0xff]  ;;  %v4770_v14 = vpack.c.bf16 %v647_v11, %v645_v10  ;;  %v692_v11 = vld [vmem:[#allocation5 + $0x6d8] sm:$0xff] }
 0x184   : > { %v4772_v15 = vpack.c.bf16 %v652_v13, %v650_v12  ;;  %v690_v10 = vld [vmem:[#allocation5 + $0x6c8] sm:$0xff] }
 0x185   : > { %v4812_v13 = vpack.c.bf16 %v692_v11, %v690_v10  ;;  %v729_v10 = vld [vmem:[#allocation5 + $0x800] sm:$0xff]  ;;  %v731_v11 = vld [vmem:[#allocation5 + $0x810] sm:$0xff] }
 0x186   : > { %4731 = vmatpush1.bf16.msra.mxu0 %v4730_v18  ;;  %v654_v18 = vld [vmem:[#allocation5 + $0x5a8] sm:$0xff] }
 0x187   : > { %4733 = vmatprep.subr.bf16.mxu0 %v4732_v19  ;;  %v656_v19 = vld [vmem:[#allocation5 + $0x5b8] sm:$0xff] }
 0x188   : > { %v4776_v21 = vpack.c.bf16 %v656_v19, %v654_v18  ;;  %v4816_v19 = vpack.c.bf16 %v696_v17, %v694_v16  ;;  %v733_v17 = vld [vmem:[#allocation5 + $0x820] sm:$0xff] }
 0x18a   : > { %4735 = vmatpush1.bf16.msra.mxu0 %v4734_v24  ;;  %v658_v24 = vld [vmem:[#allocation5 + $0x5c8] sm:$0xff] }
 0x18b   : > { %4737 = vmatprep.subr.bf16.mxu0 %v4736_v25  ;;  %v660_v25 = vld [vmem:[#allocation5 + $0x5d8] sm:$0xff] }
 0x18c   : > { %v4780_v27 = vpack.c.bf16 %v660_v25, %v658_v24  ;;  %v4820_v25 = vpack.c.bf16 %v700_v23, %v698_v22 }
 0x18e   : > { %4739 = vmatpush1.bf16.msra.mxu0 %v4738_v30  ;;  %v662_v30 = vld [vmem:[#allocation5 + $0x5e8] sm:$0xff] }
 0x18f   : > { %4741 = vmatprep.subr.bf16.mxu0 %v4740_v31  ;;  %v664_v31 = vld [vmem:[#allocation5 + $0x5f8] sm:$0xff] }
 0x190   : > { %v4784_v33 = vpack.c.bf16 %v664_v31, %v662_v30  ;;  %v4824_v31 = vpack.c.bf16 %v704_v29, %v702_v28 }
 0x192   : > { %4743 = vmatpush1.bf16.msra.mxu0 %v4742_v36  ;;  %v666_v36 = vld [vmem:[#allocation5 + $0x608] sm:$0xff] }
 0x193   : > { %4745 = vmatprep.subr.bf16.mxu0 %v4744_v37  ;;  %v668_v37 = vld [vmem:[#allocation5 + $0x618] sm:$0xff] }
 0x194   : > { %v4788_v39 = vpack.c.bf16 %v668_v37, %v666_v36  ;;  %v4828_v37 = vpack.c.bf16 %v708_v35, %v706_v34 }
 0x196   : > { %4747 = vmatpush1.bf16.msra.mxu0 %v4746_v42  ;;  %v670_v42 = vld [vmem:[#allocation5 + $0x628] sm:$0xff] }
 0x197   : > { %4749 = vmatprep.subr.bf16.mxu0 %v4748_v43  ;;  %v672_v43 = vld [vmem:[#allocation5 + $0x638] sm:$0xff] }
 0x198   : > { %v4792_v46 = vpack.c.bf16 %v672_v43, %v670_v42  ;;  %v4832_v43 = vpack.c.bf16 %v712_v41, %v710_v40 }
 0x19a   : > { %4751 = vmatpush1.bf16.msra.mxu0 %v4750_v48  ;;  %v671_v48 = vld [vmem:[#allocation5 + $0x630] sm:$0xff] }
 0x19b   : > { %4753 = vmatprep.subr.bf16.mxu0 %v4752_v49  ;;  %v464_v49 = vld [vmem:[%s7116_s25 + $0x38] sm:$0xff]  ;;  %v4794_v52 = vpack.c.bf16 %v671_v48, %v669_v47 }
 0x19c   : > { %v716_v47 = vld [vmem:[#allocation5 + $0x798] sm:$0xff] }
 0x19e   : > { %4755 = vmatpush1.bf16.msra.mxu0 %v4754_v54  ;;  %v673_v54 = vld [vmem:[#allocation5 + $0x640] sm:$0xff] }
 0x19f   : > { %4757 = vmatprep.subr.bf16.mxu0 %v4756_v55  ;;  %v675_v55 = vld [vmem:[#allocation5 + $0x650] sm:$0xff] }
 0x1a0   : > { %v4798_v58 = vpack.c.bf16 %v675_v55, %v673_v54  ;;  %v4838_v54 = vpack.c.bf16 %v715_v51, %v713_v50  ;;  %v758_v50 = vld [vmem:[#allocation5 + $0x8e8] sm:$0xff]  ;;  %v760_v51 = vld [vmem:[#allocation5 + $0x8f8] sm:$0xff] }
 0x1a2   : > { %4759 = vmatpush1.bf16.msra.mxu0 %v4758_v60  ;;  %v677_v60 = vld [vmem:[#allocation5 + $0x660] sm:$0xff] }
 0x1a3   : > { %4761 = vmatprep.subr.bf16.mxu0 %v4760_v61  ;;  %v679_v61 = vld [vmem:[#allocation5 + $0x670] sm:$0xff] }
 0x1a4   : > { %v4802_v0 = vpack.c.bf16 %v679_v61, %v677_v60  ;;  %v4842_v60 = vpack.c.bf16 %v719_v57, %v717_v56  ;;  %v762_v56 = vld [vmem:[#allocation5 + $0x908] sm:$0xff]  ;;  %v764_v57 = vld [vmem:[#allocation5 + $0x918] sm:$0xff] }
 0x1a6   : > { %4763 = vmatpush1.bf16.msra.mxu0 %v4762_v2  ;;  %v681_v2 = vld [vmem:[#allocation5 + $0x680] sm:$0xff] }
 0x1a7   : > { %4765 = vmatprep.subr.bf16.mxu0 %v4764_v3  ;;  %v683_v3 = vld [vmem:[#allocation5 + $0x690] sm:$0xff] }
 0x1a8   : > { %v4806_v6 = vpack.c.bf16 %v683_v3, %v681_v2  ;;  %v4846_v2 = vpack.c.bf16 %v723_v63, %v721_v62  ;;  %v766_v62 = vld [vmem:[#allocation5 + $0x928] sm:$0xff]  ;;  %v768_v63 = vld [vmem:[#allocation5 + $0x938] sm:$0xff] }
 0x1aa   : > { %4767 = vmatpush1.bf16.msra.mxu0 %v4766_v8  ;;  %v685_v8 = vld [vmem:[#allocation5 + $0x6a0] sm:$0xff] }
 0x1ab   : > { %4769 = vmatprep.subr.bf16.mxu0 %v4768_v9  ;;  %v687_v9 = vld [vmem:[#allocation5 + $0x6b0] sm:$0xff] }
 0x1ac   : > { %v4810_v12 = vpack.c.bf16 %v687_v9, %v685_v8  ;;  %v4850_v8 = vpack.c.bf16 %v727_v5, %v725_v4  ;;  %v770_v4 = vld [vmem:[#allocation5 + $0x948] sm:$0xff]  ;;  %v772_v5 = vld [vmem:[#allocation5 + $0x958] sm:$0xff] }
 0x1ae   : > { %4771 = vmatpush1.bf16.msra.mxu0 %v4770_v14  ;;  %v689_v14 = vld [vmem:[#allocation5 + $0x6c0] sm:$0xff] }
 0x1af   : > { %4773 = vmatprep.subr.bf16.mxu0 %v4772_v15  ;;  %v691_v15 = vld [vmem:[#allocation5 + $0x6d0] sm:$0xff] }
 0x1b0   : > { %v4814_v18 = vpack.c.bf16 %v691_v15, %v689_v14  ;;  %v463_v14 = vld [vmem:[%s7116_s25 + $0x30] sm:$0xff]  ;;  %v4854_v15 = vpack.c.bf16 %v731_v11, %v729_v10  ;;  %v774_v10 = vld [vmem:[#allocation5 + $0x968] sm:$0xff]  ;;  %v776_v11 = vld [vmem:[#allocation5 + $0x978] sm:$0xff] }
 0x1b2   : > { %4775 = vmatpush1.bf16.msra.mxu0 %v4774_v20  ;;  %v693_v20 = vld [vmem:[#allocation5 + $0x6e0] sm:$0xff] }
 0x1b3   : > { %4777 = vmatprep.subr.bf16.mxu0 %v4776_v21  ;;  %v695_v21 = vld [vmem:[#allocation5 + $0x6f0] sm:$0xff] }
 0x1b4   : > { %v4818_v24 = vpack.c.bf16 %v695_v21, %v693_v20  ;;  %v738_v20 = vld [vmem:[#allocation5 + $0x848] sm:$0xff]  ;;  %v740_v21 = vld [vmem:[#allocation5 + $0x858] sm:$0xff] }
 0x1b5   : > { %v4860_v23 = vpack.c.bf16 %v740_v21, %v738_v20  ;;  %v777_v20 = vld [vmem:[#allocation5 + $0x980] sm:$0xff]  ;;  %v779_v21 = vld [vmem:[#allocation5 + $0x990] sm:$0xff] }
 0x1b6   : > { %4779 = vmatpush1.bf16.msra.mxu0 %v4778_v26  ;;  %v697_v26 = vld [vmem:[#allocation5 + $0x700] sm:$0xff] }
 0x1b7   : > { %4781 = vmatprep.subr.bf16.mxu0 %v4780_v27  ;;  %v699_v27 = vld [vmem:[#allocation5 + $0x710] sm:$0xff] }
 0x1b8   : > { %v4822_v30 = vpack.c.bf16 %v699_v27, %v697_v26  ;;  %v742_v26 = vld [vmem:[#allocation5 + $0x868] sm:$0xff]  ;;  %v744_v27 = vld [vmem:[#allocation5 + $0x878] sm:$0xff] }
 0x1b9   : > { %v4864_v29 = vpack.c.bf16 %v744_v27, %v742_v26  ;;  %v781_v26 = vld [vmem:[#allocation5 + $0x9a0] sm:$0xff]  ;;  %v783_v27 = vld [vmem:[#allocation5 + $0x9b0] sm:$0xff] }
 0x1ba   : > { %4783 = vmatpush1.bf16.msra.mxu0 %v4782_v32  ;;  %v701_v32 = vld [vmem:[#allocation5 + $0x720] sm:$0xff] }
 0x1bb   : > { %4785 = vmatprep.subr.bf16.mxu0 %v4784_v33  ;;  %v703_v33 = vld [vmem:[#allocation5 + $0x730] sm:$0xff] }
 0x1bc   : > { %v4826_v36 = vpack.c.bf16 %v703_v33, %v701_v32  ;;  %v746_v32 = vld [vmem:[#allocation5 + $0x888] sm:$0xff]  ;;  %v748_v33 = vld [vmem:[#allocation5 + $0x898] sm:$0xff] }
 0x1bd   : > { %v4868_v35 = vpack.c.bf16 %v748_v33, %v746_v32  ;;  %v785_v32 = vld [vmem:[#allocation5 + $0x9c0] sm:$0xff]  ;;  %v787_v33 = vld [vmem:[#allocation5 + $0x9d0] sm:$0xff] }
 0x1be   : > { %4787 = vmatpush1.bf16.msra.mxu0 %v4786_v38  ;;  %v705_v38 = vld [vmem:[#allocation5 + $0x740] sm:$0xff] }
 0x1bf   : > { %4789 = vmatprep.subr.bf16.mxu0 %v4788_v39  ;;  %v707_v39 = vld [vmem:[#allocation5 + $0x750] sm:$0xff] }
 0x1c0   : > { %v4830_v42 = vpack.c.bf16 %v707_v39, %v705_v38  ;;  %v750_v38 = vld [vmem:[#allocation5 + $0x8a8] sm:$0xff]  ;;  %v752_v39 = vld [vmem:[#allocation5 + $0x8b8] sm:$0xff] }
 0x1c1   : > { %1204 = vmatmul.mubr.f32.vlgmr.msra.gmra.mrb[0].mxu0 %v461_v44  ;;  %v709_v44 = vld [vmem:[#allocation5 + $0x760] sm:$0xff]  ;;  %v4872_v41 = vpack.c.bf16 %v752_v39, %v750_v38  ;;  %v791_v39 = vld [vmem:[#allocation5 + $0x9f0] sm:$0xff] }
 0x1c2   : > { %4791 = vmatpush1.bf16.msra.mxu0 %v4790_v45  ;;  %1274 = vmatprep.mubr.f32.mxu0 %v464_v49  ;;  %v711_v45 = vld [vmem:[#allocation5 + $0x770] sm:$0xff]  ;;  %v789_v38 = vld [vmem:[#allocation5 + $0x9e0] sm:$0xff] }
 0x1c3   : > { %4793 = vmatprep.subr.bf16.mxu0 %v4792_v46  ;;  %v714_v46 = vld [vmem:[#allocation5 + $0x788] sm:$0xff]  ;;  %v4834_v48 = vpack.c.bf16 %v711_v45, %v709_v44  ;;  %v756_v45 = vld [vmem:[#allocation5 + $0x8d8] sm:$0xff] }
 0x1c4   : > { %v4836_v49 = vpack.c.bf16 %v716_v47, %v714_v46  ;;  %v754_v44 = vld [vmem:[#allocation5 + $0x8c8] sm:$0xff] }
 0x1c5   : > { %v4876_v47 = vpack.c.bf16 %v756_v45, %v754_v44  ;;  %v793_v44 = vld [vmem:[#allocation5 + $0xa00] sm:$0xff]  ;;  %v795_v45 = vld [vmem:[#allocation5 + $0xa10] sm:$0xff] }
 0x1c6   : > { %4795 = vmatpush1.bf16.msra.mxu0 %v4794_v52  ;;  %v718_v52 = vld [vmem:[#allocation5 + $0x7a8] sm:$0xff] }
 0x1c7   : > { %4797 = vmatprep.subr.bf16.mxu0 %v4796_v53  ;;  %v720_v53 = vld [vmem:[#allocation5 + $0x7b8] sm:$0xff] }
 0x1c8   : > { %v4840_v55 = vpack.c.bf16 %v720_v53, %v718_v52  ;;  %v4880_v53 = vpack.c.bf16 %v760_v51, %v758_v50  ;;  %v797_v51 = vld [vmem:[#allocation5 + $0xa20] sm:$0xff] }
 0x1ca   : > { %4799 = vmatpush1.bf16.msra.mxu0 %v4798_v58  ;;  %v722_v58 = vld [vmem:[#allocation5 + $0x7c8] sm:$0xff] }
 0x1cb   : > { %4801 = vmatprep.subr.bf16.mxu0 %v4800_v59  ;;  %v724_v59 = vld [vmem:[#allocation5 + $0x7d8] sm:$0xff] }
 0x1cc   : > { %v4844_v61 = vpack.c.bf16 %v724_v59, %v722_v58  ;;  %v4884_v59 = vpack.c.bf16 %v764_v57, %v762_v56 }
 0x1ce   : > { %4803 = vmatpush1.bf16.msra.mxu0 %v4802_v0  ;;  %v726_v0 = vld [vmem:[#allocation5 + $0x7e8] sm:$0xff] }
 0x1cf   : > { %4805 = vmatprep.subr.bf16.mxu0 %v4804_v1  ;;  %v728_v1 = vld [vmem:[#allocation5 + $0x7f8] sm:$0xff] }
 0x1d0   : > { %v4848_v3 = vpack.c.bf16 %v728_v1, %v726_v0  ;;  %v4888_v1 = vpack.c.bf16 %v768_v63, %v766_v62 }
 0x1d2   : > { %4807 = vmatpush1.bf16.msra.mxu0 %v4806_v6  ;;  %v730_v6 = vld [vmem:[#allocation5 + $0x808] sm:$0xff] }
 0x1d3   : > { %4809 = vmatprep.subr.bf16.mxu0 %v4808_v7  ;;  %v732_v7 = vld [vmem:[#allocation5 + $0x818] sm:$0xff] }
 0x1d4   : > { %v4852_v9 = vpack.c.bf16 %v732_v7, %v730_v6  ;;  %v4892_v7 = vpack.c.bf16 %v772_v5, %v770_v4 }
 0x1d6   : > { %4811 = vmatpush1.bf16.msra.mxu0 %v4810_v12  ;;  %v734_v12 = vld [vmem:[#allocation5 + $0x828] sm:$0xff] }
 0x1d7   : > { %4813 = vmatprep.subr.bf16.mxu0 %v4812_v13  ;;  %v736_v13 = vld [vmem:[#allocation5 + $0x838] sm:$0xff] }
 0x1d8   : > { %v4856_v16 = vpack.c.bf16 %v736_v13, %v734_v12  ;;  %v4896_v13 = vpack.c.bf16 %v776_v11, %v774_v10 }
 0x1da   : > { %4815 = vmatpush1.bf16.msra.mxu0 %v4814_v18  ;;  %v735_v18 = vld [vmem:[#allocation5 + $0x830] sm:$0xff] }
 0x1db   : > { %4817 = vmatprep.subr.bf16.mxu0 %v4816_v19  ;;  %v466_v19 = vld [vmem:[%s7116_s25 + $0x48] sm:$0xff]  ;;  %v4858_v22 = vpack.c.bf16 %v735_v18, %v733_v17  ;;  %v780_v17 = vld [vmem:[#allocation5 + $0x998] sm:$0xff] }
 0x1de   : > { %4819 = vmatpush1.bf16.msra.mxu0 %v4818_v24  ;;  %v737_v24 = vld [vmem:[#allocation5 + $0x840] sm:$0xff] }
 0x1df   : > { %4821 = vmatprep.subr.bf16.mxu0 %v4820_v25  ;;  %v739_v25 = vld [vmem:[#allocation5 + $0x850] sm:$0xff] }
 0x1e0   : > { %v4862_v28 = vpack.c.bf16 %v739_v25, %v737_v24  ;;  %v4902_v24 = vpack.c.bf16 %v779_v21, %v777_v20  ;;  %v822_v20 = vld [vmem:[#allocation5 + $0xae8] sm:$0xff]  ;;  %v824_v21 = vld [vmem:[#allocation5 + $0xaf8] sm:$0xff] }
 0x1e2   : > { %4823 = vmatpush1.bf16.msra.mxu0 %v4822_v30  ;;  %v741_v30 = vld [vmem:[#allocation5 + $0x860] sm:$0xff] }
 0x1e3   : > { %4825 = vmatprep.subr.bf16.mxu0 %v4824_v31  ;;  %v743_v31 = vld [vmem:[#allocation5 + $0x870] sm:$0xff] }
 0x1e4   : > { %v4866_v34 = vpack.c.bf16 %v743_v31, %v741_v30  ;;  %v4906_v30 = vpack.c.bf16 %v783_v27, %v781_v26  ;;  %v826_v26 = vld [vmem:[#allocation5 + $0xb08] sm:$0xff]  ;;  %v828_v27 = vld [vmem:[#allocation5 + $0xb18] sm:$0xff] }
 0x1e6   : > { %4827 = vmatpush1.bf16.msra.mxu0 %v4826_v36  ;;  %v745_v36 = vld [vmem:[#allocation5 + $0x880] sm:$0xff] }
 0x1e7   : > { %4829 = vmatprep.subr.bf16.mxu0 %v4828_v37  ;;  %v747_v37 = vld [vmem:[#allocation5 + $0x890] sm:$0xff] }
 0x1e8   : > { %v4870_v40 = vpack.c.bf16 %v747_v37, %v745_v36  ;;  %v4910_v36 = vpack.c.bf16 %v787_v33, %v785_v32  ;;  %v830_v32 = vld [vmem:[#allocation5 + $0xb28] sm:$0xff]  ;;  %v832_v33 = vld [vmem:[#allocation5 + $0xb38] sm:$0xff] }
 0x1ea   : > { %4831 = vmatpush1.bf16.msra.mxu0 %v4830_v42  ;;  %v749_v42 = vld [vmem:[#allocation5 + $0x8a0] sm:$0xff] }
 0x1eb   : > { %4833 = vmatprep.subr.bf16.mxu0 %v4832_v43  ;;  %v751_v43 = vld [vmem:[#allocation5 + $0x8b0] sm:$0xff] }
 0x1ec   : > { %v4874_v46 = vpack.c.bf16 %v751_v43, %v749_v42  ;;  %v4914_v42 = vpack.c.bf16 %v791_v39, %v789_v38  ;;  %v834_v38 = vld [vmem:[#allocation5 + $0xb48] sm:$0xff]  ;;  %v836_v39 = vld [vmem:[#allocation5 + $0xb58] sm:$0xff] }
 0x1ee   : > { %4835 = vmatpush1.bf16.msra.mxu0 %v4834_v48  ;;  %v753_v48 = vld [vmem:[#allocation5 + $0x8c0] sm:$0xff] }
 0x1ef   : > { %4837 = vmatprep.subr.bf16.mxu0 %v4836_v49  ;;  %v755_v49 = vld [vmem:[#allocation5 + $0x8d0] sm:$0xff] }
 0x1f0   : > { %v4878_v52 = vpack.c.bf16 %v755_v49, %v753_v48  ;;  %v465_v48 = vld [vmem:[%s7116_s25 + $0x40] sm:$0xff]  ;;  %v4918_v49 = vpack.c.bf16 %v795_v45, %v793_v44  ;;  %v838_v44 = vld [vmem:[#allocation5 + $0xb68] sm:$0xff]  ;;  %v840_v45 = vld [vmem:[#allocation5 + $0xb78] sm:$0xff] }
 0x1f2   : > { %4839 = vmatpush1.bf16.msra.mxu0 %v4838_v54  ;;  %v757_v54 = vld [vmem:[#allocation5 + $0x8e0] sm:$0xff] }
 0x1f3   : > { %4841 = vmatprep.subr.bf16.mxu0 %v4840_v55  ;;  %v759_v55 = vld [vmem:[#allocation5 + $0x8f0] sm:$0xff] }
 0x1f4   : > { %v4882_v58 = vpack.c.bf16 %v759_v55, %v757_v54  ;;  %v802_v54 = vld [vmem:[#allocation5 + $0xa48] sm:$0xff]  ;;  %v804_v55 = vld [vmem:[#allocation5 + $0xa58] sm:$0xff] }
 0x1f5   : > { %v4924_v57 = vpack.c.bf16 %v804_v55, %v802_v54  ;;  %v841_v54 = vld [vmem:[#allocation5 + $0xb80] sm:$0xff]  ;;  %v843_v55 = vld [vmem:[#allocation5 + $0xb90] sm:$0xff] }
 0x1f6   : > { %4843 = vmatpush1.bf16.msra.mxu0 %v4842_v60  ;;  %v761_v60 = vld [vmem:[#allocation5 + $0x900] sm:$0xff] }
 0x1f7   : > { %4845 = vmatprep.subr.bf16.mxu0 %v4844_v61  ;;  %v763_v61 = vld [vmem:[#allocation5 + $0x910] sm:$0xff] }
 0x1f8   : > { %v4886_v0 = vpack.c.bf16 %v763_v61, %v761_v60  ;;  %v806_v60 = vld [vmem:[#allocation5 + $0xa68] sm:$0xff]  ;;  %v808_v61 = vld [vmem:[#allocation5 + $0xa78] sm:$0xff] }
 0x1f9   : > { %v4928_v63 = vpack.c.bf16 %v808_v61, %v806_v60  ;;  %v845_v60 = vld [vmem:[#allocation5 + $0xba0] sm:$0xff]  ;;  %v847_v61 = vld [vmem:[#allocation5 + $0xbb0] sm:$0xff] }
 0x1fa   : > { %4847 = vmatpush1.bf16.msra.mxu0 %v4846_v2  ;;  %v765_v2 = vld [vmem:[#allocation5 + $0x920] sm:$0xff] }
 0x1fb   : > { %4849 = vmatprep.subr.bf16.mxu0 %v4848_v3  ;;  %v767_v3 = vld [vmem:[#allocation5 + $0x930] sm:$0xff] }
 0x1fc   : > { %v4890_v6 = vpack.c.bf16 %v767_v3, %v765_v2  ;;  %v810_v2 = vld [vmem:[#allocation5 + $0xa88] sm:$0xff]  ;;  %v812_v3 = vld [vmem:[#allocation5 + $0xa98] sm:$0xff] }
 0x1fd   : > { %v4932_v5 = vpack.c.bf16 %v812_v3, %v810_v2  ;;  %v849_v2 = vld [vmem:[#allocation5 + $0xbc0] sm:$0xff]  ;;  %v851_v3 = vld [vmem:[#allocation5 + $0xbd0] sm:$0xff] }
 0x1fe   : > { %4851 = vmatpush1.bf16.msra.mxu0 %v4850_v8  ;;  %v769_v8 = vld [vmem:[#allocation5 + $0x940] sm:$0xff] }
 0x1ff   : > { %4853 = vmatprep.subr.bf16.mxu0 %v4852_v9  ;;  %v771_v9 = vld [vmem:[#allocation5 + $0x950] sm:$0xff] }
 0x200   : > { %v4894_v12 = vpack.c.bf16 %v771_v9, %v769_v8  ;;  %v814_v8 = vld [vmem:[#allocation5 + $0xaa8] sm:$0xff]  ;;  %v816_v9 = vld [vmem:[#allocation5 + $0xab8] sm:$0xff] }
 0x201   : > { %1275 = vmatmul.mubr.f32.vlgmr.msra.gmra.mrb[0].mxu0 %v463_v14  ;;  %v773_v14 = vld [vmem:[#allocation5 + $0x960] sm:$0xff]  ;;  %v4936_v11 = vpack.c.bf16 %v816_v9, %v814_v8  ;;  %v855_v9 = vld [vmem:[#allocation5 + $0xbf0] sm:$0xff] }
 0x202   : > { %4855 = vmatpush1.bf16.msra.mxu0 %v4854_v15  ;;  %1345 = vmatprep.mubr.f32.mxu0 %v466_v19  ;;  %v775_v15 = vld [vmem:[#allocation5 + $0x970] sm:$0xff]  ;;  %v853_v8 = vld [vmem:[#allocation5 + $0xbe0] sm:$0xff] }
 0x203   : > { %4857 = vmatprep.subr.bf16.mxu0 %v4856_v16  ;;  %v778_v16 = vld [vmem:[#allocation5 + $0x988] sm:$0xff]  ;;  %v4898_v18 = vpack.c.bf16 %v775_v15, %v773_v14  ;;  %v820_v15 = vld [vmem:[#allocation5 + $0xad8] sm:$0xff] }
 0x204   : > { %v4900_v19 = vpack.c.bf16 %v780_v17, %v778_v16  ;;  %v818_v14 = vld [vmem:[#allocation5 + $0xac8] sm:$0xff] }
 0x205   : > { %v4940_v17 = vpack.c.bf16 %v820_v15, %v818_v14  ;;  %v857_v14 = vld [vmem:[#allocation5 + $0xc00] sm:$0xff]  ;;  %v859_v15 = vld [vmem:[#allocation5 + $0xc10] sm:$0xff] }
 0x206   : > { %4859 = vmatpush1.bf16.msra.mxu0 %v4858_v22  ;;  %v782_v22 = vld [vmem:[#allocation5 + $0x9a8] sm:$0xff] }
 0x207   : > { %4861 = vmatprep.subr.bf16.mxu0 %v4860_v23  ;;  %v784_v23 = vld [vmem:[#allocation5 + $0x9b8] sm:$0xff] }
 0x208   : > { %v4904_v25 = vpack.c.bf16 %v784_v23, %v782_v22  ;;  %v4944_v23 = vpack.c.bf16 %v824_v21, %v822_v20  ;;  %v861_v21 = vld [vmem:[#allocation5 + $0xc20] sm:$0xff] }
 0x20a   : > { %4863 = vmatpush1.bf16.msra.mxu0 %v4862_v28  ;;  %v786_v28 = vld [vmem:[#allocation5 + $0x9c8] sm:$0xff] }
 0x20b   : > { %4865 = vmatprep.subr.bf16.mxu0 %v4864_v29  ;;  %v788_v29 = vld [vmem:[#allocation5 + $0x9d8] sm:$0xff] }
 0x20c   : > { %v4908_v31 = vpack.c.bf16 %v788_v29, %v786_v28  ;;  %v4948_v29 = vpack.c.bf16 %v828_v27, %v826_v26 }
 0x20e   : > { %4867 = vmatpush1.bf16.msra.mxu0 %v4866_v34  ;;  %v790_v34 = vld [vmem:[#allocation5 + $0x9e8] sm:$0xff] }
 0x20f   : > { %4869 = vmatprep.subr.bf16.mxu0 %v4868_v35  ;;  %v792_v35 = vld [vmem:[#allocation5 + $0x9f8] sm:$0xff] }
 0x210   : > { %v4912_v37 = vpack.c.bf16 %v792_v35, %v790_v34  ;;  %v4952_v35 = vpack.c.bf16 %v832_v33, %v830_v32 }
 0x212   : > { %4871 = vmatpush1.bf16.msra.mxu0 %v4870_v40  ;;  %v794_v40 = vld [vmem:[#allocation5 + $0xa08] sm:$0xff] }
 0x213   : > { %4873 = vmatprep.subr.bf16.mxu0 %v4872_v41  ;;  %v796_v41 = vld [vmem:[#allocation5 + $0xa18] sm:$0xff] }
 0x214   : > { %v4916_v43 = vpack.c.bf16 %v796_v41, %v794_v40  ;;  %v4956_v41 = vpack.c.bf16 %v836_v39, %v834_v38 }
 0x216   : > { %4875 = vmatpush1.bf16.msra.mxu0 %v4874_v46  ;;  %v798_v46 = vld [vmem:[#allocation5 + $0xa28] sm:$0xff] }
 0x217   : > { %4877 = vmatprep.subr.bf16.mxu0 %v4876_v47  ;;  %v800_v47 = vld [vmem:[#allocation5 + $0xa38] sm:$0xff] }
 0x218   : > { %v4920_v50 = vpack.c.bf16 %v800_v47, %v798_v46  ;;  %v4960_v47 = vpack.c.bf16 %v840_v45, %v838_v44 }
 0x21a   : > { %4879 = vmatpush1.bf16.msra.mxu0 %v4878_v52  ;;  %v799_v52 = vld [vmem:[#allocation5 + $0xa30] sm:$0xff] }
 0x21b   : > { %4881 = vmatprep.subr.bf16.mxu0 %v4880_v53  ;;  %v468_v53 = vld [vmem:[%s7116_s25 + $0x58] sm:$0xff]  ;;  %v4922_v56 = vpack.c.bf16 %v799_v52, %v797_v51 }
 0x21c   : > { %v844_v51 = vld [vmem:[#allocation5 + $0xb98] sm:$0xff] }
 0x21e   : > { %4883 = vmatpush1.bf16.msra.mxu0 %v4882_v58  ;;  %v801_v58 = vld [vmem:[#allocation5 + $0xa40] sm:$0xff] }
 0x21f   : > { %4885 = vmatprep.subr.bf16.mxu0 %v4884_v59  ;;  %v803_v59 = vld [vmem:[#allocation5 + $0xa50] sm:$0xff] }
 0x220   : > { %v4926_v62 = vpack.c.bf16 %v803_v59, %v801_v58  ;;  %v4966_v58 = vpack.c.bf16 %v843_v55, %v841_v54  ;;  %v886_v54 = vld [vmem:[#allocation5 + $0xce8] sm:$0xff]  ;;  %v888_v55 = vld [vmem:[#allocation5 + $0xcf8] sm:$0xff] }
 0x222   : > { %4887 = vmatpush1.bf16.msra.mxu0 %v4886_v0  ;;  %v805_v0 = vld [vmem:[#allocation5 + $0xa60] sm:$0xff] }
 0x223   : > { %4889 = vmatprep.subr.bf16.mxu0 %v4888_v1  ;;  %v807_v1 = vld [vmem:[#allocation5 + $0xa70] sm:$0xff] }
 0x224   : > { %v4930_v4 = vpack.c.bf16 %v807_v1, %v805_v0  ;;  %v4970_v0 = vpack.c.bf16 %v847_v61, %v845_v60  ;;  %v890_v60 = vld [vmem:[#allocation5 + $0xd08] sm:$0xff]  ;;  %v892_v61 = vld [vmem:[#allocation5 + $0xd18] sm:$0xff] }
 0x226   : > { %4891 = vmatpush1.bf16.msra.mxu0 %v4890_v6  ;;  %v809_v6 = vld [vmem:[#allocation5 + $0xa80] sm:$0xff] }
 0x227   : > { %4893 = vmatprep.subr.bf16.mxu0 %v4892_v7  ;;  %v811_v7 = vld [vmem:[#allocation5 + $0xa90] sm:$0xff] }
 0x228   : > { %v4934_v10 = vpack.c.bf16 %v811_v7, %v809_v6  ;;  %v4974_v6 = vpack.c.bf16 %v851_v3, %v849_v2  ;;  %v894_v2 = vld [vmem:[#allocation5 + $0xd28] sm:$0xff]  ;;  %v896_v3 = vld [vmem:[#allocation5 + $0xd38] sm:$0xff] }
 0x22a   : > { %4895 = vmatpush1.bf16.msra.mxu0 %v4894_v12  ;;  %v813_v12 = vld [vmem:[#allocation5 + $0xaa0] sm:$0xff] }
 0x22b   : > { %4897 = vmatprep.subr.bf16.mxu0 %v4896_v13  ;;  %v815_v13 = vld [vmem:[#allocation5 + $0xab0] sm:$0xff] }
 0x22c   : > { %v4938_v16 = vpack.c.bf16 %v815_v13, %v813_v12  ;;  %v4978_v12 = vpack.c.bf16 %v855_v9, %v853_v8  ;;  %v898_v8 = vld [vmem:[#allocation5 + $0xd48] sm:$0xff]  ;;  %v900_v9 = vld [vmem:[#allocation5 + $0xd58] sm:$0xff] }
 0x22e   : > { %4899 = vmatpush1.bf16.msra.mxu0 %v4898_v18  ;;  %v817_v18 = vld [vmem:[#allocation5 + $0xac0] sm:$0xff] }
 0x22f   : > { %4901 = vmatprep.subr.bf16.mxu0 %v4900_v19  ;;  %v819_v19 = vld [vmem:[#allocation5 + $0xad0] sm:$0xff] }
 0x230   : > { %v4942_v22 = vpack.c.bf16 %v819_v19, %v817_v18  ;;  %v467_v18 = vld [vmem:[%s7116_s25 + $0x50] sm:$0xff]  ;;  %v4982_v19 = vpack.c.bf16 %v859_v15, %v857_v14  ;;  %v902_v14 = vld [vmem:[#allocation5 + $0xd68] sm:$0xff]  ;;  %v904_v15 = vld [vmem:[#allocation5 + $0xd78] sm:$0xff] }
 0x232   : > { %4903 = vmatpush1.bf16.msra.mxu0 %v4902_v24  ;;  %v821_v24 = vld [vmem:[#allocation5 + $0xae0] sm:$0xff] }
 0x233   : > { %4905 = vmatprep.subr.bf16.mxu0 %v4904_v25  ;;  %v823_v25 = vld [vmem:[#allocation5 + $0xaf0] sm:$0xff] }
 0x234   : > { %v4946_v28 = vpack.c.bf16 %v823_v25, %v821_v24  ;;  %v866_v24 = vld [vmem:[#allocation5 + $0xc48] sm:$0xff]  ;;  %v868_v25 = vld [vmem:[#allocation5 + $0xc58] sm:$0xff] }
 0x235   : > { %v4988_v27 = vpack.c.bf16 %v868_v25, %v866_v24  ;;  %v905_v24 = vld [vmem:[#allocation5 + $0xd80] sm:$0xff]  ;;  %v907_v25 = vld [vmem:[#allocation5 + $0xd90] sm:$0xff] }
 0x236   : > { %4907 = vmatpush1.bf16.msra.mxu0 %v4906_v30  ;;  %v825_v30 = vld [vmem:[#allocation5 + $0xb00] sm:$0xff] }
 0x237   : > { %4909 = vmatprep.subr.bf16.mxu0 %v4908_v31  ;;  %v827_v31 = vld [vmem:[#allocation5 + $0xb10] sm:$0xff] }
 0x238   : > { %v4950_v34 = vpack.c.bf16 %v827_v31, %v825_v30  ;;  %v870_v30 = vld [vmem:[#allocation5 + $0xc68] sm:$0xff]  ;;  %v872_v31 = vld [vmem:[#allocation5 + $0xc78] sm:$0xff] }
 0x239   : > { %v4992_v33 = vpack.c.bf16 %v872_v31, %v870_v30  ;;  %v909_v30 = vld [vmem:[#allocation5 + $0xda0] sm:$0xff]  ;;  %v911_v31 = vld [vmem:[#allocation5 + $0xdb0] sm:$0xff] }
 0x23a   : > { %4911 = vmatpush1.bf16.msra.mxu0 %v4910_v36  ;;  %v829_v36 = vld [vmem:[#allocation5 + $0xb20] sm:$0xff] }
 0x23b   : > { %4913 = vmatprep.subr.bf16.mxu0 %v4912_v37  ;;  %v831_v37 = vld [vmem:[#allocation5 + $0xb30] sm:$0xff] }
 0x23c   : > { %v4954_v40 = vpack.c.bf16 %v831_v37, %v829_v36  ;;  %v874_v36 = vld [vmem:[#allocation5 + $0xc88] sm:$0xff]  ;;  %v876_v37 = vld [vmem:[#allocation5 + $0xc98] sm:$0xff] }
 0x23d   : > { %v4996_v39 = vpack.c.bf16 %v876_v37, %v874_v36  ;;  %v913_v36 = vld [vmem:[#allocation5 + $0xdc0] sm:$0xff]  ;;  %v915_v37 = vld [vmem:[#allocation5 + $0xdd0] sm:$0xff] }
 0x23e   : > { %4915 = vmatpush1.bf16.msra.mxu0 %v4914_v42  ;;  %v833_v42 = vld [vmem:[#allocation5 + $0xb40] sm:$0xff] }
 0x23f   : > { %4917 = vmatprep.subr.bf16.mxu0 %v4916_v43  ;;  %v835_v43 = vld [vmem:[#allocation5 + $0xb50] sm:$0xff] }
 0x240   : > { %v4958_v46 = vpack.c.bf16 %v835_v43, %v833_v42  ;;  %v878_v42 = vld [vmem:[#allocation5 + $0xca8] sm:$0xff]  ;;  %v880_v43 = vld [vmem:[#allocation5 + $0xcb8] sm:$0xff] }
 0x241   : > { %1346 = vmatmul.mubr.f32.vlgmr.msra.gmra.mrb[0].mxu0 %v465_v48  ;;  %v837_v48 = vld [vmem:[#allocation5 + $0xb60] sm:$0xff]  ;;  %v5000_v45 = vpack.c.bf16 %v880_v43, %v878_v42  ;;  %v919_v43 = vld [vmem:[#allocation5 + $0xdf0] sm:$0xff] }
 0x242   : > { %4919 = vmatpush1.bf16.msra.mxu0 %v4918_v49  ;;  %1416 = vmatprep.mubr.f32.mxu0 %v468_v53  ;;  %v839_v49 = vld [vmem:[#allocation5 + $0xb70] sm:$0xff]  ;;  %v917_v42 = vld [vmem:[#allocation5 + $0xde0] sm:$0xff] }
 0x243   : > { %4921 = vmatprep.subr.bf16.mxu0 %v4920_v50  ;;  %v842_v50 = vld [vmem:[#allocation5 + $0xb88] sm:$0xff]  ;;  %v4962_v52 = vpack.c.bf16 %v839_v49, %v837_v48  ;;  %v884_v49 = vld [vmem:[#allocation5 + $0xcd8] sm:$0xff] }
 0x244   : > { %v4964_v53 = vpack.c.bf16 %v844_v51, %v842_v50  ;;  %v882_v48 = vld [vmem:[#allocation5 + $0xcc8] sm:$0xff] }
 0x245   : > { %v5004_v51 = vpack.c.bf16 %v884_v49, %v882_v48  ;;  %v921_v48 = vld [vmem:[#allocation5 + $0xe00] sm:$0xff]  ;;  %v923_v49 = vld [vmem:[#allocation5 + $0xe10] sm:$0xff] }
 0x246   : > { %4923 = vmatpush1.bf16.msra.mxu0 %v4922_v56  ;;  %v846_v56 = vld [vmem:[#allocation5 + $0xba8] sm:$0xff] }
 0x247   : > { %4925 = vmatprep.subr.bf16.mxu0 %v4924_v57  ;;  %v848_v57 = vld [vmem:[#allocation5 + $0xbb8] sm:$0xff] }
 0x248   : > { %v4968_v59 = vpack.c.bf16 %v848_v57, %v846_v56  ;;  %v5008_v57 = vpack.c.bf16 %v888_v55, %v886_v54  ;;  %v925_v55 = vld [vmem:[#allocation5 + $0xe20] sm:$0xff] }
 0x24a   : > { %4927 = vmatpush1.bf16.msra.mxu0 %v4926_v62  ;;  %v850_v62 = vld [vmem:[#allocation5 + $0xbc8] sm:$0xff] }
 0x24b   : > { %4929 = vmatprep.subr.bf16.mxu0 %v4928_v63  ;;  %v852_v63 = vld [vmem:[#allocation5 + $0xbd8] sm:$0xff] }
 0x24c   : > { %v4972_v1 = vpack.c.bf16 %v852_v63, %v850_v62  ;;  %v5012_v63 = vpack.c.bf16 %v892_v61, %v890_v60 }
 0x24e   : > { %4931 = vmatpush1.bf16.msra.mxu0 %v4930_v4  ;;  %v854_v4 = vld [vmem:[#allocation5 + $0xbe8] sm:$0xff] }
 0x24f   : > { %4933 = vmatprep.subr.bf16.mxu0 %v4932_v5  ;;  %v856_v5 = vld [vmem:[#allocation5 + $0xbf8] sm:$0xff] }
 0x250   : > { %v4976_v7 = vpack.c.bf16 %v856_v5, %v854_v4  ;;  %v5016_v5 = vpack.c.bf16 %v896_v3, %v894_v2 }
 0x252   : > { %4935 = vmatpush1.bf16.msra.mxu0 %v4934_v10  ;;  %v858_v10 = vld [vmem:[#allocation5 + $0xc08] sm:$0xff] }
 0x253   : > { %4937 = vmatprep.subr.bf16.mxu0 %v4936_v11  ;;  %v860_v11 = vld [vmem:[#allocation5 + $0xc18] sm:$0xff] }
 0x254   : > { %v4980_v13 = vpack.c.bf16 %v860_v11, %v858_v10  ;;  %v5020_v11 = vpack.c.bf16 %v900_v9, %v898_v8 }
 0x256   : > { %4939 = vmatpush1.bf16.msra.mxu0 %v4938_v16  ;;  %v862_v16 = vld [vmem:[#allocation5 + $0xc28] sm:$0xff] }
 0x257   : > { %4941 = vmatprep.subr.bf16.mxu0 %v4940_v17  ;;  %v864_v17 = vld [vmem:[#allocation5 + $0xc38] sm:$0xff] }
 0x258   : > { %v4984_v20 = vpack.c.bf16 %v864_v17, %v862_v16  ;;  %v5024_v17 = vpack.c.bf16 %v904_v15, %v902_v14 }
 0x25a   : > { %4943 = vmatpush1.bf16.msra.mxu0 %v4942_v22  ;;  %v863_v22 = vld [vmem:[#allocation5 + $0xc30] sm:$0xff] }
 0x25b   : > { %4945 = vmatprep.subr.bf16.mxu0 %v4944_v23  ;;  %v470_v23 = vld [vmem:[%s7116_s25 + $0x68] sm:$0xff]  ;;  %v4986_v26 = vpack.c.bf16 %v863_v22, %v861_v21  ;;  %v908_v21 = vld [vmem:[#allocation5 + $0xd98] sm:$0xff] }
 0x25e   : > { %4947 = vmatpush1.bf16.msra.mxu0 %v4946_v28  ;;  %v865_v28 = vld [vmem:[#allocation5 + $0xc40] sm:$0xff] }
 0x25f   : > { %4949 = vmatprep.subr.bf16.mxu0 %v4948_v29  ;;  %v867_v29 = vld [vmem:[#allocation5 + $0xc50] sm:$0xff] }
 0x260   : > { %v4990_v32 = vpack.c.bf16 %v867_v29, %v865_v28  ;;  %v5030_v28 = vpack.c.bf16 %v907_v25, %v905_v24  ;;  %v950_v24 = vld [vmem:[#allocation5 + $0xee8] sm:$0xff]  ;;  %v952_v25 = vld [vmem:[#allocation5 + $0xef8] sm:$0xff] }
 0x262   : > { %4951 = vmatpush1.bf16.msra.mxu0 %v4950_v34  ;;  %v869_v34 = vld [vmem:[#allocation5 + $0xc60] sm:$0xff] }
 0x263   : > { %4953 = vmatprep.subr.bf16.mxu0 %v4952_v35  ;;  %v871_v35 = vld [vmem:[#allocation5 + $0xc70] sm:$0xff] }
 0x264   : > { %v4994_v38 = vpack.c.bf16 %v871_v35, %v869_v34  ;;  %v5034_v34 = vpack.c.bf16 %v911_v31, %v909_v30  ;;  %v954_v30 = vld [vmem:[#allocation5 + $0xf08] sm:$0xff]  ;;  %v956_v31 = vld [vmem:[#allocation5 + $0xf18] sm:$0xff] }
 0x266   : > { %4955 = vmatpush1.bf16.msra.mxu0 %v4954_v40  ;;  %v873_v40 = vld [vmem:[#allocation5 + $0xc80] sm:$0xff] }
 0x267   : > { %4957 = vmatprep.subr.bf16.mxu0 %v4956_v41  ;;  %v875_v41 = vld [vmem:[#allocation5 + $0xc90] sm:$0xff] }
 0x268   : > { %v4998_v44 = vpack.c.bf16 %v875_v41, %v873_v40  ;;  %v5038_v40 = vpack.c.bf16 %v915_v37, %v913_v36  ;;  %v958_v36 = vld [vmem:[#allocation5 + $0xf28] sm:$0xff]  ;;  %v960_v37 = vld [vmem:[#allocation5 + $0xf38] sm:$0xff] }
 0x26a   : > { %4959 = vmatpush1.bf16.msra.mxu0 %v4958_v46  ;;  %v877_v46 = vld [vmem:[#allocation5 + $0xca0] sm:$0xff] }
 0x26b   : > { %4961 = vmatprep.subr.bf16.mxu0 %v4960_v47  ;;  %v879_v47 = vld [vmem:[#allocation5 + $0xcb0] sm:$0xff] }
 0x26c   : > { %v5002_v50 = vpack.c.bf16 %v879_v47, %v877_v46  ;;  %v5042_v46 = vpack.c.bf16 %v919_v43, %v917_v42  ;;  %v962_v42 = vld [vmem:[#allocation5 + $0xf48] sm:$0xff]  ;;  %v964_v43 = vld [vmem:[#allocation5 + $0xf58] sm:$0xff] }
 0x26e   : > { %4963 = vmatpush1.bf16.msra.mxu0 %v4962_v52  ;;  %v881_v52 = vld [vmem:[#allocation5 + $0xcc0] sm:$0xff] }
 0x26f   : > { %4965 = vmatprep.subr.bf16.mxu0 %v4964_v53  ;;  %v883_v53 = vld [vmem:[#allocation5 + $0xcd0] sm:$0xff] }
 0x270   : > { %v5006_v56 = vpack.c.bf16 %v883_v53, %v881_v52  ;;  %v469_v52 = vld [vmem:[%s7116_s25 + $0x60] sm:$0xff]  ;;  %v5046_v53 = vpack.c.bf16 %v923_v49, %v921_v48  ;;  %v966_v48 = vld [vmem:[#allocation5 + $0xf68] sm:$0xff]  ;;  %v968_v49 = vld [vmem:[#allocation5 + $0xf78] sm:$0xff] }
 0x272   : > { %4967 = vmatpush1.bf16.msra.mxu0 %v4966_v58  ;;  %v885_v58 = vld [vmem:[#allocation5 + $0xce0] sm:$0xff] }
 0x273   : > { %4969 = vmatprep.subr.bf16.mxu0 %v4968_v59  ;;  %v887_v59 = vld [vmem:[#allocation5 + $0xcf0] sm:$0xff] }
 0x274   : > { %v5010_v62 = vpack.c.bf16 %v887_v59, %v885_v58  ;;  %v930_v58 = vld [vmem:[#allocation5 + $0xe48] sm:$0xff]  ;;  %v932_v59 = vld [vmem:[#allocation5 + $0xe58] sm:$0xff] }
 0x275   : > { %v5052_v61 = vpack.c.bf16 %v932_v59, %v930_v58  ;;  %v969_v58 = vld [vmem:[#allocation5 + $0xf80] sm:$0xff]  ;;  %v971_v59 = vld [vmem:[#allocation5 + $0xf90] sm:$0xff] }
 0x276   : > { %4971 = vmatpush1.bf16.msra.mxu0 %v4970_v0  ;;  %v889_v0 = vld [vmem:[#allocation5 + $0xd00] sm:$0xff] }
 0x277   : > { %4973 = vmatprep.subr.bf16.mxu0 %v4972_v1  ;;  %v891_v1 = vld [vmem:[#allocation5 + $0xd10] sm:$0xff] }
 0x278   : > { %v5014_v4 = vpack.c.bf16 %v891_v1, %v889_v0  ;;  %v934_v0 = vld [vmem:[#allocation5 + $0xe68] sm:$0xff]  ;;  %v936_v1 = vld [vmem:[#allocation5 + $0xe78] sm:$0xff] }
 0x279   : > { %v5056_v3 = vpack.c.bf16 %v936_v1, %v934_v0  ;;  %v973_v0 = vld [vmem:[#allocation5 + $0xfa0] sm:$0xff]  ;;  %v975_v1 = vld [vmem:[#allocation5 + $0xfb0] sm:$0xff] }
 0x27a   : > { %4975 = vmatpush1.bf16.msra.mxu0 %v4974_v6  ;;  %v893_v6 = vld [vmem:[#allocation5 + $0xd20] sm:$0xff] }
 0x27b   : > { %4977 = vmatprep.subr.bf16.mxu0 %v4976_v7  ;;  %v895_v7 = vld [vmem:[#allocation5 + $0xd30] sm:$0xff] }
 0x27c   : > { %v5018_v10 = vpack.c.bf16 %v895_v7, %v893_v6  ;;  %v938_v6 = vld [vmem:[#allocation5 + $0xe88] sm:$0xff]  ;;  %v940_v7 = vld [vmem:[#allocation5 + $0xe98] sm:$0xff] }
 0x27d   : > { %v5060_v9 = vpack.c.bf16 %v940_v7, %v938_v6  ;;  %v977_v6 = vld [vmem:[#allocation5 + $0xfc0] sm:$0xff]  ;;  %v979_v7 = vld [vmem:[#allocation5 + $0xfd0] sm:$0xff] }
 0x27e   : > { %4979 = vmatpush1.bf16.msra.mxu0 %v4978_v12  ;;  %v897_v12 = vld [vmem:[#allocation5 + $0xd40] sm:$0xff] }
 0x27f   : > { %4981 = vmatprep.subr.bf16.mxu0 %v4980_v13  ;;  %v899_v13 = vld [vmem:[#allocation5 + $0xd50] sm:$0xff] }
 0x280   : > { %v5022_v16 = vpack.c.bf16 %v899_v13, %v897_v12  ;;  %v942_v12 = vld [vmem:[#allocation5 + $0xea8] sm:$0xff]  ;;  %v944_v13 = vld [vmem:[#allocation5 + $0xeb8] sm:$0xff] }
 0x281   : > { %1417 = vmatmul.mubr.f32.vlgmr.msra.gmra.mrb[0].mxu0 %v467_v18  ;;  %v901_v18 = vld [vmem:[#allocation5 + $0xd60] sm:$0xff]  ;;  %v5064_v15 = vpack.c.bf16 %v944_v13, %v942_v12  ;;  %v983_v13 = vld [vmem:[#allocation5 + $0xff0] sm:$0xff] }
 0x282   : > { %4983 = vmatpush1.bf16.msra.mxu0 %v4982_v19  ;;  %1487 = vmatprep.mubr.f32.mxu0 %v470_v23  ;;  %v903_v19 = vld [vmem:[#allocation5 + $0xd70] sm:$0xff]  ;;  %v981_v12 = vld [vmem:[#allocation5 + $0xfe0] sm:$0xff] }
 0x283   : > { %4985 = vmatprep.subr.bf16.mxu0 %v4984_v20  ;;  %v906_v20 = vld [vmem:[#allocation5 + $0xd88] sm:$0xff]  ;;  %v5026_v22 = vpack.c.bf16 %v903_v19, %v901_v18  ;;  %v948_v19 = vld [vmem:[#allocation5 + $0xed8] sm:$0xff] }
 0x284   : > { %v5028_v23 = vpack.c.bf16 %v908_v21, %v906_v20  ;;  %v946_v18 = vld [vmem:[#allocation5 + $0xec8] sm:$0xff] }
 0x285   : > { %v5068_v21 = vpack.c.bf16 %v948_v19, %v946_v18  ;;  %v985_v19 = vld [vmem:[#allocation7] sm:$0x3] }
 0x286   : > { %4987 = vmatpush1.bf16.msra.mxu0 %v4986_v26  ;;  %v910_v26 = vld [vmem:[#allocation5 + $0xda8] sm:$0xff] }
 0x287   : > { %4989 = vmatprep.subr.bf16.mxu0 %v4988_v27  ;;  %v912_v27 = vld [vmem:[#allocation5 + $0xdb8] sm:$0xff] }
 0x288   : > { %v5032_v29 = vpack.c.bf16 %v912_v27, %v910_v26  ;;  %v5072_v27 = vpack.c.bf16 %v952_v25, %v950_v24 }
 0x28a   : > { %4991 = vmatpush1.bf16.msra.mxu0 %v4990_v32  ;;  %v914_v32 = vld [vmem:[#allocation5 + $0xdc8] sm:$0xff] }
 0x28b   : > { %4993 = vmatprep.subr.bf16.mxu0 %v4992_v33  ;;  %v916_v33 = vld [vmem:[#allocation5 + $0xdd8] sm:$0xff] }
 0x28c   : > { %v5036_v35 = vpack.c.bf16 %v916_v33, %v914_v32  ;;  %v5076_v33 = vpack.c.bf16 %v956_v31, %v954_v30  ;;  %v1620_v30 = vld [vmem:[#allocation11 + $0x8] sm:$0xff]  ;;  %v1622_v31 = vld [vmem:[#allocation11 + $0x18] sm:$0xff] }
 0x28e   : > { %4995 = vmatpush1.bf16.msra.mxu0 %v4994_v38  ;;  %v918_v38 = vld [vmem:[#allocation5 + $0xde8] sm:$0xff] }
 0x28f   : > { %4997 = vmatprep.subr.bf16.mxu0 %v4996_v39  ;;  %v920_v39 = vld [vmem:[#allocation5 + $0xdf8] sm:$0xff] }
 0x290   : > { %v5040_v41 = vpack.c.bf16 %v920_v39, %v918_v38  ;;  %v5080_v39 = vpack.c.bf16 %v960_v37, %v958_v36  ;;  %v1626_v36 = vld [vmem:[#allocation11 + $0x38] sm:$0xff] }
 0x292   : > { %4999 = vmatpush1.bf16.msra.mxu0 %v4998_v44  ;;  %v922_v44 = vld [vmem:[#allocation5 + $0xe08] sm:$0xff] }
 0x293   : > { %5001 = vmatprep.subr.bf16.mxu0 %v5000_v45  ;;  %v924_v45 = vld [vmem:[#allocation5 + $0xe18] sm:$0xff] }
 0x294   : > { %v5044_v47 = vpack.c.bf16 %v924_v45, %v922_v44  ;;  %v5084_v45 = vpack.c.bf16 %v964_v43, %v962_v42  ;;  %v1630_v42 = vld [vmem:[#allocation11 + $0x58] sm:$0xff] }
 0x296   : > { %5003 = vmatpush1.bf16.msra.mxu0 %v5002_v50  ;;  %v926_v50 = vld [vmem:[#allocation5 + $0xe28] sm:$0xff] }
 0x297   : > { %5005 = vmatprep.subr.bf16.mxu0 %v5004_v51  ;;  %v928_v51 = vld [vmem:[#allocation5 + $0xe38] sm:$0xff] }
 0x298   : > { %v5048_v54 = vpack.c.bf16 %v928_v51, %v926_v50  ;;  %v5088_v51 = vpack.c.bf16 %v968_v49, %v966_v48  ;;  %v1634_v48 = vld [vmem:[#allocation11 + $0x78] sm:$0xff] }
 0x29a   : > { %5007 = vmatpush1.bf16.msra.mxu0 %v5006_v56  ;;  %v927_v56 = vld [vmem:[#allocation5 + $0xe30] sm:$0xff] }
 0x29b   : > { %5009 = vmatprep.subr.bf16.mxu0 %v5008_v57  ;;  %v472_v57 = vld [vmem:[%s7116_s25 + $0x78] sm:$0xff]  ;;  %v5050_v60 = vpack.c.bf16 %v927_v56, %v925_v55 }
 0x29c   : > { %v972_v55 = vld [vmem:[#allocation5 + $0xf98] sm:$0xff] }
 0x29e   : > { %5011 = vmatpush1.bf16.msra.mxu0 %v5010_v62  ;;  %v929_v62 = vld [vmem:[#allocation5 + $0xe40] sm:$0xff] }
 0x29f   : > { %5013 = vmatprep.subr.bf16.mxu0 %v5012_v63  ;;  %v931_v63 = vld [vmem:[#allocation5 + $0xe50] sm:$0xff] }
 0x2a0   : > { %v5054_v2 = vpack.c.bf16 %v931_v63, %v929_v62  ;;  %v5094_v62 = vpack.c.bf16 %v971_v59, %v969_v58  ;;  %v1637_v58 = vld [vmem:[#allocation11 + $0x90] sm:$0xff]  ;;  %v1640_v59 = vld [vmem:[#allocation11 + $0xa8] sm:$0xff] }
 0x2a2   : > { %5015 = vmatpush1.bf16.msra.mxu0 %v5014_v4  ;;  %v933_v4 = vld [vmem:[#allocation5 + $0xe60] sm:$0xff] }
 0x2a3   : > { %5017 = vmatprep.subr.bf16.mxu0 %v5016_v5  ;;  %v935_v5 = vld [vmem:[#allocation5 + $0xe70] sm:$0xff] }
 0x2a4   : > { %v5058_v8 = vpack.c.bf16 %v935_v5, %v933_v4  ;;  %v5098_v4 = vpack.c.bf16 %v975_v1, %v973_v0  ;;  %v1641_v0 = vld [vmem:[#allocation11 + $0xb0] sm:$0xff]  ;;  %v1644_v1 = vld [vmem:[#allocation11 + $0xc8] sm:$0xff] }
 0x2a6   : > { %5019 = vmatpush1.bf16.msra.mxu0 %v5018_v10  ;;  %v937_v10 = vld [vmem:[#allocation5 + $0xe80] sm:$0xff] }
 0x2a7   : > { %5021 = vmatprep.subr.bf16.mxu0 %v5020_v11  ;;  %v939_v11 = vld [vmem:[#allocation5 + $0xe90] sm:$0xff] }
 0x2a8   : > { %v5062_v14 = vpack.c.bf16 %v939_v11, %v937_v10  ;;  %v5102_v10 = vpack.c.bf16 %v979_v7, %v977_v6  ;;  %v1645_v6 = vld [vmem:[#allocation11 + $0xd0] sm:$0xff] }
 0x2aa   : > { %5023 = vmatpush1.bf16.msra.mxu0 %v5022_v16  ;;  %v941_v16 = vld [vmem:[#allocation5 + $0xea0] sm:$0xff] }
 0x2ab   : > { %5025 = vmatprep.subr.bf16.mxu0 %v5024_v17  ;;  %v943_v17 = vld [vmem:[#allocation5 + $0xeb0] sm:$0xff] }
 0x2ac   : > { %v5066_v20 = vpack.c.bf16 %v943_v17, %v941_v16  ;;  %v987_v16 = vlaneseq }
 0x2ae   : > { %5027 = vmatpush1.bf16.msra.mxu0 %v5026_v22  ;;  %v945_v22 = vld [vmem:[#allocation5 + $0xec0] sm:$0xff]  ;;  %v7154_v17 = vshrl.u32 %v987_v16, 7 }
 0x2af   : > { %5029 = vmatprep.subr.bf16.mxu0 %v5028_v23  ;;  %v947_v23 = vld [vmem:[#allocation5 + $0xed0] sm:$0xff]  ;;  %v1650_v16 = vld [vmem:[#allocation11 + $0xf8] sm:$0xff] }
 0x2b0   : > { %v5070_v26 = vpack.c.bf16 %v947_v23, %v945_v22  ;;  %v7157_v18 = vsub.s32 0, %v7154_v17 }
 0x2b2   : > { %5031 = vmatpush1.bf16.msra.mxu0 %v5030_v28  ;;  %v949_v28 = vld [vmem:[#allocation5 + $0xee0] sm:$0xff] }
 0x2b3   : > { %5033 = vmatprep.subr.bf16.mxu0 %v5032_v29  ;;  %v951_v29 = vld [vmem:[#allocation5 + $0xef0] sm:$0xff] }
 0x2b4   : > { %v5074_v32 = vpack.c.bf16 %v951_v29, %v949_v28 }
 0x2b6   : > { %5035 = vmatpush1.bf16.msra.mxu0 %v5034_v34  ;;  %v953_v34 = vld [vmem:[#allocation5 + $0xf00] sm:$0xff] }
 0x2b7   : > { %5037 = vmatprep.subr.bf16.mxu0 %v5036_v35  ;;  %v955_v35 = vld [vmem:[#allocation5 + $0xf10] sm:$0xff] }
 0x2b8   : > { %v5078_v38 = vpack.c.bf16 %v955_v35, %v953_v34  ;;  %v1621_v34 = vld [vmem:[#allocation11 + $0x10] sm:$0xff]  ;;  %v1624_v35 = vld [vmem:[#allocation11 + $0x28] sm:$0xff] }
 0x2ba   : > { %5039 = vmatpush1.bf16.msra.mxu0 %v5038_v40  ;;  %v957_v40 = vld [vmem:[#allocation5 + $0xf20] sm:$0xff] }
 0x2bb   : > { %5041 = vmatprep.subr.bf16.mxu0 %v5040_v41  ;;  %v959_v41 = vld [vmem:[#allocation5 + $0xf30] sm:$0xff] }
 0x2bc   : > { %v5082_v44 = vpack.c.bf16 %v959_v41, %v957_v40  ;;  %v1625_v40 = vld [vmem:[#allocation11 + $0x30] sm:$0xff]  ;;  %v1628_v41 = vld [vmem:[#allocation11 + $0x48] sm:$0xff] }
 0x2be   : > { %5043 = vmatpush1.bf16.msra.mxu0 %v5042_v46  ;;  %v961_v46 = vld [vmem:[#allocation5 + $0xf40] sm:$0xff] }
 0x2bf   : > { %5045 = vmatprep.subr.bf16.mxu0 %v5044_v47  ;;  %v963_v47 = vld [vmem:[#allocation5 + $0xf50] sm:$0xff] }
 0x2c0   : > { %v5086_v50 = vpack.c.bf16 %v963_v47, %v961_v46  ;;  %v1629_v46 = vld [vmem:[#allocation11 + $0x50] sm:$0xff]  ;;  %v1632_v47 = vld [vmem:[#allocation11 + $0x68] sm:$0xff] }
 0x2c1   : > { %1488 = vmatmul.mubr.f32.vlgmr.msra.gmra.mrb[0].mxu0 %v469_v52  ;;  %v965_v52 = vld [vmem:[#allocation5 + $0xf60] sm:$0xff] }
 0x2c2   : > { %5047 = vmatpush1.bf16.msra.mxu0 %v5046_v53  ;;  %1558 = vmatprep.mubr.f32.mxu0 %v472_v57  ;;  %v967_v53 = vld [vmem:[#allocation5 + $0xf70] sm:$0xff] }
 0x2c3   : > { %5049 = vmatprep.subr.bf16.mxu0 %v5048_v54  ;;  %v970_v54 = vld [vmem:[#allocation5 + $0xf88] sm:$0xff]  ;;  %v5090_v56 = vpack.c.bf16 %v967_v53, %v965_v52  ;;  %v1633_v52 = vld [vmem:[#allocation11 + $0x70] sm:$0xff] }
 0x2c4   : > { %v5092_v57 = vpack.c.bf16 %v972_v55, %v970_v54  ;;  %v1636_v53 = vld [vmem:[#allocation11 + $0x88] sm:$0xff]  ;;  %v1638_v54 = vld [vmem:[#allocation11 + $0x98] sm:$0xff] }
 0x2c6   : > { %5051 = vmatpush1.bf16.msra.mxu0 %v5050_v60  ;;  %v974_v60 = vld [vmem:[#allocation5 + $0xfa8] sm:$0xff] }
 0x2c7   : > { %5053 = vmatprep.subr.bf16.mxu0 %v5052_v61  ;;  %v976_v61 = vld [vmem:[#allocation5 + $0xfb8] sm:$0xff] }
 0x2c8   : > { %v5096_v63 = vpack.c.bf16 %v976_v61, %v974_v60  ;;  %v1642_v60 = vld [vmem:[#allocation11 + $0xb8] sm:$0xff] }
 0x2ca   : > { %5055 = vmatpush1.bf16.msra.mxu0 %v5054_v2  ;;  %v978_v2 = vld [vmem:[#allocation5 + $0xfc8] sm:$0xff] }
 0x2cb   : > { %5057 = vmatprep.subr.bf16.mxu0 %v5056_v3  ;;  %v980_v3 = vld [vmem:[#allocation5 + $0xfd8] sm:$0xff] }
 0x2cc   : > { %v5100_v5 = vpack.c.bf16 %v980_v3, %v978_v2  ;;  %v1646_v2 = vld [vmem:[#allocation11 + $0xd8] sm:$0xff] }
 0x2ce   : > { %5059 = vmatpush1.bf16.msra.mxu0 %v5058_v8  ;;  %v982_v8 = vld [vmem:[#allocation5 + $0xfe8] sm:$0xff] }
 0x2cf   : > { %5061 = vmatprep.subr.bf16.mxu0 %v5060_v9  ;;  %v984_v9 = vld [vmem:[#allocation5 + $0xff8] sm:$0xff] }
 0x2d0   : > { %v5104_v11 = vpack.c.bf16 %v984_v9, %v982_v8 }
 0x2d2   : > { %5063 = vmatpush1.bf16.msra.mxu0 %v5062_v14  ;;  %v5106_v14 = vpack.c.bf16 %v983_v13, %v981_v12 }
 0x2d3   : > { %5065 = vmatprep.subr.bf16.mxu0 %v5064_v15  ;;  %v471_v15 = vld [vmem:[%s7116_s25 + $0x70] sm:$0xff] }
 0x2d6   : > { %5067 = vmatpush1.bf16.msra.mxu0 %v5066_v20  ;;  %v7160_v20 = vsub.s32 1, %v7154_v17 }
 0x2d7   : > { %5069 = vmatprep.subr.bf16.mxu0 %v5068_v21  ;;  %v990_v21 = vrot.slane %v985_v19, %v7157_v18 }
 0x2d8   : > { %v994_v22 = vrot.slane %v985_v19, %v7160_v20 }
 0x2da   : > { %5071 = vmatpush1.bf16.msra.mxu0 %v5070_v26 }
 0x2db   : > { %5073 = vmatprep.subr.bf16.mxu0 %v5072_v27 }
 0x2de   : > { %5075 = vmatpush1.bf16.msra.mxu0 %v5074_v32  ;;  %v1619_v32 = vld [vmem:[#allocation11] sm:$0xff] }
 0x2df   : > { %5077 = vmatprep.subr.bf16.mxu0 %v5076_v33  ;;  %v5108_v33 = vpack.c.bf16 %v1622_v31, %v1620_v30  ;;  %v5110_v37 = vpack.c.bf16 %v1621_v34, %v1619_v32  ;;  %v1656_v30 = vld [vmem:[#allocation11 + $0x128] sm:$0xff]  ;;  %v1658_v31 = vld [vmem:[#allocation11 + $0x138] sm:$0xff]  ;;  %v1657_v34 = vld [vmem:[#allocation11 + $0x130] sm:$0xff] }
 0x2e0   : > { %v5144_v32 = vpack.c.bf16 %v1658_v31, %v1656_v30  ;;  %v2053_v31 = vld [vmem:[#allocation14 + $0x460] sm:$0xff] }
 0x2e1   : > { %5109 = vmatprep.subr.bf16.mxu1 %v5108_v33  ;;  %v1655_v33 = vld [vmem:[#allocation11 + $0x120] sm:$0xff] }
 0x2e2   : > { %5079 = vmatpush1.bf16.msra.mxu0 %v5078_v38  ;;  %v5112_v38 = vpack.c.bf16 %v1626_v36, %v1624_v35  ;;  %5111 = vmatpush1.bf16.msra.mxu1 %v5110_v37  ;;  %v5146_v35 = vpack.c.bf16 %v1657_v34, %v1655_v33  ;;  %v1660_v36 = vld [vmem:[#allocation11 + $0x148] sm:$0xff]  ;;  %v1662_v37 = vld [vmem:[#allocation11 + $0x158] sm:$0xff] }
 0x2e3   : > { %5081 = vmatprep.subr.bf16.mxu0 %v5080_v39  ;;  %v1623_v39 = vld [vmem:[#allocation11 + $0x20] sm:$0xff]  ;;  %v2118_v34 = vld [vmem:[#allocation14 + $0x668] sm:$0xff] }
 0x2e4   : > { %v5114_v43 = vpack.c.bf16 %v1625_v40, %v1623_v39  ;;  %5113 = vmatprep.subr.bf16.mxu1 %v5112_v38  ;;  %v5148_v38 = vpack.c.bf16 %v1662_v37, %v1660_v36  ;;  %v1659_v39 = vld [vmem:[#allocation11 + $0x140] sm:$0xff]  ;;  %v1661_v40 = vld [vmem:[#allocation11 + $0x150] sm:$0xff] }
 0x2e5   : > { %v2117_v37 = vld [vmem:[#allocation14 + $0x660] sm:$0xff] }
 0x2e6   : > { %5083 = vmatpush1.bf16.msra.mxu0 %v5082_v44  ;;  %v5116_v44 = vpack.c.bf16 %v1630_v42, %v1628_v41  ;;  %5115 = vmatpush1.bf16.msra.mxu1 %v5114_v43  ;;  %v5150_v41 = vpack.c.bf16 %v1661_v40, %v1659_v39  ;;  %v1664_v42 = vld [vmem:[#allocation11 + $0x168] sm:$0xff]  ;;  %v1666_v43 = vld [vmem:[#allocation11 + $0x178] sm:$0xff] }
 0x2e7   : > { %5085 = vmatprep.subr.bf16.mxu0 %v5084_v45  ;;  %v1627_v45 = vld [vmem:[#allocation11 + $0x40] sm:$0xff]  ;;  %v2182_v40 = vld [vmem:[#allocation14 + $0x868] sm:$0xff] }
 0x2e8   : > { %v5118_v49 = vpack.c.bf16 %v1629_v46, %v1627_v45  ;;  %5117 = vmatprep.subr.bf16.mxu1 %v5116_v44  ;;  %v5152_v44 = vpack.c.bf16 %v1666_v43, %v1664_v42  ;;  %v1663_v45 = vld [vmem:[#allocation11 + $0x160] sm:$0xff]  ;;  %v1665_v46 = vld [vmem:[#allocation11 + $0x170] sm:$0xff] }
 0x2e9   : > { %v2181_v43 = vld [vmem:[#allocation14 + $0x860] sm:$0xff] }
 0x2ea   : > { %5087 = vmatpush1.bf16.msra.mxu0 %v5086_v50  ;;  %v5120_v50 = vpack.c.bf16 %v1634_v48, %v1632_v47  ;;  %5119 = vmatpush1.bf16.msra.mxu1 %v5118_v49  ;;  %v5154_v47 = vpack.c.bf16 %v1665_v46, %v1663_v45  ;;  %v1668_v48 = vld [vmem:[#allocation11 + $0x188] sm:$0xff]  ;;  %v1670_v49 = vld [vmem:[#allocation11 + $0x198] sm:$0xff] }
 0x2eb   : > { %5089 = vmatprep.subr.bf16.mxu0 %v5088_v51  ;;  %v1631_v51 = vld [vmem:[#allocation11 + $0x60] sm:$0xff]  ;;  %v2246_v46 = vld [vmem:[#allocation14 + $0xa68] sm:$0xff] }
 0x2ec   : > { %v5122_v55 = vpack.c.bf16 %v1633_v52, %v1631_v51  ;;  %5121 = vmatprep.subr.bf16.mxu1 %v5120_v50  ;;  %v1667_v50 = vld [vmem:[#allocation11 + $0x180] sm:$0xff]  ;;  %v5156_v51 = vpack.c.bf16 %v1670_v49, %v1668_v48  ;;  %v1669_v52 = vld [vmem:[#allocation11 + $0x190] sm:$0xff] }
 0x2ed   : > { %v2245_v49 = vld [vmem:[#allocation14 + $0xa60] sm:$0xff] }
 0x2ee   : > { %5091 = vmatpush1.bf16.msra.mxu0 %v5090_v56  ;;  %v5124_v56 = vpack.c.bf16 %v1638_v54, %v1636_v53  ;;  %5123 = vmatpush1.bf16.msra.mxu1 %v5122_v55  ;;  %v1672_v53 = vld [vmem:[#allocation11 + $0x1a8] sm:$0xff]  ;;  %v1674_v54 = vld [vmem:[#allocation11 + $0x1b8] sm:$0xff]  ;;  %v5158_v55 = vpack.c.bf16 %v1669_v52, %v1667_v50 }
 0x2ef   : > { %5093 = vmatprep.subr.bf16.mxu0 %v5092_v57  ;;  %v1635_v57 = vld [vmem:[#allocation11 + $0x80] sm:$0xff]  ;;  %v2310_v52 = vld [vmem:[#allocation14 + $0xc68] sm:$0xff] }
 0x2f0   : > { %v5126_v61 = vpack.c.bf16 %v1637_v58, %v1635_v57  ;;  %5125 = vmatprep.subr.bf16.mxu1 %v5124_v56  ;;  %v5160_v56 = vpack.c.bf16 %v1674_v54, %v1672_v53  ;;  %v1671_v57 = vld [vmem:[#allocation11 + $0x1a0] sm:$0xff]  ;;  %v1673_v58 = vld [vmem:[#allocation11 + $0x1b0] sm:$0xff] }
 0x2f1   : > { %v2277_v50 = vld [vmem:[#allocation14 + $0xb60] sm:$0xff]  ;;  %v2342_v53 = vld [vmem:[#allocation14 + $0xd68] sm:$0xff] }
 0x2f2   : > { %5095 = vmatpush1.bf16.msra.mxu0 %v5094_v62  ;;  %v5128_v62 = vpack.c.bf16 %v1642_v60, %v1640_v59  ;;  %5127 = vmatpush1.bf16.msra.mxu1 %v5126_v61  ;;  %v1676_v59 = vld [vmem:[#allocation11 + $0x1c8] sm:$0xff]  ;;  %v1678_v60 = vld [vmem:[#allocation11 + $0x1d8] sm:$0xff]  ;;  %v5162_v61 = vpack.c.bf16 %v1673_v58, %v1671_v57  ;;  %v5644_v54 = vpack.c.bf16 %v2342_v53, %v2310_v52 }
 0x2f3   : > { %5097 = vmatprep.subr.bf16.mxu0 %v5096_v63  ;;  %v1639_v63 = vld [vmem:[#allocation11 + $0xa0] sm:$0xff]  ;;  %v2854_v52 = vld [vmem:[#allocation14 + $0x1d68] sm:$0xff] }
 0x2f4   : > { %v5130_v3 = vpack.c.bf16 %v1641_v0, %v1639_v63  ;;  %5129 = vmatprep.subr.bf16.mxu1 %v5128_v62  ;;  %v5164_v62 = vpack.c.bf16 %v1678_v60, %v1676_v59  ;;  %v1675_v63 = vld [vmem:[#allocation11 + $0x1c0] sm:$0xff]  ;;  %v1677_v0 = vld [vmem:[#allocation11 + $0x1d0] sm:$0xff] }
 0x2f5   : > { %v2374_v59 = vld [vmem:[#allocation14 + $0xe68] sm:$0xff] }
 0x2f6   : > { %5099 = vmatpush1.bf16.msra.mxu0 %v5098_v4  ;;  %v5132_v4 = vpack.c.bf16 %v1646_v2, %v1644_v1  ;;  %5131 = vmatpush1.bf16.msra.mxu1 %v5130_v3  ;;  %v1680_v1 = vld [vmem:[#allocation11 + $0x1e8] sm:$0xff]  ;;  %v1682_v2 = vld [vmem:[#allocation11 + $0x1f8] sm:$0xff]  ;;  %v5166_v3 = vpack.c.bf16 %v1677_v0, %v1675_v63 }
 0x2f7   : > { %5101 = vmatprep.subr.bf16.mxu0 %v5100_v5  ;;  %v1643_v5 = vld [vmem:[#allocation11 + $0xc0] sm:$0xff]  ;;  %v2406_v60 = vld [vmem:[#allocation14 + $0xf68] sm:$0xff] }
 0x2f8   : > { %v5134_v7 = vpack.c.bf16 %v1645_v6, %v1643_v5  ;;  %5133 = vmatprep.subr.bf16.mxu1 %v5132_v4  ;;  %v5168_v4 = vpack.c.bf16 %v1682_v2, %v1680_v1  ;;  %v1679_v5 = vld [vmem:[#allocation11 + $0x1e0] sm:$0xff]  ;;  %v1681_v6 = vld [vmem:[#allocation11 + $0x1f0] sm:$0xff] }
 0x2f9   : > { %v2373_v0 = vld [vmem:[#allocation14 + $0xe60] sm:$0xff] }
 0x2fa   : > { %5103 = vmatpush1.bf16.msra.mxu0 %v5102_v10  ;;  %5135 = vmatpush1.bf16.msra.mxu1 %v5134_v7  ;;  %v5170_v7 = vpack.c.bf16 %v1681_v6, %v1679_v5  ;;  %v2405_v1 = vld [vmem:[#allocation14 + $0xf60] sm:$0xff] }
 0x2fb   : > { %5105 = vmatprep.subr.bf16.mxu0 %v5104_v11  ;;  %v5650_v2 = vpack.c.bf16 %v2405_v1, %v2373_v0  ;;  %v2437_v6 = vld [vmem:[#allocation14 + $0x1060] sm:$0xff]  ;;  %v1685_v0 = vld [vmem:[#allocation11 + $0x210] sm:$0xff] }
 0x2fe   : > { %5107 = vmatpush1.bf16.msra.mxu0 %v5106_v14 }
 0x301   : > { %1559 = vmatmul.mubr.f32.vlgmr.msra.gmra.mrb[0].mxu0 %v471_v15  ;;  %v1648_v15 = vld [vmem:[#allocation11 + $0xe8] sm:$0xff] }
 0x302   : > { %v5136_v19 = vpack.c.bf16 %v1650_v16, %v1648_v15  ;;  %v1925_v16 = vld [vmem:[#allocation14 + $0x60] sm:$0xff] }
 0x304   : > { %5137 = vmatprep.subr.bf16.mxu1 %v5136_v19  ;;  %v1957_v19 = vld [vmem:[#allocation14 + $0x160] sm:$0xff] }
 0x3d4   : > { %v1560_v23 = vpop.f32.mrb[0].mxu0 }
 0x3d5   : > { %v7164_v24 = vadd.f32 %v1560_v23, %v990_v21  ;;  %v1562_v25 = vpop.f32.mrb[1].mxu0  ;;  %v1647_v21 = vld [vmem:[#allocation11 + $0xe0] sm:$0xff] }
 0x3d6   : > { %v7166_v26 = vadd.f32 %v1562_v25, %v994_v22  ;;  %v1649_v22 = vld [vmem:[#allocation11 + $0xf0] sm:$0xff]  ;;  %v1654_v25 = vld [vmem:[#allocation11 + $0x118] sm:$0xff] }
 0x3d7   : > { %v1565_v27 = vmax.f32 %v7164_v24, 0.0  ;;  %v5138_v23 = vpack.c.bf16 %v1649_v22, %v1647_v21  ;;  %v1652_v24 = vld [vmem:[#allocation11 + $0x108] sm:$0xff]  ;;  %v5622_v21 = vpack.c.bf16 %v1957_v19, %v1925_v16 }
 0x3d8   : > { %v1566_v28 = vmax.f32 %v7166_v26, 0.0  ;;  %v5140_v26 = vpack.c.bf16 %v1654_v25, %v1652_v24  ;;  %v1990_v22 = vld [vmem:[#allocation14 + $0x268] sm:$0xff]  ;;  %v1989_v25 = vld [vmem:[#allocation14 + $0x260] sm:$0xff] }
 0x3d9   : > { %5139 = vmatpush1.bf16.msra.mxu1 %v5138_v23  ;;  %v2022_v23 = vld [vmem:[#allocation14 + $0x368] sm:$0xff] }
 0x3da   : > { %v1569_v29 = vadd.f32 %v1566_v28, %v1565_v27  ;;  %5141 = vmatprep.subr.bf16.mxu1 %v5140_v26  ;;  %v5624_v24 = vpack.c.bf16 %v2022_v23, %v1990_v22  ;;  %v2021_v26 = vld [vmem:[#allocation14 + $0x360] sm:$0xff]  ;;  %v2566_v19 = vld [vmem:[#allocation14 + $0x1468] sm:$0xff] }
 0x3dc   : > { %1570 = vadd.xlane.f32.xlu0 %v1569_v29 }
 0x469   : > { %v1571_v8 = vpop.xlane.xlu0 %1570 }
 0x46a   : > { %v1573_v9 = vmul.f32 0.00390625, %v1571_v8  ;;  %v1684_v8 = vld [vmem:[#allocation11 + $0x208] sm:$0xff] }
 0x46c   : > { %v7170_v10 = vsub.f32 %v1565_v27, %v1573_v9  ;;  %v7172_v11 = vsub.f32 %v1566_v28, %v1573_v9  ;;  %v1651_v27 = vld [vmem:[#allocation11 + $0x100] sm:$0xff]  ;;  %v1653_v28 = vld [vmem:[#allocation11 + $0x110] sm:$0xff]  ;;  %v1686_v9 = vld [vmem:[#allocation11 + $0x218] sm:$0xff] }
 0x46d   : > { %v5142_v29 = vpack.c.bf16 %v1653_v28, %v1651_v27  ;;  %v5626_v27 = vpack.c.bf16 %v2021_v26, %v1989_v25  ;;  %v2054_v28 = vld [vmem:[#allocation14 + $0x468] sm:$0xff]  ;;  %v2597_v25 = vld [vmem:[#allocation14 + $0x1560] sm:$0xff] }
 0x46e   : > { %v1576_v12 = vmul.f32 %v7170_v10, %v7170_v10  ;;  %v1577_v13 = vmul.f32 %v7172_v11, %v7172_v11 }
 0x46f   : > { %5143 = vmatpush1.bf16.msra.mxu1 %v5142_v29  ;;  %v2086_v29 = vld [vmem:[#allocation14 + $0x568] sm:$0xff] }
 0x470   : > { %v1578_v14 = vadd.f32 %v1577_v13, %v1576_v12  ;;  %5145 = vmatprep.subr.bf16.mxu1 %v5144_v32  ;;  %v5172_v12 = vpack.c.bf16 %v1686_v9, %v1684_v8  ;;  %v1926_v13 = vld [vmem:[#allocation14 + $0x68] sm:$0xff]  ;;  %v5628_v30 = vpack.c.bf16 %v2086_v29, %v2054_v28  ;;  %v2085_v32 = vld [vmem:[#allocation14 + $0x560] sm:$0xff] }
 0x471   : > { %v5630_v33 = vpack.c.bf16 %v2085_v32, %v2053_v31  ;;  %v2502_v9 = vld [vmem:[#allocation14 + $0x1268] sm:$0xff] }
 0x472   : > { %1579 = vadd.xlane.f32.xlu0 %v1578_v14  ;;  %v1958_v14 = vld [vmem:[#allocation14 + $0x168] sm:$0xff] }
 0x473   : > { %5147 = vmatpush1.bf16.msra.mxu1 %v5146_v35  ;;  %v5620_v15 = vpack.c.bf16 %v1958_v14, %v1926_v13  ;;  %v2150_v35 = vld [vmem:[#allocation14 + $0x768] sm:$0xff]  ;;  %v2501_v14 = vld [vmem:[#allocation14 + $0x1260] sm:$0xff] }
 0x474   : > { %5149 = vmatprep.subr.bf16.mxu1 %v5148_v38  ;;  %v5632_v36 = vpack.c.bf16 %v2150_v35, %v2118_v34  ;;  %v2149_v38 = vld [vmem:[#allocation14 + $0x760] sm:$0xff]  ;;  %v2630_v28 = vld [vmem:[#allocation14 + $0x1668] sm:$0xff] }
 0x475   : > { %5621 = vmatprep.subr.bf16.mxu0 %v5620_v15  ;;  %v5634_v39 = vpack.c.bf16 %v2149_v38, %v2117_v37  ;;  %v2533_v15 = vld [vmem:[#allocation14 + $0x1360] sm:$0xff]  ;;  %v2662_v29 = vld [vmem:[#allocation14 + $0x1768] sm:$0xff] }
 0x476   : > { %5623 = vmatpush1.bf16.msra.mxu0 %v5622_v21  ;;  %v5658_v16 = vpack.c.bf16 %v2533_v15, %v2501_v14  ;;  %v2598_v21 = vld [vmem:[#allocation14 + $0x1568] sm:$0xff]  ;;  %v5664_v31 = vpack.c.bf16 %v2662_v29, %v2630_v28  ;;  %v2629_v34 = vld [vmem:[#allocation14 + $0x1660] sm:$0xff]  ;;  %v1702_v28 = vld [vmem:[#allocation11 + $0x298] sm:$0xff] }
 0x477   : > { %5151 = vmatpush1.bf16.msra.mxu1 %v5150_v41  ;;  %5625 = vmatprep.subr.bf16.mxu0 %v5624_v24  ;;  %v2214_v41 = vld [vmem:[#allocation14 + $0x968] sm:$0xff]  ;;  %v5660_v22 = vpack.c.bf16 %v2598_v21, %v2566_v19  ;;  %v2565_v24 = vld [vmem:[#allocation14 + $0x1460] sm:$0xff] }
 0x478   : > { %5153 = vmatprep.subr.bf16.mxu1 %v5152_v44  ;;  %v5636_v42 = vpack.c.bf16 %v2214_v41, %v2182_v40  ;;  %v2213_v44 = vld [vmem:[#allocation14 + $0x960] sm:$0xff]  ;;  %v2694_v37 = vld [vmem:[#allocation14 + $0x1868] sm:$0xff] }
 0x479   : > { %v5638_v45 = vpack.c.bf16 %v2213_v44, %v2181_v43  ;;  %v2661_v35 = vld [vmem:[#allocation14 + $0x1760] sm:$0xff]  ;;  %v2726_v38 = vld [vmem:[#allocation14 + $0x1968] sm:$0xff] }
 0x47a   : > { %5627 = vmatpush1.bf16.msra.mxu0 %v5626_v27  ;;  %v5662_v27 = vpack.c.bf16 %v2597_v25, %v2565_v24  ;;  %v2693_v40 = vld [vmem:[#allocation14 + $0x1860] sm:$0xff]  ;;  %v2758_v43 = vld [vmem:[#allocation14 + $0x1a68] sm:$0xff] }
 0x47b   : > { %5155 = vmatpush1.bf16.msra.mxu1 %v5154_v47  ;;  %5629 = vmatprep.subr.bf16.mxu0 %v5628_v30  ;;  %v2278_v47 = vld [vmem:[#allocation14 + $0xb68] sm:$0xff]  ;;  %v2725_v41 = vld [vmem:[#allocation14 + $0x1960] sm:$0xff] }
 0x47c   : > { %5157 = vmatprep.subr.bf16.mxu1 %v5156_v51  ;;  %v5640_v48 = vpack.c.bf16 %v2278_v47, %v2246_v46  ;;  %v5642_v51 = vpack.c.bf16 %v2277_v50, %v2245_v49  ;;  %v2790_v44 = vld [vmem:[#allocation14 + $0x1b68] sm:$0xff]  ;;  %v1567_v46 = vld [vmem:[#allocation8] sm:$0x3]  ;;  %v2757_v47 = vld [vmem:[#allocation14 + $0x1a60] sm:$0xff] }
 0x47d   : > { %v1568_v49 = vld [vmem:[#allocation10] sm:$0x3]  ;;  %v1597_v53 = vrot.slane %v1567_v46, %v7157_v18  ;;  %v1693_v19 = vld [vmem:[#allocation11 + $0x250] sm:$0xff]  ;;  %v1696_v21 = vld [vmem:[#allocation11 + $0x268] sm:$0xff] }
 0x47e   : > { %5631 = vmatpush1.bf16.msra.mxu0 %v5630_v33  ;;  %v1695_v25 = vld [vmem:[#allocation11 + $0x260] sm:$0xff] }
 0x47f   : > { %5159 = vmatpush1.bf16.msra.mxu1 %v5158_v55  ;;  %5633 = vmatprep.subr.bf16.mxu0 %v5632_v36  ;;  %v2309_v55 = vld [vmem:[#allocation14 + $0xc60] sm:$0xff]  ;;  %v5666_v36 = vpack.c.bf16 %v2661_v35, %v2629_v34  ;;  %v1706_v34 = vld [vmem:[#allocation11 + $0x2b8] sm:$0xff] }
 0x480   : > { %5161 = vmatprep.subr.bf16.mxu1 %v5160_v56  ;;  %v2341_v56 = vld [vmem:[#allocation14 + $0xd60] sm:$0xff] }
 0x481   : > { %v5646_v58 = vpack.c.bf16 %v2341_v56, %v2309_v55 }
 0x482   : > { %5635 = vmatpush1.bf16.msra.mxu0 %v5634_v39  ;;  %v5668_v39 = vpack.c.bf16 %v2726_v38, %v2694_v37  ;;  %v1703_v37 = vld [vmem:[#allocation11 + $0x2a0] sm:$0xff]  ;;  %v1705_v38 = vld [vmem:[#allocation11 + $0x2b0] sm:$0xff] }
 0x483   : > { %5163 = vmatpush1.bf16.msra.mxu1 %v5162_v61  ;;  %5637 = vmatprep.subr.bf16.mxu0 %v5636_v42  ;;  %v5670_v42 = vpack.c.bf16 %v2725_v41, %v2693_v40  ;;  %v1710_v40 = vld [vmem:[#allocation11 + $0x2d8] sm:$0xff]  ;;  %v5194_v41 = vpack.c.bf16 %v1705_v38, %v1703_v37  ;;  %v1743_v37 = vld [vmem:[#allocation11 + $0x3e0] sm:$0xff]  ;;  %v1745_v38 = vld [vmem:[#allocation11 + $0x3f0] sm:$0xff] }
 0x484   : > { %5165 = vmatprep.subr.bf16.mxu1 %v5164_v62  ;;  %v5648_v62 = vpack.c.bf16 %v2406_v60, %v2374_v59  ;;  %v1614_v59 = vrot.slane %v1568_v49, %v7160_v20 }
 0x486   : > { %5639 = vmatpush1.bf16.msra.mxu0 %v5638_v45  ;;  %v5672_v45 = vpack.c.bf16 %v2790_v44, %v2758_v43  ;;  %v1707_v43 = vld [vmem:[#allocation11 + $0x2c0] sm:$0xff]  ;;  %v1709_v44 = vld [vmem:[#allocation11 + $0x2d0] sm:$0xff] }
 0x487   : > { %5167 = vmatpush1.bf16.msra.mxu1 %v5166_v3  ;;  %5641 = vmatprep.subr.bf16.mxu0 %v5640_v48  ;;  %v2438_v3 = vld [vmem:[#allocation14 + $0x1068] sm:$0xff]  ;;  %v2789_v48 = vld [vmem:[#allocation14 + $0x1b60] sm:$0xff] }
 0x488   : > { %5169 = vmatprep.subr.bf16.mxu1 %v5168_v4  ;;  %v2470_v4 = vld [vmem:[#allocation14 + $0x1168] sm:$0xff]  ;;  %v5674_v50 = vpack.c.bf16 %v2789_v48, %v2757_v47  ;;  %v5198_v47 = vpack.c.bf16 %v1709_v44, %v1707_v43  ;;  %v1913_v43 = vld [vmem:[#allocation14] sm:$0xff] }
 0x489   : > { %v5652_v5 = vpack.c.bf16 %v2470_v4, %v2438_v3  ;;  %v1688_v4 = vld [vmem:[#allocation11 + $0x228] sm:$0xff] }
 0x48a   : > { %5643 = vmatpush1.bf16.msra.mxu0 %v5642_v51  ;;  %v2822_v51 = vld [vmem:[#allocation14 + $0x1c68] sm:$0xff]  ;;  %v1945_v44 = vld [vmem:[#allocation14 + $0x100] sm:$0xff] }
 0x48b   : > { %5171 = vmatpush1.bf16.msra.mxu1 %v5170_v7  ;;  %5645 = vmatprep.subr.bf16.mxu0 %v5644_v54  ;;  %v2469_v7 = vld [vmem:[#allocation14 + $0x1160] sm:$0xff]  ;;  %v1601_v54 = vrot.slane %v1567_v46, %v7160_v20  ;;  %v5676_v55 = vpack.c.bf16 %v2854_v52, %v2822_v51  ;;  %v1714_v46 = vld [vmem:[#allocation11 + $0x2f8] sm:$0xff] }
 0x48c   : > { %5173 = vmatprep.subr.bf16.mxu1 %v5172_v12  ;;  %v5654_v8 = vpack.c.bf16 %v2469_v7, %v2437_v6  ;;  %v2534_v12 = vld [vmem:[#allocation14 + $0x1368] sm:$0xff]  ;;  %v1718_v52 = vld [vmem:[#allocation11 + $0x318] sm:$0xff] }
 0x48d   : > { %v5656_v13 = vpack.c.bf16 %v2534_v12, %v2502_v9  ;;  %v1687_v9 = vld [vmem:[#allocation11 + $0x220] sm:$0xff]  ;;  %v1689_v12 = vld [vmem:[#allocation11 + $0x230] sm:$0xff]  ;;  %v1716_v51 = vld [vmem:[#allocation11 + $0x308] sm:$0xff] }
 0x48e   : > { %5647 = vmatpush1.bf16.msra.mxu0 %v5646_v58  ;;  %v1610_v58 = vrot.slane %v1568_v49, %v7157_v18  ;;  %v5178_v14 = vpack.c.bf16 %v1689_v12, %v1687_v9  ;;  %v1711_v49 = vld [vmem:[#allocation11 + $0x2e0] sm:$0xff]  ;;  %v1729_v12 = vld [vmem:[#allocation11 + $0x370] sm:$0xff] }
 0x48f   : > { %5649 = vmatprep.subr.bf16.mxu0 %v5648_v62  ;;  %v2853_v62 = vld [vmem:[#allocation14 + $0x1d60] sm:$0xff] }
 0x490   : > { %v1727_v9 = vld [vmem:[#allocation11 + $0x360] sm:$0xff] }
 0x492   : > { %5651 = vmatpush1.bf16.msra.mxu0 %v5650_v2 }
 0x493   : > { %5653 = vmatprep.subr.bf16.mxu0 %v5652_v5  ;;  %v1690_v5 = vld [vmem:[#allocation11 + $0x238] sm:$0xff] }
 0x496   : > { %5655 = vmatpush1.bf16.msra.mxu0 %v5654_v8  ;;  %v5176_v8 = vpack.c.bf16 %v1690_v5, %v1688_v4  ;;  %v1725_v4 = vld [vmem:[#allocation11 + $0x350] sm:$0xff]  ;;  %v1728_v5 = vld [vmem:[#allocation11 + $0x368] sm:$0xff] }
 0x497   : > { %5657 = vmatprep.subr.bf16.mxu0 %v5656_v13  ;;  %v1694_v13 = vld [vmem:[#allocation11 + $0x258] sm:$0xff] }
 0x49a   : > { %5659 = vmatpush1.bf16.msra.mxu0 %v5658_v16  ;;  %v1691_v16 = vld [vmem:[#allocation11 + $0x240] sm:$0xff] }
 0x49b   : > { %5661 = vmatprep.subr.bf16.mxu0 %v5660_v22  ;;  %v1698_v22 = vld [vmem:[#allocation11 + $0x278] sm:$0xff] }
 0x49c   : > { %v5184_v24 = vpack.c.bf16 %v1698_v22, %v1696_v21  ;;  %v1736_v21 = vld [vmem:[#allocation11 + $0x3a8] sm:$0xff]  ;;  %v1738_v22 = vld [vmem:[#allocation11 + $0x3b8] sm:$0xff] }
 0x49e   : > { %5663 = vmatpush1.bf16.msra.mxu0 %v5662_v27  ;;  %v1700_v27 = vld [vmem:[#allocation11 + $0x288] sm:$0xff] }
 0x49f   : > { %5665 = vmatprep.subr.bf16.mxu0 %v5664_v31  ;;  %v1699_v31 = vld [vmem:[#allocation11 + $0x280] sm:$0xff] }
 0x4a2   : > { %5667 = vmatpush1.bf16.msra.mxu0 %v5666_v36 }
 0x4a3   : > { %5669 = vmatprep.subr.bf16.mxu0 %v5668_v39  ;;  %v1708_v39 = vld [vmem:[#allocation11 + $0x2c8] sm:$0xff] }
 0x4a6   : > { %5671 = vmatpush1.bf16.msra.mxu0 %v5670_v42  ;;  %v5196_v42 = vpack.c.bf16 %v1710_v40, %v1708_v39  ;;  %v1914_v39 = vld [vmem:[#allocation14 + $0x8] sm:$0xff] }
 0x4a7   : > { %5673 = vmatprep.subr.bf16.mxu0 %v5672_v45  ;;  %v1712_v45 = vld [vmem:[#allocation11 + $0x2e8] sm:$0xff] }
 0x4a8   : > { %v5200_v48 = vpack.c.bf16 %v1714_v46, %v1712_v45  ;;  %v1946_v40 = vld [vmem:[#allocation14 + $0x108] sm:$0xff] }
 0x4a9   : > { %v1978_v45 = vld [vmem:[#allocation14 + $0x208] sm:$0xff] }
 0x4aa   : > { %5675 = vmatpush1.bf16.msra.mxu0 %v5674_v50  ;;  %v1713_v50 = vld [vmem:[#allocation11 + $0x2f0] sm:$0xff] }
 0x4ab   : > { %5677 = vmatprep.subr.bf16.mxu0 %v5676_v55  ;;  %v1715_v55 = vld [vmem:[#allocation11 + $0x300] sm:$0xff]  ;;  %v2010_v46 = vld [vmem:[#allocation14 + $0x308] sm:$0xff] }
 0x4ff   : > { %v1580_v57 = vpop.xlane.xlu0 %1579 }
 0x500   : > { %v1581_v61 = vmul.f32 0.00390625, %v1580_v57 }
 0x502   : > { %v1582_v63 = vadd.f32 1e-05, %v1581_v61  ;;  %v2821_v61 = vld [vmem:[#allocation14 + $0x1c60] sm:$0xff] }
 0x503   : > { %v5678_v1 = vpack.c.bf16 %v2853_v62, %v2821_v61  ;;  %v1719_v61 = vld [vmem:[#allocation11 + $0x320] sm:$0xff]  ;;  %v1721_v62 = vld [vmem:[#allocation11 + $0x330] sm:$0xff] }
 0x504   : > { %6410 = vrsqrt.f32 %v1582_v63  ;;  %vm1585_vm0 = vcmp.eq.f32.partialorder %v1582_v63, inf  ;;  %v1588_v30 = vand.u32 2147483648, %v1582_v63  ;;  %vm1587_vm1 = vcmp.eq.f32.partialorder %v1582_v63, 0.0 }
 0x505   : > { %5679 = vmatpush1.bf16.msra.mxu0 %v5678_v1  ;;  %v5210_v1 = vpack.c.bf16 %v1721_v62, %v1719_v61  ;;  %v2105_v61 = vld [vmem:[#allocation14 + $0x600] sm:$0xff] }
 0x506   : > { %v2137_v62 = vld [vmem:[#allocation14 + $0x700] sm:$0xff] }
 0x50e   : > { %v6411_v23 = vpop.eup %6410 }
 0x50f   : > { %v1584_v26 = vmul.f32 %v6411_v23, %v1582_v63  ;;  %v5182_v23 = vpack.c.bf16 %v1693_v19, %v1691_v16  ;;  %v1731_v16 = vld [vmem:[#allocation11 + $0x380] sm:$0xff]  ;;  %v1733_v19 = vld [vmem:[#allocation11 + $0x390] sm:$0xff] }
 0x511   : > { %v1586_v32 = vsel %vm1585_vm0, %v1582_v63, %v1584_v26  ;;  %v1683_v63 = vld [vmem:[#allocation11 + $0x200] sm:$0xff]  ;;  %v1697_v26 = vld [vmem:[#allocation11 + $0x270] sm:$0xff] }
 0x512   : > { %v1589_v33 = vsel %vm1587_vm1, %v1588_v30, %v1586_v32  ;;  %v5186_v29 = vpack.c.bf16 %v1697_v26, %v1695_v25  ;;  %v5188_v30 = vpack.c.bf16 %v1702_v28, %v1700_v27  ;;  %v1701_v32 = vld [vmem:[#allocation11 + $0x290] sm:$0xff]  ;;  %v1735_v25 = vld [vmem:[#allocation11 + $0x3a0] sm:$0xff]  ;;  %v1740_v27 = vld [vmem:[#allocation11 + $0x3c8] sm:$0xff] }
 0x513   : > { %6412 = vrcp.f32 %v1589_v33  ;;  %v1704_v33 = vld [vmem:[#allocation11 + $0x2a8] sm:$0xff]  ;;  %v5190_v35 = vpack.c.bf16 %v1701_v32, %v1699_v31  ;;  %v1737_v26 = vld [vmem:[#allocation11 + $0x3b0] sm:$0xff]  ;;  %v1742_v28 = vld [vmem:[#allocation11 + $0x3d8] sm:$0xff] }
 0x514   : > { %v5192_v36 = vpack.c.bf16 %v1706_v34, %v1704_v33  ;;  %v1739_v31 = vld [vmem:[#allocation11 + $0x3c0] sm:$0xff]  ;;  %v1741_v32 = vld [vmem:[#allocation11 + $0x3d0] sm:$0xff]  ;;  %v1744_v33 = vld [vmem:[#allocation11 + $0x3e8] sm:$0xff] }
 0x515   : > { %v1746_v34 = vld [vmem:[#allocation11 + $0x3f8] sm:$0xff] }
 0x51d   : > { %v6413_v56 = vpop.eup %6412 }
 0x51e   : > { %v1592_v57 = vmul.f32 %v6413_v56, %v7172_v11  ;;  %v1591_v60 = vmul.f32 %v6413_v56, %v7170_v10  ;;  %v5174_v11 = vpack.c.bf16 %v1685_v0, %v1683_v63  ;;  %v1692_v10 = vld [vmem:[#allocation11 + $0x248] sm:$0xff]  ;;  %v1717_v56 = vld [vmem:[#allocation11 + $0x310] sm:$0xff]  ;;  %v1726_v0 = vld [vmem:[#allocation11 + $0x358] sm:$0xff] }
 0x51f   : > { %v5180_v15 = vpack.c.bf16 %v1694_v13, %v1692_v10  ;;  %v1724_v63 = vld [vmem:[#allocation11 + $0x348] sm:$0xff]  ;;  %v1734_v13 = vld [vmem:[#allocation11 + $0x398] sm:$0xff] }
 0x520   : > { %v1605_v2 = vmul.f32 %v1601_v54, %v1592_v57  ;;  %v1604_v3 = vmul.f32 %v1597_v53, %v1591_v60  ;;  %v5202_v53 = vpack.c.bf16 %v1713_v50, %v1711_v49  ;;  %v5204_v54 = vpack.c.bf16 %v1718_v52, %v1716_v51  ;;  %v1720_v57 = vld [vmem:[#allocation11 + $0x328] sm:$0xff] }
 0x521   : > { %v1732_v10 = vld [vmem:[#allocation11 + $0x388] sm:$0xff] }
 0x522   : > { %v1618_v6 = vadd.f32 %v1614_v59, %v1605_v2  ;;  %v7184_v7 = vadd.f32 %v1610_v58, %v1604_v3  ;;  %v1722_v58 = vld [vmem:[#allocation11 + $0x338] sm:$0xff]  ;;  %v5206_v59 = vpack.c.bf16 %v1717_v56, %v1715_v55  ;;  %v5212_v2 = vpack.c.bf16 %v1726_v0, %v1724_v63  ;;  %v1723_v3 = vld [vmem:[#allocation11 + $0x340] sm:$0xff]  ;;  %v2042_v51 = vld [vmem:[#allocation14 + $0x408] sm:$0xff] }
 0x523   : > { %v5208_v60 = vpack.c.bf16 %v1722_v58, %v1720_v57  ;;  %v1977_v49 = vld [vmem:[#allocation14 + $0x200] sm:$0xff]  ;;  %v2074_v52 = vld [vmem:[#allocation14 + $0x508] sm:$0xff] }
 0x524   : > { %1835 = vmatprep.mubr.f32.mxu1 %v1618_v6  ;;  %v2009_v50 = vld [vmem:[#allocation14 + $0x300] sm:$0xff]  ;;  %v2106_v57 = vld [vmem:[#allocation14 + $0x608] sm:$0xff] }
 0x525   : > { %1836 = vmatmul.mubr.f32.vlgmr.msra.gmra.mrb[0].mxu1 %v7184_v7  ;;  %v2041_v55 = vld [vmem:[#allocation14 + $0x400] sm:$0xff]  ;;  %v2138_v58 = vld [vmem:[#allocation14 + $0x708] sm:$0xff] }
 0x526   : > { %5175 = vmatpush1.bf16.msra.mxu1 %v5174_v11  ;;  %1906 = vmatprep.mubr.f32.mxu1 %v1618_v6  ;;  %v1730_v6 = vld [vmem:[#allocation11 + $0x378] sm:$0xff]  ;;  %v5214_v11 = vpack.c.bf16 %v1725_v4, %v1723_v3  ;;  %v2073_v56 = vld [vmem:[#allocation14 + $0x500] sm:$0xff]  ;;  %v2170_v63 = vld [vmem:[#allocation14 + $0x808] sm:$0xff] }
 0x527   : > { %5177 = vmatprep.subr.bf16.mxu1 %v5176_v8  ;;  %v5216_v8 = vpack.c.bf16 %v1730_v6, %v1728_v5  ;;  %v2202_v0 = vld [vmem:[#allocation14 + $0x908] sm:$0xff]  ;;  %v2201_v3 = vld [vmem:[#allocation14 + $0x900] sm:$0xff] }
 0x528   : > { %v2234_v4 = vld [vmem:[#allocation14 + $0xa08] sm:$0xff] }
 0x529   : > { %v2266_v5 = vld [vmem:[#allocation14 + $0xb08] sm:$0xff] }
 0x52a   : > { %5179 = vmatpush1.bf16.msra.mxu1 %v5178_v14  ;;  %v5218_v14 = vpack.c.bf16 %v1729_v12, %v1727_v9  ;;  %v2265_v9 = vld [vmem:[#allocation14 + $0xb00] sm:$0xff]  ;;  %v2298_v12 = vld [vmem:[#allocation14 + $0xc08] sm:$0xff] }
 0x52b   : > { %5181 = vmatprep.subr.bf16.mxu1 %v5180_v15  ;;  %v5220_v15 = vpack.c.bf16 %v1734_v13, %v1732_v10  ;;  %v2330_v10 = vld [vmem:[#allocation14 + $0xd08] sm:$0xff] }
 0x52e   : > { %5183 = vmatpush1.bf16.msra.mxu1 %v5182_v23  ;;  %v5222_v23 = vpack.c.bf16 %v1733_v19, %v1731_v16  ;;  %v2329_v16 = vld [vmem:[#allocation14 + $0xd00] sm:$0xff]  ;;  %v2886_v19 = vld [vmem:[#allocation14 + $0x1e68] sm:$0xff] }
 0x52f   : > { %5185 = vmatprep.subr.bf16.mxu1 %v5184_v24  ;;  %v5224_v24 = vpack.c.bf16 %v1738_v22, %v1736_v21  ;;  %v2362_v21 = vld [vmem:[#allocation14 + $0xe08] sm:$0xff] }
 0x530   : > { %v2394_v22 = vld [vmem:[#allocation14 + $0xf08] sm:$0xff] }
 0x532   : > { %5187 = vmatpush1.bf16.msra.mxu1 %v5186_v29  ;;  %v5226_v29 = vpack.c.bf16 %v1737_v26, %v1735_v25  ;;  %v2885_v25 = vld [vmem:[#allocation14 + $0x1e60] sm:$0xff] }
 0x533   : > { %5189 = vmatprep.subr.bf16.mxu1 %v5188_v30  ;;  %v5228_v30 = vpack.c.bf16 %v1742_v28, %v1740_v27  ;;  %v2917_v26 = vld [vmem:[#allocation14 + $0x1f60] sm:$0xff] }
 0x534   : > { %v5682_v28 = vpack.c.bf16 %v2917_v26, %v2885_v25  ;;  %v1747_v26 = vld [vmem:[#allocation13] sm:$0x3] }
 0x536   : > { %5191 = vmatpush1.bf16.msra.mxu1 %v5190_v35  ;;  %v5230_v35 = vpack.c.bf16 %v1741_v32, %v1739_v31  ;;  %v2393_v31 = vld [vmem:[#allocation14 + $0xf00] sm:$0xff]  ;;  %v2426_v32 = vld [vmem:[#allocation14 + $0x1008] sm:$0xff] }
 0x537   : > { %5193 = vmatprep.subr.bf16.mxu1 %v5192_v36  ;;  %v5232_v36 = vpack.c.bf16 %v1746_v34, %v1744_v33  ;;  %v2458_v33 = vld [vmem:[#allocation14 + $0x1108] sm:$0xff] }
 0x538   : > { %v1930_v34 = vld [vmem:[#allocation14 + $0x88] sm:$0xff] }
 0x53a   : > { %5195 = vmatpush1.bf16.msra.mxu1 %v5194_v41  ;;  %v5234_v41 = vpack.c.bf16 %v1745_v38, %v1743_v37  ;;  %v5268_v37 = vpack.c.bf16 %v2458_v33, %v2426_v32  ;;  %v2425_v38 = vld [vmem:[#allocation14 + $0x1000] sm:$0xff]  ;;  %v1980_v33 = vld [vmem:[#allocation14 + $0x218] sm:$0xff] }
 0x53b   : > { %5197 = vmatprep.subr.bf16.mxu1 %v5196_v42  ;;  %v5236_v42 = vpack.c.bf16 %v1946_v40, %v1914_v39  ;;  %v2457_v39 = vld [vmem:[#allocation14 + $0x1100] sm:$0xff] }
 0x53c   : > { %v1961_v32 = vld [vmem:[#allocation14 + $0x180] sm:$0xff] }
 0x53e   : > { %5199 = vmatpush1.bf16.msra.mxu1 %v5198_v47  ;;  %v5238_v47 = vpack.c.bf16 %v1945_v44, %v1913_v43  ;;  %v5270_v43 = vpack.c.bf16 %v2457_v39, %v2425_v38 }
 0x53f   : > { %5201 = vmatprep.subr.bf16.mxu1 %v5200_v48  ;;  %v5240_v48 = vpack.c.bf16 %v2010_v46, %v1978_v45  ;;  %v2489_v45 = vld [vmem:[#allocation14 + $0x1200] sm:$0xff] }
 0x540   : > { %v2521_v46 = vld [vmem:[#allocation14 + $0x1300] sm:$0xff] }
 0x542   : > { %5203 = vmatpush1.bf16.msra.mxu1 %v5202_v53  ;;  %v5242_v53 = vpack.c.bf16 %v2009_v50, %v1977_v49  ;;  %v5274_v49 = vpack.c.bf16 %v2521_v46, %v2489_v45 }
 0x543   : > { %5205 = vmatprep.subr.bf16.mxu1 %v5204_v54  ;;  %v5244_v54 = vpack.c.bf16 %v2074_v52, %v2042_v51  ;;  %v2553_v51 = vld [vmem:[#allocation14 + $0x1400] sm:$0xff] }
 0x544   : > { %v2585_v52 = vld [vmem:[#allocation14 + $0x1500] sm:$0xff] }
 0x546   : > { %5207 = vmatpush1.bf16.msra.mxu1 %v5206_v59  ;;  %v5246_v59 = vpack.c.bf16 %v2073_v56, %v2041_v55  ;;  %v5278_v55 = vpack.c.bf16 %v2585_v52, %v2553_v51  ;;  %v2058_v51 = vld [vmem:[#allocation14 + $0x488] sm:$0xff] }
 0x547   : > { %5209 = vmatprep.subr.bf16.mxu1 %v5208_v60  ;;  %v5248_v60 = vpack.c.bf16 %v2138_v58, %v2106_v57  ;;  %v2617_v57 = vld [vmem:[#allocation14 + $0x1600] sm:$0xff]  ;;  %v2090_v52 = vld [vmem:[#allocation14 + $0x588] sm:$0xff] }
 0x548   : > { %v2649_v58 = vld [vmem:[#allocation14 + $0x1700] sm:$0xff] }
 0x54a   : > { %5211 = vmatpush1.bf16.msra.mxu1 %v5210_v1  ;;  %v5250_v1 = vpack.c.bf16 %v2137_v62, %v2105_v61  ;;  %v5282_v61 = vpack.c.bf16 %v2649_v58, %v2617_v57  ;;  %v5756_v58 = vpack.c.bf16 %v2090_v52, %v2058_v51  ;;  %v2396_v51 = vld [vmem:[#allocation14 + $0xf18] sm:$0xff]  ;;  %v2378_v52 = vld [vmem:[#allocation14 + $0xe88] sm:$0xff] }
 0x54b   : > { %5213 = vmatprep.subr.bf16.mxu1 %v5212_v2  ;;  %v2169_v2 = vld [vmem:[#allocation14 + $0x800] sm:$0xff] }
 0x54c   : > { %v5254_v6 = vpack.c.bf16 %v2201_v3, %v2169_v2 }
 0x54e   : > { %5215 = vmatpush1.bf16.msra.mxu1 %v5214_v11  ;;  %v5256_v11 = vpack.c.bf16 %v2266_v5, %v2234_v4  ;;  %v2745_v4 = vld [vmem:[#allocation14 + $0x1a00] sm:$0xff] }
 0x54f   : > { %5217 = vmatprep.subr.bf16.mxu1 %v5216_v8  ;;  %v2233_v8 = vld [vmem:[#allocation14 + $0xa00] sm:$0xff] }
 0x550   : > { %v5258_v13 = vpack.c.bf16 %v2265_v9, %v2233_v8  ;;  %v2777_v5 = vld [vmem:[#allocation14 + $0x1b00] sm:$0xff] }
 0x551   : > { %v5290_v8 = vpack.c.bf16 %v2777_v5, %v2745_v4 }
 0x552   : > { %5219 = vmatpush1.bf16.msra.mxu1 %v5218_v14  ;;  %v5260_v14 = vpack.c.bf16 %v2330_v10, %v2298_v12  ;;  %v2809_v12 = vld [vmem:[#allocation14 + $0x1c00] sm:$0xff] }
 0x553   : > { %5221 = vmatprep.subr.bf16.mxu1 %v5220_v15  ;;  %v2297_v15 = vld [vmem:[#allocation14 + $0xc00] sm:$0xff] }
 0x554   : > { %v5262_v27 = vpack.c.bf16 %v2329_v16, %v2297_v15  ;;  %v2841_v10 = vld [vmem:[#allocation14 + $0x1d00] sm:$0xff] }
 0x555   : > { %v5294_v15 = vpack.c.bf16 %v2841_v10, %v2809_v12  ;;  %v2186_v12 = vld [vmem:[#allocation14 + $0x888] sm:$0xff] }
 0x556   : > { %5223 = vmatpush1.bf16.msra.mxu1 %v5222_v23  ;;  %v2918_v23 = vld [vmem:[#allocation14 + $0x1f68] sm:$0xff] }
 0x557   : > { %5225 = vmatprep.subr.bf16.mxu1 %v5224_v24  ;;  %v5680_v24 = vpack.c.bf16 %v2918_v23, %v2886_v19  ;;  %v2873_v19 = vld [vmem:[#allocation14 + $0x1e00] sm:$0xff]  ;;  %v1948_v23 = vld [vmem:[#allocation14 + $0x118] sm:$0xff]  ;;  %v2218_v10 = vld [vmem:[#allocation14 + $0x988] sm:$0xff] }
 0x559   : > { %5681 = vmatprep.subr.bf16.mxu0 %v5680_v24 }
 0x55a   : > { %5227 = vmatpush1.bf16.msra.mxu1 %v5226_v29  ;;  %v5264_v29 = vpack.c.bf16 %v2394_v22, %v2362_v21  ;;  %5683 = vmatpush1.bf16.msra.mxu0 %v5682_v28  ;;  %v2905_v21 = vld [vmem:[#allocation14 + $0x1f00] sm:$0xff]  ;;  %v1916_v22 = vld [vmem:[#allocation14 + $0x18] sm:$0xff]  ;;  %v1915_v28 = vld [vmem:[#allocation14 + $0x10] sm:$0xff] }
 0x55b   : > { %5229 = vmatprep.subr.bf16.mxu1 %v5228_v30  ;;  %v2361_v30 = vld [vmem:[#allocation14 + $0xe00] sm:$0xff]  ;;  %v5298_v24 = vpack.c.bf16 %v2905_v21, %v2873_v19  ;;  %v5300_v25 = vpack.c.bf16 %v1948_v23, %v1916_v22  ;;  %v5764_v21 = vpack.c.bf16 %v2218_v10, %v2186_v12  ;;  %v2524_v12 = vld [vmem:[#allocation14 + $0x1318] sm:$0xff]  ;;  %v2506_v10 = vld [vmem:[#allocation14 + $0x1288] sm:$0xff] }
 0x55c   : > { %v2185_v22 = vld [vmem:[#allocation14 + $0x880] sm:$0xff] }
 0x55d   : > { %v2217_v23 = vld [vmem:[#allocation14 + $0x980] sm:$0xff] }
 0x55e   : > { %5231 = vmatpush1.bf16.msra.mxu1 %v5230_v35  ;;  %v5266_v35 = vpack.c.bf16 %v2393_v31, %v2361_v30  ;;  %v1754_v30 = vrot.slane %v1747_v26, %v7157_v18  ;;  %v1929_v31 = vld [vmem:[#allocation14 + $0x80] sm:$0xff] }
 0x55f   : > { %5233 = vmatprep.subr.bf16.mxu1 %v5232_v36  ;;  %v1962_v36 = vld [vmem:[#allocation14 + $0x188] sm:$0xff] }
 0x560   : > { %v5748_v40 = vpack.c.bf16 %v1962_v36, %v1930_v34  ;;  %v1994_v36 = vld [vmem:[#allocation14 + $0x288] sm:$0xff] }
 0x562   : > { %5235 = vmatpush1.bf16.msra.mxu1 %v5234_v41  ;;  %v2490_v41 = vld [vmem:[#allocation14 + $0x1208] sm:$0xff]  ;;  %5749 = vmatprep.subr.bf16.mxu0 %v5748_v40 }
 0x563   : > { %5237 = vmatprep.subr.bf16.mxu1 %v5236_v42  ;;  %v2522_v42 = vld [vmem:[#allocation14 + $0x1308] sm:$0xff] }
 0x564   : > { %v5272_v44 = vpack.c.bf16 %v2522_v42, %v2490_v41  ;;  %v5750_v41 = vpack.c.bf16 %v1961_v32, %v1929_v31  ;;  %v1979_v42 = vld [vmem:[#allocation14 + $0x210] sm:$0xff] }
 0x565   : > { %1907 = vmatmul.mubr.f32.vlgmr.msra.gmra.mrb[2].mxu1 %v7184_v7  ;;  %v5252_v7 = vpack.c.bf16 %v2202_v0, %v2170_v63  ;;  %v2681_v63 = vld [vmem:[#allocation14 + $0x1800] sm:$0xff]  ;;  %v2267_v31 = vld [vmem:[#allocation14 + $0xb10] sm:$0xff] }
 0x566   : > { %5239 = vmatpush1.bf16.msra.mxu1 %v5238_v47  ;;  %v2554_v47 = vld [vmem:[#allocation14 + $0x1408] sm:$0xff]  ;;  %v2713_v0 = vld [vmem:[#allocation14 + $0x1900] sm:$0xff] }
 0x567   : > { %5241 = vmatprep.subr.bf16.mxu1 %v5240_v48  ;;  %v2586_v48 = vld [vmem:[#allocation14 + $0x1508] sm:$0xff]  ;;  %v5286_v2 = vpack.c.bf16 %v2713_v0, %v2681_v63 }
 0x568   : > { %v5276_v50 = vpack.c.bf16 %v2586_v48, %v2554_v47  ;;  %v1993_v47 = vld [vmem:[#allocation14 + $0x280] sm:$0xff]  ;;  %v2122_v63 = vld [vmem:[#allocation14 + $0x688] sm:$0xff] }
 0x569   : > { %v2025_v48 = vld [vmem:[#allocation14 + $0x380] sm:$0xff]  ;;  %v2154_v0 = vld [vmem:[#allocation14 + $0x788] sm:$0xff] }
 0x56a   : > { %5243 = vmatpush1.bf16.msra.mxu1 %v5242_v53  ;;  %v2618_v53 = vld [vmem:[#allocation14 + $0x1608] sm:$0xff]  ;;  %v5760_v5 = vpack.c.bf16 %v2154_v0, %v2122_v63  ;;  %v2460_v63 = vld [vmem:[#allocation14 + $0x1118] sm:$0xff] }
 0x56b   : > { %5245 = vmatprep.subr.bf16.mxu1 %v5244_v54  ;;  %v2650_v54 = vld [vmem:[#allocation14 + $0x1708] sm:$0xff] }
 0x56c   : > { %v5280_v56 = vpack.c.bf16 %v2650_v54, %v2618_v53  ;;  %v5754_v54 = vpack.c.bf16 %v2025_v48, %v1993_v47  ;;  %v2313_v48 = vld [vmem:[#allocation14 + $0xc80] sm:$0xff]  ;;  %v2442_v0 = vld [vmem:[#allocation14 + $0x1088] sm:$0xff] }
 0x56e   : > { %5247 = vmatpush1.bf16.msra.mxu1 %v5246_v59  ;;  %v2682_v59 = vld [vmem:[#allocation14 + $0x1808] sm:$0xff] }
 0x56f   : > { %5249 = vmatprep.subr.bf16.mxu1 %v5248_v60  ;;  %v2714_v60 = vld [vmem:[#allocation14 + $0x1908] sm:$0xff] }
 0x570   : > { %v5284_v62 = vpack.c.bf16 %v2714_v60, %v2682_v59  ;;  %v2057_v59 = vld [vmem:[#allocation14 + $0x480] sm:$0xff] }
 0x571   : > { %v2089_v60 = vld [vmem:[#allocation14 + $0x580] sm:$0xff] }
 0x572   : > { %5251 = vmatpush1.bf16.msra.mxu1 %v5250_v1  ;;  %v2746_v1 = vld [vmem:[#allocation14 + $0x1a08] sm:$0xff] }
 0x573   : > { %5253 = vmatprep.subr.bf16.mxu1 %v5252_v7  ;;  %v2778_v7 = vld [vmem:[#allocation14 + $0x1b08] sm:$0xff] }
 0x574   : > { %v5288_v3 = vpack.c.bf16 %v2778_v7, %v2746_v1  ;;  %v5758_v7 = vpack.c.bf16 %v2089_v60, %v2057_v59  ;;  %v2377_v60 = vld [vmem:[#allocation14 + $0xe80] sm:$0xff] }
 0x576   : > { %5255 = vmatpush1.bf16.msra.mxu1 %v5254_v6  ;;  %v2810_v6 = vld [vmem:[#allocation14 + $0x1c08] sm:$0xff] }
 0x577   : > { %5257 = vmatprep.subr.bf16.mxu1 %v5256_v11  ;;  %v2842_v11 = vld [vmem:[#allocation14 + $0x1d08] sm:$0xff] }
 0x578   : > { %v5292_v9 = vpack.c.bf16 %v2842_v11, %v2810_v6  ;;  %v2121_v6 = vld [vmem:[#allocation14 + $0x680] sm:$0xff] }
 0x579   : > { %v2153_v11 = vld [vmem:[#allocation14 + $0x780] sm:$0xff] }
 0x57a   : > { %5259 = vmatpush1.bf16.msra.mxu1 %v5258_v13  ;;  %v2874_v13 = vld [vmem:[#allocation14 + $0x1e08] sm:$0xff] }
 0x57b   : > { %5261 = vmatprep.subr.bf16.mxu1 %v5260_v14  ;;  %v2906_v14 = vld [vmem:[#allocation14 + $0x1f08] sm:$0xff] }
 0x57c   : > { %v5296_v16 = vpack.c.bf16 %v2906_v14, %v2874_v13  ;;  %v5762_v14 = vpack.c.bf16 %v2153_v11, %v2121_v6  ;;  %v2441_v11 = vld [vmem:[#allocation14 + $0x1080] sm:$0xff] }
 0x57e   : > { %5263 = vmatpush1.bf16.msra.mxu1 %v5262_v27  ;;  %v1758_v27 = vrot.slane %v1747_v26, %v7160_v20  ;;  %v2250_v26 = vld [vmem:[#allocation14 + $0xa88] sm:$0xff] }
 0x57f   : > { %5265 = vmatprep.subr.bf16.mxu1 %v5264_v29  ;;  %v1947_v29 = vld [vmem:[#allocation14 + $0x110] sm:$0xff] }
 0x580   : > { %v5302_v40 = vpack.c.bf16 %v1947_v29, %v1915_v28  ;;  %v5766_v29 = vpack.c.bf16 %v2217_v23, %v2185_v22  ;;  %v2505_v23 = vld [vmem:[#allocation14 + $0x1280] sm:$0xff] }
 0x582   : > { %5267 = vmatpush1.bf16.msra.mxu1 %v5266_v35  ;;  %v2012_v35 = vld [vmem:[#allocation14 + $0x318] sm:$0xff] }
 0x583   : > { %5269 = vmatprep.subr.bf16.mxu1 %v5268_v37  ;;  %v2026_v37 = vld [vmem:[#allocation14 + $0x388] sm:$0xff]  ;;  %v5304_v45 = vpack.c.bf16 %v2012_v35, %v1980_v33  ;;  %v2281_v35 = vld [vmem:[#allocation14 + $0xb80] sm:$0xff] }
 0x584   : > { %v5752_v46 = vpack.c.bf16 %v2026_v37, %v1994_v36  ;;  %v2300_v36 = vld [vmem:[#allocation14 + $0xc18] sm:$0xff] }
 0x585   : > { %v2332_v37 = vld [vmem:[#allocation14 + $0xd18] sm:$0xff] }
 0x586   : > { %5271 = vmatpush1.bf16.msra.mxu1 %v5270_v43  ;;  %v2011_v43 = vld [vmem:[#allocation14 + $0x310] sm:$0xff] }
 0x587   : > { %5273 = vmatprep.subr.bf16.mxu1 %v5272_v44  ;;  %v5306_v53 = vpack.c.bf16 %v2011_v43, %v1979_v42  ;;  %v2299_v43 = vld [vmem:[#allocation14 + $0xc10] sm:$0xff] }
 0x58a   : > { %5275 = vmatpush1.bf16.msra.mxu1 %v5274_v49  ;;  %v2044_v49 = vld [vmem:[#allocation14 + $0x418] sm:$0xff] }
 0x58b   : > { %5277 = vmatprep.subr.bf16.mxu1 %v5276_v50  ;;  %v2076_v50 = vld [vmem:[#allocation14 + $0x518] sm:$0xff] }
 0x58c   : > { %v5308_v57 = vpack.c.bf16 %v2076_v50, %v2044_v49  ;;  %v2345_v49 = vld [vmem:[#allocation14 + $0xd80] sm:$0xff]  ;;  %v2364_v50 = vld [vmem:[#allocation14 + $0xe18] sm:$0xff] }
 0x58e   : > { %5279 = vmatpush1.bf16.msra.mxu1 %v5278_v55  ;;  %v2043_v55 = vld [vmem:[#allocation14 + $0x410] sm:$0xff] }
 0x58f   : > { %5281 = vmatprep.subr.bf16.mxu1 %v5280_v56  ;;  %v2075_v56 = vld [vmem:[#allocation14 + $0x510] sm:$0xff] }
 0x590   : > { %v5310_v1 = vpack.c.bf16 %v2075_v56, %v2043_v55  ;;  %v5774_v55 = vpack.c.bf16 %v2345_v49, %v2313_v48  ;;  %v2363_v56 = vld [vmem:[#allocation14 + $0xe10] sm:$0xff]  ;;  %v2633_v49 = vld [vmem:[#allocation14 + $0x1680] sm:$0xff] }
 0x592   : > { %5283 = vmatpush1.bf16.msra.mxu1 %v5282_v61  ;;  %v2108_v61 = vld [vmem:[#allocation14 + $0x618] sm:$0xff] }
 0x593   : > { %5285 = vmatprep.subr.bf16.mxu1 %v5284_v62  ;;  %v2140_v62 = vld [vmem:[#allocation14 + $0x718] sm:$0xff] }
 0x594   : > { %v5312_v4 = vpack.c.bf16 %v2140_v62, %v2108_v61  ;;  %v2409_v61 = vld [vmem:[#allocation14 + $0xf80] sm:$0xff]  ;;  %v2428_v62 = vld [vmem:[#allocation14 + $0x1018] sm:$0xff] }
 0x596   : > { %5287 = vmatpush1.bf16.msra.mxu1 %v5286_v2  ;;  %v2107_v2 = vld [vmem:[#allocation14 + $0x610] sm:$0xff] }
 0x597   : > { %5289 = vmatprep.subr.bf16.mxu1 %v5288_v3  ;;  %v2139_v3 = vld [vmem:[#allocation14 + $0x710] sm:$0xff] }
 0x598   : > { %v5314_v13 = vpack.c.bf16 %v2139_v3, %v2107_v2  ;;  %v5778_v2 = vpack.c.bf16 %v2409_v61, %v2377_v60  ;;  %v2427_v3 = vld [vmem:[#allocation14 + $0x1010] sm:$0xff]  ;;  %v2697_v61 = vld [vmem:[#allocation14 + $0x1880] sm:$0xff] }
 0x59a   : > { %5291 = vmatpush1.bf16.msra.mxu1 %v5290_v8  ;;  %v2172_v8 = vld [vmem:[#allocation14 + $0x818] sm:$0xff] }
 0x59b   : > { %5293 = vmatprep.subr.bf16.mxu1 %v5292_v9  ;;  %v2204_v9 = vld [vmem:[#allocation14 + $0x918] sm:$0xff] }
 0x59c   : > { %v5316_v19 = vpack.c.bf16 %v2204_v9, %v2172_v8  ;;  %v2473_v8 = vld [vmem:[#allocation14 + $0x1180] sm:$0xff]  ;;  %v2492_v9 = vld [vmem:[#allocation14 + $0x1218] sm:$0xff] }
 0x59e   : > { %5295 = vmatpush1.bf16.msra.mxu1 %v5294_v15  ;;  %v2171_v15 = vld [vmem:[#allocation14 + $0x810] sm:$0xff] }
 0x59f   : > { %5297 = vmatprep.subr.bf16.mxu1 %v5296_v16  ;;  %v2203_v16 = vld [vmem:[#allocation14 + $0x910] sm:$0xff] }
 0x5a0   : > { %v5318_v28 = vpack.c.bf16 %v2203_v16, %v2171_v15  ;;  %v5782_v15 = vpack.c.bf16 %v2473_v8, %v2441_v11  ;;  %v2491_v16 = vld [vmem:[#allocation14 + $0x1210] sm:$0xff]  ;;  %v2761_v8 = vld [vmem:[#allocation14 + $0x1a80] sm:$0xff] }
 0x5a2   : > { %5299 = vmatpush1.bf16.msra.mxu1 %v5298_v24  ;;  %v2236_v24 = vld [vmem:[#allocation14 + $0xa18] sm:$0xff] }
 0x5a3   : > { %5301 = vmatprep.subr.bf16.mxu1 %v5300_v25  ;;  %v2268_v25 = vld [vmem:[#allocation14 + $0xb18] sm:$0xff] }
 0x5a4   : > { %v5320_v32 = vpack.c.bf16 %v2268_v25, %v2236_v24  ;;  %v2537_v24 = vld [vmem:[#allocation14 + $0x1380] sm:$0xff]  ;;  %v2556_v25 = vld [vmem:[#allocation14 + $0x1418] sm:$0xff] }
 0x5f8   : > { %v1837_v34 = vpop.f32.mrb[0].mxu1 }
 0x5f9   : > { %v1839_v38 = vpop.f32.mrb[1].mxu1  ;;  %v7192_v44 = vadd.f32 %v1837_v34, %v1754_v30  ;;  %v2235_v30 = vld [vmem:[#allocation14 + $0xa10] sm:$0xff]  ;;  %v2249_v34 = vld [vmem:[#allocation14 + $0xa80] sm:$0xff] }
 0x5fa   : > { %v7190_v39 = vadd.f32 %v1839_v38, %v1758_v27  ;;  %v2282_v27 = vld [vmem:[#allocation14 + $0xb88] sm:$0xff]  ;;  %v5770_v42 = vpack.c.bf16 %v2281_v35, %v2249_v34  ;;  %v2569_v35 = vld [vmem:[#allocation14 + $0x1480] sm:$0xff] }
 0x5fb   : > { %v5768_v33 = vpack.c.bf16 %v2282_v27, %v2250_v26  ;;  %v2314_v38 = vld [vmem:[#allocation14 + $0xc88] sm:$0xff]  ;;  %v2588_v26 = vld [vmem:[#allocation14 + $0x1518] sm:$0xff] }
 0x5fc   : > { %3169 = vmatprep.mubr.f32.mxu1 %v7190_v39  ;;  %3631 = vmatprep.mubr.f32.mxu0 %v7190_v39  ;;  %v2570_v27 = vld [vmem:[#allocation14 + $0x1488] sm:$0xff] }
 0x5fd   : > { %3170 = vmatmul.mubr.f32.vlgmr.msra.gmra.mrb[4].mxu1 %v7192_v44  ;;  %3632 = vmatmul.mubr.f32.vlgmr.msra.gmra.mrb[2].mxu0 %v7192_v44 }
 0x5fe   : > { %5303 = vmatpush1.bf16.msra.mxu1 %v5302_v40  ;;  %5751 = vmatpush1.bf16.msra.mxu0 %v5750_v41  ;;  %v2346_v40 = vld [vmem:[#allocation14 + $0xd88] sm:$0xff]  ;;  %v5322_v41 = vpack.c.bf16 %v2267_v31, %v2235_v30  ;;  %v5786_v30 = vpack.c.bf16 %v2537_v24, %v2505_v23  ;;  %v2555_v31 = vld [vmem:[#allocation14 + $0x1410] sm:$0xff]  ;;  %v2825_v24 = vld [vmem:[#allocation14 + $0x1c80] sm:$0xff] }
 0x5ff   : > { %5305 = vmatprep.subr.bf16.mxu1 %v5304_v45  ;;  %5753 = vmatprep.subr.bf16.mxu0 %v5752_v46  ;;  %v2331_v45 = vld [vmem:[#allocation14 + $0xd10] sm:$0xff]  ;;  %v5324_v46 = vpack.c.bf16 %v2332_v37, %v2300_v36  ;;  %v5772_v47 = vpack.c.bf16 %v2346_v40, %v2314_v38  ;;  %v2601_v36 = vld [vmem:[#allocation14 + $0x1580] sm:$0xff]  ;;  %v2620_v37 = vld [vmem:[#allocation14 + $0x1618] sm:$0xff] }
 0x600   : > { %v2652_v38 = vld [vmem:[#allocation14 + $0x1718] sm:$0xff]  ;;  %v2634_v40 = vld [vmem:[#allocation14 + $0x1688] sm:$0xff] }
 0x602   : > { %5307 = vmatpush1.bf16.msra.mxu1 %v5306_v53  ;;  %5755 = vmatpush1.bf16.msra.mxu0 %v5754_v54  ;;  %v2410_v53 = vld [vmem:[#allocation14 + $0xf88] sm:$0xff]  ;;  %v5326_v54 = vpack.c.bf16 %v2331_v45, %v2299_v43  ;;  %v5790_v43 = vpack.c.bf16 %v2601_v36, %v2569_v35  ;;  %v2619_v45 = vld [vmem:[#allocation14 + $0x1610] sm:$0xff] }
 0x603   : > { %5309 = vmatprep.subr.bf16.mxu1 %v5308_v57  ;;  %5757 = vmatprep.subr.bf16.mxu0 %v5756_v58  ;;  %v2395_v57 = vld [vmem:[#allocation14 + $0xf10] sm:$0xff]  ;;  %v5328_v58 = vpack.c.bf16 %v2396_v51, %v2364_v50  ;;  %v5776_v59 = vpack.c.bf16 %v2410_v53, %v2378_v52  ;;  %v2665_v50 = vld [vmem:[#allocation14 + $0x1780] sm:$0xff]  ;;  %v2684_v51 = vld [vmem:[#allocation14 + $0x1818] sm:$0xff] }
 0x604   : > { %v2716_v52 = vld [vmem:[#allocation14 + $0x1918] sm:$0xff]  ;;  %v2698_v53 = vld [vmem:[#allocation14 + $0x1888] sm:$0xff] }
 0x606   : > { %5311 = vmatpush1.bf16.msra.mxu1 %v5310_v1  ;;  %5759 = vmatpush1.bf16.msra.mxu0 %v5758_v7  ;;  %v2474_v1 = vld [vmem:[#allocation14 + $0x1188] sm:$0xff]  ;;  %v5330_v7 = vpack.c.bf16 %v2395_v57, %v2363_v56  ;;  %v5794_v56 = vpack.c.bf16 %v2665_v50, %v2633_v49  ;;  %v2683_v57 = vld [vmem:[#allocation14 + $0x1810] sm:$0xff] }
 0x607   : > { %5313 = vmatprep.subr.bf16.mxu1 %v5312_v4  ;;  %5761 = vmatprep.subr.bf16.mxu0 %v5760_v5  ;;  %v2459_v4 = vld [vmem:[#allocation14 + $0x1110] sm:$0xff]  ;;  %v5332_v5 = vpack.c.bf16 %v2460_v63, %v2428_v62  ;;  %v5780_v6 = vpack.c.bf16 %v2474_v1, %v2442_v0  ;;  %v2729_v62 = vld [vmem:[#allocation14 + $0x1980] sm:$0xff]  ;;  %v2748_v63 = vld [vmem:[#allocation14 + $0x1a18] sm:$0xff] }
 0x608   : > { %v2780_v0 = vld [vmem:[#allocation14 + $0x1b18] sm:$0xff]  ;;  %v2762_v1 = vld [vmem:[#allocation14 + $0x1a88] sm:$0xff] }
 0x60a   : > { %5315 = vmatpush1.bf16.msra.mxu1 %v5314_v13  ;;  %5763 = vmatpush1.bf16.msra.mxu0 %v5762_v14  ;;  %v2538_v13 = vld [vmem:[#allocation14 + $0x1388] sm:$0xff]  ;;  %v5334_v14 = vpack.c.bf16 %v2459_v4, %v2427_v3  ;;  %v5798_v3 = vpack.c.bf16 %v2729_v62, %v2697_v61  ;;  %v2747_v4 = vld [vmem:[#allocation14 + $0x1a10] sm:$0xff] }
 0x60b   : > { %5317 = vmatprep.subr.bf16.mxu1 %v5316_v19  ;;  %5765 = vmatprep.subr.bf16.mxu0 %v5764_v21  ;;  %v2523_v19 = vld [vmem:[#allocation14 + $0x1310] sm:$0xff]  ;;  %v5336_v21 = vpack.c.bf16 %v2524_v12, %v2492_v9  ;;  %v5784_v22 = vpack.c.bf16 %v2538_v13, %v2506_v10  ;;  %v2793_v9 = vld [vmem:[#allocation14 + $0x1b80] sm:$0xff]  ;;  %v2812_v12 = vld [vmem:[#allocation14 + $0x1c18] sm:$0xff] }
 0x60c   : > { %v2844_v10 = vld [vmem:[#allocation14 + $0x1d18] sm:$0xff]  ;;  %v2826_v13 = vld [vmem:[#allocation14 + $0x1c88] sm:$0xff] }
 0x60d   : > { %v1998_v61 = vld [vmem:[#allocation14 + $0x2a8] sm:$0xff] }
 0x60e   : > { %5319 = vmatpush1.bf16.msra.mxu1 %v5318_v28  ;;  %5767 = vmatpush1.bf16.msra.mxu0 %v5766_v29  ;;  %v2602_v28 = vld [vmem:[#allocation14 + $0x1588] sm:$0xff]  ;;  %v5338_v29 = vpack.c.bf16 %v2523_v19, %v2491_v16  ;;  %v5802_v16 = vpack.c.bf16 %v2793_v9, %v2761_v8  ;;  %v2811_v19 = vld [vmem:[#allocation14 + $0x1c10] sm:$0xff] }
 0x60f   : > { %5321 = vmatprep.subr.bf16.mxu1 %v5320_v32  ;;  %5769 = vmatprep.subr.bf16.mxu0 %v5768_v33  ;;  %v2587_v32 = vld [vmem:[#allocation14 + $0x1510] sm:$0xff]  ;;  %v5340_v33 = vpack.c.bf16 %v2588_v26, %v2556_v25  ;;  %v5788_v34 = vpack.c.bf16 %v2602_v28, %v2570_v27  ;;  %v2857_v25 = vld [vmem:[#allocation14 + $0x1d80] sm:$0xff]  ;;  %v2876_v26 = vld [vmem:[#allocation14 + $0x1e18] sm:$0xff] }
 0x610   : > { %v2908_v27 = vld [vmem:[#allocation14 + $0x1f18] sm:$0xff]  ;;  %v2890_v28 = vld [vmem:[#allocation14 + $0x1e88] sm:$0xff] }
 0x611   : > { %v5360_v35 = vpack.c.bf16 %v2908_v27, %v2876_v26  ;;  %v2030_v62 = vld [vmem:[#allocation14 + $0x3a8] sm:$0xff] }
 0x612   : > { %5323 = vmatpush1.bf16.msra.mxu1 %v5322_v41  ;;  %5771 = vmatpush1.bf16.msra.mxu0 %v5770_v42  ;;  %v2666_v41 = vld [vmem:[#allocation14 + $0x1788] sm:$0xff]  ;;  %v5342_v42 = vpack.c.bf16 %v2587_v32, %v2555_v31  ;;  %v5806_v32 = vpack.c.bf16 %v2857_v25, %v2825_v24 }
 0x613   : > { %5325 = vmatprep.subr.bf16.mxu1 %v5324_v46  ;;  %5773 = vmatprep.subr.bf16.mxu0 %v5772_v47  ;;  %v2651_v46 = vld [vmem:[#allocation14 + $0x1710] sm:$0xff]  ;;  %v5344_v47 = vpack.c.bf16 %v2652_v38, %v2620_v37  ;;  %v5792_v48 = vpack.c.bf16 %v2666_v41, %v2634_v40  ;;  %v2889_v37 = vld [vmem:[#allocation14 + $0x1e80] sm:$0xff]  ;;  %v1918_v40 = vld [vmem:[#allocation14 + $0x28] sm:$0xff] }
 0x614   : > { %v2921_v38 = vld [vmem:[#allocation14 + $0x1f80] sm:$0xff]  ;;  %v1950_v41 = vld [vmem:[#allocation14 + $0x128] sm:$0xff] }
 0x615   : > { %v5364_v49 = vpack.c.bf16 %v1950_v41, %v1918_v40  ;;  %v2062_v8 = vld [vmem:[#allocation14 + $0x4a8] sm:$0xff]  ;;  %v2173_v41 = vld [vmem:[#allocation14 + $0x820] sm:$0xff] }
 0x616   : > { %5327 = vmatpush1.bf16.msra.mxu1 %v5326_v54  ;;  %5775 = vmatpush1.bf16.msra.mxu0 %v5774_v55  ;;  %v2730_v54 = vld [vmem:[#allocation14 + $0x1988] sm:$0xff]  ;;  %v5346_v55 = vpack.c.bf16 %v2651_v46, %v2619_v45 }
 0x617   : > { %5329 = vmatprep.subr.bf16.mxu1 %v5328_v58  ;;  %5777 = vmatprep.subr.bf16.mxu0 %v5776_v59  ;;  %v2715_v58 = vld [vmem:[#allocation14 + $0x1910] sm:$0xff]  ;;  %v5348_v59 = vpack.c.bf16 %v2716_v52, %v2684_v51  ;;  %v5796_v60 = vpack.c.bf16 %v2730_v54, %v2698_v53  ;;  %v1917_v54 = vld [vmem:[#allocation14 + $0x20] sm:$0xff]  ;;  %v2094_v9 = vld [vmem:[#allocation14 + $0x5a8] sm:$0xff] }
 0x618   : > { %v2126_v24 = vld [vmem:[#allocation14 + $0x6a8] sm:$0xff] }
 0x619   : > { %v2158_v25 = vld [vmem:[#allocation14 + $0x7a8] sm:$0xff] }
 0x61a   : > { %5331 = vmatpush1.bf16.msra.mxu1 %v5330_v7  ;;  %5779 = vmatpush1.bf16.msra.mxu0 %v5778_v2  ;;  %v2794_v7 = vld [vmem:[#allocation14 + $0x1b88] sm:$0xff]  ;;  %v5350_v2 = vpack.c.bf16 %v2715_v58, %v2683_v57  ;;  %v1933_v57 = vld [vmem:[#allocation14 + $0xa0] sm:$0xff] }
 0x61b   : > { %5333 = vmatprep.subr.bf16.mxu1 %v5332_v5  ;;  %5781 = vmatprep.subr.bf16.mxu0 %v5780_v6  ;;  %v2779_v5 = vld [vmem:[#allocation14 + $0x1b10] sm:$0xff]  ;;  %v5352_v6 = vpack.c.bf16 %v2780_v0, %v2748_v63  ;;  %v5800_v11 = vpack.c.bf16 %v2794_v7, %v2762_v1  ;;  %v1965_v58 = vld [vmem:[#allocation14 + $0x1a0] sm:$0xff] }
 0x61c   : > { %v5878_v0 = vpack.c.bf16 %v1965_v58, %v1933_v57  ;;  %v1981_v1 = vld [vmem:[#allocation14 + $0x220] sm:$0xff] }
 0x61d   : > { %v2013_v7 = vld [vmem:[#allocation14 + $0x320] sm:$0xff] }
 0x61e   : > { %5335 = vmatpush1.bf16.msra.mxu1 %v5334_v14  ;;  %5783 = vmatpush1.bf16.msra.mxu0 %v5782_v15  ;;  %v2858_v14 = vld [vmem:[#allocation14 + $0x1d88] sm:$0xff]  ;;  %v5354_v15 = vpack.c.bf16 %v2779_v5, %v2747_v4  ;;  %v5880_v5 = vpack.c.bf16 %v2030_v62, %v1998_v61  ;;  %v2269_v57 = vld [vmem:[#allocation14 + $0xb20] sm:$0xff] }
 0x61f   : > { %5337 = vmatprep.subr.bf16.mxu1 %v5336_v21  ;;  %5785 = vmatprep.subr.bf16.mxu0 %v5784_v22  ;;  %v2843_v21 = vld [vmem:[#allocation14 + $0x1d10] sm:$0xff]  ;;  %v5356_v22 = vpack.c.bf16 %v2844_v10, %v2812_v12  ;;  %v5804_v23 = vpack.c.bf16 %v2858_v14, %v2826_v13  ;;  %v5370_v12 = vpack.c.bf16 %v2013_v7, %v1981_v1  ;;  %v2045_v13 = vld [vmem:[#allocation14 + $0x420] sm:$0xff]  ;;  %v2302_v62 = vld [vmem:[#allocation14 + $0xc28] sm:$0xff] }
 0x620   : > { %v5358_v31 = vpack.c.bf16 %v2843_v21, %v2811_v19  ;;  %v2077_v14 = vld [vmem:[#allocation14 + $0x520] sm:$0xff]  ;;  %v2110_v19 = vld [vmem:[#allocation14 + $0x628] sm:$0xff] }
 0x621   : > { %v5374_v26 = vpack.c.bf16 %v2077_v14, %v2045_v13  ;;  %v2285_v61 = vld [vmem:[#allocation14 + $0xba0] sm:$0xff]  ;;  %v2350_v1 = vld [vmem:[#allocation14 + $0xda8] sm:$0xff] }
 0x622   : > { %5339 = vmatpush1.bf16.msra.mxu1 %v5338_v29  ;;  %5787 = vmatpush1.bf16.msra.mxu0 %v5786_v30  ;;  %v2922_v29 = vld [vmem:[#allocation14 + $0x1f88] sm:$0xff]  ;;  %v1748_v30 = vld [vmem:[#allocation13 + $0x2] sm:$0x3] }
 0x623   : > { %5341 = vmatprep.subr.bf16.mxu1 %v5340_v33  ;;  %5789 = vmatprep.subr.bf16.mxu0 %v5788_v34  ;;  %v2875_v33 = vld [vmem:[#allocation14 + $0x1e10] sm:$0xff]  ;;  %v5808_v36 = vpack.c.bf16 %v2922_v29, %v2890_v28  ;;  %v1766_v45 = vrot.slane %v1748_v30, %v7160_v20  ;;  %v2109_v28 = vld [vmem:[#allocation14 + $0x620] sm:$0xff]  ;;  %v2414_v13 = vld [vmem:[#allocation14 + $0xfa8] sm:$0xff] }
 0x624   : > { %v2907_v34 = vld [vmem:[#allocation14 + $0x1f10] sm:$0xff]  ;;  %v2141_v29 = vld [vmem:[#allocation14 + $0x720] sm:$0xff] }
 0x625   : > { %v5362_v46 = vpack.c.bf16 %v2907_v34, %v2875_v33  ;;  %v2157_v33 = vld [vmem:[#allocation14 + $0x7a0] sm:$0xff]  ;;  %v2174_v34 = vld [vmem:[#allocation14 + $0x828] sm:$0xff] }
 0x626   : > { %5343 = vmatpush1.bf16.msra.mxu1 %v5342_v42  ;;  %5791 = vmatpush1.bf16.msra.mxu0 %v5790_v43  ;;  %v1934_v42 = vld [vmem:[#allocation14 + $0xa8] sm:$0xff] }
 0x627   : > { %5345 = vmatprep.subr.bf16.mxu1 %v5344_v47  ;;  %5793 = vmatprep.subr.bf16.mxu0 %v5792_v48  ;;  %v1966_v43 = vld [vmem:[#allocation14 + $0x1a8] sm:$0xff]  ;;  %v5810_v47 = vpack.c.bf16 %v2921_v38, %v2889_v37  ;;  %v1762_v48 = vrot.slane %v1748_v30, %v7157_v18  ;;  %v5378_v38 = vpack.c.bf16 %v2141_v29, %v2109_v28 }
 0x628   : > { %v5876_v50 = vpack.c.bf16 %v1966_v43, %v1934_v42  ;;  %v2222_v37 = vld [vmem:[#allocation14 + $0x9a8] sm:$0xff]  ;;  %v2205_v42 = vld [vmem:[#allocation14 + $0x920] sm:$0xff] }
 0x629   : > { %v2478_v28 = vld [vmem:[#allocation14 + $0x11a8] sm:$0xff] }
 0x62a   : > { %5347 = vmatpush1.bf16.msra.mxu1 %v5346_v55  ;;  %5795 = vmatpush1.bf16.msra.mxu0 %v5794_v56  ;;  %v1949_v56 = vld [vmem:[#allocation14 + $0x120] sm:$0xff] }
 0x62b   : > { %5349 = vmatprep.subr.bf16.mxu1 %v5348_v59  ;;  %5797 = vmatprep.subr.bf16.mxu0 %v5796_v60  ;;  %v1982_v59 = vld [vmem:[#allocation14 + $0x228] sm:$0xff]  ;;  %v5366_v63 = vpack.c.bf16 %v1949_v56, %v1917_v54  ;;  %v2237_v56 = vld [vmem:[#allocation14 + $0xa20] sm:$0xff] }
 0x62c   : > { %v2014_v60 = vld [vmem:[#allocation14 + $0x328] sm:$0xff]  ;;  %v5386_v7 = vpack.c.bf16 %v2269_v57, %v2237_v56 }
 0x62d   : > { %v5368_v4 = vpack.c.bf16 %v2014_v60, %v1982_v59  ;;  %v2253_v60 = vld [vmem:[#allocation14 + $0xaa0] sm:$0xff]  ;;  %v2606_v56 = vld [vmem:[#allocation14 + $0x15a8] sm:$0xff] }
 0x62e   : > { %5351 = vmatpush1.bf16.msra.mxu1 %v5350_v2  ;;  %5799 = vmatpush1.bf16.msra.mxu0 %v5798_v3  ;;  %v1997_v2 = vld [vmem:[#allocation14 + $0x2a0] sm:$0xff] }
 0x62f   : > { %5353 = vmatprep.subr.bf16.mxu1 %v5352_v6  ;;  %5801 = vmatprep.subr.bf16.mxu0 %v5800_v11  ;;  %v2029_v3 = vld [vmem:[#allocation14 + $0x3a0] sm:$0xff]  ;;  %v2046_v6 = vld [vmem:[#allocation14 + $0x428] sm:$0xff] }
 0x630   : > { %v2078_v11 = vld [vmem:[#allocation14 + $0x528] sm:$0xff]  ;;  %v5882_v10 = vpack.c.bf16 %v2029_v3, %v1997_v2  ;;  %v5898_v2 = vpack.c.bf16 %v2285_v61, %v2253_v60  ;;  %v2301_v3 = vld [vmem:[#allocation14 + $0xc20] sm:$0xff] }
 0x631   : > { %v5372_v21 = vpack.c.bf16 %v2078_v11, %v2046_v6  ;;  %v2317_v11 = vld [vmem:[#allocation14 + $0xca0] sm:$0xff] }
 0x632   : > { %5355 = vmatpush1.bf16.msra.mxu1 %v5354_v15  ;;  %5803 = vmatpush1.bf16.msra.mxu0 %v5802_v16  ;;  %v2061_v15 = vld [vmem:[#allocation14 + $0x4a0] sm:$0xff] }
 0x633   : > { %5357 = vmatprep.subr.bf16.mxu1 %v5356_v22  ;;  %5805 = vmatprep.subr.bf16.mxu0 %v5804_v23  ;;  %v2093_v16 = vld [vmem:[#allocation14 + $0x5a0] sm:$0xff]  ;;  %v5884_v22 = vpack.c.bf16 %v2094_v9, %v2062_v8  ;;  %v2142_v23 = vld [vmem:[#allocation14 + $0x728] sm:$0xff] }
 0x634   : > { %v5886_v27 = vpack.c.bf16 %v2093_v16, %v2061_v15  ;;  %v5376_v30 = vpack.c.bf16 %v2142_v23, %v2110_v19  ;;  %v2349_v8 = vld [vmem:[#allocation14 + $0xda0] sm:$0xff]  ;;  %v2366_v9 = vld [vmem:[#allocation14 + $0xe28] sm:$0xff] }
 0x635   : > { %v5902_v15 = vpack.c.bf16 %v2349_v8, %v2317_v11  ;;  %v2365_v16 = vld [vmem:[#allocation14 + $0xe20] sm:$0xff] }
 0x636   : > { %5359 = vmatpush1.bf16.msra.mxu1 %v5358_v31  ;;  %5807 = vmatpush1.bf16.msra.mxu0 %v5806_v32  ;;  %v5888_v31 = vpack.c.bf16 %v2158_v25, %v2126_v24  ;;  %v2125_v32 = vld [vmem:[#allocation14 + $0x6a0] sm:$0xff]  ;;  %v2430_v25 = vld [vmem:[#allocation14 + $0x1028] sm:$0xff] }
 0x637   : > { %5361 = vmatprep.subr.bf16.mxu1 %v5360_v35  ;;  %5809 = vmatprep.subr.bf16.mxu0 %v5808_v36  ;;  %v2206_v35 = vld [vmem:[#allocation14 + $0x928] sm:$0xff]  ;;  %v5890_v40 = vpack.c.bf16 %v2157_v33, %v2125_v32  ;;  %v2397_v19 = vld [vmem:[#allocation14 + $0xf20] sm:$0xff] }
 0x638   : > { %v1908_v51 = vpop.f32.mrb[2].mxu1  ;;  %v2190_v36 = vld [vmem:[#allocation14 + $0x8a8] sm:$0xff]  ;;  %v5380_v43 = vpack.c.bf16 %v2206_v35, %v2174_v34  ;;  %v2381_v23 = vld [vmem:[#allocation14 + $0xea0] sm:$0xff]  ;;  %v5394_v29 = vpack.c.bf16 %v2397_v19, %v2365_v16 }
 0x639   : > { %v1910_v52 = vpop.f32.mrb[3].mxu1  ;;  %v7202_v55 = vadd.f32 %v1908_v51, %v1762_v48  ;;  %v2238_v48 = vld [vmem:[#allocation14 + $0xa28] sm:$0xff]  ;;  %v2413_v24 = vld [vmem:[#allocation14 + $0xfa0] sm:$0xff] }
 0x63a   : > { %v7200_v53 = vadd.f32 %v1910_v52, %v1766_v45  ;;  %5363 = vmatpush1.bf16.msra.mxu1 %v5362_v46  ;;  %5811 = vmatpush1.bf16.msra.mxu0 %v5810_v47  ;;  %v5892_v45 = vpack.c.bf16 %v2222_v37, %v2190_v36  ;;  %v2189_v46 = vld [vmem:[#allocation14 + $0x8a0] sm:$0xff]  ;;  %v2286_v51 = vld [vmem:[#allocation14 + $0xba8] sm:$0xff]  ;;  %v5382_v52 = vpack.c.bf16 %v2205_v42, %v2173_v41 }
 0x63b   : > { %5365 = vmatprep.subr.bf16.mxu1 %v5364_v49  ;;  %5877 = vmatprep.subr.bf16.mxu0 %v5876_v50  ;;  %v2221_v47 = vld [vmem:[#allocation14 + $0x9a0] sm:$0xff]  ;;  %v2270_v49 = vld [vmem:[#allocation14 + $0xb28] sm:$0xff] }
 0x63c   : > { %3175 = vmatprep.mubr.f32.mxu1 %v7200_v53  ;;  %3637 = vmatprep.mubr.f32.mxu0 %v7200_v53  ;;  %v2254_v50 = vld [vmem:[#allocation14 + $0xaa8] sm:$0xff]  ;;  %v5894_v54 = vpack.c.bf16 %v2221_v47, %v2189_v46  ;;  %v5384_v58 = vpack.c.bf16 %v2270_v49, %v2238_v48  ;;  %v2461_v32 = vld [vmem:[#allocation14 + $0x1120] sm:$0xff] }
 0x63d   : > { %3176 = vmatmul.mubr.f32.gmra.mrb[6].mxu1 %v7202_v55  ;;  %3638 = vmatmul.mubr.f32.gmra.mrb[4].mxu0 %v7202_v55  ;;  %v5896_v59 = vpack.c.bf16 %v2286_v51, %v2254_v50  ;;  %v2445_v35 = vld [vmem:[#allocation14 + $0x10a0] sm:$0xff]  ;;  %v2494_v37 = vld [vmem:[#allocation14 + $0x1228] sm:$0xff] }
 0x63e   : > { %3246 = vmatprep.mubr.f32.mxu1 %v7190_v39  ;;  %3785 = vmatprep.mubr.f32.mxu0 %v7190_v39  ;;  %v2477_v36 = vld [vmem:[#allocation14 + $0x11a0] sm:$0xff]  ;;  %v2542_v41 = vld [vmem:[#allocation14 + $0x13a8] sm:$0xff] }
 0x63f   : > { %v2525_v46 = vld [vmem:[#allocation14 + $0x1320] sm:$0xff]  ;;  %v2558_v51 = vld [vmem:[#allocation14 + $0x1428] sm:$0xff] }
 0x640   : > { %v2509_v49 = vld [vmem:[#allocation14 + $0x12a0] sm:$0xff]  ;;  %v2734_v16 = vld [vmem:[#allocation14 + $0x19a8] sm:$0xff] }
 0x641   : > { %3247 = vmatmul.mubr.f32.vlgmr.msra.gmra.mrb[8].mxu1 %v7192_v44  ;;  %3786 = vmatmul.mubr.f32.vlgmr.msra.gmra.mrb[6].mxu0 %v7192_v44  ;;  %v2541_v50 = vld [vmem:[#allocation14 + $0x13a0] sm:$0xff] }
 0x642   : > { %5367 = vmatpush1.bf16.msra.mxu1 %v5366_v63  ;;  %5879 = vmatpush1.bf16.msra.mxu0 %v5878_v0  ;;  %v2334_v63 = vld [vmem:[#allocation14 + $0xd28] sm:$0xff]  ;;  %v2589_v60 = vld [vmem:[#allocation14 + $0x1520] sm:$0xff] }
 0x643   : > { %3252 = vmatprep.mubr.f32.mxu1 %v7200_v53  ;;  %3791 = vmatprep.mubr.f32.mxu0 %v7200_v53  ;;  %v2318_v0 = vld [vmem:[#allocation14 + $0xca8] sm:$0xff]  ;;  %v2653_v11 = vld [vmem:[#allocation14 + $0x1720] sm:$0xff] }
 0x644   : > { %5369 = vmatprep.subr.bf16.mxu1 %v5368_v4  ;;  %5881 = vmatprep.subr.bf16.mxu0 %v5880_v5  ;;  %v2333_v4 = vld [vmem:[#allocation14 + $0xd20] sm:$0xff]  ;;  %v5388_v5 = vpack.c.bf16 %v2334_v63, %v2302_v62  ;;  %v5900_v6 = vpack.c.bf16 %v2350_v1, %v2318_v0  ;;  %v2622_v1 = vld [vmem:[#allocation14 + $0x1628] sm:$0xff] }
 0x645   : > { %3253 = vmatmul.mubr.f32.gmra.mrb[10].mxu1 %v7202_v55  ;;  %3792 = vmatmul.mubr.f32.gmra.mrb[8].mxu0 %v7202_v55  ;;  %v5390_v14 = vpack.c.bf16 %v2333_v4, %v2301_v3  ;;  %v2573_v63 = vld [vmem:[#allocation14 + $0x14a0] sm:$0xff]  ;;  %v2670_v3 = vld [vmem:[#allocation14 + $0x17a8] sm:$0xff] }
 0x646   : > { %5371 = vmatpush1.bf16.msra.mxu1 %v5370_v12  ;;  %5883 = vmatpush1.bf16.msra.mxu0 %v5882_v10  ;;  %v2398_v12 = vld [vmem:[#allocation14 + $0xf28] sm:$0xff]  ;;  %v2605_v0 = vld [vmem:[#allocation14 + $0x15a0] sm:$0xff] }
 0x647   : > { %3323 = vmatprep.mubr.f32.mxu1 %v7190_v39  ;;  %3939 = vmatprep.mubr.f32.mxu0 %v7190_v39  ;;  %v2382_v10 = vld [vmem:[#allocation14 + $0xea8] sm:$0xff] }
 0x648   : > { %5373 = vmatprep.subr.bf16.mxu1 %v5372_v21  ;;  %5885 = vmatprep.subr.bf16.mxu0 %v5884_v22  ;;  %v5392_v21 = vpack.c.bf16 %v2398_v12, %v2366_v9  ;;  %v5904_v22 = vpack.c.bf16 %v2414_v13, %v2382_v10  ;;  %v2637_v12 = vld [vmem:[#allocation14 + $0x16a0] sm:$0xff]  ;;  %v2686_v13 = vld [vmem:[#allocation14 + $0x1828] sm:$0xff] }
 0x649   : > { %v2669_v10 = vld [vmem:[#allocation14 + $0x17a0] sm:$0xff] }
 0x64a   : > { %5375 = vmatpush1.bf16.msra.mxu1 %v5374_v26  ;;  %5887 = vmatpush1.bf16.msra.mxu0 %v5886_v27  ;;  %v2462_v26 = vld [vmem:[#allocation14 + $0x1128] sm:$0xff] }
 0x64b   : > { %5377 = vmatprep.subr.bf16.mxu1 %v5376_v30  ;;  %5889 = vmatprep.subr.bf16.mxu0 %v5888_v31  ;;  %v2446_v27 = vld [vmem:[#allocation14 + $0x10a8] sm:$0xff]  ;;  %v5906_v30 = vpack.c.bf16 %v2413_v24, %v2381_v23  ;;  %v2429_v31 = vld [vmem:[#allocation14 + $0x1020] sm:$0xff]  ;;  %v5396_v33 = vpack.c.bf16 %v2462_v26, %v2430_v25 }
 0x64c   : > { %v5908_v34 = vpack.c.bf16 %v2478_v28, %v2446_v27  ;;  %v5398_v42 = vpack.c.bf16 %v2461_v32, %v2429_v31  ;;  %v2717_v23 = vld [vmem:[#allocation14 + $0x1920] sm:$0xff]  ;;  %v2750_v28 = vld [vmem:[#allocation14 + $0x1a28] sm:$0xff] }
 0x64d   : > { %v2701_v26 = vld [vmem:[#allocation14 + $0x18a0] sm:$0xff]  ;;  %v2798_v31 = vld [vmem:[#allocation14 + $0x1ba8] sm:$0xff] }
 0x64e   : > { %5379 = vmatpush1.bf16.msra.mxu1 %v5378_v38  ;;  %5891 = vmatpush1.bf16.msra.mxu0 %v5890_v40  ;;  %v2526_v38 = vld [vmem:[#allocation14 + $0x1328] sm:$0xff]  ;;  %v2733_v27 = vld [vmem:[#allocation14 + $0x19a0] sm:$0xff] }
 0x64f   : > { %5381 = vmatprep.subr.bf16.mxu1 %v5380_v43  ;;  %5893 = vmatprep.subr.bf16.mxu0 %v5892_v45  ;;  %v2510_v40 = vld [vmem:[#allocation14 + $0x12a8] sm:$0xff]  ;;  %v5910_v43 = vpack.c.bf16 %v2477_v36, %v2445_v35  ;;  %v2493_v45 = vld [vmem:[#allocation14 + $0x1220] sm:$0xff]  ;;  %v5400_v47 = vpack.c.bf16 %v2526_v38, %v2494_v37 }
 0x650   : > { %v5912_v48 = vpack.c.bf16 %v2542_v41, %v2510_v40  ;;  %v5402_v57 = vpack.c.bf16 %v2525_v46, %v2493_v45  ;;  %v2781_v35 = vld [vmem:[#allocation14 + $0x1b20] sm:$0xff]  ;;  %v2814_v41 = vld [vmem:[#allocation14 + $0x1c28] sm:$0xff] }
 0x651   : > { %v2765_v38 = vld [vmem:[#allocation14 + $0x1aa0] sm:$0xff]  ;;  %v2862_v45 = vld [vmem:[#allocation14 + $0x1da8] sm:$0xff] }
 0x652   : > { %5383 = vmatpush1.bf16.msra.mxu1 %v5382_v52  ;;  %5895 = vmatpush1.bf16.msra.mxu0 %v5894_v54  ;;  %v2590_v52 = vld [vmem:[#allocation14 + $0x1528] sm:$0xff]  ;;  %v2797_v40 = vld [vmem:[#allocation14 + $0x1ba0] sm:$0xff] }
 0x653   : > { %5385 = vmatprep.subr.bf16.mxu1 %v5384_v58  ;;  %5897 = vmatprep.subr.bf16.mxu0 %v5896_v59  ;;  %v2574_v54 = vld [vmem:[#allocation14 + $0x14a8] sm:$0xff]  ;;  %v5914_v58 = vpack.c.bf16 %v2541_v50, %v2509_v49  ;;  %v2557_v59 = vld [vmem:[#allocation14 + $0x1420] sm:$0xff]  ;;  %v5404_v61 = vpack.c.bf16 %v2590_v52, %v2558_v51 }
 0x654   : > { %v5916_v62 = vpack.c.bf16 %v2606_v56, %v2574_v54  ;;  %v5406_v4 = vpack.c.bf16 %v2589_v60, %v2557_v59  ;;  %v2845_v49 = vld [vmem:[#allocation14 + $0x1d20] sm:$0xff]  ;;  %v2878_v56 = vld [vmem:[#allocation14 + $0x1e28] sm:$0xff] }
 0x655   : > { %v2829_v52 = vld [vmem:[#allocation14 + $0x1ca0] sm:$0xff]  ;;  %v2926_v59 = vld [vmem:[#allocation14 + $0x1fa8] sm:$0xff] }
 0x656   : > { %5387 = vmatpush1.bf16.msra.mxu1 %v5386_v7  ;;  %5899 = vmatpush1.bf16.msra.mxu0 %v5898_v2  ;;  %v2654_v7 = vld [vmem:[#allocation14 + $0x1728] sm:$0xff]  ;;  %v2861_v54 = vld [vmem:[#allocation14 + $0x1da0] sm:$0xff] }
 0x657   : > { %5389 = vmatprep.subr.bf16.mxu1 %v5388_v5  ;;  %5901 = vmatprep.subr.bf16.mxu0 %v5900_v6  ;;  %v2638_v2 = vld [vmem:[#allocation14 + $0x16a8] sm:$0xff]  ;;  %v5918_v5 = vpack.c.bf16 %v2605_v0, %v2573_v63  ;;  %v2621_v6 = vld [vmem:[#allocation14 + $0x1620] sm:$0xff]  ;;  %v5408_v8 = vpack.c.bf16 %v2654_v7, %v2622_v1 }
 0x658   : > { %v5920_v9 = vpack.c.bf16 %v2670_v3, %v2638_v2  ;;  %v5410_v19 = vpack.c.bf16 %v2653_v11, %v2621_v6  ;;  %v2909_v63 = vld [vmem:[#allocation14 + $0x1f20] sm:$0xff]  ;;  %v1920_v3 = vld [vmem:[#allocation14 + $0x38] sm:$0xff]  ;;  %v1970_v6 = vld [vmem:[#allocation14 + $0x1c8] sm:$0xff] }
 0x659   : > { %v2893_v7 = vld [vmem:[#allocation14 + $0x1ea0] sm:$0xff] }
 0x65a   : > { %5391 = vmatpush1.bf16.msra.mxu1 %v5390_v14  ;;  %5903 = vmatpush1.bf16.msra.mxu0 %v5902_v15  ;;  %v2718_v14 = vld [vmem:[#allocation14 + $0x1928] sm:$0xff]  ;;  %v2925_v2 = vld [vmem:[#allocation14 + $0x1fa0] sm:$0xff] }
 0x65b   : > { %5393 = vmatprep.subr.bf16.mxu1 %v5392_v21  ;;  %5905 = vmatprep.subr.bf16.mxu0 %v5904_v22  ;;  %v2702_v15 = vld [vmem:[#allocation14 + $0x18a8] sm:$0xff]  ;;  %v5922_v21 = vpack.c.bf16 %v2669_v10, %v2637_v12  ;;  %v2685_v22 = vld [vmem:[#allocation14 + $0x1820] sm:$0xff]  ;;  %v5412_v24 = vpack.c.bf16 %v2718_v14, %v2686_v13  ;;  %v1919_v10 = vld [vmem:[#allocation14 + $0x30] sm:$0xff] }
 0x65c   : > { %v5924_v25 = vpack.c.bf16 %v2734_v16, %v2702_v15  ;;  %v5414_v32 = vpack.c.bf16 %v2717_v23, %v2685_v22  ;;  %v1951_v13 = vld [vmem:[#allocation14 + $0x130] sm:$0xff]  ;;  %v1937_v14 = vld [vmem:[#allocation14 + $0xc0] sm:$0xff]  ;;  %v1984_v16 = vld [vmem:[#allocation14 + $0x238] sm:$0xff] }
 0x65d   : > { %v1969_v15 = vld [vmem:[#allocation14 + $0x1c0] sm:$0xff]  ;;  %v2034_v22 = vld [vmem:[#allocation14 + $0x3c8] sm:$0xff]  ;;  %v5430_v23 = vpack.c.bf16 %v1951_v13, %v1919_v10 }
 0x65e   : > { %5395 = vmatpush1.bf16.msra.mxu1 %v5394_v29  ;;  %5907 = vmatpush1.bf16.msra.mxu0 %v5906_v30  ;;  %v2782_v29 = vld [vmem:[#allocation14 + $0x1b28] sm:$0xff] }
 0x65f   : > { %5397 = vmatprep.subr.bf16.mxu1 %v5396_v33  ;;  %5909 = vmatprep.subr.bf16.mxu0 %v5908_v34  ;;  %v2766_v30 = vld [vmem:[#allocation14 + $0x1aa8] sm:$0xff]  ;;  %v5926_v33 = vpack.c.bf16 %v2733_v27, %v2701_v26  ;;  %v2749_v34 = vld [vmem:[#allocation14 + $0x1a20] sm:$0xff]  ;;  %v5416_v36 = vpack.c.bf16 %v2782_v29, %v2750_v28  ;;  %v2015_v26 = vld [vmem:[#allocation14 + $0x330] sm:$0xff] }
 0x660   : > { %v5928_v37 = vpack.c.bf16 %v2798_v31, %v2766_v30  ;;  %v5418_v46 = vpack.c.bf16 %v2781_v35, %v2749_v34  ;;  %v2001_v29 = vld [vmem:[#allocation14 + $0x2c0] sm:$0xff]  ;;  %v2048_v31 = vld [vmem:[#allocation14 + $0x438] sm:$0xff]  ;;  %v2098_v34 = vld [vmem:[#allocation14 + $0x5c8] sm:$0xff] }
 0x661   : > { %v2033_v30 = vld [vmem:[#allocation14 + $0x3c0] sm:$0xff] }
 0x662   : > { %5399 = vmatpush1.bf16.msra.mxu1 %v5398_v42  ;;  %5911 = vmatpush1.bf16.msra.mxu0 %v5910_v43  ;;  %v2846_v42 = vld [vmem:[#allocation14 + $0x1d28] sm:$0xff] }
 0x663   : > { %5401 = vmatprep.subr.bf16.mxu1 %v5400_v47  ;;  %5913 = vmatprep.subr.bf16.mxu0 %v5912_v48  ;;  %v2830_v43 = vld [vmem:[#allocation14 + $0x1ca8] sm:$0xff]  ;;  %v5930_v47 = vpack.c.bf16 %v2797_v40, %v2765_v38  ;;  %v2813_v48 = vld [vmem:[#allocation14 + $0x1c20] sm:$0xff]  ;;  %v5420_v50 = vpack.c.bf16 %v2846_v42, %v2814_v41  ;;  %v2079_v38 = vld [vmem:[#allocation14 + $0x530] sm:$0xff] }
 0x664   : > { %v5932_v51 = vpack.c.bf16 %v2862_v45, %v2830_v43  ;;  %v5422_v60 = vpack.c.bf16 %v2845_v49, %v2813_v48  ;;  %v2065_v40 = vld [vmem:[#allocation14 + $0x4c0] sm:$0xff]  ;;  %v2112_v45 = vld [vmem:[#allocation14 + $0x638] sm:$0xff]  ;;  %v2162_v48 = vld [vmem:[#allocation14 + $0x7c8] sm:$0xff] }
 0x665   : > { %v2097_v43 = vld [vmem:[#allocation14 + $0x5c0] sm:$0xff] }
 0x666   : > { %5403 = vmatpush1.bf16.msra.mxu1 %v5402_v57  ;;  %5915 = vmatpush1.bf16.msra.mxu0 %v5914_v58  ;;  %v2910_v57 = vld [vmem:[#allocation14 + $0x1f28] sm:$0xff] }
 0x667   : > { %5405 = vmatprep.subr.bf16.mxu1 %v5404_v61  ;;  %5917 = vmatprep.subr.bf16.mxu0 %v5916_v62  ;;  %v2894_v58 = vld [vmem:[#allocation14 + $0x1ea8] sm:$0xff]  ;;  %v5934_v61 = vpack.c.bf16 %v2861_v54, %v2829_v52  ;;  %v2877_v62 = vld [vmem:[#allocation14 + $0x1e20] sm:$0xff]  ;;  %v5424_v0 = vpack.c.bf16 %v2910_v57, %v2878_v56  ;;  %v2111_v52 = vld [vmem:[#allocation14 + $0x630] sm:$0xff] }
 0x668   : > { %v5936_v1 = vpack.c.bf16 %v2926_v59, %v2894_v58  ;;  %v5426_v11 = vpack.c.bf16 %v2909_v63, %v2877_v62  ;;  %v2143_v54 = vld [vmem:[#allocation14 + $0x730] sm:$0xff]  ;;  %v2129_v56 = vld [vmem:[#allocation14 + $0x6c0] sm:$0xff]  ;;  %v2176_v59 = vld [vmem:[#allocation14 + $0x838] sm:$0xff] }
 0x669   : > { %v2161_v58 = vld [vmem:[#allocation14 + $0x7c0] sm:$0xff]  ;;  %v2226_v62 = vld [vmem:[#allocation14 + $0x9c8] sm:$0xff]  ;;  %v5442_v63 = vpack.c.bf16 %v2143_v54, %v2111_v52 }
 0x66a   : > { %5407 = vmatpush1.bf16.msra.mxu1 %v5406_v4  ;;  %5919 = vmatpush1.bf16.msra.mxu0 %v5918_v5  ;;  %v1952_v4 = vld [vmem:[#allocation14 + $0x138] sm:$0xff]  ;;  %v1938_v5 = vld [vmem:[#allocation14 + $0xc8] sm:$0xff] }
 0x66b   : > { %5409 = vmatprep.subr.bf16.mxu1 %v5408_v8  ;;  %5921 = vmatprep.subr.bf16.mxu0 %v5920_v9  ;;  %v5938_v8 = vpack.c.bf16 %v2925_v2, %v2893_v7  ;;  %v5428_v9 = vpack.c.bf16 %v1952_v4, %v1920_v3  ;;  %v6004_v12 = vpack.c.bf16 %v1970_v6, %v1938_v5  ;;  %v2175_v7 = vld [vmem:[#allocation14 + $0x830] sm:$0xff]  ;;  %v2193_v3 = vld [vmem:[#allocation14 + $0x8c0] sm:$0xff]  ;;  %v2240_v6 = vld [vmem:[#allocation14 + $0xa38] sm:$0xff] }
 0x66c   : > { %v2207_v2 = vld [vmem:[#allocation14 + $0x930] sm:$0xff]  ;;  %v2225_v5 = vld [vmem:[#allocation14 + $0x9c0] sm:$0xff] }
 0x66d   : > { %v6022_v10 = vpack.c.bf16 %v2225_v5, %v2193_v3  ;;  %v2527_v5 = vld [vmem:[#allocation14 + $0x1330] sm:$0xff] }
 0x66e   : > { %5411 = vmatpush1.bf16.msra.mxu1 %v5410_v19  ;;  %5923 = vmatpush1.bf16.msra.mxu0 %v5922_v21  ;;  %v2016_v19 = vld [vmem:[#allocation14 + $0x338] sm:$0xff]  ;;  %v2002_v21 = vld [vmem:[#allocation14 + $0x2c8] sm:$0xff] }
 0x66f   : > { %5413 = vmatprep.subr.bf16.mxu1 %v5412_v24  ;;  %5925 = vmatprep.subr.bf16.mxu0 %v5924_v25  ;;  %v6006_v24 = vpack.c.bf16 %v1969_v15, %v1937_v14  ;;  %v1983_v25 = vld [vmem:[#allocation14 + $0x230] sm:$0xff]  ;;  %v5432_v27 = vpack.c.bf16 %v2016_v19, %v1984_v16  ;;  %v6008_v28 = vpack.c.bf16 %v2034_v22, %v2002_v21  ;;  %v2257_v16 = vld [vmem:[#allocation14 + $0xac0] sm:$0xff]  ;;  %v2304_v22 = vld [vmem:[#allocation14 + $0xc38] sm:$0xff] }
 0x670   : > { %v5434_v35 = vpack.c.bf16 %v2015_v26, %v1983_v25  ;;  %v2239_v14 = vld [vmem:[#allocation14 + $0xa30] sm:$0xff]  ;;  %v2289_v21 = vld [vmem:[#allocation14 + $0xbc0] sm:$0xff]  ;;  %v2354_v25 = vld [vmem:[#allocation14 + $0xdc8] sm:$0xff] }
 0x671   : > { %v2271_v15 = vld [vmem:[#allocation14 + $0xb30] sm:$0xff] }
 0x672   : > { %5415 = vmatpush1.bf16.msra.mxu1 %v5414_v32  ;;  %5927 = vmatpush1.bf16.msra.mxu0 %v5926_v33  ;;  %v2080_v32 = vld [vmem:[#allocation14 + $0x538] sm:$0xff]  ;;  %v2066_v33 = vld [vmem:[#allocation14 + $0x4c8] sm:$0xff]  ;;  %v5450_v26 = vpack.c.bf16 %v2271_v15, %v2239_v14 }
 0x673   : > { %5417 = vmatprep.subr.bf16.mxu1 %v5416_v36  ;;  %5929 = vmatprep.subr.bf16.mxu0 %v5928_v37  ;;  %v6010_v36 = vpack.c.bf16 %v2033_v30, %v2001_v29  ;;  %v2047_v37 = vld [vmem:[#allocation14 + $0x430] sm:$0xff]  ;;  %v5436_v41 = vpack.c.bf16 %v2080_v32, %v2048_v31  ;;  %v6012_v42 = vpack.c.bf16 %v2098_v34, %v2066_v33  ;;  %v2321_v31 = vld [vmem:[#allocation14 + $0xcc0] sm:$0xff]  ;;  %v2368_v34 = vld [vmem:[#allocation14 + $0xe38] sm:$0xff] }
 0x674   : > { %v5438_v49 = vpack.c.bf16 %v2079_v38, %v2047_v37  ;;  %v2303_v29 = vld [vmem:[#allocation14 + $0xc30] sm:$0xff]  ;;  %v2353_v33 = vld [vmem:[#allocation14 + $0xdc0] sm:$0xff]  ;;  %v2418_v37 = vld [vmem:[#allocation14 + $0xfc8] sm:$0xff] }
 0x675   : > { %v2335_v30 = vld [vmem:[#allocation14 + $0xd30] sm:$0xff] }
 0x676   : > { %5419 = vmatpush1.bf16.msra.mxu1 %v5418_v46  ;;  %5931 = vmatpush1.bf16.msra.mxu0 %v5930_v47  ;;  %v2144_v46 = vld [vmem:[#allocation14 + $0x738] sm:$0xff]  ;;  %v2130_v47 = vld [vmem:[#allocation14 + $0x6c8] sm:$0xff]  ;;  %v5454_v38 = vpack.c.bf16 %v2335_v30, %v2303_v29 }
 0x677   : > { %5421 = vmatprep.subr.bf16.mxu1 %v5420_v50  ;;  %5933 = vmatprep.subr.bf16.mxu0 %v5932_v51  ;;  %v6014_v50 = vpack.c.bf16 %v2097_v43, %v2065_v40  ;;  %v5440_v51 = vpack.c.bf16 %v2144_v46, %v2112_v45  ;;  %v6016_v57 = vpack.c.bf16 %v2162_v48, %v2130_v47  ;;  %v2399_v43 = vld [vmem:[#allocation14 + $0xf30] sm:$0xff]  ;;  %v2385_v45 = vld [vmem:[#allocation14 + $0xec0] sm:$0xff]  ;;  %v2432_v48 = vld [vmem:[#allocation14 + $0x1038] sm:$0xff] }
 0x678   : > { %v6030_v40 = vpack.c.bf16 %v2353_v33, %v2321_v31  ;;  %v2417_v47 = vld [vmem:[#allocation14 + $0xfc0] sm:$0xff]  ;;  %v2655_v33 = vld [vmem:[#allocation14 + $0x1730] sm:$0xff] }
 0x679   : > { %v6034_v54 = vpack.c.bf16 %v2417_v47, %v2385_v45  ;;  %v2719_v47 = vld [vmem:[#allocation14 + $0x1930] sm:$0xff] }
 0x67a   : > { %5423 = vmatpush1.bf16.msra.mxu1 %v5422_v60  ;;  %5935 = vmatpush1.bf16.msra.mxu0 %v5934_v61  ;;  %v2208_v60 = vld [vmem:[#allocation14 + $0x938] sm:$0xff]  ;;  %v2194_v61 = vld [vmem:[#allocation14 + $0x8c8] sm:$0xff] }
 0x67b   : > { %5425 = vmatprep.subr.bf16.mxu1 %v5424_v0  ;;  %5937 = vmatprep.subr.bf16.mxu0 %v5936_v1  ;;  %v6018_v0 = vpack.c.bf16 %v2161_v58, %v2129_v56  ;;  %v5444_v1 = vpack.c.bf16 %v2208_v60, %v2176_v59  ;;  %v6020_v4 = vpack.c.bf16 %v2226_v62, %v2194_v61  ;;  %v2463_v58 = vld [vmem:[#allocation14 + $0x1130] sm:$0xff]  ;;  %v2449_v59 = vld [vmem:[#allocation14 + $0x10c0] sm:$0xff]  ;;  %v2496_v62 = vld [vmem:[#allocation14 + $0x1238] sm:$0xff] }
 0x67c   : > { %v2481_v61 = vld [vmem:[#allocation14 + $0x11c0] sm:$0xff] }
 0x67e   : > { %5427 = vmatpush1.bf16.msra.mxu1 %v5426_v11  ;;  %5939 = vmatpush1.bf16.msra.mxu0 %v5938_v8  ;;  %v2272_v11 = vld [vmem:[#allocation14 + $0xb38] sm:$0xff]  ;;  %v2258_v8 = vld [vmem:[#allocation14 + $0xac8] sm:$0xff] }
 0x67f   : > { %5429 = vmatprep.subr.bf16.mxu1 %v5428_v9  ;;  %6005 = vmatprep.subr.bf16.mxu0 %v6004_v12  ;;  %v2290_v9 = vld [vmem:[#allocation14 + $0xbc8] sm:$0xff]  ;;  %v5446_v12 = vpack.c.bf16 %v2207_v2, %v2175_v7  ;;  %v5448_v13 = vpack.c.bf16 %v2272_v11, %v2240_v6  ;;  %v6038_v2 = vpack.c.bf16 %v2481_v61, %v2449_v59  ;;  %v2513_v6 = vld [vmem:[#allocation14 + $0x12c0] sm:$0xff]  ;;  %v2783_v61 = vld [vmem:[#allocation14 + $0x1b30] sm:$0xff] }
 0x680   : > { %v6024_v19 = vpack.c.bf16 %v2290_v9, %v2258_v8  ;;  %v2545_v8 = vld [vmem:[#allocation14 + $0x13c0] sm:$0xff]  ;;  %v2560_v9 = vld [vmem:[#allocation14 + $0x1438] sm:$0xff] }
 0x681   : > { %3324 = vmatmul.mubr.f32.vlgmr.msra.gmra.mrb[12].mxu1 %v7192_v44  ;;  %3940 = vmatmul.mubr.f32.vlgmr.msra.gmra.mrb[10].mxu0 %v7192_v44  ;;  %v6042_v15 = vpack.c.bf16 %v2545_v8, %v2513_v6  ;;  %v2847_v8 = vld [vmem:[#allocation14 + $0x1d30] sm:$0xff] }
 0x682   : > { %3329 = vmatprep.mubr.f32.mxu1 %v7200_v53  ;;  %5431 = vmatpush1.bf16.msra.mxu1 %v5430_v23  ;;  %v2336_v23 = vld [vmem:[#allocation14 + $0xd38] sm:$0xff] }
 0x683   : > { %3945 = vmatprep.mubr.f32.mxu0 %v7200_v53  ;;  %6007 = vmatpush1.bf16.msra.mxu0 %v6006_v24  ;;  %v2322_v24 = vld [vmem:[#allocation14 + $0xcc8] sm:$0xff] }
 0x684   : > { %5433 = vmatprep.subr.bf16.mxu1 %v5432_v27  ;;  %6009 = vmatprep.subr.bf16.mxu0 %v6008_v28  ;;  %v6026_v27 = vpack.c.bf16 %v2289_v21, %v2257_v16  ;;  %v5452_v28 = vpack.c.bf16 %v2336_v23, %v2304_v22  ;;  %v6028_v32 = vpack.c.bf16 %v2354_v25, %v2322_v24  ;;  %v2591_v21 = vld [vmem:[#allocation14 + $0x1530] sm:$0xff]  ;;  %v2577_v22 = vld [vmem:[#allocation14 + $0x14c0] sm:$0xff]  ;;  %v2624_v25 = vld [vmem:[#allocation14 + $0x1638] sm:$0xff] }
 0x685   : > { %3330 = vmatmul.mubr.f32.gmra.mrb[14].mxu1 %v7202_v55  ;;  %3946 = vmatmul.mubr.f32.gmra.mrb[12].mxu0 %v7202_v55  ;;  %v2609_v24 = vld [vmem:[#allocation14 + $0x15c0] sm:$0xff] }
 0x686   : > { %5435 = vmatpush1.bf16.msra.mxu1 %v5434_v35  ;;  %3400 = vmatprep.mubr.f32.mxu1 %v7190_v39  ;;  %v2400_v35 = vld [vmem:[#allocation14 + $0xf38] sm:$0xff]  ;;  %v6046_v30 = vpack.c.bf16 %v2609_v24, %v2577_v22  ;;  %v2911_v24 = vld [vmem:[#allocation14 + $0x1f30] sm:$0xff] }
 0x687   : > { %6011 = vmatpush1.bf16.msra.mxu0 %v6010_v36  ;;  %4093 = vmatprep.mubr.f32.mxu0 %v7190_v39  ;;  %v2386_v36 = vld [vmem:[#allocation14 + $0xec8] sm:$0xff] }
 0x688   : > { %5437 = vmatprep.subr.bf16.mxu1 %v5436_v41  ;;  %6013 = vmatprep.subr.bf16.mxu0 %v6012_v42  ;;  %v5456_v41 = vpack.c.bf16 %v2400_v35, %v2368_v34  ;;  %v2367_v42 = vld [vmem:[#allocation14 + $0xe30] sm:$0xff]  ;;  %v6032_v46 = vpack.c.bf16 %v2418_v37, %v2386_v36  ;;  %v2641_v34 = vld [vmem:[#allocation14 + $0x16c0] sm:$0xff]  ;;  %v2688_v37 = vld [vmem:[#allocation14 + $0x1838] sm:$0xff] }
 0x689   : > { %v5458_v52 = vpack.c.bf16 %v2399_v43, %v2367_v42  ;;  %v2673_v36 = vld [vmem:[#allocation14 + $0x17c0] sm:$0xff] }
 0x68a   : > { %5439 = vmatpush1.bf16.msra.mxu1 %v5438_v49  ;;  %v2464_v49 = vld [vmem:[#allocation14 + $0x1138] sm:$0xff]  ;;  %v6050_v43 = vpack.c.bf16 %v2673_v36, %v2641_v34  ;;  %v1921_v36 = vld [vmem:[#allocation14 + $0x40] sm:$0xff] }
 0x68b   : > { %6015 = vmatpush1.bf16.msra.mxu0 %v6014_v50  ;;  %5441 = vmatprep.subr.bf16.mxu1 %v5440_v51  ;;  %v2450_v50 = vld [vmem:[#allocation14 + $0x10c8] sm:$0xff]  ;;  %v5460_v56 = vpack.c.bf16 %v2464_v49, %v2432_v48  ;;  %v2705_v48 = vld [vmem:[#allocation14 + $0x18c0] sm:$0xff] }
 0x68c   : > { %6017 = vmatprep.subr.bf16.mxu0 %v6016_v57  ;;  %v2482_v51 = vld [vmem:[#allocation14 + $0x11c8] sm:$0xff]  ;;  %v2431_v57 = vld [vmem:[#allocation14 + $0x1030] sm:$0xff] }
 0x68d   : > { %v6036_v60 = vpack.c.bf16 %v2482_v51, %v2450_v50  ;;  %v5462_v7 = vpack.c.bf16 %v2463_v58, %v2431_v57  ;;  %v2737_v50 = vld [vmem:[#allocation14 + $0x19c0] sm:$0xff]  ;;  %v2752_v51 = vld [vmem:[#allocation14 + $0x1a38] sm:$0xff] }
 0x68e   : > { %5443 = vmatpush1.bf16.msra.mxu1 %v5442_v63  ;;  %v2528_v63 = vld [vmem:[#allocation14 + $0x1338] sm:$0xff]  ;;  %v6054_v58 = vpack.c.bf16 %v2737_v50, %v2705_v48  ;;  %v2017_v50 = vld [vmem:[#allocation14 + $0x340] sm:$0xff] }
 0x68f   : > { %6019 = vmatpush1.bf16.msra.mxu0 %v6018_v0  ;;  %5445 = vmatprep.subr.bf16.mxu1 %v5444_v1  ;;  %v2514_v0 = vld [vmem:[#allocation14 + $0x12c8] sm:$0xff]  ;;  %v5464_v3 = vpack.c.bf16 %v2528_v63, %v2496_v62  ;;  %v2769_v62 = vld [vmem:[#allocation14 + $0x1ac0] sm:$0xff] }
 0x690   : > { %6021 = vmatprep.subr.bf16.mxu0 %v6020_v4  ;;  %v2546_v1 = vld [vmem:[#allocation14 + $0x13c8] sm:$0xff]  ;;  %v2495_v4 = vld [vmem:[#allocation14 + $0x1230] sm:$0xff] }
 0x691   : > { %v6040_v11 = vpack.c.bf16 %v2546_v1, %v2514_v0  ;;  %v5466_v14 = vpack.c.bf16 %v2527_v5, %v2495_v4  ;;  %v2801_v0 = vld [vmem:[#allocation14 + $0x1bc0] sm:$0xff]  ;;  %v2816_v1 = vld [vmem:[#allocation14 + $0x1c38] sm:$0xff] }
 0x692   : > { %5447 = vmatpush1.bf16.msra.mxu1 %v5446_v12  ;;  %v2592_v12 = vld [vmem:[#allocation14 + $0x1538] sm:$0xff]  ;;  %v6058_v5 = vpack.c.bf16 %v2801_v0, %v2769_v62  ;;  %v2081_v0 = vld [vmem:[#allocation14 + $0x540] sm:$0xff] }
 0x693   : > { %6023 = vmatpush1.bf16.msra.mxu0 %v6022_v10  ;;  %5449 = vmatprep.subr.bf16.mxu1 %v5448_v13  ;;  %v2578_v10 = vld [vmem:[#allocation14 + $0x14c8] sm:$0xff]  ;;  %v5468_v16 = vpack.c.bf16 %v2592_v12, %v2560_v9  ;;  %v2833_v9 = vld [vmem:[#allocation14 + $0x1cc0] sm:$0xff] }
 0x694   : > { %6025 = vmatprep.subr.bf16.mxu0 %v6024_v19  ;;  %v2610_v13 = vld [vmem:[#allocation14 + $0x15c8] sm:$0xff]  ;;  %v2559_v19 = vld [vmem:[#allocation14 + $0x1430] sm:$0xff] }
 0x695   : > { %v6044_v23 = vpack.c.bf16 %v2610_v13, %v2578_v10  ;;  %v5470_v29 = vpack.c.bf16 %v2591_v21, %v2559_v19  ;;  %v2865_v10 = vld [vmem:[#allocation14 + $0x1dc0] sm:$0xff]  ;;  %v2880_v13 = vld [vmem:[#allocation14 + $0x1e38] sm:$0xff] }
 0x696   : > { %5451 = vmatpush1.bf16.msra.mxu1 %v5450_v26  ;;  %v2656_v26 = vld [vmem:[#allocation14 + $0x1738] sm:$0xff]  ;;  %v6062_v21 = vpack.c.bf16 %v2865_v10, %v2833_v9  ;;  %v2145_v10 = vld [vmem:[#allocation14 + $0x740] sm:$0xff] }
 0x697   : > { %6027 = vmatpush1.bf16.msra.mxu0 %v6026_v27  ;;  %5453 = vmatprep.subr.bf16.mxu1 %v5452_v28  ;;  %v2642_v27 = vld [vmem:[#allocation14 + $0x16c8] sm:$0xff]  ;;  %v5472_v31 = vpack.c.bf16 %v2656_v26, %v2624_v25  ;;  %v2897_v25 = vld [vmem:[#allocation14 + $0x1ec0] sm:$0xff] }
 0x698   : > { %6029 = vmatprep.subr.bf16.mxu0 %v6028_v32  ;;  %v2674_v28 = vld [vmem:[#allocation14 + $0x17c8] sm:$0xff]  ;;  %v2623_v32 = vld [vmem:[#allocation14 + $0x1630] sm:$0xff] }
 0x699   : > { %v6048_v35 = vpack.c.bf16 %v2674_v28, %v2642_v27  ;;  %v5474_v42 = vpack.c.bf16 %v2655_v33, %v2623_v32  ;;  %v2929_v27 = vld [vmem:[#allocation14 + $0x1fc0] sm:$0xff]  ;;  %v1922_v28 = vld [vmem:[#allocation14 + $0x48] sm:$0xff] }
 0x69a   : > { %5455 = vmatpush1.bf16.msra.mxu1 %v5454_v38  ;;  %v2720_v38 = vld [vmem:[#allocation14 + $0x1938] sm:$0xff]  ;;  %v6066_v33 = vpack.c.bf16 %v2929_v27, %v2897_v25  ;;  %v2938_v25 = vld [vmem:[#allocation16 + $0x8] sm:$0xff] }
 0x69b   : > { %6031 = vmatpush1.bf16.msra.mxu0 %v6030_v40  ;;  %5457 = vmatprep.subr.bf16.mxu1 %v5456_v41  ;;  %v2706_v40 = vld [vmem:[#allocation14 + $0x18c8] sm:$0xff]  ;;  %v5476_v45 = vpack.c.bf16 %v2720_v38, %v2688_v37  ;;  %v1953_v37 = vld [vmem:[#allocation14 + $0x140] sm:$0xff] }
 0x69c   : > { %6033 = vmatprep.subr.bf16.mxu0 %v6032_v46  ;;  %v2738_v41 = vld [vmem:[#allocation14 + $0x19c8] sm:$0xff]  ;;  %v2687_v46 = vld [vmem:[#allocation14 + $0x1830] sm:$0xff]  ;;  %v1941_v38 = vld [vmem:[#allocation14 + $0xe0] sm:$0xff] }
 0x69d   : > { %v6052_v49 = vpack.c.bf16 %v2738_v41, %v2706_v40  ;;  %v5478_v57 = vpack.c.bf16 %v2719_v47, %v2687_v46  ;;  %v1973_v40 = vld [vmem:[#allocation14 + $0x1e0] sm:$0xff]  ;;  %v1986_v41 = vld [vmem:[#allocation14 + $0x248] sm:$0xff]  ;;  %v5494_v46 = vpack.c.bf16 %v1953_v37, %v1921_v36 }
 0x69e   : > { %5459 = vmatpush1.bf16.msra.mxu1 %v5458_v52  ;;  %v2784_v52 = vld [vmem:[#allocation14 + $0x1b38] sm:$0xff]  ;;  %v6134_v47 = vpack.c.bf16 %v1973_v40, %v1941_v38  ;;  %v2229_v36 = vld [vmem:[#allocation14 + $0x9e0] sm:$0xff]  ;;  %v2242_v37 = vld [vmem:[#allocation14 + $0xa48] sm:$0xff] }
 0x69f   : > { %6035 = vmatpush1.bf16.msra.mxu0 %v6034_v54  ;;  %5461 = vmatprep.subr.bf16.mxu1 %v5460_v56  ;;  %v2770_v54 = vld [vmem:[#allocation14 + $0x1ac8] sm:$0xff]  ;;  %v5480_v59 = vpack.c.bf16 %v2784_v52, %v2752_v51  ;;  %v2005_v51 = vld [vmem:[#allocation14 + $0x2e0] sm:$0xff] }
 0x6a0   : > { %6037 = vmatprep.subr.bf16.mxu0 %v6036_v60  ;;  %v2802_v56 = vld [vmem:[#allocation14 + $0x1bc8] sm:$0xff]  ;;  %v2751_v60 = vld [vmem:[#allocation14 + $0x1a30] sm:$0xff] }
 0x6a1   : > { %v6056_v63 = vpack.c.bf16 %v2802_v56, %v2770_v54  ;;  %v5482_v4 = vpack.c.bf16 %v2783_v61, %v2751_v60  ;;  %v2037_v54 = vld [vmem:[#allocation14 + $0x3e0] sm:$0xff]  ;;  %v2050_v56 = vld [vmem:[#allocation14 + $0x448] sm:$0xff] }
 0x6a2   : > { %5463 = vmatpush1.bf16.msra.mxu1 %v5462_v7  ;;  %v2848_v7 = vld [vmem:[#allocation14 + $0x1d38] sm:$0xff]  ;;  %v6138_v61 = vpack.c.bf16 %v2037_v54, %v2005_v51  ;;  %v2274_v38 = vld [vmem:[#allocation14 + $0xb48] sm:$0xff]  ;;  %v2273_v51 = vld [vmem:[#allocation14 + $0xb40] sm:$0xff] }
 0x6a3   : > { %6039 = vmatpush1.bf16.msra.mxu0 %v6038_v2  ;;  %5465 = vmatprep.subr.bf16.mxu1 %v5464_v3  ;;  %v2834_v2 = vld [vmem:[#allocation14 + $0x1cc8] sm:$0xff]  ;;  %v5484_v6 = vpack.c.bf16 %v2848_v7, %v2816_v1  ;;  %v2069_v1 = vld [vmem:[#allocation14 + $0x4e0] sm:$0xff] }
 0x6a4   : > { %6041 = vmatprep.subr.bf16.mxu0 %v6040_v11  ;;  %v2866_v3 = vld [vmem:[#allocation14 + $0x1dc8] sm:$0xff]  ;;  %v2815_v11 = vld [vmem:[#allocation14 + $0x1c30] sm:$0xff] }
 0x6a5   : > { %v6060_v12 = vpack.c.bf16 %v2866_v3, %v2834_v2  ;;  %v5486_v19 = vpack.c.bf16 %v2847_v8, %v2815_v11  ;;  %v2101_v2 = vld [vmem:[#allocation14 + $0x5e0] sm:$0xff]  ;;  %v2114_v3 = vld [vmem:[#allocation14 + $0x648] sm:$0xff] }
 0x6a6   : > { %5467 = vmatpush1.bf16.msra.mxu1 %v5466_v14  ;;  %v2912_v14 = vld [vmem:[#allocation14 + $0x1f38] sm:$0xff]  ;;  %v2113_v8 = vld [vmem:[#allocation14 + $0x640] sm:$0xff]  ;;  %v6142_v9 = vpack.c.bf16 %v2101_v2, %v2069_v1  ;;  %v2326_v1 = vld [vmem:[#allocation14 + $0xce8] sm:$0xff] }
 0x6a7   : > { %6043 = vmatpush1.bf16.msra.mxu0 %v6042_v15  ;;  %5469 = vmatprep.subr.bf16.mxu1 %v5468_v16  ;;  %v2898_v15 = vld [vmem:[#allocation14 + $0x1ec8] sm:$0xff]  ;;  %v5488_v22 = vpack.c.bf16 %v2912_v14, %v2880_v13  ;;  %v2133_v13 = vld [vmem:[#allocation14 + $0x6e0] sm:$0xff]  ;;  %v5506_v27 = vpack.c.bf16 %v2145_v10, %v2113_v8 }
 0x6a8   : > { %6045 = vmatprep.subr.bf16.mxu0 %v6044_v23  ;;  %v2930_v16 = vld [vmem:[#allocation14 + $0x1fc8] sm:$0xff]  ;;  %v2879_v23 = vld [vmem:[#allocation14 + $0x1e30] sm:$0xff]  ;;  %v2165_v14 = vld [vmem:[#allocation14 + $0x7e0] sm:$0xff] }
 0x6a9   : > { %v6064_v26 = vpack.c.bf16 %v2930_v16, %v2898_v15  ;;  %v5490_v32 = vpack.c.bf16 %v2911_v24, %v2879_v23  ;;  %v2178_v16 = vld [vmem:[#allocation14 + $0x848] sm:$0xff]  ;;  %v7237_v24 = vld [vmem:[#allocation16] sm:$0xff] }
 0x6aa   : > { %5471 = vmatpush1.bf16.msra.mxu1 %v5470_v29  ;;  %v1954_v29 = vld [vmem:[#allocation14 + $0x148] sm:$0xff]  ;;  %v7252_v40 = vrot.slane %v7237_v24, %v7160_v20 }
 0x6ab   : > { %6047 = vmatpush1.bf16.msra.mxu0 %v6046_v30  ;;  %5473 = vmatprep.subr.bf16.mxu1 %v5472_v31  ;;  %v1942_v30 = vld [vmem:[#allocation14 + $0xe8] sm:$0xff]  ;;  %v5492_v34 = vpack.c.bf16 %v1954_v29, %v1922_v28  ;;  %v6146_v28 = vpack.c.bf16 %v2165_v14, %v2133_v13 }
 0x6ac   : > { %6049 = vmatprep.subr.bf16.mxu0 %v6048_v35  ;;  %v1974_v31 = vld [vmem:[#allocation14 + $0x1e8] sm:$0xff] }
 0x6ad   : > { %v6132_v35 = vpack.c.bf16 %v1974_v31, %v1942_v30  ;;  %v2230_v23 = vld [vmem:[#allocation14 + $0x9e8] sm:$0xff]  ;;  %v2177_v30 = vld [vmem:[#allocation14 + $0x840] sm:$0xff] }
 0x6ae   : > { %5475 = vmatpush1.bf16.msra.mxu1 %v5474_v42  ;;  %v2018_v42 = vld [vmem:[#allocation14 + $0x348] sm:$0xff]  ;;  %v2209_v31 = vld [vmem:[#allocation14 + $0x940] sm:$0xff] }
 0x6af   : > { %6051 = vmatpush1.bf16.msra.mxu0 %v6050_v43  ;;  %5477 = vmatprep.subr.bf16.mxu1 %v5476_v45  ;;  %v2006_v43 = vld [vmem:[#allocation14 + $0x2e8] sm:$0xff]  ;;  %v5496_v48 = vpack.c.bf16 %v2018_v42, %v1986_v41 }
 0x6b0   : > { %6053 = vmatprep.subr.bf16.mxu0 %v6052_v49  ;;  %v2038_v45 = vld [vmem:[#allocation14 + $0x3e8] sm:$0xff]  ;;  %v1985_v49 = vld [vmem:[#allocation14 + $0x240] sm:$0xff] }
 0x6b1   : > { %v6136_v52 = vpack.c.bf16 %v2038_v45, %v2006_v43  ;;  %v5498_v60 = vpack.c.bf16 %v2017_v50, %v1985_v49  ;;  %v2262_v42 = vld [vmem:[#allocation14 + $0xae8] sm:$0xff]  ;;  %v5510_v45 = vpack.c.bf16 %v2209_v31, %v2177_v30  ;;  %v5512_v49 = vpack.c.bf16 %v2274_v38, %v2242_v37  ;;  %v2241_v50 = vld [vmem:[#allocation14 + $0xa40] sm:$0xff] }
 0x6b2   : > { %5479 = vmatpush1.bf16.msra.mxu1 %v5478_v57  ;;  %v2082_v57 = vld [vmem:[#allocation14 + $0x548] sm:$0xff]  ;;  %v5514_v2 = vpack.c.bf16 %v2273_v51, %v2241_v50  ;;  %v2433_v38 = vld [vmem:[#allocation14 + $0x1040] sm:$0xff] }
 0x6b3   : > { %6055 = vmatpush1.bf16.msra.mxu0 %v6054_v58  ;;  %5481 = vmatprep.subr.bf16.mxu1 %v5480_v59  ;;  %v2070_v58 = vld [vmem:[#allocation14 + $0x4e8] sm:$0xff]  ;;  %v5500_v62 = vpack.c.bf16 %v2082_v57, %v2050_v56 }
 0x6b4   : > { %6057 = vmatprep.subr.bf16.mxu0 %v6056_v63  ;;  %v2102_v59 = vld [vmem:[#allocation14 + $0x5e8] sm:$0xff]  ;;  %v2049_v63 = vld [vmem:[#allocation14 + $0x440] sm:$0xff] }
 0x6b5   : > { %v6140_v7 = vpack.c.bf16 %v2102_v59, %v2070_v58  ;;  %v5502_v11 = vpack.c.bf16 %v2081_v0, %v2049_v63  ;;  %v2294_v43 = vld [vmem:[#allocation14 + $0xbe8] sm:$0xff] }
 0x6b6   : > { %5483 = vmatpush1.bf16.msra.mxu1 %v5482_v4  ;;  %v2146_v4 = vld [vmem:[#allocation14 + $0x748] sm:$0xff]  ;;  %v6152_v59 = vpack.c.bf16 %v2294_v43, %v2262_v42  ;;  %v2465_v42 = vld [vmem:[#allocation14 + $0x1140] sm:$0xff] }
 0x6b7   : > { %6059 = vmatpush1.bf16.msra.mxu0 %v6058_v5  ;;  %5485 = vmatprep.subr.bf16.mxu1 %v5484_v6  ;;  %v2134_v5 = vld [vmem:[#allocation14 + $0x6e8] sm:$0xff]  ;;  %v2453_v43 = vld [vmem:[#allocation14 + $0x10e0] sm:$0xff]  ;;  %v5526_v51 = vpack.c.bf16 %v2465_v42, %v2433_v38 }
 0x6b8   : > { %6061 = vmatprep.subr.bf16.mxu0 %v6060_v12  ;;  %v2166_v6 = vld [vmem:[#allocation14 + $0x7e8] sm:$0xff]  ;;  %v5504_v12 = vpack.c.bf16 %v2146_v4, %v2114_v3  ;;  %v2709_v38 = vld [vmem:[#allocation14 + $0x18e0] sm:$0xff] }
 0x6b9   : > { %v6144_v15 = vpack.c.bf16 %v2166_v6, %v2134_v5  ;;  %v2305_v5 = vld [vmem:[#allocation14 + $0xc40] sm:$0xff]  ;;  %v2402_v10 = vld [vmem:[#allocation14 + $0xf48] sm:$0xff] }
 0x6ba   : > { %5487 = vmatpush1.bf16.msra.mxu1 %v5486_v19  ;;  %v2210_v19 = vld [vmem:[#allocation14 + $0x948] sm:$0xff]  ;;  %v2337_v6 = vld [vmem:[#allocation14 + $0xd40] sm:$0xff] }
 0x6bb   : > { %6063 = vmatpush1.bf16.msra.mxu0 %v6062_v21  ;;  %5489 = vmatprep.subr.bf16.mxu1 %v5488_v22  ;;  %v2198_v21 = vld [vmem:[#allocation14 + $0x8e8] sm:$0xff]  ;;  %v7235_v22 = vsub.s32 4, %v7154_v17  ;;  %v5508_v29 = vpack.c.bf16 %v2210_v19, %v2178_v16 }
 0x6bc   : > { %6065 = vmatprep.subr.bf16.mxu0 %v6064_v26  ;;  %v7240_v26 = vsub.s32 5, %v7154_v17  ;;  %v2390_v13 = vld [vmem:[#allocation14 + $0xee8] sm:$0xff] }
 0x6bd   : > { %v2422_v14 = vld [vmem:[#allocation14 + $0xfe8] sm:$0xff] }
 0x6be   : > { %5491 = vmatpush1.bf16.msra.mxu1 %v5490_v32  ;;  %v2197_v32 = vld [vmem:[#allocation14 + $0x8e0] sm:$0xff]  ;;  %v7255_v41 = vrot.slane %v2938_v25, %v7240_v26  ;;  %v2466_v30 = vld [vmem:[#allocation14 + $0x1148] sm:$0xff] }
 0x6bf   : > { %6067 = vmatpush1.bf16.msra.mxu0 %v6066_v33  ;;  %5493 = vmatprep.subr.bf16.mxu1 %v5492_v34  ;;  %v6148_v33 = vpack.c.bf16 %v2230_v23, %v2198_v21  ;;  %v7245_v34 = vrot.slane %v7237_v24, %v7157_v18  ;;  %v2369_v21 = vld [vmem:[#allocation14 + $0xe40] sm:$0xff]  ;;  %v2454_v31 = vld [vmem:[#allocation14 + $0x10e8] sm:$0xff] }
 0x6c0   : > { %6133 = vmatprep.subr.bf16.mxu0 %v6132_v35  ;;  %v7248_v35 = vrot.slane %v2938_v25, %v7235_v22  ;;  %v2401_v23 = vld [vmem:[#allocation14 + $0xf40] sm:$0xff]  ;;  %v2550_v50 = vld [vmem:[#allocation14 + $0x13e8] sm:$0xff] }
 0x6c1   : > { %3401 = vmatmul.mubr.f32.vlgmr.msra.gmra.mrb[16].mxu1 %v7192_v44  ;;  %v2389_v25 = vld [vmem:[#allocation14 + $0xee0] sm:$0xff] }
 0x6c2   : > { %4094 = vmatmul.mubr.f32.vlgmr.msra.gmra.mrb[14].mxu0 %v7192_v44  ;;  %3406 = vmatprep.mubr.f32.mxu1 %v7200_v53 }
 0x6c3   : > { %5495 = vmatpush1.bf16.msra.mxu1 %v5494_v46  ;;  %4099 = vmatprep.mubr.f32.mxu0 %v7200_v53 }
 0x6c4   : > { %6135 = vmatpush1.bf16.msra.mxu0 %v6134_v47  ;;  %5497 = vmatprep.subr.bf16.mxu1 %v5496_v48  ;;  %v6150_v48 = vpack.c.bf16 %v2229_v36, %v2197_v32  ;;  %v2486_v32 = vld [vmem:[#allocation14 + $0x11e8] sm:$0xff] }
 0x6c5   : > { %3407 = vmatmul.mubr.f32.gmra.mrb[18].mxu1 %v7202_v55  ;;  %6137 = vmatprep.subr.bf16.mxu0 %v6136_v52  ;;  %v2261_v52 = vld [vmem:[#allocation14 + $0xae0] sm:$0xff] }
 0x6c6   : > { %4100 = vmatmul.mubr.f32.gmra.mrb[16].mxu0 %v7202_v55  ;;  %3477 = vmatprep.mubr.f32.mxu1 %v7190_v39 }
 0x6c7   : > { %5499 = vmatpush1.bf16.msra.mxu1 %v5498_v60  ;;  %4247 = vmatprep.mubr.f32.mxu0 %v7190_v39  ;;  %v2293_v60 = vld [vmem:[#allocation14 + $0xbe0] sm:$0xff] }
 0x6c8   : > { %6139 = vmatpush1.bf16.msra.mxu0 %v6138_v61  ;;  %5501 = vmatprep.subr.bf16.mxu1 %v5500_v62  ;;  %v2306_v61 = vld [vmem:[#allocation14 + $0xc48] sm:$0xff]  ;;  %v6154_v3 = vpack.c.bf16 %v2293_v60, %v2261_v52  ;;  %v2549_v60 = vld [vmem:[#allocation14 + $0x13e0] sm:$0xff] }
 0x6c9   : > { %6141 = vmatprep.subr.bf16.mxu0 %v6140_v7  ;;  %v2338_v62 = vld [vmem:[#allocation14 + $0xd48] sm:$0xff] }
 0x6ca   : > { %v2358_v7 = vld [vmem:[#allocation14 + $0xde8] sm:$0xff]  ;;  %v5516_v4 = vpack.c.bf16 %v2338_v62, %v2306_v61 }
 0x6cb   : > { %5503 = vmatpush1.bf16.msra.mxu1 %v5502_v11  ;;  %v2325_v11 = vld [vmem:[#allocation14 + $0xce0] sm:$0xff]  ;;  %v6156_v8 = vpack.c.bf16 %v2358_v7, %v2326_v1  ;;  %v2562_v61 = vld [vmem:[#allocation14 + $0x1448] sm:$0xff] }
 0x6cc   : > { %6143 = vmatpush1.bf16.msra.mxu0 %v6142_v9  ;;  %5505 = vmatprep.subr.bf16.mxu1 %v5504_v12  ;;  %v2357_v9 = vld [vmem:[#allocation14 + $0xde0] sm:$0xff]  ;;  %v2370_v12 = vld [vmem:[#allocation14 + $0xe48] sm:$0xff] }
 0x6cd   : > { %6145 = vmatprep.subr.bf16.mxu0 %v6144_v15  ;;  %v5518_v15 = vpack.c.bf16 %v2337_v6, %v2305_v5  ;;  %v6158_v16 = vpack.c.bf16 %v2357_v9, %v2325_v11  ;;  %v5520_v19 = vpack.c.bf16 %v2402_v10, %v2370_v12  ;;  %v2594_v62 = vld [vmem:[#allocation14 + $0x1548] sm:$0xff]  ;;  %v2581_v5 = vld [vmem:[#allocation14 + $0x14e0] sm:$0xff] }
 0x6ce   : > { %v2613_v11 = vld [vmem:[#allocation14 + $0x15e0] sm:$0xff]  ;;  %v2658_v9 = vld [vmem:[#allocation14 + $0x1748] sm:$0xff] }
 0x6cf   : > { %5507 = vmatpush1.bf16.msra.mxu1 %v5506_v27  ;;  %v6160_v27 = vpack.c.bf16 %v2422_v14, %v2390_v13  ;;  %v2646_v12 = vld [vmem:[#allocation14 + $0x16e8] sm:$0xff]  ;;  %v6174_v14 = vpack.c.bf16 %v2613_v11, %v2581_v5  ;;  %v2869_v5 = vld [vmem:[#allocation14 + $0x1de0] sm:$0xff] }
 0x6d0   : > { %6147 = vmatpush1.bf16.msra.mxu0 %v6146_v28  ;;  %5509 = vmatprep.subr.bf16.mxu1 %v5508_v29  ;;  %v3171_v46 = vpop.f32.mrb[4].mxu1  ;;  %v3633_v47 = vpop.f32.mrb[2].mxu0  ;;  %v2421_v28 = vld [vmem:[#allocation14 + $0xfe0] sm:$0xff]  ;;  %v2434_v29 = vld [vmem:[#allocation14 + $0x1048] sm:$0xff] }
 0x6d1   : > { %6149 = vmatprep.subr.bf16.mxu0 %v6148_v33  ;;  %v3172_v54 = vadd.f32 %v3171_v46, %v7245_v34  ;;  %v3634_v56 = vadd.f32 %v3633_v47, %v7248_v35  ;;  %v3173_v57 = vpop.f32.mrb[5].mxu1  ;;  %v3635_v58 = vpop.f32.mrb[3].mxu0  ;;  %v5522_v33 = vpack.c.bf16 %v2401_v23, %v2369_v21  ;;  %v6162_v36 = vpack.c.bf16 %v2421_v28, %v2389_v25  ;;  %v2485_v46 = vld [vmem:[#allocation14 + $0x11e0] sm:$0xff]  ;;  %v2498_v47 = vld [vmem:[#allocation14 + $0x1248] sm:$0xff] }
 0x6d2   : > { %v3174_v63 = vadd.f32 %v3173_v57, %v7252_v40  ;;  %v3636_v0 = vadd.f32 %v3635_v58, %v7255_v41  ;;  %v5524_v37 = vpack.c.bf16 %v2466_v30, %v2434_v29  ;;  %v6166_v52 = vpack.c.bf16 %v2485_v46, %v2453_v43  ;;  %v2529_v57 = vld [vmem:[#allocation14 + $0x1340] sm:$0xff]  ;;  %v2678_v10 = vld [vmem:[#allocation14 + $0x17e8] sm:$0xff] }
 0x6d3   : > { %4337 = vst [vmem:[%s7263_s21] sm:$0xff] %v3172_v54  ;;  %5511 = vmatpush1.bf16.msra.mxu1 %v5510_v45  ;;  %4349 = vst [vmem:[%s7263_s21 + $0x60] sm:$0xff] %v3634_v56  ;;  %v6164_v45 = vpack.c.bf16 %v2486_v32, %v2454_v31  ;;  %v2497_v56 = vld [vmem:[#allocation14 + $0x1240] sm:$0xff]  ;;  %v6176_v23 = vpack.c.bf16 %v2678_v10, %v2646_v12  ;;  %v2722_v28 = vld [vmem:[#allocation14 + $0x1948] sm:$0xff] }
 0x6d4   : > { %6151 = vmatpush1.bf16.msra.mxu0 %v6150_v48  ;;  %4338 = vst [vmem:[%s7263_s21 + $0x8] sm:$0xff] %v3174_v63  ;;  %4350 = vst [vmem:[%s7263_s21 + $0x68] sm:$0xff] %v3636_v0  ;;  %5513 = vmatprep.subr.bf16.mxu1 %v5512_v49  ;;  %v2530_v48 = vld [vmem:[#allocation14 + $0x1348] sm:$0xff]  ;;  %v2517_v58 = vld [vmem:[#allocation14 + $0x12e0] sm:$0xff]  ;;  %v5530_v1 = vpack.c.bf16 %v2529_v57, %v2497_v56 }
 0x6d5   : > { %6153 = vmatprep.subr.bf16.mxu0 %v6152_v59  ;;  %v2518_v49 = vld [vmem:[#allocation14 + $0x12e8] sm:$0xff]  ;;  %v5528_v54 = vpack.c.bf16 %v2530_v48, %v2498_v47  ;;  %v6170_v7 = vpack.c.bf16 %v2549_v60, %v2517_v58  ;;  %v2645_v21 = vld [vmem:[#allocation14 + $0x16e0] sm:$0xff] }
 0x6d6   : > { %v6168_v59 = vpack.c.bf16 %v2550_v50, %v2518_v49  ;;  %v2582_v63 = vld [vmem:[#allocation14 + $0x14e8] sm:$0xff]  ;;  %v2677_v25 = vld [vmem:[#allocation14 + $0x17e0] sm:$0xff] }
 0x6d7   : > { %5515 = vmatpush1.bf16.msra.mxu1 %v5514_v2  ;;  %v2614_v0 = vld [vmem:[#allocation14 + $0x15e8] sm:$0xff]  ;;  %v5532_v2 = vpack.c.bf16 %v2594_v62, %v2562_v61  ;;  %v6178_v32 = vpack.c.bf16 %v2677_v25, %v2645_v21  ;;  %v2741_v43 = vld [vmem:[#allocation14 + $0x19e0] sm:$0xff]  ;;  %v1956_v25 = vld [vmem:[#allocation14 + $0x158] sm:$0xff] }
 0x6d8   : > { %6155 = vmatpush1.bf16.msra.mxu0 %v6154_v3  ;;  %5517 = vmatprep.subr.bf16.mxu1 %v5516_v4  ;;  %v2561_v3 = vld [vmem:[#allocation14 + $0x1440] sm:$0xff]  ;;  %v6172_v6 = vpack.c.bf16 %v2614_v0, %v2582_v63  ;;  %v2710_v29 = vld [vmem:[#allocation14 + $0x18e8] sm:$0xff]  ;;  %v6182_v50 = vpack.c.bf16 %v2741_v43, %v2709_v38  ;;  %v1987_v38 = vld [vmem:[#allocation14 + $0x250] sm:$0xff] }
 0x6d9   : > { %6157 = vmatprep.subr.bf16.mxu0 %v6156_v8  ;;  %v2593_v4 = vld [vmem:[#allocation14 + $0x1540] sm:$0xff]  ;;  %v2626_v8 = vld [vmem:[#allocation14 + $0x1648] sm:$0xff]  ;;  %v2052_v43 = vld [vmem:[#allocation14 + $0x458] sm:$0xff] }
 0x6da   : > { %v5534_v13 = vpack.c.bf16 %v2593_v4, %v2561_v3  ;;  %v2742_v30 = vld [vmem:[#allocation14 + $0x19e8] sm:$0xff]  ;;  %v2773_v56 = vld [vmem:[#allocation14 + $0x1ae0] sm:$0xff] }
 0x6db   : > { %5519 = vmatpush1.bf16.msra.mxu1 %v5518_v15  ;;  %v5536_v15 = vpack.c.bf16 %v2658_v9, %v2626_v8  ;;  %v6180_v42 = vpack.c.bf16 %v2742_v30, %v2710_v29  ;;  %v2786_v46 = vld [vmem:[#allocation14 + $0x1b48] sm:$0xff]  ;;  %v2805_v58 = vld [vmem:[#allocation14 + $0x1be0] sm:$0xff]  ;;  %v1923_v30 = vld [vmem:[#allocation14 + $0x50] sm:$0xff] }
 0x6dc   : > { %6159 = vmatpush1.bf16.msra.mxu0 %v6158_v16  ;;  %5521 = vmatprep.subr.bf16.mxu1 %v5520_v19  ;;  %v2625_v16 = vld [vmem:[#allocation14 + $0x1640] sm:$0xff]  ;;  %v2774_v47 = vld [vmem:[#allocation14 + $0x1ae8] sm:$0xff]  ;;  %v6186_v0 = vpack.c.bf16 %v2805_v58, %v2773_v56  ;;  %v2115_v56 = vld [vmem:[#allocation14 + $0x650] sm:$0xff] }
 0x6dd   : > { %6161 = vmatprep.subr.bf16.mxu0 %v6160_v27  ;;  %v2657_v19 = vld [vmem:[#allocation14 + $0x1740] sm:$0xff]  ;;  %v2690_v27 = vld [vmem:[#allocation14 + $0x1848] sm:$0xff]  ;;  %v2180_v58 = vld [vmem:[#allocation14 + $0x858] sm:$0xff] }
 0x6de   : > { %v5538_v31 = vpack.c.bf16 %v2657_v19, %v2625_v16  ;;  %v2806_v48 = vld [vmem:[#allocation14 + $0x1be8] sm:$0xff]  ;;  %v2837_v3 = vld [vmem:[#allocation14 + $0x1ce0] sm:$0xff] }
 0x6df   : > { %5523 = vmatpush1.bf16.msra.mxu1 %v5522_v33  ;;  %v5540_v33 = vpack.c.bf16 %v2722_v28, %v2690_v27  ;;  %v6184_v57 = vpack.c.bf16 %v2806_v48, %v2774_v47  ;;  %v2850_v60 = vld [vmem:[#allocation14 + $0x1d48] sm:$0xff]  ;;  %v6190_v10 = vpack.c.bf16 %v2869_v5, %v2837_v3  ;;  %v2901_v16 = vld [vmem:[#allocation14 + $0x1ee0] sm:$0xff]  ;;  %v2051_v48 = vld [vmem:[#allocation14 + $0x450] sm:$0xff]  ;;  %v7282_v3 = vsub.s32 3, %v7154_v17 }
 0x6e0   : > { %6163 = vmatpush1.bf16.msra.mxu0 %v6162_v36  ;;  %5525 = vmatprep.subr.bf16.mxu1 %v5524_v37  ;;  %v2689_v36 = vld [vmem:[#allocation14 + $0x1840] sm:$0xff]  ;;  %v2838_v61 = vld [vmem:[#allocation14 + $0x1ce8] sm:$0xff] }
 0x6e1   : > { %6165 = vmatprep.subr.bf16.mxu0 %v6164_v45  ;;  %v2721_v37 = vld [vmem:[#allocation14 + $0x1940] sm:$0xff]  ;;  %v2754_v45 = vld [vmem:[#allocation14 + $0x1a48] sm:$0xff] }
 0x6e2   : > { %v5542_v49 = vpack.c.bf16 %v2721_v37, %v2689_v36  ;;  %v2870_v62 = vld [vmem:[#allocation14 + $0x1de8] sm:$0xff]  ;;  %v2933_v21 = vld [vmem:[#allocation14 + $0x1fe0] sm:$0xff] }
 0x6e3   : > { %5527 = vmatpush1.bf16.msra.mxu1 %v5526_v51  ;;  %v5544_v51 = vpack.c.bf16 %v2786_v46, %v2754_v45  ;;  %v6188_v4 = vpack.c.bf16 %v2870_v62, %v2838_v61  ;;  %v2914_v11 = vld [vmem:[#allocation14 + $0x1f48] sm:$0xff]  ;;  %v6194_v28 = vpack.c.bf16 %v2933_v21, %v2901_v16  ;;  %v2084_v45 = vld [vmem:[#allocation14 + $0x558] sm:$0xff]  ;;  %v2179_v61 = vld [vmem:[#allocation14 + $0x850] sm:$0xff]  ;;  %v2960_v21 = vrot.slane %v7237_v24, %v7282_v3 }
 0x6e4   : > { %6167 = vmatpush1.bf16.msra.mxu0 %v6166_v52  ;;  %5529 = vmatprep.subr.bf16.mxu1 %v5528_v54  ;;  %v2753_v52 = vld [vmem:[#allocation14 + $0x1a40] sm:$0xff]  ;;  %v2902_v8 = vld [vmem:[#allocation14 + $0x1ee8] sm:$0xff]  ;;  %v5564_v47 = vpack.c.bf16 %v2084_v45, %v2052_v43  ;;  %v2275_v16 = vld [vmem:[#allocation14 + $0xb50] sm:$0xff] }
 0x6e5   : > { %6169 = vmatprep.subr.bf16.mxu0 %v6168_v59  ;;  %v2785_v54 = vld [vmem:[#allocation14 + $0x1b40] sm:$0xff]  ;;  %v2818_v59 = vld [vmem:[#allocation14 + $0x1c48] sm:$0xff]  ;;  %v2404_v43 = vld [vmem:[#allocation14 + $0xf58] sm:$0xff] }
 0x6e6   : > { %v5546_v63 = vpack.c.bf16 %v2785_v54, %v2753_v52  ;;  %v2934_v9 = vld [vmem:[#allocation14 + $0x1fe8] sm:$0xff] }
 0x6e7   : > { %5531 = vmatpush1.bf16.msra.mxu1 %v5530_v1  ;;  %v5548_v1 = vpack.c.bf16 %v2850_v60, %v2818_v59  ;;  %v6192_v19 = vpack.c.bf16 %v2934_v9, %v2902_v8  ;;  %v2212_v59 = vld [vmem:[#allocation14 + $0x958] sm:$0xff] }
 0x6e8   : > { %6171 = vmatpush1.bf16.msra.mxu0 %v6170_v7  ;;  %5533 = vmatprep.subr.bf16.mxu1 %v5532_v2  ;;  %v2817_v7 = vld [vmem:[#allocation14 + $0x1c40] sm:$0xff]  ;;  %v5572_v62 = vpack.c.bf16 %v2212_v59, %v2180_v58  ;;  %v2436_v59 = vld [vmem:[#allocation14 + $0x1058] sm:$0xff] }
 0x6e9   : > { %6173 = vmatprep.subr.bf16.mxu0 %v6172_v6  ;;  %v2849_v2 = vld [vmem:[#allocation14 + $0x1d40] sm:$0xff]  ;;  %v2882_v6 = vld [vmem:[#allocation14 + $0x1e48] sm:$0xff] }
 0x6ea   : > { %v5550_v12 = vpack.c.bf16 %v2849_v2, %v2817_v7  ;;  %v2276_v7 = vld [vmem:[#allocation14 + $0xb58] sm:$0xff]  ;;  %v7279_v2 = vld [vmem:[#allocation16 + $0x10] sm:$0xff] }
 0x6eb   : > { %5535 = vmatpush1.bf16.msra.mxu1 %v5534_v13  ;;  %v5552_v13 = vpack.c.bf16 %v2914_v11, %v2882_v6 }
 0x6ec   : > { %6175 = vmatpush1.bf16.msra.mxu0 %v6174_v14  ;;  %5537 = vmatprep.subr.bf16.mxu1 %v5536_v15  ;;  %v2881_v14 = vld [vmem:[#allocation14 + $0x1e40] sm:$0xff] }
 0x6ed   : > { %6177 = vmatprep.subr.bf16.mxu0 %v6176_v23  ;;  %v2913_v15 = vld [vmem:[#allocation14 + $0x1f40] sm:$0xff]  ;;  %v1924_v23 = vld [vmem:[#allocation14 + $0x58] sm:$0xff] }
 0x6ee   : > { %v5554_v27 = vpack.c.bf16 %v2913_v15, %v2881_v14  ;;  %v5556_v29 = vpack.c.bf16 %v1956_v25, %v1924_v23  ;;  %v3012_v14 = vrot.slane %v7279_v2, %v7157_v18  ;;  %v2243_v15 = vld [vmem:[#allocation14 + $0xa50] sm:$0xff]  ;;  %v2308_v23 = vld [vmem:[#allocation14 + $0xc58] sm:$0xff] }
 0x6ef   : > { %5539 = vmatpush1.bf16.msra.mxu1 %v5538_v31  ;;  %v1955_v31 = vld [vmem:[#allocation14 + $0x150] sm:$0xff]  ;;  %v2340_v25 = vld [vmem:[#allocation14 + $0xd58] sm:$0xff] }
 0x6f0   : > { %6179 = vmatpush1.bf16.msra.mxu0 %v6178_v32  ;;  %5541 = vmatprep.subr.bf16.mxu1 %v5540_v33  ;;  %v1988_v32 = vld [vmem:[#allocation14 + $0x258] sm:$0xff]  ;;  %v5558_v36 = vpack.c.bf16 %v1955_v31, %v1923_v30 }
 0x6f1   : > { %6181 = vmatprep.subr.bf16.mxu0 %v6180_v42  ;;  %v2020_v33 = vld [vmem:[#allocation14 + $0x358] sm:$0xff]  ;;  %v2019_v42 = vld [vmem:[#allocation14 + $0x350] sm:$0xff] }
 0x6f2   : > { %v5560_v37 = vpack.c.bf16 %v2020_v33, %v1988_v32  ;;  %v5562_v46 = vpack.c.bf16 %v2019_v42, %v1987_v38  ;;  %v5580_v32 = vpack.c.bf16 %v2340_v25, %v2308_v23  ;;  %v2307_v33 = vld [vmem:[#allocation14 + $0xc50] sm:$0xff]  ;;  %v2372_v42 = vld [vmem:[#allocation14 + $0xe58] sm:$0xff] }
 0x6f3   : > { %5543 = vmatpush1.bf16.msra.mxu1 %v5542_v49  ;;  %v2083_v49 = vld [vmem:[#allocation14 + $0x550] sm:$0xff]  ;;  %v2692_v25 = vld [vmem:[#allocation14 + $0x1858] sm:$0xff] }
 0x6f4   : > { %6183 = vmatpush1.bf16.msra.mxu0 %v6182_v50  ;;  %5545 = vmatprep.subr.bf16.mxu1 %v5544_v51  ;;  %v2116_v50 = vld [vmem:[#allocation14 + $0x658] sm:$0xff]  ;;  %v5566_v52 = vpack.c.bf16 %v2083_v49, %v2051_v48  ;;  %v2659_v23 = vld [vmem:[#allocation14 + $0x1750] sm:$0xff] }
 0x6f5   : > { %6185 = vmatprep.subr.bf16.mxu0 %v6184_v57  ;;  %v2148_v51 = vld [vmem:[#allocation14 + $0x758] sm:$0xff]  ;;  %v2147_v57 = vld [vmem:[#allocation14 + $0x750] sm:$0xff] }
 0x6f6   : > { %v5568_v54 = vpack.c.bf16 %v2148_v51, %v2116_v50  ;;  %v5570_v60 = vpack.c.bf16 %v2147_v57, %v2115_v56  ;;  %v2403_v56 = vld [vmem:[#allocation14 + $0xf50] sm:$0xff] }
 0x6f7   : > { %5547 = vmatpush1.bf16.msra.mxu1 %v5546_v63  ;;  %v2211_v63 = vld [vmem:[#allocation14 + $0x950] sm:$0xff] }
 0x6f8   : > { %6187 = vmatpush1.bf16.msra.mxu0 %v6186_v0  ;;  %5549 = vmatprep.subr.bf16.mxu1 %v5548_v1  ;;  %v7277_v0 = vsub.s32 2, %v7154_v17  ;;  %v2244_v1 = vld [vmem:[#allocation14 + $0xa58] sm:$0xff]  ;;  %v5574_v6 = vpack.c.bf16 %v2211_v63, %v2179_v61  ;;  %v2435_v63 = vld [vmem:[#allocation14 + $0x1050] sm:$0xff] }
 0x6f9   : > { %6189 = vmatprep.subr.bf16.mxu0 %v6188_v4  ;;  %v5576_v11 = vpack.c.bf16 %v2276_v7, %v2244_v1  ;;  %v2467_v1 = vld [vmem:[#allocation14 + $0x1150] sm:$0xff]  ;;  %v2500_v7 = vld [vmem:[#allocation14 + $0x1258] sm:$0xff] }
 0x6fb   : > { %5551 = vmatpush1.bf16.msra.mxu1 %v5550_v12 }
 0x6fc   : > { %6191 = vmatpush1.bf16.msra.mxu0 %v6190_v10  ;;  %5553 = vmatprep.subr.bf16.mxu1 %v5552_v13  ;;  %v2956_v13 = vrot.slane %v7237_v24, %v7277_v0 }
 0x6fd   : > { %6193 = vmatprep.subr.bf16.mxu0 %v6192_v19 }
 0x6ff   : > { %5555 = vmatpush1.bf16.msra.mxu1 %v5554_v27 }
 0x700   : > { %6195 = vmatpush1.bf16.msra.mxu0 %v6194_v28  ;;  %5557 = vmatprep.subr.bf16.mxu1 %v5556_v29 }
 0x702   : > { %3478 = vmatmul.mubr.f32.vlgmr.msra.gmra.mrb[20].mxu1 %v7192_v44 }
 0x703   : > { %4248 = vmatmul.mubr.f32.vlgmr.msra.gmra.mrb[18].mxu0 %v7192_v44  ;;  %3483 = vmatprep.mubr.f32.mxu1 %v7200_v53 }
 0x704   : > { %5559 = vmatpush1.bf16.msra.mxu1 %v5558_v36  ;;  %4253 = vmatprep.mubr.f32.mxu0 %v7200_v53  ;;  %v2339_v36 = vld [vmem:[#allocation14 + $0xd50] sm:$0xff] }
 0x705   : > { %5561 = vmatprep.subr.bf16.mxu1 %v5560_v37 }
 0x706   : > { %3484 = vmatmul.mubr.f32.gmra.mrb[22].mxu1 %v7202_v55 }
 0x707   : > { %4254 = vmatmul.mubr.f32.gmra.mrb[20].mxu0 %v7202_v55  ;;  %3554 = vmatprep.mubr.f32.mxu1 %v7190_v39 }
 0x708   : > { %5563 = vmatpush1.bf16.msra.mxu1 %v5562_v46 }
 0x709   : > { %5565 = vmatprep.subr.bf16.mxu1 %v5564_v47  ;;  %v5582_v47 = vpack.c.bf16 %v2339_v36, %v2307_v33  ;;  %v2755_v36 = vld [vmem:[#allocation14 + $0x1a50] sm:$0xff] }
 0x70c   : > { %5567 = vmatpush1.bf16.msra.mxu1 %v5566_v52  ;;  %v5584_v52 = vpack.c.bf16 %v2404_v43, %v2372_v42  ;;  %v2852_v42 = vld [vmem:[#allocation14 + $0x1d58] sm:$0xff] }
 0x70d   : > { %5569 = vmatprep.subr.bf16.mxu1 %v5568_v54  ;;  %v2371_v54 = vld [vmem:[#allocation14 + $0xe50] sm:$0xff] }
 0x70e   : > { %v5586_v61 = vpack.c.bf16 %v2403_v56, %v2371_v54  ;;  %v2915_v54 = vld [vmem:[#allocation14 + $0x1f50] sm:$0xff]  ;;  %v1928_v56 = vld [vmem:[#allocation14 + $0x78] sm:$0xff] }
 0x710   : > { %5571 = vmatpush1.bf16.msra.mxu1 %v5570_v60  ;;  %v3177_v4 = vpop.f32.mrb[6].mxu1  ;;  %v3639_v5 = vpop.f32.mrb[4].mxu0  ;;  %v2468_v60 = vld [vmem:[#allocation14 + $0x1158] sm:$0xff] }
 0x711   : > { %v3178_v8 = vadd.f32 %v3177_v4, %v7245_v34  ;;  %5573 = vmatprep.subr.bf16.mxu1 %v5572_v62  ;;  %v3640_v9 = vadd.f32 %v3639_v5, %v7248_v35  ;;  %v3179_v12 = vpop.f32.mrb[7].mxu1  ;;  %v3641_v10 = vpop.f32.mrb[5].mxu0  ;;  %v3016_v35 = vrot.slane %v7279_v2, %v7160_v20  ;;  %v5588_v62 = vpack.c.bf16 %v2468_v60, %v2436_v59  ;;  %v2532_v4 = vld [vmem:[#allocation14 + $0x1358] sm:$0xff]  ;;  %v1927_v60 = vld [vmem:[#allocation14 + $0x70] sm:$0xff] }
 0x712   : > { %v3180_v19 = vadd.f32 %v3179_v12, %v7252_v40  ;;  %v3642_v34 = vadd.f32 %v3641_v10, %v7255_v41  ;;  %v5578_v40 = vpack.c.bf16 %v2275_v16, %v2243_v15  ;;  %v5590_v5 = vpack.c.bf16 %v2467_v1, %v2435_v63  ;;  %v2596_v12 = vld [vmem:[#allocation14 + $0x1558] sm:$0xff]  ;;  %v2595_v15 = vld [vmem:[#allocation14 + $0x1550] sm:$0xff] }
 0x713   : > { %4369 = vst [vmem:[%s7263_s21 + $0x100] sm:$0xff] %v3178_v8  ;;  %4381 = vst [vmem:[%s7263_s21 + $0x160] sm:$0xff] %v3640_v9  ;;  %v2531_v8 = vld [vmem:[#allocation14 + $0x1350] sm:$0xff]  ;;  %v2564_v9 = vld [vmem:[#allocation14 + $0x1458] sm:$0xff] }
 0x714   : > { %4370 = vst [vmem:[%s7263_s21 + $0x108] sm:$0xff] %v3180_v19  ;;  %5575 = vmatpush1.bf16.msra.mxu1 %v5574_v6  ;;  %4382 = vst [vmem:[%s7263_s21 + $0x168] sm:$0xff] %v3642_v34  ;;  %v3248_v27 = vpop.f32.mrb[8].mxu1  ;;  %v3787_v28 = vpop.f32.mrb[6].mxu0  ;;  %v5592_v6 = vpack.c.bf16 %v2532_v4, %v2500_v7  ;;  %v2628_v16 = vld [vmem:[#allocation14 + $0x1658] sm:$0xff]  ;;  %v1991_v4 = vld [vmem:[#allocation14 + $0x270] sm:$0xff] }
 0x715   : > { %v3249_v41 = vadd.f32 %v3248_v27, %v2956_v13  ;;  %5577 = vmatprep.subr.bf16.mxu1 %v5576_v11  ;;  %v3788_v29 = vadd.f32 %v3787_v28, %v3012_v14  ;;  %v3250_v30 = vpop.f32.mrb[9].mxu1  ;;  %v3789_v31 = vpop.f32.mrb[7].mxu0  ;;  %v2499_v11 = vld [vmem:[#allocation14 + $0x1250] sm:$0xff]  ;;  %v2660_v19 = vld [vmem:[#allocation14 + $0x1758] sm:$0xff] }
 0x716   : > { %v3251_v37 = vadd.f32 %v3250_v30, %v2960_v21  ;;  %v3790_v38 = vadd.f32 %v3789_v31, %v3016_v35  ;;  %v5594_v10 = vpack.c.bf16 %v2531_v8, %v2499_v11  ;;  %v2724_v27 = vld [vmem:[#allocation14 + $0x1958] sm:$0xff] }
 0x717   : > { %4339 = vst [vmem:[%s7263_s21 + $0x10] sm:$0xff] %v3249_v41  ;;  %4353 = vst [vmem:[%s7263_s21 + $0x80] sm:$0xff] %v3788_v29  ;;  %v2691_v41 = vld [vmem:[#allocation14 + $0x1850] sm:$0xff]  ;;  %v2756_v30 = vld [vmem:[#allocation14 + $0x1a58] sm:$0xff] }
 0x718   : > { %4340 = vst [vmem:[%s7263_s21 + $0x18] sm:$0xff] %v3251_v37  ;;  %5579 = vmatpush1.bf16.msra.mxu1 %v5578_v40  ;;  %4354 = vst [vmem:[%s7263_s21 + $0x88] sm:$0xff] %v3790_v38  ;;  %v3254_v45 = vpop.f32.mrb[10].mxu1  ;;  %v3793_v46 = vpop.f32.mrb[8].mxu0  ;;  %v5604_v40 = vpack.c.bf16 %v2724_v27, %v2692_v25  ;;  %v2723_v29 = vld [vmem:[#allocation14 + $0x1950] sm:$0xff]  ;;  %v2788_v31 = vld [vmem:[#allocation14 + $0x1b58] sm:$0xff] }
 0x719   : > { %v3255_v48 = vadd.f32 %v3254_v45, %v2956_v13  ;;  %5581 = vmatprep.subr.bf16.mxu1 %v5580_v32  ;;  %v3794_v49 = vadd.f32 %v3793_v46, %v3012_v14  ;;  %v3256_v50 = vpop.f32.mrb[11].mxu1  ;;  %v3795_v51 = vpop.f32.mrb[9].mxu0  ;;  %v5596_v13 = vpack.c.bf16 %v2596_v12, %v2564_v9  ;;  %v2563_v14 = vld [vmem:[#allocation14 + $0x1450] sm:$0xff]  ;;  %v5606_v32 = vpack.c.bf16 %v2723_v29, %v2691_v41  ;;  %v2820_v38 = vld [vmem:[#allocation14 + $0x1c58] sm:$0xff] }
 0x71a   : > { %v3257_v57 = vadd.f32 %v3256_v50, %v2960_v21  ;;  %v3796_v58 = vadd.f32 %v3795_v51, %v3016_v35  ;;  %v5598_v34 = vpack.c.bf16 %v2595_v15, %v2563_v14  ;;  %v5600_v21 = vpack.c.bf16 %v2660_v19, %v2628_v16  ;;  %v2627_v35 = vld [vmem:[#allocation14 + $0x1650] sm:$0xff]  ;;  %v2024_v63 = vld [vmem:[#allocation14 + $0x378] sm:$0xff] }
 0x71b   : > { %4371 = vst [vmem:[%s7263_s21 + $0x110] sm:$0xff] %v3255_v48  ;;  %4385 = vst [vmem:[%s7263_s21 + $0x180] sm:$0xff] %v3794_v49  ;;  %v5602_v28 = vpack.c.bf16 %v2659_v23, %v2627_v35  ;;  %v5608_v33 = vpack.c.bf16 %v2788_v31, %v2756_v30  ;;  %v2787_v37 = vld [vmem:[#allocation14 + $0x1b50] sm:$0xff]  ;;  %v5612_v45 = vpack.c.bf16 %v2852_v42, %v2820_v38  ;;  %v2884_v48 = vld [vmem:[#allocation14 + $0x1e58] sm:$0xff] }
 0x71c   : > { %4372 = vst [vmem:[%s7263_s21 + $0x118] sm:$0xff] %v3257_v57  ;;  %5583 = vmatpush1.bf16.msra.mxu1 %v5582_v47  ;;  %4386 = vst [vmem:[%s7263_s21 + $0x188] sm:$0xff] %v3796_v58  ;;  %v5610_v43 = vpack.c.bf16 %v2787_v37, %v2755_v36  ;;  %v2819_v46 = vld [vmem:[#allocation14 + $0x1c50] sm:$0xff]  ;;  %v2916_v49 = vld [vmem:[#allocation14 + $0x1f58] sm:$0xff]  ;;  %v2964_v30 = vrot.slane %v7237_v24, %v7235_v22  ;;  %v3028_v31 = vrot.slane %v7279_v2, %v7235_v22 }
 0x71d   : > { %5585 = vmatprep.subr.bf16.mxu1 %v5584_v52  ;;  %v2851_v47 = vld [vmem:[#allocation14 + $0x1d50] sm:$0xff]  ;;  %v5616_v51 = vpack.c.bf16 %v2916_v49, %v2884_v48  ;;  %v1960_v57 = vld [vmem:[#allocation14 + $0x178] sm:$0xff]  ;;  %v2968_v37 = vrot.slane %v7237_v24, %v7240_v26  ;;  %v3032_v38 = vrot.slane %v7279_v2, %v7240_v26 }
 0x71e   : > { %v5614_v50 = vpack.c.bf16 %v2851_v47, %v2819_v46  ;;  %v2883_v52 = vld [vmem:[#allocation14 + $0x1e50] sm:$0xff]  ;;  %v5684_v59 = vpack.c.bf16 %v1960_v57, %v1928_v56  ;;  %v2088_v11 = vld [vmem:[#allocation14 + $0x578] sm:$0xff] }
 0x71f   : > { %v5618_v58 = vpack.c.bf16 %v2915_v54, %v2883_v52  ;;  %v2055_v12 = vld [vmem:[#allocation14 + $0x470] sm:$0xff]  ;;  %v2152_v14 = vld [vmem:[#allocation14 + $0x778] sm:$0xff] }
 0x720   : > { %5587 = vmatpush1.bf16.msra.mxu1 %v5586_v61  ;;  %v1959_v61 = vld [vmem:[#allocation14 + $0x170] sm:$0xff]  ;;  %v2216_v35 = vld [vmem:[#allocation14 + $0x978] sm:$0xff] }
 0x721   : > { %5589 = vmatprep.subr.bf16.mxu1 %v5588_v62  ;;  %v1992_v62 = vld [vmem:[#allocation14 + $0x278] sm:$0xff]  ;;  %v5686_v1 = vpack.c.bf16 %v1959_v61, %v1927_v60  ;;  %v2119_v19 = vld [vmem:[#allocation14 + $0x670] sm:$0xff] }
 0x722   : > { %v5688_v7 = vpack.c.bf16 %v2024_v63, %v1992_v62  ;;  %v2183_v27 = vld [vmem:[#allocation14 + $0x870] sm:$0xff]  ;;  %v2280_v41 = vld [vmem:[#allocation14 + $0xb78] sm:$0xff] }
 0x723   : > { %v2279_v36 = vld [vmem:[#allocation14 + $0xb70] sm:$0xff]  ;;  %v2312_v42 = vld [vmem:[#allocation14 + $0xc78] sm:$0xff] }
 0x724   : > { %5591 = vmatpush1.bf16.msra.mxu1 %v5590_v5  ;;  %v2023_v5 = vld [vmem:[#allocation14 + $0x370] sm:$0xff]  ;;  %v2376_v57 = vld [vmem:[#allocation14 + $0xe78] sm:$0xff] }
 0x725   : > { %5593 = vmatprep.subr.bf16.mxu1 %v5592_v6  ;;  %v2056_v6 = vld [vmem:[#allocation14 + $0x478] sm:$0xff]  ;;  %v5690_v8 = vpack.c.bf16 %v2023_v5, %v1991_v4  ;;  %v2311_v24 = vld [vmem:[#allocation14 + $0xc70] sm:$0xff] }
 0x726   : > { %v5692_v9 = vpack.c.bf16 %v2088_v11, %v2056_v6  ;;  %v2343_v54 = vld [vmem:[#allocation14 + $0xd70] sm:$0xff] }
 0x727   : > { %v5710_v61 = vpack.c.bf16 %v2343_v54, %v2311_v24  ;;  %v2375_v5 = vld [vmem:[#allocation14 + $0xe70] sm:$0xff]  ;;  %v2824_v54 = vld [vmem:[#allocation14 + $0x1c78] sm:$0xff] }
 0x728   : > { %5595 = vmatpush1.bf16.msra.mxu1 %v5594_v10  ;;  %v2087_v10 = vld [vmem:[#allocation14 + $0x570] sm:$0xff] }
 0x729   : > { %5597 = vmatprep.subr.bf16.mxu1 %v5596_v13  ;;  %v2120_v13 = vld [vmem:[#allocation14 + $0x678] sm:$0xff]  ;;  %v5694_v15 = vpack.c.bf16 %v2087_v10, %v2055_v12  ;;  %v2407_v6 = vld [vmem:[#allocation14 + $0xf70] sm:$0xff] }
 0x72a   : > { %v5696_v16 = vpack.c.bf16 %v2152_v14, %v2120_v13  ;;  %v2472_v12 = vld [vmem:[#allocation14 + $0x1178] sm:$0xff]  ;;  %v5714_v10 = vpack.c.bf16 %v2407_v6, %v2375_v5  ;;  %v2439_v14 = vld [vmem:[#allocation14 + $0x1070] sm:$0xff] }
 0x72b   : > { %v2791_v24 = vld [vmem:[#allocation14 + $0x1b70] sm:$0xff]  ;;  %v1964_v5 = vld [vmem:[#allocation14 + $0x198] sm:$0xff] }
 0x72c   : > { %5599 = vmatpush1.bf16.msra.mxu1 %v5598_v34  ;;  %v2151_v34 = vld [vmem:[#allocation14 + $0x770] sm:$0xff] }
 0x72d   : > { %5601 = vmatprep.subr.bf16.mxu1 %v5600_v21  ;;  %v2184_v21 = vld [vmem:[#allocation14 + $0x878] sm:$0xff]  ;;  %v5698_v23 = vpack.c.bf16 %v2151_v34, %v2119_v19 }
 0x72e   : > { %v5700_v25 = vpack.c.bf16 %v2216_v35, %v2184_v21  ;;  %v2536_v19 = vld [vmem:[#allocation14 + $0x1378] sm:$0xff]  ;;  %v2503_v35 = vld [vmem:[#allocation14 + $0x1270] sm:$0xff] }
 0x730   : > { %5603 = vmatpush1.bf16.msra.mxu1 %v5602_v28  ;;  %v2215_v28 = vld [vmem:[#allocation14 + $0x970] sm:$0xff] }
 0x731   : > { %5605 = vmatprep.subr.bf16.mxu1 %v5604_v40  ;;  %v2248_v40 = vld [vmem:[#allocation14 + $0xa78] sm:$0xff]  ;;  %v5702_v29 = vpack.c.bf16 %v2215_v28, %v2183_v27 }
 0x732   : > { %v2600_v27 = vld [vmem:[#allocation14 + $0x1578] sm:$0xff] }
 0x734   : > { %5607 = vmatpush1.bf16.msra.mxu1 %v5606_v32  ;;  %v5704_v32 = vpack.c.bf16 %v2280_v41, %v2248_v40  ;;  %v2567_v41 = vld [vmem:[#allocation14 + $0x1470] sm:$0xff] }
 0x735   : > { %5609 = vmatprep.subr.bf16.mxu1 %v5608_v33  ;;  %v2247_v33 = vld [vmem:[#allocation14 + $0xa70] sm:$0xff] }
 0x736   : > { %v5706_v47 = vpack.c.bf16 %v2279_v36, %v2247_v33  ;;  %v2631_v36 = vld [vmem:[#allocation14 + $0x1670] sm:$0xff] }
 0x738   : > { %5611 = vmatpush1.bf16.msra.mxu1 %v5610_v43  ;;  %v2344_v43 = vld [vmem:[#allocation14 + $0xd78] sm:$0xff] }
 0x739   : > { %5613 = vmatprep.subr.bf16.mxu1 %v5612_v45  ;;  %v5708_v52 = vpack.c.bf16 %v2344_v43, %v2312_v42  ;;  %v2728_v42 = vld [vmem:[#allocation14 + $0x1978] sm:$0xff] }
 0x73c   : > { %5615 = vmatpush1.bf16.msra.mxu1 %v5614_v50 }
 0x73d   : > { %5617 = vmatprep.subr.bf16.mxu1 %v5616_v51 }
 0x740   : > { %5619 = vmatpush1.bf16.msra.mxu1 %v5618_v58  ;;  %v2408_v58 = vld [vmem:[#allocation14 + $0xf78] sm:$0xff] }
 0x741   : > { %5685 = vmatprep.subr.bf16.mxu1 %v5684_v59  ;;  %v5712_v4 = vpack.c.bf16 %v2408_v58, %v2376_v57  ;;  %v2823_v58 = vld [vmem:[#allocation14 + $0x1c70] sm:$0xff] }
 0x743   : > { %3555 = vmatmul.mubr.f32.vlgmr.msra.gmra.mrb[24].mxu1 %v7192_v44 }
 0x744   : > { %3560 = vmatprep.mubr.f32.mxu1 %v7200_v53  ;;  %5687 = vmatpush1.bf16.msra.mxu1 %v5686_v1 }
 0x745   : > { %5689 = vmatprep.subr.bf16.mxu1 %v5688_v7 }
 0x747   : > { %3561 = vmatmul.mubr.f32.gmra.mrb[26].mxu1 %v7202_v55 }
 0x748   : > { %5691 = vmatpush1.bf16.msra.mxu1 %v5690_v8  ;;  %3708 = vmatprep.mubr.f32.mxu1 %v7190_v39 }
 0x749   : > { %5693 = vmatprep.subr.bf16.mxu1 %v5692_v9  ;;  %v2440_v9 = vld [vmem:[#allocation14 + $0x1078] sm:$0xff] }
 0x74a   : > { %v5716_v13 = vpack.c.bf16 %v2472_v12, %v2440_v9  ;;  %v1963_v9 = vld [vmem:[#allocation14 + $0x190] sm:$0xff]  ;;  %v1996_v12 = vld [vmem:[#allocation14 + $0x298] sm:$0xff] }
 0x74c   : > { %5695 = vmatpush1.bf16.msra.mxu1 %v5694_v15  ;;  %v2471_v15 = vld [vmem:[#allocation14 + $0x1170] sm:$0xff] }
 0x74d   : > { %5697 = vmatprep.subr.bf16.mxu1 %v5696_v16  ;;  %v2504_v16 = vld [vmem:[#allocation14 + $0x1278] sm:$0xff]  ;;  %v5718_v34 = vpack.c.bf16 %v2471_v15, %v2439_v14  ;;  %v1995_v15 = vld [vmem:[#allocation14 + $0x290] sm:$0xff] }
 0x74e   : > { %v5720_v21 = vpack.c.bf16 %v2536_v19, %v2504_v16  ;;  %v2027_v16 = vld [vmem:[#allocation14 + $0x390] sm:$0xff]  ;;  %v2060_v19 = vld [vmem:[#allocation14 + $0x498] sm:$0xff] }
 0x750   : > { %5699 = vmatpush1.bf16.msra.mxu1 %v5698_v23  ;;  %v2535_v23 = vld [vmem:[#allocation14 + $0x1370] sm:$0xff] }
 0x751   : > { %5701 = vmatprep.subr.bf16.mxu1 %v5700_v25  ;;  %v2568_v25 = vld [vmem:[#allocation14 + $0x1478] sm:$0xff]  ;;  %v5722_v28 = vpack.c.bf16 %v2535_v23, %v2503_v35  ;;  %v2059_v23 = vld [vmem:[#allocation14 + $0x490] sm:$0xff] }
 0x752   : > { %v5724_v40 = vpack.c.bf16 %v2600_v27, %v2568_v25  ;;  %v2091_v25 = vld [vmem:[#allocation14 + $0x590] sm:$0xff]  ;;  %v2124_v27 = vld [vmem:[#allocation14 + $0x698] sm:$0xff] }
 0x754   : > { %5703 = vmatpush1.bf16.msra.mxu1 %v5702_v29  ;;  %v3325_v45 = vpop.f32.mrb[12].mxu1  ;;  %v3941_v46 = vpop.f32.mrb[10].mxu0  ;;  %v2599_v29 = vld [vmem:[#allocation14 + $0x1570] sm:$0xff] }
 0x755   : > { %v3326_v48 = vadd.f32 %v3325_v45, %v2964_v30  ;;  %v3942_v49 = vadd.f32 %v3941_v46, %v3028_v31  ;;  %v3327_v50 = vpop.f32.mrb[13].mxu1  ;;  %5705 = vmatprep.subr.bf16.mxu1 %v5704_v32  ;;  %v3943_v51 = vpop.f32.mrb[11].mxu0  ;;  %v5726_v32 = vpack.c.bf16 %v2599_v29, %v2567_v41  ;;  %v2695_v46 = vld [vmem:[#allocation14 + $0x1870] sm:$0xff] }
 0x756   : > { %v3328_v56 = vadd.f32 %v3327_v50, %v2968_v37  ;;  %v3944_v2 = vadd.f32 %v3943_v51, %v3032_v38  ;;  %v2123_v29 = vld [vmem:[#allocation14 + $0x690] sm:$0xff] }
 0x757   : > { %4341 = vst [vmem:[%s7263_s21 + $0x20] sm:$0xff] %v3326_v48  ;;  %4357 = vst [vmem:[%s7263_s21 + $0xa0] sm:$0xff] %v3942_v49  ;;  %v2760_v48 = vld [vmem:[#allocation14 + $0x1a78] sm:$0xff] }
 0x758   : > { %4342 = vst [vmem:[%s7263_s21 + $0x28] sm:$0xff] %v3328_v56  ;;  %4358 = vst [vmem:[%s7263_s21 + $0xa8] sm:$0xff] %v3944_v2  ;;  %5707 = vmatpush1.bf16.msra.mxu1 %v5706_v47  ;;  %v3331_v59 = vpop.f32.mrb[14].mxu1  ;;  %v3947_v60 = vpop.f32.mrb[12].mxu0  ;;  %v2727_v47 = vld [vmem:[#allocation14 + $0x1970] sm:$0xff]  ;;  %v2792_v49 = vld [vmem:[#allocation14 + $0x1b78] sm:$0xff] }
 0x759   : > { %v3332_v62 = vadd.f32 %v3331_v59, %v2964_v30  ;;  %v3948_v63 = vadd.f32 %v3947_v60, %v3028_v31  ;;  %v3333_v1 = vpop.f32.mrb[15].mxu1  ;;  %5709 = vmatprep.subr.bf16.mxu1 %v5708_v52  ;;  %v3949_v7 = vpop.f32.mrb[13].mxu0  ;;  %v2632_v30 = vld [vmem:[#allocation14 + $0x1678] sm:$0xff]  ;;  %v5734_v50 = vpack.c.bf16 %v2727_v47, %v2695_v46  ;;  %v5736_v51 = vpack.c.bf16 %v2792_v49, %v2760_v48  ;;  %v2759_v52 = vld [vmem:[#allocation14 + $0x1a70] sm:$0xff]  ;;  %v6414_v49 = vld [vmem:[#allocation16] sm:$0xff] }
 0x75a   : > { %v3334_v11 = vadd.f32 %v3333_v1, %v2968_v37  ;;  %v3950_v8 = vadd.f32 %v3949_v7, %v3032_v38  ;;  %v2664_v31 = vld [vmem:[#allocation14 + $0x1778] sm:$0xff]  ;;  %v2663_v37 = vld [vmem:[#allocation14 + $0x1770] sm:$0xff]  ;;  %v5738_v2 = vpack.c.bf16 %v2791_v24, %v2759_v52 }
 0x75b   : > { %4373 = vst [vmem:[%s7263_s21 + $0x120] sm:$0xff] %v3332_v62  ;;  %4389 = vst [vmem:[%s7263_s21 + $0x1a0] sm:$0xff] %v3948_v63  ;;  %v5728_v33 = vpack.c.bf16 %v2664_v31, %v2632_v30  ;;  %v2696_v38 = vld [vmem:[#allocation14 + $0x1878] sm:$0xff]  ;;  %v5730_v43 = vpack.c.bf16 %v2663_v37, %v2631_v36  ;;  %v2855_v59 = vld [vmem:[#allocation14 + $0x1d70] sm:$0xff] }
 0x75c   : > { %4374 = vst [vmem:[%s7263_s21 + $0x128] sm:$0xff] %v3334_v11  ;;  %4390 = vst [vmem:[%s7263_s21 + $0x1a8] sm:$0xff] %v3950_v8  ;;  %5711 = vmatpush1.bf16.msra.mxu1 %v5710_v61  ;;  %v5732_v45 = vpack.c.bf16 %v2728_v42, %v2696_v38  ;;  %v2856_v56 = vld [vmem:[#allocation14 + $0x1d78] sm:$0xff]  ;;  %v5742_v62 = vpack.c.bf16 %v2855_v59, %v2823_v58  ;;  %v2887_v1 = vld [vmem:[#allocation14 + $0x1e70] sm:$0xff]  ;;  %v7333_v42 = vsub.s32 6, %v7154_v17 }
 0x75d   : > { %5713 = vmatprep.subr.bf16.mxu1 %v5712_v4  ;;  %v5740_v57 = vpack.c.bf16 %v2856_v56, %v2824_v54  ;;  %v2888_v60 = vld [vmem:[#allocation14 + $0x1e78] sm:$0xff]  ;;  %v2919_v7 = vld [vmem:[#allocation14 + $0x1f70] sm:$0xff] }
 0x75e   : > { %v2920_v61 = vld [vmem:[#allocation14 + $0x1f78] sm:$0xff]  ;;  %v5746_v6 = vpack.c.bf16 %v2919_v7, %v2887_v1  ;;  %v1931_v8 = vld [vmem:[#allocation14 + $0x90] sm:$0xff] }
 0x75f   : > { %v5744_v63 = vpack.c.bf16 %v2920_v61, %v2888_v60  ;;  %v1932_v4 = vld [vmem:[#allocation14 + $0x98] sm:$0xff]  ;;  %v2155_v30 = vld [vmem:[#allocation14 + $0x790] sm:$0xff] }
 0x760   : > { %5715 = vmatpush1.bf16.msra.mxu1 %v5714_v10  ;;  %v5812_v11 = vpack.c.bf16 %v1964_v5, %v1932_v4  ;;  %v2028_v10 = vld [vmem:[#allocation14 + $0x398] sm:$0xff]  ;;  %v2187_v37 = vld [vmem:[#allocation14 + $0x890] sm:$0xff] }
 0x761   : > { %5717 = vmatprep.subr.bf16.mxu1 %v5716_v13  ;;  %v5814_v13 = vpack.c.bf16 %v1963_v9, %v1931_v8  ;;  %v5816_v14 = vpack.c.bf16 %v2028_v10, %v1996_v12  ;;  %v2188_v31 = vld [vmem:[#allocation14 + $0x898] sm:$0xff]  ;;  %v2219_v38 = vld [vmem:[#allocation14 + $0x990] sm:$0xff] }
 0x762   : > { %v2284_v46 = vld [vmem:[#allocation14 + $0xb98] sm:$0xff]  ;;  %v5830_v48 = vpack.c.bf16 %v2219_v38, %v2187_v37  ;;  %v2251_v52 = vld [vmem:[#allocation14 + $0xa90] sm:$0xff] }
 0x763   : > { %v7338_v47 = vld [vmem:[#allocation16 + $0x18] sm:$0xff]  ;;  %v2283_v24 = vld [vmem:[#allocation14 + $0xb90] sm:$0xff] }
 0x764   : > { %5719 = vmatpush1.bf16.msra.mxu1 %v5718_v34  ;;  %v2092_v34 = vld [vmem:[#allocation14 + $0x598] sm:$0xff]  ;;  %v3044_v54 = vrot.slane %v7338_v47, %v7157_v18  ;;  %v5834_v59 = vpack.c.bf16 %v2283_v24, %v2251_v52  ;;  %v2315_v1 = vld [vmem:[#allocation14 + $0xc90] sm:$0xff] }
 0x765   : > { %5721 = vmatprep.subr.bf16.mxu1 %v5720_v21  ;;  %v5818_v21 = vpack.c.bf16 %v2027_v16, %v1995_v15  ;;  %v5820_v35 = vpack.c.bf16 %v2092_v34, %v2060_v19  ;;  %v2347_v7 = vld [vmem:[#allocation14 + $0xd90] sm:$0xff]  ;;  %v2412_v8 = vld [vmem:[#allocation14 + $0xf98] sm:$0xff] }
 0x766   : > { %v5838_v10 = vpack.c.bf16 %v2347_v7, %v2315_v1  ;;  %v2379_v19 = vld [vmem:[#allocation14 + $0xe90] sm:$0xff]  ;;  %v2636_v52 = vld [vmem:[#allocation14 + $0x1698] sm:$0xff] }
 0x767   : > { %v2411_v34 = vld [vmem:[#allocation14 + $0xf90] sm:$0xff]  ;;  %v2668_v24 = vld [vmem:[#allocation14 + $0x1798] sm:$0xff] }
 0x768   : > { %5723 = vmatpush1.bf16.msra.mxu1 %v5722_v28  ;;  %v2156_v28 = vld [vmem:[#allocation14 + $0x798] sm:$0xff]  ;;  %v2507_v37 = vld [vmem:[#allocation14 + $0x1290] sm:$0xff] }
 0x769   : > { %5725 = vmatprep.subr.bf16.mxu1 %v5724_v40  ;;  %v5822_v40 = vpack.c.bf16 %v2091_v25, %v2059_v23  ;;  %v5824_v41 = vpack.c.bf16 %v2156_v28, %v2124_v27  ;;  %v2444_v25 = vld [vmem:[#allocation14 + $0x1098] sm:$0xff]  ;;  %v2539_v38 = vld [vmem:[#allocation14 + $0x1390] sm:$0xff] }
 0x76a   : > { %v2476_v27 = vld [vmem:[#allocation14 + $0x1198] sm:$0xff] }
 0x76b   : > { %v2796_v1 = vld [vmem:[#allocation14 + $0x1b98] sm:$0xff] }
 0x76c   : > { %5727 = vmatpush1.bf16.msra.mxu1 %v5726_v32  ;;  %v2220_v32 = vld [vmem:[#allocation14 + $0x998] sm:$0xff] }
 0x76d   : > { %5729 = vmatprep.subr.bf16.mxu1 %v5728_v33  ;;  %v5826_v33 = vpack.c.bf16 %v2155_v30, %v2123_v29  ;;  %v5828_v36 = vpack.c.bf16 %v2220_v32, %v2188_v31  ;;  %v2443_v29 = vld [vmem:[#allocation14 + $0x1090] sm:$0xff]  ;;  %v2508_v31 = vld [vmem:[#allocation14 + $0x1298] sm:$0xff] }
 0x76e   : > { %v2475_v30 = vld [vmem:[#allocation14 + $0x1190] sm:$0xff]  ;;  %v2540_v32 = vld [vmem:[#allocation14 + $0x1398] sm:$0xff] }
 0x770   : > { %5731 = vmatpush1.bf16.msra.mxu1 %v5730_v43  ;;  %v7336_v43 = vsub.s32 7, %v7154_v17  ;;  %v2316_v17 = vld [vmem:[#allocation14 + $0xc98] sm:$0xff] }
 0x771   : > { %5733 = vmatprep.subr.bf16.mxu1 %v5732_v45  ;;  %v2252_v45 = vld [vmem:[#allocation14 + $0xa98] sm:$0xff] }
 0x772   : > { %v2976_v56 = vrot.slane %v6414_v49, %v7336_v43 }
 0x774   : > { %5735 = vmatpush1.bf16.msra.mxu1 %v5734_v50  ;;  %v2972_v50 = vrot.slane %v6414_v49, %v7333_v42 }
 0x775   : > { %5737 = vmatprep.subr.bf16.mxu1 %v5736_v51  ;;  %v5832_v51 = vpack.c.bf16 %v2284_v46, %v2252_v45  ;;  %v2572_v45 = vld [vmem:[#allocation14 + $0x1498] sm:$0xff] }
 0x776   : > { %v2604_v46 = vld [vmem:[#allocation14 + $0x1598] sm:$0xff] }
 0x777   : > { %v5852_v49 = vpack.c.bf16 %v2604_v46, %v2572_v45  ;;  %v2063_v46 = vld [vmem:[#allocation14 + $0x4b0] sm:$0xff] }
 0x778   : > { %5739 = vmatpush1.bf16.msra.mxu1 %v5738_v2  ;;  %v2348_v2 = vld [vmem:[#allocation14 + $0xd98] sm:$0xff] }
 0x779   : > { %5741 = vmatprep.subr.bf16.mxu1 %v5740_v57  ;;  %v3048_v57 = vrot.slane %v7338_v47, %v7160_v20 }
 0x77c   : > { %5743 = vmatpush1.bf16.msra.mxu1 %v5742_v62 }
 0x77d   : > { %5745 = vmatprep.subr.bf16.mxu1 %v5744_v63  ;;  %v5836_v63 = vpack.c.bf16 %v2348_v2, %v2316_v17  ;;  %v2635_v17 = vld [vmem:[#allocation14 + $0x1690] sm:$0xff] }
 0x77e   : > { %v2667_v2 = vld [vmem:[#allocation14 + $0x1790] sm:$0xff] }
 0x780   : > { %5747 = vmatpush1.bf16.msra.mxu1 %v5746_v6 }
 0x781   : > { %5813 = vmatprep.subr.bf16.mxu1 %v5812_v11  ;;  %v2380_v11 = vld [vmem:[#allocation14 + $0xe98] sm:$0xff] }
 0x782   : > { %v5840_v16 = vpack.c.bf16 %v2412_v8, %v2380_v11  ;;  %v2828_v11 = vld [vmem:[#allocation14 + $0x1c98] sm:$0xff] }
 0x783   : > { %3709 = vmatmul.mubr.f32.vlgmr.msra.gmra.mrb[28].mxu1 %v7192_v44  ;;  %v2860_v8 = vld [vmem:[#allocation14 + $0x1d98] sm:$0xff] }
 0x784   : > { %3714 = vmatprep.mubr.f32.mxu1 %v7200_v53  ;;  %5815 = vmatpush1.bf16.msra.mxu1 %v5814_v13 }
 0x785   : > { %5817 = vmatprep.subr.bf16.mxu1 %v5816_v14 }
 0x787   : > { %3715 = vmatmul.mubr.f32.gmra.mrb[30].mxu1 %v7202_v55 }
 0x788   : > { %5819 = vmatpush1.bf16.msra.mxu1 %v5818_v21  ;;  %3862 = vmatprep.mubr.f32.mxu1 %v7190_v39 }
 0x789   : > { %5821 = vmatprep.subr.bf16.mxu1 %v5820_v35 }
 0x78c   : > { %5823 = vmatpush1.bf16.msra.mxu1 %v5822_v40  ;;  %v5842_v40 = vpack.c.bf16 %v2411_v34, %v2379_v19  ;;  %v2891_v34 = vld [vmem:[#allocation14 + $0x1e90] sm:$0xff] }
 0x78d   : > { %5825 = vmatprep.subr.bf16.mxu1 %v5824_v41  ;;  %v5844_v41 = vpack.c.bf16 %v2476_v27, %v2444_v25 }
 0x790   : > { %5827 = vmatpush1.bf16.msra.mxu1 %v5826_v33  ;;  %v5846_v33 = vpack.c.bf16 %v2475_v30, %v2443_v29  ;;  %v2032_v29 = vld [vmem:[#allocation14 + $0x3b8] sm:$0xff] }
 0x791   : > { %5829 = vmatprep.subr.bf16.mxu1 %v5828_v36  ;;  %v5848_v36 = vpack.c.bf16 %v2540_v32, %v2508_v31  ;;  %v1999_v32 = vld [vmem:[#allocation14 + $0x2b0] sm:$0xff] }
 0x794   : > { %5831 = vmatpush1.bf16.msra.mxu1 %v5830_v48  ;;  %v3402_v58 = vpop.f32.mrb[16].mxu1  ;;  %v5850_v48 = vpack.c.bf16 %v2539_v38, %v2507_v37  ;;  %v2096_v37 = vld [vmem:[#allocation14 + $0x5b8] sm:$0xff] }
 0x795   : > { %v3403_v60 = vadd.f32 %v3402_v58, %v2972_v50  ;;  %v4095_v61 = vpop.f32.mrb[14].mxu0  ;;  %v3404_v62 = vpop.f32.mrb[17].mxu1  ;;  %5833 = vmatprep.subr.bf16.mxu1 %v5832_v51  ;;  %v2603_v51 = vld [vmem:[#allocation14 + $0x1590] sm:$0xff]  ;;  %v2732_v58 = vld [vmem:[#allocation14 + $0x1998] sm:$0xff] }
 0x796   : > { %v4096_v4 = vadd.f32 %v4095_v61, %v3044_v54  ;;  %v3405_v5 = vadd.f32 %v3404_v62, %v2976_v56  ;;  %v4097_v6 = vpop.f32.mrb[15].mxu0  ;;  %v2699_v61 = vld [vmem:[#allocation14 + $0x1890] sm:$0xff] }
 0x797   : > { %4343 = vst [vmem:[%s7263_s21 + $0x30] sm:$0xff] %v3403_v60  ;;  %v4098_v9 = vadd.f32 %v4097_v6, %v3048_v57  ;;  %v2731_v62 = vld [vmem:[#allocation14 + $0x1990] sm:$0xff] }
 0x798   : > { %4361 = vst [vmem:[%s7263_s21 + $0xc0] sm:$0xff] %v4096_v4  ;;  %4344 = vst [vmem:[%s7263_s21 + $0x38] sm:$0xff] %v3405_v5  ;;  %5835 = vmatpush1.bf16.msra.mxu1 %v5834_v59  ;;  %v3408_v12 = vpop.f32.mrb[18].mxu1  ;;  %v5858_v59 = vpack.c.bf16 %v2667_v2, %v2635_v17  ;;  %v5862_v7 = vpack.c.bf16 %v2731_v62, %v2699_v61  ;;  %v2763_v5 = vld [vmem:[#allocation14 + $0x1a90] sm:$0xff]  ;;  %v2224_v17 = vld [vmem:[#allocation14 + $0x9b8] sm:$0xff] }
 0x799   : > { %4362 = vst [vmem:[%s7263_s21 + $0xc8] sm:$0xff] %v4098_v9  ;;  %v3409_v13 = vadd.f32 %v3408_v12, %v2972_v50  ;;  %v4101_v14 = vpop.f32.mrb[16].mxu0  ;;  %v3410_v15 = vpop.f32.mrb[19].mxu1  ;;  %5837 = vmatprep.subr.bf16.mxu1 %v5836_v63  ;;  %v2571_v50 = vld [vmem:[#allocation14 + $0x1490] sm:$0xff]  ;;  %v2764_v63 = vld [vmem:[#allocation14 + $0x1a98] sm:$0xff]  ;;  %v5868_v12 = vpack.c.bf16 %v2860_v8, %v2828_v11  ;;  %v3060_v8 = vrot.slane %v7338_v47, %v7235_v22 }
 0x79a   : > { %v4102_v21 = vadd.f32 %v4101_v14, %v3044_v54  ;;  %v3411_v35 = vadd.f32 %v3410_v15, %v2976_v56  ;;  %v4103_v23 = vpop.f32.mrb[17].mxu0  ;;  %v5854_v54 = vpack.c.bf16 %v2603_v51, %v2571_v50  ;;  %v5856_v56 = vpack.c.bf16 %v2668_v24, %v2636_v52  ;;  %v2795_v6 = vld [vmem:[#allocation14 + $0x1b90] sm:$0xff]  ;;  %v2892_v14 = vld [vmem:[#allocation14 + $0x1e98] sm:$0xff] }
 0x79b   : > { %4375 = vst [vmem:[%s7263_s21 + $0x130] sm:$0xff] %v3409_v13  ;;  %v4104_v28 = vadd.f32 %v4103_v23, %v3048_v57  ;;  %v2700_v57 = vld [vmem:[#allocation14 + $0x1898] sm:$0xff]  ;;  %v5864_v4 = vpack.c.bf16 %v2796_v1, %v2764_v63  ;;  %v5866_v9 = vpack.c.bf16 %v2795_v6, %v2763_v5  ;;  %v2859_v13 = vld [vmem:[#allocation14 + $0x1d90] sm:$0xff] }
 0x79c   : > { %4393 = vst [vmem:[%s7263_s21 + $0x1c0] sm:$0xff] %v4102_v21  ;;  %4376 = vst [vmem:[%s7263_s21 + $0x138] sm:$0xff] %v3411_v35  ;;  %5839 = vmatpush1.bf16.msra.mxu1 %v5838_v10  ;;  %v5860_v60 = vpack.c.bf16 %v2732_v58, %v2700_v57  ;;  %v2827_v10 = vld [vmem:[#allocation14 + $0x1c90] sm:$0xff]  ;;  %v2924_v15 = vld [vmem:[#allocation14 + $0x1f98] sm:$0xff] }
 0x79d   : > { %4394 = vst [vmem:[%s7263_s21 + $0x1c8] sm:$0xff] %v4104_v28  ;;  %5841 = vmatprep.subr.bf16.mxu1 %v5840_v16  ;;  %v5870_v16 = vpack.c.bf16 %v2859_v13, %v2827_v10  ;;  %v5872_v19 = vpack.c.bf16 %v2924_v15, %v2892_v14  ;;  %v2923_v21 = vld [vmem:[#allocation14 + $0x1f90] sm:$0xff]  ;;  %v1936_v35 = vld [vmem:[#allocation14 + $0xb8] sm:$0xff] }
 0x79e   : > { %v1968_v23 = vld [vmem:[#allocation14 + $0x1b8] sm:$0xff]  ;;  %v5874_v25 = vpack.c.bf16 %v2923_v21, %v2891_v34  ;;  %v1935_v28 = vld [vmem:[#allocation14 + $0xb0] sm:$0xff] }
 0x79f   : > { %v5940_v27 = vpack.c.bf16 %v1968_v23, %v1936_v35  ;;  %v2160_v50 = vld [vmem:[#allocation14 + $0x7b8] sm:$0xff]  ;;  %v2127_v24 = vld [vmem:[#allocation14 + $0x6b0] sm:$0xff] }
 0x7a0   : > { %5843 = vmatpush1.bf16.msra.mxu1 %v5842_v40  ;;  %v1967_v40 = vld [vmem:[#allocation14 + $0x1b0] sm:$0xff]  ;;  %v2288_v61 = vld [vmem:[#allocation14 + $0xbb8] sm:$0xff] }
 0x7a1   : > { %5845 = vmatprep.subr.bf16.mxu1 %v5844_v41  ;;  %v2000_v41 = vld [vmem:[#allocation14 + $0x2b8] sm:$0xff]  ;;  %v5942_v30 = vpack.c.bf16 %v1967_v40, %v1935_v28  ;;  %v2191_v58 = vld [vmem:[#allocation14 + $0x8b0] sm:$0xff] }
 0x7a2   : > { %v5944_v31 = vpack.c.bf16 %v2032_v29, %v2000_v41  ;;  %v2255_v1 = vld [vmem:[#allocation14 + $0xab0] sm:$0xff]  ;;  %v2320_v6 = vld [vmem:[#allocation14 + $0xcb8] sm:$0xff] }
 0x7a3   : > { %v2352_v11 = vld [vmem:[#allocation14 + $0xdb8] sm:$0xff]  ;;  %v2351_v15 = vld [vmem:[#allocation14 + $0xdb0] sm:$0xff] }
 0x7a4   : > { %5847 = vmatpush1.bf16.msra.mxu1 %v5846_v33  ;;  %v2031_v33 = vld [vmem:[#allocation14 + $0x3b0] sm:$0xff]  ;;  %v5964_v14 = vpack.c.bf16 %v2352_v11, %v2320_v6  ;;  %v2384_v22 = vld [vmem:[#allocation14 + $0xeb8] sm:$0xff] }
 0x7a5   : > { %5849 = vmatprep.subr.bf16.mxu1 %v5848_v36  ;;  %v2064_v36 = vld [vmem:[#allocation14 + $0x4b8] sm:$0xff]  ;;  %v5946_v38 = vpack.c.bf16 %v2031_v33, %v1999_v32  ;;  %v2383_v28 = vld [vmem:[#allocation14 + $0xeb0] sm:$0xff] }
 0x7a6   : > { %v5948_v45 = vpack.c.bf16 %v2096_v37, %v2064_v36  ;;  %v2416_v21 = vld [vmem:[#allocation14 + $0xfb8] sm:$0xff]  ;;  %v2415_v40 = vld [vmem:[#allocation14 + $0xfb0] sm:$0xff] }
 0x7a7   : > { %v2480_v32 = vld [vmem:[#allocation14 + $0x11b8] sm:$0xff] }
 0x7a8   : > { %5851 = vmatpush1.bf16.msra.mxu1 %v5850_v48  ;;  %v2095_v48 = vld [vmem:[#allocation14 + $0x5b0] sm:$0xff]  ;;  %v2704_v6 = vld [vmem:[#allocation14 + $0x18b8] sm:$0xff] }
 0x7a9   : > { %5853 = vmatprep.subr.bf16.mxu1 %v5852_v49  ;;  %v2128_v49 = vld [vmem:[#allocation14 + $0x6b8] sm:$0xff]  ;;  %v5950_v51 = vpack.c.bf16 %v2095_v48, %v2063_v46  ;;  %v2447_v48 = vld [vmem:[#allocation14 + $0x10b0] sm:$0xff] }
 0x7aa   : > { %v5952_v52 = vpack.c.bf16 %v2160_v50, %v2128_v49  ;;  %v2479_v49 = vld [vmem:[#allocation14 + $0x11b0] sm:$0xff]  ;;  %v2512_v50 = vld [vmem:[#allocation14 + $0x12b8] sm:$0xff] }
 0x7ab   : > { %v2736_v11 = vld [vmem:[#allocation14 + $0x19b8] sm:$0xff] }
 0x7ac   : > { %5855 = vmatpush1.bf16.msra.mxu1 %v5854_v54  ;;  %v2159_v54 = vld [vmem:[#allocation14 + $0x7b0] sm:$0xff] }
 0x7ad   : > { %5857 = vmatprep.subr.bf16.mxu1 %v5856_v56  ;;  %v2192_v56 = vld [vmem:[#allocation14 + $0x8b8] sm:$0xff]  ;;  %v5954_v2 = vpack.c.bf16 %v2159_v54, %v2127_v24  ;;  %v2511_v54 = vld [vmem:[#allocation14 + $0x12b0] sm:$0xff] }
 0x7ae   : > { %v5956_v57 = vpack.c.bf16 %v2224_v17, %v2192_v56  ;;  %v2543_v56 = vld [vmem:[#allocation14 + $0x13b0] sm:$0xff]  ;;  %v2576_v17 = vld [vmem:[#allocation14 + $0x14b8] sm:$0xff] }
 0x7b0   : > { %5859 = vmatpush1.bf16.msra.mxu1 %v5858_v59  ;;  %v2223_v59 = vld [vmem:[#allocation14 + $0x9b0] sm:$0xff] }
 0x7b1   : > { %5861 = vmatprep.subr.bf16.mxu1 %v5860_v60  ;;  %v2256_v60 = vld [vmem:[#allocation14 + $0xab8] sm:$0xff]  ;;  %v5958_v62 = vpack.c.bf16 %v2223_v59, %v2191_v58  ;;  %v2575_v59 = vld [vmem:[#allocation14 + $0x14b0] sm:$0xff] }
 0x7b2   : > { %v5960_v63 = vpack.c.bf16 %v2288_v61, %v2256_v60  ;;  %v2607_v60 = vld [vmem:[#allocation14 + $0x15b0] sm:$0xff]  ;;  %v2640_v61 = vld [vmem:[#allocation14 + $0x16b8] sm:$0xff] }
 0x7b4   : > { %5863 = vmatpush1.bf16.msra.mxu1 %v5862_v7  ;;  %v2287_v7 = vld [vmem:[#allocation14 + $0xbb0] sm:$0xff] }
 0x7b5   : > { %5865 = vmatprep.subr.bf16.mxu1 %v5864_v4  ;;  %v7358_v4 = vld [vmem:[#allocation16 + $0x8] sm:$0xff]  ;;  %v5962_v10 = vpack.c.bf16 %v2287_v7, %v2255_v1  ;;  %v2639_v7 = vld [vmem:[#allocation14 + $0x16b0] sm:$0xff] }
 0x7b6   : > { %v2980_v5 = vrot.slane %v7358_v4, %v7157_v18  ;;  %v2319_v18 = vld [vmem:[#allocation14 + $0xcb0] sm:$0xff] }
 0x7b8   : > { %5867 = vmatpush1.bf16.msra.mxu1 %v5866_v9  ;;  %v2984_v9 = vrot.slane %v7358_v4, %v7160_v20 }
 0x7b9   : > { %5869 = vmatprep.subr.bf16.mxu1 %v5868_v12  ;;  %v3064_v12 = vrot.slane %v7338_v47, %v7240_v26  ;;  %v5966_v26 = vpack.c.bf16 %v2351_v15, %v2319_v18 }
 0x7bc   : > { %5871 = vmatpush1.bf16.msra.mxu1 %v5870_v16 }
 0x7bd   : > { %5873 = vmatprep.subr.bf16.mxu1 %v5872_v19 }
 0x7c0   : > { %5875 = vmatpush1.bf16.msra.mxu1 %v5874_v25 }
 0x7c1   : > { %5941 = vmatprep.subr.bf16.mxu1 %v5940_v27  ;;  %v5968_v27 = vpack.c.bf16 %v2416_v21, %v2384_v22  ;;  %v2864_v22 = vld [vmem:[#allocation14 + $0x1db8] sm:$0xff] }
 0x7c3   : > { %3863 = vmatmul.mubr.f32.vlgmr.msra.gmra.mrb[32].mxu1 %v7192_v44 }
 0x7c4   : > { %3868 = vmatprep.mubr.f32.mxu1 %v7200_v53  ;;  %5943 = vmatpush1.bf16.msra.mxu1 %v5942_v30 }
 0x7c5   : > { %5945 = vmatprep.subr.bf16.mxu1 %v5944_v31  ;;  %v2448_v31 = vld [vmem:[#allocation14 + $0x10b8] sm:$0xff] }
 0x7c6   : > { %v5972_v46 = vpack.c.bf16 %v2480_v32, %v2448_v31  ;;  %v1939_v32 = vld [vmem:[#allocation14 + $0xd0] sm:$0xff] }
 0x7c7   : > { %3869 = vmatmul.mubr.f32.gmra.mrb[34].mxu1 %v7202_v55 }
 0x7c8   : > { %5947 = vmatpush1.bf16.msra.mxu1 %v5946_v38  ;;  %4016 = vmatprep.mubr.f32.mxu1 %v7190_v39 }
 0x7c9   : > { %5949 = vmatprep.subr.bf16.mxu1 %v5948_v45  ;;  %v5970_v45 = vpack.c.bf16 %v2415_v40, %v2383_v28  ;;  %v2895_v28 = vld [vmem:[#allocation14 + $0x1eb0] sm:$0xff] }
 0x7ca   : > { %v2927_v40 = vld [vmem:[#allocation14 + $0x1fb0] sm:$0xff] }
 0x7cc   : > { %5951 = vmatpush1.bf16.msra.mxu1 %v5950_v51  ;;  %v2544_v51 = vld [vmem:[#allocation14 + $0x13b8] sm:$0xff] }
 0x7cd   : > { %5953 = vmatprep.subr.bf16.mxu1 %v5952_v52  ;;  %v5974_v52 = vpack.c.bf16 %v2479_v49, %v2447_v48  ;;  %v5976_v24 = vpack.c.bf16 %v2544_v51, %v2512_v50  ;;  %v2035_v48 = vld [vmem:[#allocation14 + $0x3d0] sm:$0xff]  ;;  %v2068_v49 = vld [vmem:[#allocation14 + $0x4d8] sm:$0xff] }
 0x7ce   : > { %v2100_v50 = vld [vmem:[#allocation14 + $0x5d8] sm:$0xff] }
 0x7d0   : > { %5955 = vmatpush1.bf16.msra.mxu1 %v5954_v2  ;;  %v2608_v2 = vld [vmem:[#allocation14 + $0x15b8] sm:$0xff] }
 0x7d1   : > { %5957 = vmatprep.subr.bf16.mxu1 %v5956_v57  ;;  %v5978_v57 = vpack.c.bf16 %v2543_v56, %v2511_v54  ;;  %v5980_v58 = vpack.c.bf16 %v2608_v2, %v2576_v17  ;;  %v2099_v54 = vld [vmem:[#allocation14 + $0x5d0] sm:$0xff]  ;;  %v2132_v56 = vld [vmem:[#allocation14 + $0x6d8] sm:$0xff] }
 0x7d2   : > { %v2164_v17 = vld [vmem:[#allocation14 + $0x7d8] sm:$0xff] }
 0x7d4   : > { %5959 = vmatpush1.bf16.msra.mxu1 %v5958_v62  ;;  %v2672_v62 = vld [vmem:[#allocation14 + $0x17b8] sm:$0xff] }
 0x7d5   : > { %v3479_v13 = vpop.f32.mrb[20].mxu1  ;;  %5961 = vmatprep.subr.bf16.mxu1 %v5960_v63  ;;  %v5982_v63 = vpack.c.bf16 %v2607_v60, %v2575_v59  ;;  %v5984_v1 = vpack.c.bf16 %v2672_v62, %v2640_v61  ;;  %v2163_v59 = vld [vmem:[#allocation14 + $0x7d0] sm:$0xff]  ;;  %v2196_v60 = vld [vmem:[#allocation14 + $0x8d8] sm:$0xff] }
 0x7d6   : > { %v3480_v16 = vadd.f32 %v3479_v13, %v2980_v5  ;;  %v4249_v19 = vpop.f32.mrb[18].mxu0  ;;  %v3481_v34 = vpop.f32.mrb[21].mxu1  ;;  %v2768_v13 = vld [vmem:[#allocation14 + $0x1ab8] sm:$0xff] }
 0x7d7   : > { %v4250_v20 = vadd.f32 %v4249_v19, %v3060_v8  ;;  %v3482_v35 = vadd.f32 %v3481_v34, %v2984_v9  ;;  %v4251_v23 = vpop.f32.mrb[19].mxu0  ;;  %v2799_v19 = vld [vmem:[#allocation14 + $0x1bb0] sm:$0xff]  ;;  %v2832_v34 = vld [vmem:[#allocation14 + $0x1cb8] sm:$0xff] }
 0x7d8   : > { %4345 = vst [vmem:[%s7263_s21 + $0x40] sm:$0xff] %v3480_v16  ;;  %v4252_v25 = vadd.f32 %v4251_v23, %v3064_v12  ;;  %5963 = vmatpush1.bf16.msra.mxu1 %v5962_v10  ;;  %v2735_v10 = vld [vmem:[#allocation14 + $0x19b0] sm:$0xff]  ;;  %v2228_v61 = vld [vmem:[#allocation14 + $0x9d8] sm:$0xff] }
 0x7d9   : > { %4365 = vst [vmem:[%s7263_s21 + $0xe0] sm:$0xff] %v4250_v20  ;;  %4346 = vst [vmem:[%s7263_s21 + $0x48] sm:$0xff] %v3482_v35  ;;  %v3485_v47 = vpop.f32.mrb[22].mxu1  ;;  %5965 = vmatprep.subr.bf16.mxu1 %v5964_v14  ;;  %v2800_v14 = vld [vmem:[#allocation14 + $0x1bb8] sm:$0xff]  ;;  %v2767_v16 = vld [vmem:[#allocation14 + $0x1ab0] sm:$0xff]  ;;  %v5996_v20 = vpack.c.bf16 %v2864_v22, %v2832_v34 }
 0x7da   : > { %4366 = vst [vmem:[%s7263_s21 + $0xe8] sm:$0xff] %v4252_v25  ;;  %v3486_v41 = vadd.f32 %v3485_v47, %v2980_v5  ;;  %v4255_v29 = vpop.f32.mrb[20].mxu0  ;;  %v3487_v30 = vpop.f32.mrb[23].mxu1  ;;  %v2671_v5 = vld [vmem:[#allocation14 + $0x17b0] sm:$0xff]  ;;  %v5992_v15 = vpack.c.bf16 %v2800_v14, %v2768_v13  ;;  %v5994_v21 = vpack.c.bf16 %v2799_v19, %v2767_v16  ;;  %v2896_v25 = vld [vmem:[#allocation14 + $0x1eb8] sm:$0xff]  ;;  %v2988_v14 = vrot.slane %v7358_v4, %v7277_v0 }
 0x7db   : > { %v4256_v33 = vadd.f32 %v4255_v29, %v3060_v8  ;;  %v3488_v36 = vadd.f32 %v3487_v30, %v2984_v9  ;;  %v4257_v37 = vpop.f32.mrb[21].mxu0  ;;  %v5986_v8 = vpack.c.bf16 %v2671_v5, %v2639_v7  ;;  %v5988_v9 = vpack.c.bf16 %v2736_v11, %v2704_v6  ;;  %v2831_v35 = vld [vmem:[#allocation14 + $0x1cb0] sm:$0xff]  ;;  %v1972_v29 = vld [vmem:[#allocation14 + $0x1d8] sm:$0xff] }
 0x7dc   : > { %4377 = vst [vmem:[%s7263_s21 + $0x140] sm:$0xff] %v3486_v41  ;;  %v4258_v38 = vadd.f32 %v4257_v37, %v3064_v12  ;;  %5967 = vmatpush1.bf16.msra.mxu1 %v5966_v26  ;;  %v2703_v12 = vld [vmem:[#allocation14 + $0x18b0] sm:$0xff]  ;;  %v2928_v26 = vld [vmem:[#allocation14 + $0x1fb8] sm:$0xff]  ;;  %v6002_v30 = vpack.c.bf16 %v2927_v40, %v2895_v28 }
 0x7dd   : > { %4397 = vst [vmem:[%s7263_s21 + $0x1e0] sm:$0xff] %v4256_v33  ;;  %4378 = vst [vmem:[%s7263_s21 + $0x148] sm:$0xff] %v3488_v36  ;;  %5969 = vmatprep.subr.bf16.mxu1 %v5968_v27  ;;  %v5990_v18 = vpack.c.bf16 %v2735_v10, %v2703_v12  ;;  %v2863_v23 = vld [vmem:[#allocation14 + $0x1db0] sm:$0xff]  ;;  %v6000_v27 = vpack.c.bf16 %v2928_v26, %v2896_v25  ;;  %v1940_v41 = vld [vmem:[#allocation14 + $0xd8] sm:$0xff] }
 0x7de   : > { %4398 = vst [vmem:[%s7263_s21 + $0x1e8] sm:$0xff] %v4258_v38  ;;  %v5998_v47 = vpack.c.bf16 %v2863_v23, %v2831_v35  ;;  %v6068_v31 = vpack.c.bf16 %v1972_v29, %v1940_v41  ;;  %v1971_v33 = vld [vmem:[#allocation14 + $0x1d0] sm:$0xff]  ;;  %v2004_v36 = vld [vmem:[#allocation14 + $0x2d8] sm:$0xff] }
 0x7df   : > { %v2036_v37 = vld [vmem:[#allocation14 + $0x3d8] sm:$0xff]  ;;  %v6070_v38 = vpack.c.bf16 %v1971_v33, %v1939_v32  ;;  %v2227_v7 = vld [vmem:[#allocation14 + $0x9d0] sm:$0xff] }
 0x7e0   : > { %5971 = vmatpush1.bf16.msra.mxu1 %v5970_v45  ;;  %v6072_v45 = vpack.c.bf16 %v2036_v37, %v2004_v36  ;;  %v2260_v5 = vld [vmem:[#allocation14 + $0xad8] sm:$0xff]  ;;  %v2291_v12 = vld [vmem:[#allocation14 + $0xbd0] sm:$0xff] }
 0x7e1   : > { %5973 = vmatprep.subr.bf16.mxu1 %v5972_v46  ;;  %v2003_v46 = vld [vmem:[#allocation14 + $0x2d0] sm:$0xff]  ;;  %v2292_v6 = vld [vmem:[#allocation14 + $0xbd8] sm:$0xff] }
 0x7e2   : > { %v6074_v51 = vpack.c.bf16 %v2035_v48, %v2003_v46  ;;  %v2324_v10 = vld [vmem:[#allocation14 + $0xcd8] sm:$0xff]  ;;  %v2323_v19 = vld [vmem:[#allocation14 + $0xcd0] sm:$0xff] }
 0x7e3   : > { %v2356_v13 = vld [vmem:[#allocation14 + $0xdd8] sm:$0xff]  ;;  %v2355_v34 = vld [vmem:[#allocation14 + $0xdd0] sm:$0xff] }
 0x7e4   : > { %5975 = vmatpush1.bf16.msra.mxu1 %v5974_v52  ;;  %v6076_v52 = vpack.c.bf16 %v2100_v50, %v2068_v49  ;;  %v6092_v16 = vpack.c.bf16 %v2356_v13, %v2324_v10  ;;  %v6094_v26 = vpack.c.bf16 %v2355_v34, %v2323_v19  ;;  %v2419_v28 = vld [vmem:[#allocation14 + $0xfd0] sm:$0xff]  ;;  %v2452_v41 = vld [vmem:[#allocation14 + $0x10d8] sm:$0xff] }
 0x7e5   : > { %5977 = vmatprep.subr.bf16.mxu1 %v5976_v24  ;;  %v2067_v24 = vld [vmem:[#allocation14 + $0x4d0] sm:$0xff]  ;;  %v2484_v29 = vld [vmem:[#allocation14 + $0x11d8] sm:$0xff] }
 0x7e6   : > { %v6078_v2 = vpack.c.bf16 %v2099_v54, %v2067_v24  ;;  %v6100_v36 = vpack.c.bf16 %v2484_v29, %v2452_v41  ;;  %v2451_v37 = vld [vmem:[#allocation14 + $0x10d0] sm:$0xff]  ;;  %v2548_v46 = vld [vmem:[#allocation14 + $0x13d8] sm:$0xff] }
 0x7e7   : > { %v2515_v50 = vld [vmem:[#allocation14 + $0x12d0] sm:$0xff]  ;;  %v2612_v24 = vld [vmem:[#allocation14 + $0x15d8] sm:$0xff] }
 0x7e8   : > { %5979 = vmatpush1.bf16.msra.mxu1 %v5978_v57  ;;  %v6080_v57 = vpack.c.bf16 %v2164_v17, %v2132_v56  ;;  %v2579_v17 = vld [vmem:[#allocation14 + $0x14d0] sm:$0xff] }
 0x7e9   : > { %5981 = vmatprep.subr.bf16.mxu1 %v5980_v58  ;;  %v2131_v58 = vld [vmem:[#allocation14 + $0x6d0] sm:$0xff] }
 0x7ea   : > { %v6082_v62 = vpack.c.bf16 %v2163_v59, %v2131_v58  ;;  %v2676_v58 = vld [vmem:[#allocation14 + $0x17d8] sm:$0xff]  ;;  %v2771_v13 = vld [vmem:[#allocation14 + $0x1ad0] sm:$0xff] }
 0x7eb   : > { %v2835_v34 = vld [vmem:[#allocation14 + $0x1cd0] sm:$0xff] }
 0x7ec   : > { %5983 = vmatpush1.bf16.msra.mxu1 %v5982_v63  ;;  %v6084_v63 = vpack.c.bf16 %v2228_v61, %v2196_v60  ;;  %v2643_v61 = vld [vmem:[#allocation14 + $0x16d0] sm:$0xff] }
 0x7ed   : > { %5985 = vmatprep.subr.bf16.mxu1 %v5984_v1  ;;  %v2195_v1 = vld [vmem:[#allocation14 + $0x8d0] sm:$0xff] }
 0x7ee   : > { %v6086_v11 = vpack.c.bf16 %v2227_v7, %v2195_v1  ;;  %v2740_v1 = vld [vmem:[#allocation14 + $0x19d8] sm:$0xff]  ;;  %v1943_v41 = vld [vmem:[#allocation14 + $0xf0] sm:$0xff] }
 0x7ef   : > { %v1975_v29 = vld [vmem:[#allocation14 + $0x1f0] sm:$0xff] }
 0x7f0   : > { %5987 = vmatpush1.bf16.msra.mxu1 %v5986_v8  ;;  %v6088_v8 = vpack.c.bf16 %v2292_v6, %v2260_v5  ;;  %v2707_v6 = vld [vmem:[#allocation14 + $0x18d0] sm:$0xff] }
 0x7f1   : > { %5989 = vmatprep.subr.bf16.mxu1 %v5988_v9  ;;  %v2259_v9 = vld [vmem:[#allocation14 + $0xad0] sm:$0xff] }
 0x7f4   : > { %5991 = vmatpush1.bf16.msra.mxu1 %v5990_v18  ;;  %v2992_v18 = vrot.slane %v7358_v4, %v7282_v3 }
 0x7f5   : > { %5993 = vmatprep.subr.bf16.mxu1 %v5992_v15  ;;  %v6090_v15 = vpack.c.bf16 %v2291_v12, %v2259_v9  ;;  %v2804_v9 = vld [vmem:[#allocation14 + $0x1bd8] sm:$0xff] }
 0x7f8   : > { %5995 = vmatpush1.bf16.msra.mxu1 %v5994_v21  ;;  %v2388_v21 = vld [vmem:[#allocation14 + $0xed8] sm:$0xff] }
 0x7f9   : > { %5997 = vmatprep.subr.bf16.mxu1 %v5996_v20  ;;  %v2420_v20 = vld [vmem:[#allocation14 + $0xfd8] sm:$0xff] }
 0x7fc   : > { %5999 = vmatpush1.bf16.msra.mxu1 %v5998_v47  ;;  %v6096_v47 = vpack.c.bf16 %v2420_v20, %v2388_v21  ;;  %v2900_v21 = vld [vmem:[#allocation14 + $0x1ed8] sm:$0xff] }
 0x7fd   : > { %6001 = vmatprep.subr.bf16.mxu1 %v6000_v27  ;;  %v2387_v27 = vld [vmem:[#allocation14 + $0xed0] sm:$0xff]  ;;  %v2932_v20 = vld [vmem:[#allocation14 + $0x1fd8] sm:$0xff] }
 0x7fe   : > { %v6098_v33 = vpack.c.bf16 %v2419_v28, %v2387_v27  ;;  %v1976_v27 = vld [vmem:[#allocation14 + $0x1f8] sm:$0xff] }
 0x800   : > { %6003 = vmatpush1.bf16.msra.mxu1 %v6002_v30 }
 0x801   : > { %6069 = vmatprep.subr.bf16.mxu1 %v6068_v31 }
 0x803   : > { %4017 = vmatmul.mubr.f32.vlgmr.msra.gmra.mrb[36].mxu1 %v7192_v44 }
 0x804   : > { %4022 = vmatprep.mubr.f32.mxu1 %v7200_v53  ;;  %6071 = vmatpush1.bf16.msra.mxu1 %v6070_v38  ;;  %v2483_v38 = vld [vmem:[#allocation14 + $0x11d0] sm:$0xff] }
 0x805   : > { %6073 = vmatprep.subr.bf16.mxu1 %v6072_v45  ;;  %v2516_v45 = vld [vmem:[#allocation14 + $0x12d8] sm:$0xff]  ;;  %v6102_v48 = vpack.c.bf16 %v2483_v38, %v2451_v37  ;;  %v2039_v37 = vld [vmem:[#allocation14 + $0x3f0] sm:$0xff] }
 0x806   : > { %v6104_v49 = vpack.c.bf16 %v2548_v46, %v2516_v45  ;;  %v2072_v38 = vld [vmem:[#allocation14 + $0x4f8] sm:$0xff] }
 0x807   : > { %4023 = vmatmul.mubr.f32.gmra.mrb[38].mxu1 %v7202_v55  ;;  %v2104_v45 = vld [vmem:[#allocation14 + $0x5f8] sm:$0xff] }
 0x808   : > { %6075 = vmatpush1.bf16.msra.mxu1 %v6074_v51  ;;  %4170 = vmatprep.mubr.f32.mxu1 %v7190_v39  ;;  %v2547_v51 = vld [vmem:[#allocation14 + $0x13d0] sm:$0xff] }
 0x809   : > { %6077 = vmatprep.subr.bf16.mxu1 %v6076_v52  ;;  %v2580_v52 = vld [vmem:[#allocation14 + $0x14d8] sm:$0xff]  ;;  %v6106_v54 = vpack.c.bf16 %v2547_v51, %v2515_v50  ;;  %v2103_v50 = vld [vmem:[#allocation14 + $0x5f0] sm:$0xff] }
 0x80a   : > { %v6108_v56 = vpack.c.bf16 %v2612_v24, %v2580_v52  ;;  %v2136_v51 = vld [vmem:[#allocation14 + $0x6f8] sm:$0xff] }
 0x80b   : > { %v2168_v52 = vld [vmem:[#allocation14 + $0x7f8] sm:$0xff] }
 0x80c   : > { %6079 = vmatpush1.bf16.msra.mxu1 %v6078_v2  ;;  %v2611_v2 = vld [vmem:[#allocation14 + $0x15d0] sm:$0xff] }
 0x80d   : > { %6081 = vmatprep.subr.bf16.mxu1 %v6080_v57  ;;  %v2644_v57 = vld [vmem:[#allocation14 + $0x16d8] sm:$0xff]  ;;  %v6110_v59 = vpack.c.bf16 %v2611_v2, %v2579_v17  ;;  %v2167_v17 = vld [vmem:[#allocation14 + $0x7f0] sm:$0xff] }
 0x80e   : > { %v6112_v60 = vpack.c.bf16 %v2676_v58, %v2644_v57  ;;  %v2200_v2 = vld [vmem:[#allocation14 + $0x8f8] sm:$0xff] }
 0x80f   : > { %v2232_v57 = vld [vmem:[#allocation14 + $0x9f8] sm:$0xff] }
 0x810   : > { %6083 = vmatpush1.bf16.msra.mxu1 %v6082_v62  ;;  %v2675_v62 = vld [vmem:[#allocation14 + $0x17d0] sm:$0xff] }
 0x811   : > { %6085 = vmatprep.subr.bf16.mxu1 %v6084_v63  ;;  %v2708_v63 = vld [vmem:[#allocation14 + $0x18d8] sm:$0xff]  ;;  %v6114_v7 = vpack.c.bf16 %v2675_v62, %v2643_v61  ;;  %v2231_v61 = vld [vmem:[#allocation14 + $0x9f0] sm:$0xff] }
 0x812   : > { %v6116_v5 = vpack.c.bf16 %v2740_v1, %v2708_v63  ;;  %v2264_v62 = vld [vmem:[#allocation14 + $0xaf8] sm:$0xff] }
 0x813   : > { %v2296_v63 = vld [vmem:[#allocation14 + $0xbf8] sm:$0xff] }
 0x814   : > { %6087 = vmatpush1.bf16.msra.mxu1 %v6086_v11  ;;  %v2739_v11 = vld [vmem:[#allocation14 + $0x19d0] sm:$0xff] }
 0x815   : > { %6089 = vmatprep.subr.bf16.mxu1 %v6088_v8  ;;  %v2772_v8 = vld [vmem:[#allocation14 + $0x1ad8] sm:$0xff]  ;;  %v6118_v12 = vpack.c.bf16 %v2739_v11, %v2707_v6 }
 0x816   : > { %v3556_v22 = vpop.f32.mrb[24].mxu1  ;;  %v6120_v10 = vpack.c.bf16 %v2804_v9, %v2772_v8  ;;  %v2328_v6 = vld [vmem:[#allocation14 + $0xcf8] sm:$0xff]  ;;  %v3004_v8 = vrot.slane %v7358_v4, %v7333_v42  ;;  %v3008_v9 = vrot.slane %v7358_v4, %v7336_v43  ;;  %v2423_v4 = vld [vmem:[#allocation14 + $0xff0] sm:$0xff] }
 0x817   : > { %v3557_v35 = vadd.f32 %v3556_v22, %v2988_v14  ;;  %v3558_v23 = vpop.f32.mrb[25].mxu1  ;;  %v2867_v22 = vld [vmem:[#allocation14 + $0x1dd0] sm:$0xff]  ;;  %v2360_v11 = vld [vmem:[#allocation14 + $0xdf8] sm:$0xff] }
 0x818   : > { %v3559_v25 = vadd.f32 %v3558_v23, %v2992_v18  ;;  %6091 = vmatpush1.bf16.msra.mxu1 %v6090_v15  ;;  %v2868_v15 = vld [vmem:[#allocation14 + $0x1dd8] sm:$0xff]  ;;  %v6128_v23 = vpack.c.bf16 %v2932_v20, %v2900_v21 }
 0x819   : > { %4347 = vst [vmem:[%s7263_s21 + $0x50] sm:$0xff] %v3557_v35  ;;  %6093 = vmatprep.subr.bf16.mxu1 %v6092_v16  ;;  %v6126_v35 = vpack.c.bf16 %v2867_v22, %v2835_v34 }
 0x81a   : > { %4348 = vst [vmem:[%s7263_s21 + $0x58] sm:$0xff] %v3559_v25  ;;  %v3562_v40 = vpop.f32.mrb[26].mxu1  ;;  %v2899_v25 = vld [vmem:[#allocation14 + $0x1ed0] sm:$0xff] }
 0x81b   : > { %v3563_v30 = vadd.f32 %v3562_v40, %v2988_v14  ;;  %v3564_v31 = vpop.f32.mrb[27].mxu1  ;;  %v2803_v14 = vld [vmem:[#allocation14 + $0x1bd0] sm:$0xff] }
 0x81c   : > { %v3565_v32 = vadd.f32 %v3564_v31, %v2992_v18  ;;  %6095 = vmatpush1.bf16.msra.mxu1 %v6094_v26  ;;  %v2836_v18 = vld [vmem:[#allocation14 + $0x1cd8] sm:$0xff]  ;;  %v6122_v16 = vpack.c.bf16 %v2803_v14, %v2771_v13  ;;  %v2931_v26 = vld [vmem:[#allocation14 + $0x1fd0] sm:$0xff] }
 0x81d   : > { %4379 = vst [vmem:[%s7263_s21 + $0x150] sm:$0xff] %v3563_v30  ;;  %6097 = vmatprep.subr.bf16.mxu1 %v6096_v47  ;;  %v6124_v19 = vpack.c.bf16 %v2868_v15, %v2836_v18  ;;  %v1944_v47 = vld [vmem:[#allocation14 + $0xf8] sm:$0xff]  ;;  %v6130_v28 = vpack.c.bf16 %v2931_v26, %v2899_v25  ;;  %v2327_v13 = vld [vmem:[#allocation14 + $0xcf0] sm:$0xff] }
 0x81e   : > { %4380 = vst [vmem:[%s7263_s21 + $0x158] sm:$0xff] %v3565_v32  ;;  %v6196_v40 = vpack.c.bf16 %v1976_v27, %v1944_v47  ;;  %v2008_v30 = vld [vmem:[#allocation14 + $0x2f8] sm:$0xff]  ;;  %v6198_v32 = vpack.c.bf16 %v1975_v29, %v1943_v41  ;;  %v2359_v14 = vld [vmem:[#allocation14 + $0xdf0] sm:$0xff] }
 0x81f   : > { %v2040_v31 = vld [vmem:[#allocation14 + $0x3f8] sm:$0xff]  ;;  %v6222_v21 = vpack.c.bf16 %v2359_v14, %v2327_v13  ;;  %v2455_v29 = vld [vmem:[#allocation14 + $0x10f0] sm:$0xff] }
 0x820   : > { %6099 = vmatpush1.bf16.msra.mxu1 %v6098_v33  ;;  %v6200_v33 = vpack.c.bf16 %v2040_v31, %v2008_v30  ;;  %v2392_v15 = vld [vmem:[#allocation14 + $0xef8] sm:$0xff]  ;;  %v2487_v30 = vld [vmem:[#allocation14 + $0x11f0] sm:$0xff] }
 0x821   : > { %6101 = vmatprep.subr.bf16.mxu1 %v6100_v36  ;;  %v2007_v36 = vld [vmem:[#allocation14 + $0x2f0] sm:$0xff]  ;;  %v2456_v25 = vld [vmem:[#allocation14 + $0x10f8] sm:$0xff] }
 0x822   : > { %v6202_v46 = vpack.c.bf16 %v2039_v37, %v2007_v36  ;;  %v2488_v26 = vld [vmem:[#allocation14 + $0x11f8] sm:$0xff]  ;;  %v2519_v37 = vld [vmem:[#allocation14 + $0x12f0] sm:$0xff] }
 0x823   : > { %v6228_v41 = vpack.c.bf16 %v2488_v26, %v2456_v25  ;;  %v2520_v31 = vld [vmem:[#allocation14 + $0x12f8] sm:$0xff]  ;;  %v2871_v13 = vld [vmem:[#allocation14 + $0x1df0] sm:$0xff] }
 0x824   : > { %6103 = vmatpush1.bf16.msra.mxu1 %v6102_v48  ;;  %v6204_v48 = vpack.c.bf16 %v2104_v45, %v2072_v38  ;;  %v2551_v38 = vld [vmem:[#allocation14 + $0x13f0] sm:$0xff]  ;;  %v2584_v45 = vld [vmem:[#allocation14 + $0x14f8] sm:$0xff] }
 0x825   : > { %6105 = vmatprep.subr.bf16.mxu1 %v6104_v49  ;;  %v2071_v49 = vld [vmem:[#allocation14 + $0x4f0] sm:$0xff]  ;;  %v2904_v14 = vld [vmem:[#allocation14 + $0x1ef8] sm:$0xff] }
 0x826   : > { %v6206_v24 = vpack.c.bf16 %v2103_v50, %v2071_v49  ;;  %v2583_v50 = vld [vmem:[#allocation14 + $0x14f0] sm:$0xff] }
 0x828   : > { %6107 = vmatpush1.bf16.msra.mxu1 %v6106_v54  ;;  %v6208_v54 = vpack.c.bf16 %v2168_v52, %v2136_v51  ;;  %v2615_v51 = vld [vmem:[#allocation14 + $0x15f0] sm:$0xff]  ;;  %v2648_v52 = vld [vmem:[#allocation14 + $0x16f8] sm:$0xff] }
 0x829   : > { %6109 = vmatprep.subr.bf16.mxu1 %v6108_v56  ;;  %v2135_v56 = vld [vmem:[#allocation14 + $0x6f0] sm:$0xff] }
 0x82a   : > { %v6210_v58 = vpack.c.bf16 %v2167_v17, %v2135_v56  ;;  %v2647_v17 = vld [vmem:[#allocation14 + $0x16f0] sm:$0xff] }
 0x82c   : > { %6111 = vmatpush1.bf16.msra.mxu1 %v6110_v59  ;;  %v6212_v59 = vpack.c.bf16 %v2232_v57, %v2200_v2  ;;  %v2679_v2 = vld [vmem:[#allocation14 + $0x17f0] sm:$0xff]  ;;  %v2712_v57 = vld [vmem:[#allocation14 + $0x18f8] sm:$0xff] }
 0x82d   : > { %6113 = vmatprep.subr.bf16.mxu1 %v6112_v60  ;;  %v2199_v60 = vld [vmem:[#allocation14 + $0x8f0] sm:$0xff] }
 0x82e   : > { %v6214_v1 = vpack.c.bf16 %v2231_v61, %v2199_v60  ;;  %v2711_v61 = vld [vmem:[#allocation14 + $0x18f0] sm:$0xff] }
 0x830   : > { %6115 = vmatpush1.bf16.msra.mxu1 %v6114_v7  ;;  %v6216_v7 = vpack.c.bf16 %v2296_v63, %v2264_v62  ;;  %v2743_v62 = vld [vmem:[#allocation14 + $0x19f0] sm:$0xff]  ;;  %v2776_v63 = vld [vmem:[#allocation14 + $0x1af8] sm:$0xff] }
 0x831   : > { %6117 = vmatprep.subr.bf16.mxu1 %v6116_v5  ;;  %v2295_v5 = vld [vmem:[#allocation14 + $0xbf0] sm:$0xff] }
 0x834   : > { %6119 = vmatpush1.bf16.msra.mxu1 %v6118_v12 }
 0x835   : > { %6121 = vmatprep.subr.bf16.mxu1 %v6120_v10  ;;  %v6220_v10 = vpack.c.bf16 %v2360_v11, %v2328_v6  ;;  %v2807_v6 = vld [vmem:[#allocation14 + $0x1bf0] sm:$0xff]  ;;  %v2840_v11 = vld [vmem:[#allocation14 + $0x1cf8] sm:$0xff] }
 0x838   : > { %6123 = vmatpush1.bf16.msra.mxu1 %v6122_v16  ;;  %v2424_v16 = vld [vmem:[#allocation14 + $0xff8] sm:$0xff] }
 0x839   : > { %6125 = vmatprep.subr.bf16.mxu1 %v6124_v19  ;;  %v6224_v20 = vpack.c.bf16 %v2424_v16, %v2392_v15 }
 0x83c   : > { %6127 = vmatpush1.bf16.msra.mxu1 %v6126_v35  ;;  %v2391_v35 = vld [vmem:[#allocation14 + $0xef0] sm:$0xff] }
 0x83d   : > { %6129 = vmatprep.subr.bf16.mxu1 %v6128_v23 }
 0x840   : > { %6131 = vmatpush1.bf16.msra.mxu1 %v6130_v28 }
 0x841   : > { %6197 = vmatprep.subr.bf16.mxu1 %v6196_v40  ;;  %v6226_v40 = vpack.c.bf16 %v2423_v4, %v2391_v35 }
 0x843   : > { %4171 = vmatmul.mubr.f32.vlgmr.msra.gmra.mrb[40].mxu1 %v7192_v44 }
 0x844   : > { %4176 = vmatprep.mubr.f32.mxu1 %v7200_v53  ;;  %6199 = vmatpush1.bf16.msra.mxu1 %v6198_v32  ;;  %v2552_v32 = vld [vmem:[#allocation14 + $0x13f8] sm:$0xff] }
 0x845   : > { %6201 = vmatprep.subr.bf16.mxu1 %v6200_v33  ;;  %v6230_v33 = vpack.c.bf16 %v2487_v30, %v2455_v29  ;;  %v6232_v36 = vpack.c.bf16 %v2552_v32, %v2520_v31 }
 0x847   : > { %4177 = vmatmul.mubr.f32.gmra.mrb[42].mxu1 %v7202_v55 }
 0x848   : > { %6203 = vmatpush1.bf16.msra.mxu1 %v6202_v46  ;;  %4324 = vmatprep.mubr.f32.mxu1 %v7190_v39  ;;  %v2263_v39 = vld [vmem:[#allocation14 + $0xaf0] sm:$0xff]  ;;  %v2616_v46 = vld [vmem:[#allocation14 + $0x15f8] sm:$0xff] }
 0x849   : > { %6205 = vmatprep.subr.bf16.mxu1 %v6204_v48  ;;  %v6218_v12 = vpack.c.bf16 %v2295_v5, %v2263_v39  ;;  %v6234_v48 = vpack.c.bf16 %v2551_v38, %v2519_v37  ;;  %v6236_v49 = vpack.c.bf16 %v2616_v46, %v2584_v45  ;;  %v2775_v5 = vld [vmem:[#allocation14 + $0x1af0] sm:$0xff]  ;;  %v6417_v37 = vld [vmem:[#allocation16 + $0x18] sm:$0xff] }
 0x84a   : > { %v3052_v38 = vrot.slane %v6417_v37, %v7277_v0  ;;  %v3056_v45 = vrot.slane %v6417_v37, %v7282_v3 }
 0x84c   : > { %6207 = vmatpush1.bf16.msra.mxu1 %v6206_v24  ;;  %v2680_v24 = vld [vmem:[#allocation14 + $0x17f8] sm:$0xff] }
 0x84d   : > { %6209 = vmatprep.subr.bf16.mxu1 %v6208_v54  ;;  %v6238_v54 = vpack.c.bf16 %v2615_v51, %v2583_v50  ;;  %v6240_v56 = vpack.c.bf16 %v2680_v24, %v2648_v52 }
 0x850   : > { %6211 = vmatpush1.bf16.msra.mxu1 %v6210_v58  ;;  %v2744_v58 = vld [vmem:[#allocation14 + $0x19f8] sm:$0xff] }
 0x851   : > { %6213 = vmatprep.subr.bf16.mxu1 %v6212_v59  ;;  %v6242_v59 = vpack.c.bf16 %v2679_v2, %v2647_v17  ;;  %v6244_v60 = vpack.c.bf16 %v2744_v58, %v2712_v57 }
 0x854   : > { %6215 = vmatpush1.bf16.msra.mxu1 %v6214_v1  ;;  %v2808_v1 = vld [vmem:[#allocation14 + $0x1bf8] sm:$0xff] }
 0x855   : > { %6217 = vmatprep.subr.bf16.mxu1 %v6216_v7  ;;  %v6246_v7 = vpack.c.bf16 %v2743_v62, %v2711_v61  ;;  %v6248_v39 = vpack.c.bf16 %v2808_v1, %v2776_v63 }
 0x856   : > { %v3710_v18 = vpop.f32.mrb[28].mxu1 }
 0x857   : > { %v3711_v19 = vadd.f32 %v3710_v18, %v3004_v8  ;;  %v3712_v34 = vpop.f32.mrb[29].mxu1  ;;  %v2936_v18 = vld [vmem:[#allocation14 + $0x1ff8] sm:$0xff] }
 0x858   : > { %v3713_v22 = vadd.f32 %v3712_v34, %v3008_v9  ;;  %6219 = vmatpush1.bf16.msra.mxu1 %v6218_v12  ;;  %v6256_v16 = vpack.c.bf16 %v2936_v18, %v2904_v14  ;;  %v2935_v34 = vld [vmem:[#allocation14 + $0x1ff0] sm:$0xff] }
 0x859   : > { %4351 = vst [vmem:[%s7263_s21 + $0x70] sm:$0xff] %v3711_v19  ;;  %6221 = vmatprep.subr.bf16.mxu1 %v6220_v10  ;;  %v2839_v10 = vld [vmem:[#allocation14 + $0x1cf0] sm:$0xff] }
 0x85a   : > { %4352 = vst [vmem:[%s7263_s21 + $0x78] sm:$0xff] %v3713_v22  ;;  %v3716_v23 = vpop.f32.mrb[30].mxu1  ;;  %v6254_v15 = vpack.c.bf16 %v2871_v13, %v2839_v10  ;;  %v2903_v19 = vld [vmem:[#allocation14 + $0x1ef0] sm:$0xff] }
 0x85b   : > { %v3717_v47 = vadd.f32 %v3716_v23, %v3004_v8  ;;  %v3718_v27 = vpop.f32.mrb[31].mxu1  ;;  %v2872_v8 = vld [vmem:[#allocation14 + $0x1df8] sm:$0xff]  ;;  %v6258_v22 = vpack.c.bf16 %v2935_v34, %v2903_v19 }
 0x85c   : > { %v3719_v28 = vadd.f32 %v3718_v27, %v3008_v9  ;;  %6223 = vmatpush1.bf16.msra.mxu1 %v6222_v21  ;;  %v6250_v9 = vpack.c.bf16 %v2807_v6, %v2775_v5  ;;  %v6252_v12 = vpack.c.bf16 %v2872_v8, %v2840_v11  ;;  %v6416_v21 = vld [vmem:[#allocation16 + $0x10] sm:$0xff] }
 0x85d   : > { %4383 = vst [vmem:[%s7263_s21 + $0x170] sm:$0xff] %v3717_v47  ;;  %6225 = vmatprep.subr.bf16.mxu1 %v6224_v20  ;;  %v3020_v20 = vrot.slane %v6416_v21, %v7277_v0  ;;  %v3024_v35 = vrot.slane %v6416_v21, %v7282_v3  ;;  %v3068_v0 = vrot.slane %v6417_v37, %v7333_v42 }
 0x85e   : > { %4384 = vst [vmem:[%s7263_s21 + $0x178] sm:$0xff] %v3719_v28  ;;  %v3040_v28 = vrot.slane %v6416_v21, %v7336_v43  ;;  %v3072_v3 = vrot.slane %v6417_v37, %v7336_v43 }
 0x860   : > { %6227 = vmatpush1.bf16.msra.mxu1 %v6226_v40 }
 0x861   : > { %6229 = vmatprep.subr.bf16.mxu1 %v6228_v41 }
 0x864   : > { %6231 = vmatpush1.bf16.msra.mxu1 %v6230_v33 }
 0x865   : > { %6233 = vmatprep.subr.bf16.mxu1 %v6232_v36 }
 0x868   : > { %6235 = vmatpush1.bf16.msra.mxu1 %v6234_v48 }
 0x869   : > { %6237 = vmatprep.subr.bf16.mxu1 %v6236_v49 }
 0x86c   : > { %6239 = vmatpush1.bf16.msra.mxu1 %v6238_v54 }
 0x86d   : > { %6241 = vmatprep.subr.bf16.mxu1 %v6240_v56 }
 0x870   : > { %6243 = vmatpush1.bf16.msra.mxu1 %v6242_v59 }
 0x871   : > { %6245 = vmatprep.subr.bf16.mxu1 %v6244_v60 }
 0x874   : > { %6247 = vmatpush1.bf16.msra.mxu1 %v6246_v7 }
 0x875   : > { %6249 = vmatprep.subr.bf16.mxu1 %v6248_v39 }
 0x878   : > { %6251 = vmatpush1.bf16.msra.mxu1 %v6250_v9 }
 0x879   : > { %6253 = vmatprep.subr.bf16.mxu1 %v6252_v12 }
 0x87c   : > { %6255 = vmatpush1.bf16.msra.mxu1 %v6254_v15 }
 0x87d   : > { %6257 = vmatprep.subr.bf16.mxu1 %v6256_v16 }
 0x880   : > { %6259 = vmatpush1.bf16.msra.mxu1 %v6258_v22 }
 0x883   : > { %4325 = vmatmul.mubr.f32.vlgmr.msra.gmra.mrb[44].mxu1 %v7192_v44 }
 0x884   : > { %4330 = vmatprep.mubr.f32.mxu1 %v7200_v53 }
 0x887   : > { %4331 = vmatmul.mubr.f32.gmra.mrb[46].mxu1 %v7202_v55  ;;  %v3036_v55 = vrot.slane %v6416_v21, %v7333_v42 }
 0x896   : > { %v3864_v4 = vpop.f32.mrb[32].mxu1 }
 0x897   : > { %v3865_v23 = vadd.f32 %v3864_v4, %v3020_v20  ;;  %v3866_v25 = vpop.f32.mrb[33].mxu1 }
 0x898   : > { %v3867_v26 = vadd.f32 %v3866_v25, %v3024_v35 }
 0x899   : > { %4355 = vst [vmem:[%s7263_s21 + $0x90] sm:$0xff] %v3865_v23 }
 0x89a   : > { %4356 = vst [vmem:[%s7263_s21 + $0x98] sm:$0xff] %v3867_v26  ;;  %v3870_v44 = vpop.f32.mrb[34].mxu1 }
 0x89b   : > { %v3871_v47 = vadd.f32 %v3870_v44, %v3020_v20  ;;  %v3872_v27 = vpop.f32.mrb[35].mxu1 }
 0x89c   : > { %v3873_v53 = vadd.f32 %v3872_v27, %v3024_v35 }
 0x89d   : > { %4387 = vst [vmem:[%s7263_s21 + $0x190] sm:$0xff] %v3871_v47 }
 0x89e   : > { %4388 = vst [vmem:[%s7263_s21 + $0x198] sm:$0xff] %v3873_v53 }
 0x8d6   : > { %v4018_v40 = vpop.f32.mrb[36].mxu1 }
 0x8d7   : > { %v4019_v41 = vadd.f32 %v4018_v40, %v3036_v55  ;;  %v4020_v29 = vpop.f32.mrb[37].mxu1 }
 0x8d8   : > { %v4021_v30 = vadd.f32 %v4020_v29, %v3040_v28 }
 0x8d9   : > { %4359 = vst [vmem:[%s7263_s21 + $0xb0] sm:$0xff] %v4019_v41 }
 0x8da   : > { %4360 = vst [vmem:[%s7263_s21 + $0xb8] sm:$0xff] %v4021_v30  ;;  %v4024_v31 = vpop.f32.mrb[38].mxu1 }
 0x8db   : > { %v4025_v32 = vadd.f32 %v4024_v31, %v3036_v55  ;;  %v4026_v33 = vpop.f32.mrb[39].mxu1 }
 0x8dc   : > { %v4027_v36 = vadd.f32 %v4026_v33, %v3040_v28 }
 0x8dd   : > { %4391 = vst [vmem:[%s7263_s21 + $0x1b0] sm:$0xff] %v4025_v32 }
 0x8de   : > { %4392 = vst [vmem:[%s7263_s21 + $0x1b8] sm:$0xff] %v4027_v36 }
 0x916   : > { %v4172_v46 = vpop.f32.mrb[40].mxu1 }
 0x917   : > { %v4173_v48 = vadd.f32 %v4172_v46, %v3052_v38  ;;  %v4174_v49 = vpop.f32.mrb[41].mxu1 }
 0x918   : > { %v4175_v50 = vadd.f32 %v4174_v49, %v3056_v45 }
 0x919   : > { %4363 = vst [vmem:[%s7263_s21 + $0xd0] sm:$0xff] %v4173_v48 }
 0x91a   : > { %4364 = vst [vmem:[%s7263_s21 + $0xd8] sm:$0xff] %v4175_v50  ;;  %v4178_v51 = vpop.f32.mrb[42].mxu1 }
 0x91b   : > { %v4179_v52 = vadd.f32 %v4178_v51, %v3052_v38  ;;  %v4180_v24 = vpop.f32.mrb[43].mxu1 }
 0x91c   : > { %v4181_v54 = vadd.f32 %v4180_v24, %v3056_v45 }
 0x91d   : > { %4395 = vst [vmem:[%s7263_s21 + $0x1d0] sm:$0xff] %v4179_v52 }
 0x91e   : > { %4396 = vst [vmem:[%s7263_s21 + $0x1d8] sm:$0xff] %v4181_v54 }
 0x956   : > { %v4326_v56 = vpop.f32.mrb[44].mxu1 }
 0x957   : > { %v4327_v17 = vadd.f32 %v4326_v56, %v3068_v0  ;;  %v4328_v2 = vpop.f32.mrb[45].mxu1 }
 0x958   : > { %v4329_v57 = vadd.f32 %v4328_v2, %v3072_v3 }
 0x959   : > { %4367 = vst [vmem:[%s7263_s21 + $0xf0] sm:$0xff] %v4327_v17 }
 0x95a   : > { %4368 = vst [vmem:[%s7263_s21 + $0xf8] sm:$0xff] %v4329_v57  ;;  %v4332_v58 = vpop.f32.mrb[46].mxu1 }
 0x95b   : > { %v4333_v59 = vadd.f32 %v4332_v58, %v3068_v0  ;;  %v4334_v60 = vpop.f32.mrb[47].mxu1 }
 0x95c   : > { %v4335_v42 = vadd.f32 %v4334_v60, %v3072_v3 }
 0x95d   : > { %4399 = vst [vmem:[%s7263_s21 + $0x1f0] sm:$0xff] %v4333_v59 }
 0x95e   : > { %4400 = vst [vmem:[%s7263_s21 + $0x1f8] sm:$0xff] %v4335_v42 }
 0x95f   : > { %6685 = shalt.err (!%p6682_p10)
}
 0x960   : > { %s6686_s25 = scalar_lea.hbm %s7430_s17, 8192  ;;  %s6690_s28 = scalar_lea.hbm %s7512_s23, 16384 }
 0x961   : > { %p6687_p11 = scmp.ne.s32.totalorder %s7430_s17, %s6686_s25  ;;  %p6691_p9 = scmp.lt.u32.totalorder %s7430_s17, %s7512_s23 }
 0x962   : > { %p6692_p7 = scmp.lt.u32.totalorder %s6690_s28, %s6686_s25  ;;  %p6694_p12 = scmp.lt.u32.totalorder %s6686_s25, %s7430_s17 }
 0x963   : > { %p6688_p8 = pnand %p6687_p11, %p7513_p1 }
 0x964   : > { %p6693_p4 = por %p6692_p7, %p6691_p9 }
 0x965   : > { %p6689_p5 = pneg %p6688_p8 }
 0x966   : > { %p6695_p13 = por %p6694_p12, %p6693_p4 }
 0x968   : > { %p6696_p0 = pnand %p6695_p13, %p6689_p5 }
 0x96a   : > { %6699 = shalt.err (!%p6696_p0)
}
 0x96b   : > { %s6771_s18 = smov 4096   ;;  %s6772_s1 = smov 256  }
 0x96c   : > { %6310 = dma.vmem_to_hbm [thread:$0]  (%p7513_p1), %s7432_s26, 8192, %s7430_s17, %s4402_s15, %s6771_s18, %s6771_s18, %s6772_s1  }
 0x96d PF: > { %s4430_s9 = sand.u32 1, %s6742_s30   ;;  %p7514_p2 = scmp.ne.s32.totalorder %s7501_s20, 0 }
 0x96e   : > { %p7515_p3 = scmp.ge.s32.totalorder %s6754_s12, 2  ;;  %s4431_s22 = scalar_lea.sflag [#allocation4], %s4430_s9 }
 0x970   : > { %p6342_p6 = pnand %p7515_p3, %p7514_p2 }
 0x972   : > { %6737 = dma.done.wait (!%p6342_p6), %s4431_s22, 8192  }
 0x973   : > { %6739 = vsyncadd (!%p6342_p6), %s4431_s22, 4294959104  ;;  %p26_p10 = scmp.ge.s32.totalorder %s7042_s19, 4   ;;  %s7516_s30 = smov %s6746_s10 }
 0x974   : > { %s7517_s10 = smov %s6750_s11  ;;  %s7518_s11 = smov %s7054_s24 }
 0x975   : > { %s7519_s12 = smov %s7042_s19  ;;  %28 = sbr.rel (!%p26_p10) target bundleno = 12 (0xc), region = 133 }
 0x97c   :  { %4436 = vsyncpa [#allocation3], 1 }
 0x97d   :  { %4438 = vsyncpa [#allocation3 + $0x1], 1 }
 0x97e   :  { %4439 = vsyncpa [#allocation6], 1 }
 0x97f   :  { %4440 = vsyncpa [#allocation9], 1 }
 0x980   :  { %4441 = vsyncpa [#allocation12], 1 }
 0x981   :  { %4442 = vsyncpa [#allocation15], 1 }
 0x982   :  { %4443 = vsyncpa [#allocation4], 1 }
 0x983   :  { %4445 = vsyncpa [#allocation4 + $0x1], 1 }

</bundles_post_ra>
